<compile_context>
chip_gen: v7x
topology: tpu7x:2x2x1
jax: 0.10.0
libtpu: 0.0.40
codegen_flags: <defaults>
</compile_context>

<pallas_src>
import functools
import math

import jax
import jax.numpy as jnp
from jax import lax
from jax.experimental import pallas as pl
from jax.experimental.pallas import tpu as pltpu


# --------------------------------------------------------------------------- #
# Kernel body
# --------------------------------------------------------------------------- #
def _morlet_kernel(a_env_ref, a_osc_ref, norm_ref, valid_ref, x_ref, out_ref, *,
                   L, s_blk, tj, n_j, t_start, t_step, pad, mxu_dtype):
    """One grid step = (one block of `s_blk` scales) x (one contraction tile).

    a_env_ref : SMEM (n_scales_pad,) f32   1 / (scale * sigma)
    a_osc_ref : SMEM (n_scales_pad,) f32   omega0 / scale
    norm_ref  : SMEM (n_scales_pad,) f32   1 / sqrt(scale)
    valid_ref : VMEM (tj, L)  f32          banded-Toeplitz validity slice (0/1)
    x_ref     : VMEM (B, tj)  f32          contraction tile of the input
    out_ref   : VMEM (B, s_blk*L) f32      lane-dense output slab (resident over j)
    """
    blk = pl.program_id(0)

    valid = valid_ref[...]                                   # (tj, L)
    x = x_ref[...]                                           # (B, tj)
    if mxu_dtype is not None:
        x = x.astype(mxu_dtype)

    # Reversed (and j-tile rotated) tap positions, scale independent:
    #   t_row[o] = t[(L - 1 + j_base - o) mod L]
    o_idx = lax.broadcasted_iota(jnp.int32, (1, L), 1)
    if n_j == 1:
        k_idx = (L - 1) - o_idx
    else:
        j_base = pl.program_id(1) * tj
        k_idx = (L - 1 + j_base) - o_idx
        k_idx = jnp.where(k_idx >= L, k_idx - L, k_idx)      # single wrap suffices
    t_row = t_start + k_idx.astype(jnp.float32) * t_step     # (1, L)

    shift0 = (pad + 1) % L                                   # static lane shift

    for s_local in range(s_blk):
        s_idx = blk * s_blk + s_local                        # SMEM scalar reads
        a_env = a_env_ref[s_idx]
        a_osc = a_osc_ref[s_idx]
        norm = norm_ref[s_idx]

        # O(L) transcendentals per scale (EUP), shared by the whole band.
        z = t_row * a_env
        env = jnp.exp(-0.5 * z * z)                          # (1, L)
        osc = jnp.cos(t_row * a_osc)                         # (1, L)
        w_row = (norm * env) * osc

        # Banded Toeplitz strip  Mt[j_local, o] = w[(j_base + j_local) - o + pad]:
        # broadcast the row and give sublane j_local an extra lane-shift of j_local
        # (static strided roll, XLU); wrapped entries are killed by the mask.
        band = pltpu.roll(jnp.broadcast_to(w_row, (tj, L)),
                          shift0, axis=1, stride=1, stride_axis=0)
        strip = band * valid
        if mxu_dtype is not None:
            strip = strip.astype(mxu_dtype)

        # One MXU dot per scale, written straight into its lane-dense column slice.
        contrib = jnp.dot(x, strip, preferred_element_type=jnp.float32)
        cols = pl.ds(s_local * L, L)
        if n_j == 1:
            out_ref[:, cols] = contrib
        else:
            kj = pl.program_id(1)

            @pl.when(kj == 0)
            def _():
                out_ref[:, cols] = contrib

            @pl.when(kj > 0)
            def _():
                out_ref[:, cols] = out_ref[:, cols] + contrib


# --------------------------------------------------------------------------- #
# Generation-aware blocking plan
# --------------------------------------------------------------------------- #
def _vmem_capacity_bytes():
    try:
        return int(pltpu.get_tpu_info().vmem_capacity_bytes)
    except Exception:
        return 64 * 1024 * 1024          # conservative (v7x per-core VMEM)


def _num_tensorcores():
    try:
        info = pltpu.get_tpu_info()
        for attr in ("num_cores", "core_count", "num_tensorcores"):
            v = getattr(info, attr, None)
            if isinstance(v, int) and v > 0:
                return v
    except Exception:
        pass
    try:
        v = getattr(jax.devices()[0], "num_cores", None)
        if isinstance(v, int) and v > 0:
            return v
    except Exception:
        pass
    return 1


def _plan_blocking(n_scales, L, B_pad):
    """Pick (scale block, contraction tile) from the device's VMEM capacity."""
    vmem_cap = _vmem_capacity_bytes()
    n_tc = _num_tensorcores()
    budget = (vmem_cap * 3) // 5         # leave headroom for compiler temporaries

    def working_set(s_blk, tj):
        out_blk = 2 * B_pad * s_blk * L * 4      # double-buffered output slab
        x_blk = 2 * B_pad * tj * 4               # double-buffered x tile
        mask = 2 * tj * L * 4                    # double-buffered validity slice
        strips = 3 * tj * L * 4                  # broadcast + band + masked strip
        return out_blk + x_blk + mask + strips + (2 << 20)

    # Lane-density constraint on the output block: (s_blk * L) % 128 == 0,
    # or s_blk spans the (padded) scale axis.
    g = 128 // math.gcd(L, 128)
    cands = [c for c in range(g, n_scales + 1, g)]
    if not cands or cands[-1] != n_scales:
        cands.append(n_scales)

    # Contraction (j) tiling only when even the minimal block does not fit.
    tj = L
    if L % 128 == 0 and working_set(cands[0], L) > budget:
        divisors = [c for c in range(128, L, 128) if L % c == 0]
        for c in reversed(divisors):
            if working_set(cands[0], c) <= budget:
                tj = c
                break
        else:
            if divisors:
                tj = divisors[0]
    # TODO(synk): very large L with L % 128 != 0 cannot be j-tiled lane-densely; such
    # shapes fall back to a single contraction tile (best effort).

    # Largest scale block that fits the budget.
    s_blk = cands[0]
    for c in cands:
        if working_set(c, tj) <= budget:
            s_blk = c

    # Megacore balance: keep the "parallel" step count a multiple of the TC count.
    if n_tc > 1:
        if (-(-n_scales // s_blk)) % n_tc != 0:
            for c in sorted((c for c in cands if c <= s_blk), reverse=True):
                if (-(-n_scales // c)) % n_tc == 0 and working_set(c, tj) <= budget:
                    s_blk = c
                    break
    return s_blk, tj, vmem_cap


# --------------------------------------------------------------------------- #
# Wrapper
# --------------------------------------------------------------------------- #
def morlet_wavelet_layer(x, scales, omega0, sigma, *, mxu_dtype=None,
                         scale_block=None, k_tile=None):
    """Pallas implementation of MorletWaveletLayer.forward: (B, L) -> (B, n_scales, L).

    mxu_dtype: optional (e.g. jnp.bfloat16) cast of the dot operands; default keeps f32.
    scale_block / k_tile: optional overrides of the auto blocking (used by tests).
    """
    x = jnp.asarray(x, jnp.float32)
    B, L = x.shape
    scales = jnp.asarray(scales, jnp.float32).reshape(-1)
    n_scales = scales.shape[0]
    omega0_s = jnp.asarray(omega0, jnp.float32).reshape(-1)[0]
    sigma_s = jnp.asarray(sigma, jnp.float32).reshape(-1)[0]

    pad = L // 2
    t_start = float(-L // 2)                              # == torch: -signal_length // 2
    t_step = (float(L // 2) - t_start) / max(L - 1, 1)

    # Pad the batch to a sublane multiple so output vregs are not half-masked.
    B_pad = max(8, -(-B // 8) * 8)

    s_blk, tj, vmem_cap = _plan_blocking(n_scales, L, B_pad)
    if scale_block is not None:
        s_blk = int(scale_block)
    if k_tile is not None and L % int(k_tile) == 0:
        tj = int(k_tile)
    n_j = L // tj
    n_blocks = -(-n_scales // s_blk)
    n_scales_pad = n_blocks * s_blk

    # Per-scale scalar factors: hoisted out of the per-grid-step scalar path.
    if n_scales_pad != n_scales:
        scales = jnp.concatenate(
            [scales, jnp.broadcast_to(scales[-1], (n_scales_pad - n_scales,))])
    a_env = 1.0 / (scales * sigma_s)                      # (n_scales_pad,)
    a_osc = omega0_s / scales                             # (n_scales_pad,)
    norm = lax.rsqrt(scales)                              # (n_scales_pad,)

    # Grid-invariant band-validity mask, built once and fed as a VMEM input.
    j_i = jnp.arange(L, dtype=jnp.int32)[:, None]
    o_i = jnp.arange(L, dtype=jnp.int32)[None, :]
    d = j_i - o_i
    valid = jnp.logical_and(d >= -pad, d <= (L - 1) - pad).astype(jnp.float32)

    x_pad = x if B_pad == B else jnp.pad(x, ((0, B_pad - B), (0, 0)))

    kernel = functools.partial(
        _morlet_kernel, L=L, s_blk=s_blk, tj=tj, n_j=n_j,
        t_start=t_start, t_step=t_step, pad=pad, mxu_dtype=mxu_dtype)

    out2d = pl.pallas_call(
        kernel,
        out_shape=jax.ShapeDtypeStruct((B_pad, n_scales_pad * L), jnp.float32),
        grid=(n_blocks, n_j),
        in_specs=[
            pl.BlockSpec(memory_space=pltpu.MemorySpace.SMEM),       # a_env
            pl.BlockSpec(memory_space=pltpu.MemorySpace.SMEM),       # a_osc
            pl.BlockSpec(memory_space=pltpu.MemorySpace.SMEM),       # norm
            pl.BlockSpec((tj, L), lambda i, k: (k, 0)),              # validity mask
            pl.BlockSpec((B_pad, tj), lambda i, k: (0, k)),          # x tile
        ],
        out_specs=pl.BlockSpec((B_pad, s_blk * L), lambda i, k: (0, i)),
        compiler_params=pltpu.CompilerParams(
            dimension_semantics=("parallel", "arbitrary"),
            vmem_limit_bytes=int(min(0.75 * vmem_cap, 112 * 1024 * 1024))),
    )(a_env, a_osc, norm, valid, x_pad)

    # Free reshape: (B_pad, n_scales_pad*L) -> (B_pad, n_scales_pad, L), then drop pads.
    out = out2d.reshape(B_pad, n_scales_pad, L)
    return out[:B, :n_scales, :]


# --------------------------------------------------------------------------- #
# Pure-JAX reference (mirrors the PyTorch loop) for validation
# --------------------------------------------------------------------------- #
def morlet_reference(x, scales, omega0, sigma):
    x = jnp.asarray(x, jnp.float32)
    B, L = x.shape
    P = L // 2
    omega0 = jnp.asarray(omega0, jnp.float32).reshape(-1)[0]
    sigma = jnp.asarray(sigma, jnp.float32).reshape(-1)[0]
    t = jnp.linspace(-L // 2, L // 2, L, dtype=jnp.float32)
    xp = jnp.pad(x, ((0, 0), (P, P)))
    idx = jnp.arange(L)[:, None] + jnp.arange(L)[None, :]    # (o, k) -> padded index
    windows = xp[:, idx]                                     # (B, L, L)
    coeffs = []
    for i in range(scales.shape[0]):
        s = scales[i]
        arg = t / s
        w = (1.0 / jnp.sqrt(s)) * jnp.exp(-0.5 * (arg / sigma) ** 2) * jnp.cos(omega0 * arg)
        coeffs.append(jnp.einsum('bok,k->bo', windows, w,
                                 precision=lax.Precision.HIGHEST))
    return jnp.stack(coeffs, axis=1)


if __name__ == "__main__":
    # Deterministic parameter init (same as the module's __init__).
    n_scales = 20
    scales = jnp.linspace(1.0, 30.0, n_scales, dtype=jnp.float32)
    omega0 = jnp.array([6.0], dtype=jnp.float32)
    sigma = jnp.array([1.0], dtype=jnp.float32)

    # Small deterministic input: batch=4, signal_length=128 (lane-dense).
    B, L = 4, 128
    x = jax.random.normal(jax.random.PRNGKey(0), (B, L), dtype=jnp.float32)

    out = jax.block_until_ready(jax.jit(morlet_wavelet_layer)(x, scales, omega0, sigma))
    ref = morlet_reference(x, scales, omega0, sigma)
    assert out.shape == (B, n_scales, L), out.shape
    err = float(jnp.max(jnp.abs(out - ref)))
    assert jnp.allclose(out, ref, atol=1e-3, rtol=1e-3), err

    # Exercise the large-L code path explicitly: contraction (j) tiling with
    # accumulation, multiple scale blocks, and batch padding (B=3 -> 8 sublanes).
    B2, L2, n_s2 = 3, 256, 6
    scales2 = jnp.linspace(1.0, 30.0, n_s2, dtype=jnp.float32)
    x2 = jax.random.normal(jax.random.PRNGKey(1), (B2, L2), dtype=jnp.float32)
    tiled_fn = jax.jit(functools.partial(morlet_wavelet_layer, scale_block=2, k_tile=128))
    out2 = jax.block_until_ready(tiled_fn(x2, scales2, omega0, sigma))
    ref2 = morlet_reference(x2, scales2, omega0, sigma)
    assert out2.shape == (B2, n_s2, L2), out2.shape
    err2 = float(jnp.max(jnp.abs(out2 - ref2)))
    assert jnp.allclose(out2, ref2, atol=1e-3, rtol=1e-3), err2

    print("KERNEL_OK")
</pallas_src>

<mosaic_0001>
module attributes {stable_mosaic.version = 11 : i64} {
  func.func @_morlet_kernel(%arg0: i32, %arg1: i32, %arg2: memref<20xf32, #tpu.memory_space<smem>>, %arg3: memref<20xf32, #tpu.memory_space<smem>>, %arg4: memref<20xf32, #tpu.memory_space<smem>>, %arg5: memref<128x128xf32, #tpu.memory_space<vmem>>, %arg6: memref<8x128xf32, #tpu.memory_space<vmem>>, %arg7: memref<8x2560xf32, #tpu.memory_space<vmem>>) attributes {dimension_semantics = [#tpu.dimension_semantics<parallel>, #tpu.dimension_semantics<arbitrary>], iteration_bounds = array<i64: 1, 1>, scalar_prefetch = 0 : i64, scratch_operands = 0 : i64, tpu.core_type = #tpu.core_type<tc>, window_params = [{transform_indices = @transform_0, window_bounds = array<i64: 20>}, {transform_indices = @transform_1, window_bounds = array<i64: 20>}, {transform_indices = @transform_2, window_bounds = array<i64: 20>}, {transform_indices = @transform_3, window_bounds = array<i64: 128, 128>}, {transform_indices = @transform_4, window_bounds = array<i64: 8, 128>}, {transform_indices = @transform_5, window_bounds = array<i64: 8, 2560>}]} {
    %c0 = arith.constant 0 : index
    %c0_0 = arith.constant 0 : index
    %0 = vector.load %arg5[%c0, %c0_0] : memref<128x128xf32, #tpu.memory_space<vmem>>, vector<128x128xf32>
    %c0_1 = arith.constant 0 : index
    %c0_2 = arith.constant 0 : index
    %1 = vector.load %arg6[%c0_1, %c0_2] : memref<8x128xf32, #tpu.memory_space<vmem>>, vector<8x128xf32>
    %2 = tpu.iota {dimensions = array<i32: 1>} : vector<1x128xi32>
    %c127_i32 = arith.constant 127 : i32
    %3 = vector.broadcast %c127_i32 : i32 to vector<1x128xi32>
    %4 = arith.subi %3, %2 : vector<1x128xi32>
    %5 = arith.sitofp %4 : vector<1x128xi32> to vector<1x128xf32>
    %cst = arith.constant 1.00787401 : f32
    %6 = vector.broadcast %cst : f32 to vector<1x128xf32>
    %7 = arith.mulf %5, %6 : vector<1x128xf32>
    %cst_3 = arith.constant -6.400000e+01 : f32
    %8 = vector.broadcast %cst_3 : f32 to vector<1x128xf32>
    %9 = arith.addf %8, %7 : vector<1x128xf32>
    %c20_i32 = arith.constant 20 : i32
    %10 = arith.muli %arg0, %c20_i32 : i32
    %c0_i32 = arith.constant 0 : i32
    %11 = arith.addi %10, %c0_i32 : i32
    %12 = arith.index_cast %11 : i32 to index
    %13 = memref.load %arg2[%12] : memref<20xf32, #tpu.memory_space<smem>>
    %14 = arith.index_cast %11 : i32 to index
    %15 = memref.load %arg3[%14] : memref<20xf32, #tpu.memory_space<smem>>
    %16 = arith.index_cast %11 : i32 to index
    %17 = memref.load %arg4[%16] : memref<20xf32, #tpu.memory_space<smem>>
    %18 = vector.broadcast %13 : f32 to vector<1x128xf32>
    %19 = arith.mulf %9, %18 : vector<1x128xf32>
    %cst_4 = arith.constant -5.000000e-01 : f32
    %20 = vector.broadcast %cst_4 : f32 to vector<1x128xf32>
    %21 = arith.mulf %20, %19 : vector<1x128xf32>
    %22 = arith.mulf %21, %19 : vector<1x128xf32>
    %23 = math.exp %22 : vector<1x128xf32>
    %24 = vector.broadcast %15 : f32 to vector<1x128xf32>
    %25 = arith.mulf %9, %24 : vector<1x128xf32>
    %26 = math.cos %25 : vector<1x128xf32>
    %27 = vector.broadcast %17 : f32 to vector<1x128xf32>
    %28 = arith.mulf %27, %23 : vector<1x128xf32>
    %29 = arith.mulf %28, %26 : vector<1x128xf32>
    %30 = vector.shape_cast %29 : vector<1x128xf32> to vector<1x128xf32>
    %31 = vector.broadcast %30 : vector<1x128xf32> to vector<128x128xf32>
    %c65_i32 = arith.constant 65 : i32
    %32 = tpu.dynamic_rotate %31 by %c65_i32 dim 1 {stride = 1 : si32, stride_dimension = 0 : si32} : vector<128x128xf32>, i32 -> vector<128x128xf32>
    %33 = arith.mulf %32, %0 : vector<128x128xf32>
    %cst_5 = arith.constant dense<0.000000e+00> : vector<8x128xf32>
    %34 = tpu.matmul %1, %33, %cst_5 {dimension_numbers = #tpu.dot_dimension_numbers<[1], [0], [0], [1], [0, 0, 1, 1], [], []>} : vector<8x128xf32>, vector<128x128xf32>, vector<8x128xf32> -> vector<8x128xf32>
    %c0_6 = arith.constant 0 : index
    %c0_7 = arith.constant 0 : index
    %35 = vector.load %arg7[%c0_6, %c0_7] : memref<8x2560xf32, #tpu.memory_space<vmem>>, vector<8x128xf32>
    tpu.vector_store %arg7[%c0_6, %c0_7], %34 {strides = array<i32>} : memref<8x2560xf32, #tpu.memory_space<vmem>>, vector<8x128xf32>,
    %c20_i32_8 = arith.constant 20 : i32
    %36 = arith.muli %arg0, %c20_i32_8 : i32
    %c1_i32 = arith.constant 1 : i32
    %37 = arith.addi %36, %c1_i32 : i32
    %38 = arith.index_cast %37 : i32 to index
    %39 = memref.load %arg2[%38] : memref<20xf32, #tpu.memory_space<smem>>
    %40 = arith.index_cast %37 : i32 to index
    %41 = memref.load %arg3[%40] : memref<20xf32, #tpu.memory_space<smem>>
    %42 = arith.index_cast %37 : i32 to index
    %43 = memref.load %arg4[%42] : memref<20xf32, #tpu.memory_space<smem>>
    %44 = vector.broadcast %39 : f32 to vector<1x128xf32>
    %45 = arith.mulf %9, %44 : vector<1x128xf32>
    %cst_9 = arith.constant -5.000000e-01 : f32
    %46 = vector.broadcast %cst_9 : f32 to vector<1x128xf32>
    %47 = arith.mulf %46, %45 : vector<1x128xf32>
    %48 = arith.mulf %47, %45 : vector<1x128xf32>
    %49 = math.exp %48 : vector<1x128xf32>
    %50 = vector.broadcast %41 : f32 to vector<1x128xf32>
    %51 = arith.mulf %9, %50 : vector<1x128xf32>
    %52 = math.cos %51 : vector<1x128xf32>
    %53 = vector.broadcast %43 : f32 to vector<1x128xf32>
    %54 = arith.mulf %53, %49 : vector<1x128xf32>
    %55 = arith.mulf %54, %52 : vector<1x128xf32>
    %56 = vector.shape_cast %55 : vector<1x128xf32> to vector<1x128xf32>
    %57 = vector.broadcast %56 : vector<1x128xf32> to vector<128x128xf32>
    %c65_i32_10 = arith.constant 65 : i32
    %58 = tpu.dynamic_rotate %57 by %c65_i32_10 dim 1 {stride = 1 : si32, stride_dimension = 0 : si32} : vector<128x128xf32>, i32 -> vector<128x128xf32>
    %59 = arith.mulf %58, %0 : vector<128x128xf32>
    %cst_11 = arith.constant dense<0.000000e+00> : vector<8x128xf32>
    %60 = tpu.matmul %1, %59, %cst_11 {dimension_numbers = #tpu.dot_dimension_numbers<[1], [0], [0], [1], [0, 0, 1, 1], [], []>} : vector<8x128xf32>, vector<128x128xf32>, vector<8x128xf32> -> vector<8x128xf32>
    %c0_12 = arith.constant 0 : index
    %c128 = arith.constant 128 : index
    %61 = vector.load %arg7[%c0_12, %c128] : memref<8x2560xf32, #tpu.memory_space<vmem>>, vector<8x128xf32>
    tpu.vector_store %arg7[%c0_12, %c128], %60 {strides = array<i32>} : memref<8x2560xf32, #tpu.memory_space<vmem>>, vector<8x128xf32>,
    %c20_i32_13 = arith.constant 20 : i32
    %62 = arith.muli %arg0, %c20_i32_13 : i32
    %c2_i32 = arith.constant 2 : i32
    %63 = arith.addi %62, %c2_i32 : i32
    %64 = arith.index_cast %63 : i32 to index
    %65 = memref.load %arg2[%64] : memref<20xf32, #tpu.memory_space<smem>>
    %66 = arith.index_cast %63 : i32 to index
    %67 = memref.load %arg3[%66] : memref<20xf32, #tpu.memory_space<smem>>
    %68 = arith.index_cast %63 : i32 to index
    %69 = memref.load %arg4[%68] : memref<20xf32, #tpu.memory_space<smem>>
    %70 = vector.broadcast %65 : f32 to vector<1x128xf32>
    %71 = arith.mulf %9, %70 : vector<1x128xf32>
    %cst_14 = arith.constant -5.000000e-01 : f32
    %72 = vector.broadcast %cst_14 : f32 to vector<1x128xf32>
    %73 = arith.mulf %72, %71 : vector<1x128xf32>
    %74 = arith.mulf %73, %71 : vector<1x128xf32>
    %75 = math.exp %74 : vector<1x128xf32>
    %76 = vector.broadcast %67 : f32 to vector<1x128xf32>
    %77 = arith.mulf %9, %76 : vector<1x128xf32>
    %78 = math.cos %77 : vector<1x128xf32>
    %79 = vector.broadcast %69 : f32 to vector<1x128xf32>
    %80 = arith.mulf %79, %75 : vector<1x128xf32>
    %81 = arith.mulf %80, %78 : vector<1x128xf32>
    %82 = vector.shape_cast %81 : vector<1x128xf32> to vector<1x128xf32>
    %83 = vector.broadcast %82 : vector<1x128xf32> to vector<128x128xf32>
    %c65_i32_15 = arith.constant 65 : i32
    %84 = tpu.dynamic_rotate %83 by %c65_i32_15 dim 1 {stride = 1 : si32, stride_dimension = 0 : si32} : vector<128x128xf32>, i32 -> vector<128x128xf32>
    %85 = arith.mulf %84, %0 : vector<128x128xf32>
    %cst_16 = arith.constant dense<0.000000e+00> : vector<8x128xf32>
    %86 = tpu.matmul %1, %85, %cst_16 {dimension_numbers = #tpu.dot_dimension_numbers<[1], [0], [0], [1], [0, 0, 1, 1], [], []>} : vector<8x128xf32>, vector<128x128xf32>, vector<8x128xf32> -> vector<8x128xf32>
    %c0_17 = arith.constant 0 : index
    %c256 = arith.constant 256 : index
    %87 = vector.load %arg7[%c0_17, %c256] : memref<8x2560xf32, #tpu.memory_space<vmem>>, vector<8x128xf32>
    tpu.vector_store %arg7[%c0_17, %c256], %86 {strides = array<i32>} : memref<8x2560xf32, #tpu.memory_space<vmem>>, vector<8x128xf32>,
    %c20_i32_18 = arith.constant 20 : i32
    %88 = arith.muli %arg0, %c20_i32_18 : i32
    %c3_i32 = arith.constant 3 : i32
    %89 = arith.addi %88, %c3_i32 : i32
    %90 = arith.index_cast %89 : i32 to index
    %91 = memref.load %arg2[%90] : memref<20xf32, #tpu.memory_space<smem>>
    %92 = arith.index_cast %89 : i32 to index
    %93 = memref.load %arg3[%92] : memref<20xf32, #tpu.memory_space<smem>>
    %94 = arith.index_cast %89 : i32 to index
    %95 = memref.load %arg4[%94] : memref<20xf32, #tpu.memory_space<smem>>
    %96 = vector.broadcast %91 : f32 to vector<1x128xf32>
    %97 = arith.mulf %9, %96 : vector<1x128xf32>
    %cst_19 = arith.constant -5.000000e-01 : f32
    %98 = vector.broadcast %cst_19 : f32 to vector<1x128xf32>
    %99 = arith.mulf %98, %97 : vector<1x128xf32>
    %100 = arith.mulf %99, %97 : vector<1x128xf32>
    %101 = math.exp %100 : vector<1x128xf32>
    %102 = vector.broadcast %93 : f32 to vector<1x128xf32>
    %103 = arith.mulf %9, %102 : vector<1x128xf32>
    %104 = math.cos %103 : vector<1x128xf32>
    %105 = vector.broadcast %95 : f32 to vector<1x128xf32>
    %106 = arith.mulf %105, %101 : vector<1x128xf32>
    %107 = arith.mulf %106, %104 : vector<1x128xf32>
    %108 = vector.shape_cast %107 : vector<1x128xf32> to vector<1x128xf32>
    %109 = vector.broadcast %108 : vector<1x128xf32> to vector<128x128xf32>
    %c65_i32_20 = arith.constant 65 : i32
    %110 = tpu.dynamic_rotate %109 by %c65_i32_20 dim 1 {stride = 1 : si32, stride_dimension = 0 : si32} : vector<128x128xf32>, i32 -> vector<128x128xf32>
    %111 = arith.mulf %110, %0 : vector<128x128xf32>
    %cst_21 = arith.constant dense<0.000000e+00> : vector<8x128xf32>
    %112 = tpu.matmul %1, %111, %cst_21 {dimension_numbers = #tpu.dot_dimension_numbers<[1], [0], [0], [1], [0, 0, 1, 1], [], []>} : vector<8x128xf32>, vector<128x128xf32>, vector<8x128xf32> -> vector<8x128xf32>
    %c0_22 = arith.constant 0 : index
    %c384 = arith.constant 384 : index
    %113 = vector.load %arg7[%c0_22, %c384] : memref<8x2560xf32, #tpu.memory_space<vmem>>, vector<8x128xf32>
    tpu.vector_store %arg7[%c0_22, %c384], %112 {strides = array<i32>} : memref<8x2560xf32, #tpu.memory_space<vmem>>, vector<8x128xf32>,
    %c20_i32_23 = arith.constant 20 : i32
    %114 = arith.muli %arg0, %c20_i32_23 : i32
    %c4_i32 = arith.constant 4 : i32
    %115 = arith.addi %114, %c4_i32 : i32
    %116 = arith.index_cast %115 : i32 to index
    %117 = memref.load %arg2[%116] : memref<20xf32, #tpu.memory_space<smem>>
    %118 = arith.index_cast %115 : i32 to index
    %119 = memref.load %arg3[%118] : memref<20xf32, #tpu.memory_space<smem>>
    %120 = arith.index_cast %115 : i32 to index
    %121 = memref.load %arg4[%120] : memref<20xf32, #tpu.memory_space<smem>>
    %122 = vector.broadcast %117 : f32 to vector<1x128xf32>
    %123 = arith.mulf %9, %122 : vector<1x128xf32>
    %cst_24 = arith.constant -5.000000e-01 : f32
    %124 = vector.broadcast %cst_24 : f32 to vector<1x128xf32>
    %125 = arith.mulf %124, %123 : vector<1x128xf32>
    %126 = arith.mulf %125, %123 : vector<1x128xf32>
    %127 = math.exp %126 : vector<1x128xf32>
    %128 = vector.broadcast %119 : f32 to vector<1x128xf32>
    %129 = arith.mulf %9, %128 : vector<1x128xf32>
    %130 = math.cos %129 : vector<1x128xf32>
    %131 = vector.broadcast %121 : f32 to vector<1x128xf32>
    %132 = arith.mulf %131, %127 : vector<1x128xf32>
    %133 = arith.mulf %132, %130 : vector<1x128xf32>
    %134 = vector.shape_cast %133 : vector<1x128xf32> to vector<1x128xf32>
    %135 = vector.broadcast %134 : vector<1x128xf32> to vector<128x128xf32>
    %c65_i32_25 = arith.constant 65 : i32
    %136 = tpu.dynamic_rotate %135 by %c65_i32_25 dim 1 {stride = 1 : si32, stride_dimension = 0 : si32} : vector<128x128xf32>, i32 -> vector<128x128xf32>
    %137 = arith.mulf %136, %0 : vector<128x128xf32>
    %cst_26 = arith.constant dense<0.000000e+00> : vector<8x128xf32>
    %138 = tpu.matmul %1, %137, %cst_26 {dimension_numbers = #tpu.dot_dimension_numbers<[1], [0], [0], [1], [0, 0, 1, 1], [], []>} : vector<8x128xf32>, vector<128x128xf32>, vector<8x128xf32> -> vector<8x128xf32>
    %c0_27 = arith.constant 0 : index
    %c512 = arith.constant 512 : index
    %139 = vector.load %arg7[%c0_27, %c512] : memref<8x2560xf32, #tpu.memory_space<vmem>>, vector<8x128xf32>
    tpu.vector_store %arg7[%c0_27, %c512], %138 {strides = array<i32>} : memref<8x2560xf32, #tpu.memory_space<vmem>>, vector<8x128xf32>,
    %c20_i32_28 = arith.constant 20 : i32
    %140 = arith.muli %arg0, %c20_i32_28 : i32
    %c5_i32 = arith.constant 5 : i32
    %141 = arith.addi %140, %c5_i32 : i32
    %142 = arith.index_cast %141 : i32 to index
    %143 = memref.load %arg2[%142] : memref<20xf32, #tpu.memory_space<smem>>
    %144 = arith.index_cast %141 : i32 to index
    %145 = memref.load %arg3[%144] : memref<20xf32, #tpu.memory_space<smem>>
    %146 = arith.index_cast %141 : i32 to index
    %147 = memref.load %arg4[%146] : memref<20xf32, #tpu.memory_space<smem>>
    %148 = vector.broadcast %143 : f32 to vector<1x128xf32>
    %149 = arith.mulf %9, %148 : vector<1x128xf32>
    %cst_29 = arith.constant -5.000000e-01 : f32
    %150 = vector.broadcast %cst_29 : f32 to vector<1x128xf32>
    %151 = arith.mulf %150, %149 : vector<1x128xf32>
    %152 = arith.mulf %151, %149 : vector<1x128xf32>
    %153 = math.exp %152 : vector<1x128xf32>
    %154 = vector.broadcast %145 : f32 to vector<1x128xf32>
    %155 = arith.mulf %9, %154 : vector<1x128xf32>
    %156 = math.cos %155 : vector<1x128xf32>
    %157 = vector.broadcast %147 : f32 to vector<1x128xf32>
    %158 = arith.mulf %157, %153 : vector<1x128xf32>
    %159 = arith.mulf %158, %156 : vector<1x128xf32>
    %160 = vector.shape_cast %159 : vector<1x128xf32> to vector<1x128xf32>
    %161 = vector.broadcast %160 : vector<1x128xf32> to vector<128x128xf32>
    %c65_i32_30 = arith.constant 65 : i32
    %162 = tpu.dynamic_rotate %161 by %c65_i32_30 dim 1 {stride = 1 : si32, stride_dimension = 0 : si32} : vector<128x128xf32>, i32 -> vector<128x128xf32>
    %163 = arith.mulf %162, %0 : vector<128x128xf32>
    %cst_31 = arith.constant dense<0.000000e+00> : vector<8x128xf32>
    %164 = tpu.matmul %1, %163, %cst_31 {dimension_numbers = #tpu.dot_dimension_numbers<[1], [0], [0], [1], [0, 0, 1, 1], [], []>} : vector<8x128xf32>, vector<128x128xf32>, vector<8x128xf32> -> vector<8x128xf32>
    %c0_32 = arith.constant 0 : index
    %c640 = arith.constant 640 : index
    %165 = vector.load %arg7[%c0_32, %c640] : memref<8x2560xf32, #tpu.memory_space<vmem>>, vector<8x128xf32>
    tpu.vector_store %arg7[%c0_32, %c640], %164 {strides = array<i32>} : memref<8x2560xf32, #tpu.memory_space<vmem>>, vector<8x128xf32>,
    %c20_i32_33 = arith.constant 20 : i32
    %166 = arith.muli %arg0, %c20_i32_33 : i32
    %c6_i32 = arith.constant 6 : i32
    %167 = arith.addi %166, %c6_i32 : i32
    %168 = arith.index_cast %167 : i32 to index
    %169 = memref.load %arg2[%168] : memref<20xf32, #tpu.memory_space<smem>>
    %170 = arith.index_cast %167 : i32 to index
    %171 = memref.load %arg3[%170] : memref<20xf32, #tpu.memory_space<smem>>
    %172 = arith.index_cast %167 : i32 to index
    %173 = memref.load %arg4[%172] : memref<20xf32, #tpu.memory_space<smem>>
    %174 = vector.broadcast %169 : f32 to vector<1x128xf32>
    %175 = arith.mulf %9, %174 : vector<1x128xf32>
    %cst_34 = arith.constant -5.000000e-01 : f32
    %176 = vector.broadcast %cst_34 : f32 to vector<1x128xf32>
    %177 = arith.mulf %176, %175 : vector<1x128xf32>
    %178 = arith.mulf %177, %175 : vector<1x128xf32>
    %179 = math.exp %178 : vector<1x128xf32>
    %180 = vector.broadcast %171 : f32 to vector<1x128xf32>
    %181 = arith.mulf %9, %180 : vector<1x128xf32>
    %182 = math.cos %181 : vector<1x128xf32>
    %183 = vector.broadcast %173 : f32 to vector<1x128xf32>
    %184 = arith.mulf %183, %179 : vector<1x128xf32>
    %185 = arith.mulf %184, %182 : vector<1x128xf32>
    %186 = vector.shape_cast %185 : vector<1x128xf32> to vector<1x128xf32>
    %187 = vector.broadcast %186 : vector<1x128xf32> to vector<128x128xf32>
    %c65_i32_35 = arith.constant 65 : i32
    %188 = tpu.dynamic_rotate %187 by %c65_i32_35 dim 1 {stride = 1 : si32, stride_dimension = 0 : si32} : vector<128x128xf32>, i32 -> vector<128x128xf32>
    %189 = arith.mulf %188, %0 : vector<128x128xf32>
    %cst_36 = arith.constant dense<0.000000e+00> : vector<8x128xf32>
    %190 = tpu.matmul %1, %189, %cst_36 {dimension_numbers = #tpu.dot_dimension_numbers<[1], [0], [0], [1], [0, 0, 1, 1], [], []>} : vector<8x128xf32>, vector<128x128xf32>, vector<8x128xf32> -> vector<8x128xf32>
    %c0_37 = arith.constant 0 : index
    %c768 = arith.constant 768 : index
    %191 = vector.load %arg7[%c0_37, %c768] : memref<8x2560xf32, #tpu.memory_space<vmem>>, vector<8x128xf32>
    tpu.vector_store %arg7[%c0_37, %c768], %190 {strides = array<i32>} : memref<8x2560xf32, #tpu.memory_space<vmem>>, vector<8x128xf32>,
    %c20_i32_38 = arith.constant 20 : i32
    %192 = arith.muli %arg0, %c20_i32_38 : i32
    %c7_i32 = arith.constant 7 : i32
    %193 = arith.addi %192, %c7_i32 : i32
    %194 = arith.index_cast %193 : i32 to index
    %195 = memref.load %arg2[%194] : memref<20xf32, #tpu.memory_space<smem>>
    %196 = arith.index_cast %193 : i32 to index
    %197 = memref.load %arg3[%196] : memref<20xf32, #tpu.memory_space<smem>>
    %198 = arith.index_cast %193 : i32 to index
    %199 = memref.load %arg4[%198] : memref<20xf32, #tpu.memory_space<smem>>
    %200 = vector.broadcast %195 : f32 to vector<1x128xf32>
    %201 = arith.mulf %9, %200 : vector<1x128xf32>
    %cst_39 = arith.constant -5.000000e-01 : f32
    %202 = vector.broadcast %cst_39 : f32 to vector<1x128xf32>
    %203 = arith.mulf %202, %201 : vector<1x128xf32>
    %204 = arith.mulf %203, %201 : vector<1x128xf32>
    %205 = math.exp %204 : vector<1x128xf32>
    %206 = vector.broadcast %197 : f32 to vector<1x128xf32>
    %207 = arith.mulf %9, %206 : vector<1x128xf32>
    %208 = math.cos %207 : vector<1x128xf32>
    %209 = vector.broadcast %199 : f32 to vector<1x128xf32>
    %210 = arith.mulf %209, %205 : vector<1x128xf32>
    %211 = arith.mulf %210, %208 : vector<1x128xf32>
    %212 = vector.shape_cast %211 : vector<1x128xf32> to vector<1x128xf32>
    %213 = vector.broadcast %212 : vector<1x128xf32> to vector<128x128xf32>
    %c65_i32_40 = arith.constant 65 : i32
    %214 = tpu.dynamic_rotate %213 by %c65_i32_40 dim 1 {stride = 1 : si32, stride_dimension = 0 : si32} : vector<128x128xf32>, i32 -> vector<128x128xf32>
    %215 = arith.mulf %214, %0 : vector<128x128xf32>
    %cst_41 = arith.constant dense<0.000000e+00> : vector<8x128xf32>
    %216 = tpu.matmul %1, %215, %cst_41 {dimension_numbers = #tpu.dot_dimension_numbers<[1], [0], [0], [1], [0, 0, 1, 1], [], []>} : vector<8x128xf32>, vector<128x128xf32>, vector<8x128xf32> -> vector<8x128xf32>
    %c0_42 = arith.constant 0 : index
    %c896 = arith.constant 896 : index
    %217 = vector.load %arg7[%c0_42, %c896] : memref<8x2560xf32, #tpu.memory_space<vmem>>, vector<8x128xf32>
    tpu.vector_store %arg7[%c0_42, %c896], %216 {strides = array<i32>} : memref<8x2560xf32, #tpu.memory_space<vmem>>, vector<8x128xf32>,
    %c20_i32_43 = arith.constant 20 : i32
    %218 = arith.muli %arg0, %c20_i32_43 : i32
    %c8_i32 = arith.constant 8 : i32
    %219 = arith.addi %218, %c8_i32 : i32
    %220 = arith.index_cast %219 : i32 to index
    %221 = memref.load %arg2[%220] : memref<20xf32, #tpu.memory_space<smem>>
    %222 = arith.index_cast %219 : i32 to index
    %223 = memref.load %arg3[%222] : memref<20xf32, #tpu.memory_space<smem>>
    %224 = arith.index_cast %219 : i32 to index
    %225 = memref.load %arg4[%224] : memref<20xf32, #tpu.memory_space<smem>>
    %226 = vector.broadcast %221 : f32 to vector<1x128xf32>
    %227 = arith.mulf %9, %226 : vector<1x128xf32>
    %cst_44 = arith.constant -5.000000e-01 : f32
    %228 = vector.broadcast %cst_44 : f32 to vector<1x128xf32>
    %229 = arith.mulf %228, %227 : vector<1x128xf32>
    %230 = arith.mulf %229, %227 : vector<1x128xf32>
    %231 = math.exp %230 : vector<1x128xf32>
    %232 = vector.broadcast %223 : f32 to vector<1x128xf32>
    %233 = arith.mulf %9, %232 : vector<1x128xf32>
    %234 = math.cos %233 : vector<1x128xf32>
    %235 = vector.broadcast %225 : f32 to vector<1x128xf32>
    %236 = arith.mulf %235, %231 : vector<1x128xf32>
    %237 = arith.mulf %236, %234 : vector<1x128xf32>
    %238 = vector.shape_cast %237 : vector<1x128xf32> to vector<1x128xf32>
    %239 = vector.broadcast %238 : vector<1x128xf32> to vector<128x128xf32>
    %c65_i32_45 = arith.constant 65 : i32
    %240 = tpu.dynamic_rotate %239 by %c65_i32_45 dim 1 {stride = 1 : si32, stride_dimension = 0 : si32} : vector<128x128xf32>, i32 -> vector<128x128xf32>
    %241 = arith.mulf %240, %0 : vector<128x128xf32>
    %cst_46 = arith.constant dense<0.000000e+00> : vector<8x128xf32>
    %242 = tpu.matmul %1, %241, %cst_46 {dimension_numbers = #tpu.dot_dimension_numbers<[1], [0], [0], [1], [0, 0, 1, 1], [], []>} : vector<8x128xf32>, vector<128x128xf32>, vector<8x128xf32> -> vector<8x128xf32>
    %c0_47 = arith.constant 0 : index
    %c1024 = arith.constant 1024 : index
    %243 = vector.load %arg7[%c0_47, %c1024] : memref<8x2560xf32, #tpu.memory_space<vmem>>, vector<8x128xf32>
    tpu.vector_store %arg7[%c0_47, %c1024], %242 {strides = array<i32>} : memref<8x2560xf32, #tpu.memory_space<vmem>>, vector<8x128xf32>,
    %c20_i32_48 = arith.constant 20 : i32
    %244 = arith.muli %arg0, %c20_i32_48 : i32
    %c9_i32 = arith.constant 9 : i32
    %245 = arith.addi %244, %c9_i32 : i32
    %246 = arith.index_cast %245 : i32 to index
    %247 = memref.load %arg2[%246] : memref<20xf32, #tpu.memory_space<smem>>
    %248 = arith.index_cast %245 : i32 to index
    %249 = memref.load %arg3[%248] : memref<20xf32, #tpu.memory_space<smem>>
    %250 = arith.index_cast %245 : i32 to index
    %251 = memref.load %arg4[%250] : memref<20xf32, #tpu.memory_space<smem>>
    %252 = vector.broadcast %247 : f32 to vector<1x128xf32>
    %253 = arith.mulf %9, %252 : vector<1x128xf32>
    %cst_49 = arith.constant -5.000000e-01 : f32
    %254 = vector.broadcast %cst_49 : f32 to vector<1x128xf32>
    %255 = arith.mulf %254, %253 : vector<1x128xf32>
    %256 = arith.mulf %255, %253 : vector<1x128xf32>
    %257 = math.exp %256 : vector<1x128xf32>
    %258 = vector.broadcast %249 : f32 to vector<1x128xf32>
    %259 = arith.mulf %9, %258 : vector<1x128xf32>
    %260 = math.cos %259 : vector<1x128xf32>
    %261 = vector.broadcast %251 : f32 to vector<1x128xf32>
    %262 = arith.mulf %261, %257 : vector<1x128xf32>
    %263 = arith.mulf %262, %260 : vector<1x128xf32>
    %264 = vector.shape_cast %263 : vector<1x128xf32> to vector<1x128xf32>
    %265 = vector.broadcast %264 : vector<1x128xf32> to vector<128x128xf32>
    %c65_i32_50 = arith.constant 65 : i32
    %266 = tpu.dynamic_rotate %265 by %c65_i32_50 dim 1 {stride = 1 : si32, stride_dimension = 0 : si32} : vector<128x128xf32>, i32 -> vector<128x128xf32>
    %267 = arith.mulf %266, %0 : vector<128x128xf32>
    %cst_51 = arith.constant dense<0.000000e+00> : vector<8x128xf32>
    %268 = tpu.matmul %1, %267, %cst_51 {dimension_numbers = #tpu.dot_dimension_numbers<[1], [0], [0], [1], [0, 0, 1, 1], [], []>} : vector<8x128xf32>, vector<128x128xf32>, vector<8x128xf32> -> vector<8x128xf32>
    %c0_52 = arith.constant 0 : index
    %c1152 = arith.constant 1152 : index
    %269 = vector.load %arg7[%c0_52, %c1152] : memref<8x2560xf32, #tpu.memory_space<vmem>>, vector<8x128xf32>
    tpu.vector_store %arg7[%c0_52, %c1152], %268 {strides = array<i32>} : memref<8x2560xf32, #tpu.memory_space<vmem>>, vector<8x128xf32>,
    %c20_i32_53 = arith.constant 20 : i32
    %270 = arith.muli %arg0, %c20_i32_53 : i32
    %c10_i32 = arith.constant 10 : i32
    %271 = arith.addi %270, %c10_i32 : i32
    %272 = arith.index_cast %271 : i32 to index
    %273 = memref.load %arg2[%272] : memref<20xf32, #tpu.memory_space<smem>>
    %274 = arith.index_cast %271 : i32 to index
    %275 = memref.load %arg3[%274] : memref<20xf32, #tpu.memory_space<smem>>
    %276 = arith.index_cast %271 : i32 to index
    %277 = memref.load %arg4[%276] : memref<20xf32, #tpu.memory_space<smem>>
    %278 = vector.broadcast %273 : f32 to vector<1x128xf32>
    %279 = arith.mulf %9, %278 : vector<1x128xf32>
    %cst_54 = arith.constant -5.000000e-01 : f32
    %280 = vector.broadcast %cst_54 : f32 to vector<1x128xf32>
    %281 = arith.mulf %280, %279 : vector<1x128xf32>
    %282 = arith.mulf %281, %279 : vector<1x128xf32>
    %283 = math.exp %282 : vector<1x128xf32>
    %284 = vector.broadcast %275 : f32 to vector<1x128xf32>
    %285 = arith.mulf %9, %284 : vector<1x128xf32>
    %286 = math.cos %285 : vector<1x128xf32>
    %287 = vector.broadcast %277 : f32 to vector<1x128xf32>
    %288 = arith.mulf %287, %283 : vector<1x128xf32>
    %289 = arith.mulf %288, %286 : vector<1x128xf32>
    %290 = vector.shape_cast %289 : vector<1x128xf32> to vector<1x128xf32>
    %291 = vector.broadcast %290 : vector<1x128xf32> to vector<128x128xf32>
    %c65_i32_55 = arith.constant 65 : i32
    %292 = tpu.dynamic_rotate %291 by %c65_i32_55 dim 1 {stride = 1 : si32, stride_dimension = 0 : si32} : vector<128x128xf32>, i32 -> vector<128x128xf32>
    %293 = arith.mulf %292, %0 : vector<128x128xf32>
    %cst_56 = arith.constant dense<0.000000e+00> : vector<8x128xf32>
    %294 = tpu.matmul %1, %293, %cst_56 {dimension_numbers = #tpu.dot_dimension_numbers<[1], [0], [0], [1], [0, 0, 1, 1], [], []>} : vector<8x128xf32>, vector<128x128xf32>, vector<8x128xf32> -> vector<8x128xf32>
    %c0_57 = arith.constant 0 : index
    %c1280 = arith.constant 1280 : index
    %295 = vector.load %arg7[%c0_57, %c1280] : memref<8x2560xf32, #tpu.memory_space<vmem>>, vector<8x128xf32>
    tpu.vector_store %arg7[%c0_57, %c1280], %294 {strides = array<i32>} : memref<8x2560xf32, #tpu.memory_space<vmem>>, vector<8x128xf32>,
    %c20_i32_58 = arith.constant 20 : i32
    %296 = arith.muli %arg0, %c20_i32_58 : i32
    %c11_i32 = arith.constant 11 : i32
    %297 = arith.addi %296, %c11_i32 : i32
    %298 = arith.index_cast %297 : i32 to index
    %299 = memref.load %arg2[%298] : memref<20xf32, #tpu.memory_space<smem>>
    %300 = arith.index_cast %297 : i32 to index
    %301 = memref.load %arg3[%300] : memref<20xf32, #tpu.memory_space<smem>>
    %302 = arith.index_cast %297 : i32 to index
    %303 = memref.load %arg4[%302] : memref<20xf32, #tpu.memory_space<smem>>
    %304 = vector.broadcast %299 : f32 to vector<1x128xf32>
    %305 = arith.mulf %9, %304 : vector<1x128xf32>
    %cst_59 = arith.constant -5.000000e-01 : f32
    %306 = vector.broadcast %cst_59 : f32 to vector<1x128xf32>
    %307 = arith.mulf %306, %305 : vector<1x128xf32>
    %308 = arith.mulf %307, %305 : vector<1x128xf32>
    %309 = math.exp %308 : vector<1x128xf32>
    %310 = vector.broadcast %301 : f32 to vector<1x128xf32>
    %311 = arith.mulf %9, %310 : vector<1x128xf32>
    %312 = math.cos %311 : vector<1x128xf32>
    %313 = vector.broadcast %303 : f32 to vector<1x128xf32>
    %314 = arith.mulf %313, %309 : vector<1x128xf32>
    %315 = arith.mulf %314, %312 : vector<1x128xf32>
    %316 = vector.shape_cast %315 : vector<1x128xf32> to vector<1x128xf32>
    %317 = vector.broadcast %316 : vector<1x128xf32> to vector<128x128xf32>
    %c65_i32_60 = arith.constant 65 : i32
    %318 = tpu.dynamic_rotate %317 by %c65_i32_60 dim 1 {stride = 1 : si32, stride_dimension = 0 : si32} : vector<128x128xf32>, i32 -> vector<128x128xf32>
    %319 = arith.mulf %318, %0 : vector<128x128xf32>
    %cst_61 = arith.constant dense<0.000000e+00> : vector<8x128xf32>
    %320 = tpu.matmul %1, %319, %cst_61 {dimension_numbers = #tpu.dot_dimension_numbers<[1], [0], [0], [1], [0, 0, 1, 1], [], []>} : vector<8x128xf32>, vector<128x128xf32>, vector<8x128xf32> -> vector<8x128xf32>
    %c0_62 = arith.constant 0 : index
    %c1408 = arith.constant 1408 : index
    %321 = vector.load %arg7[%c0_62, %c1408] : memref<8x2560xf32, #tpu.memory_space<vmem>>, vector<8x128xf32>
    tpu.vector_store %arg7[%c0_62, %c1408], %320 {strides = array<i32>} : memref<8x2560xf32, #tpu.memory_space<vmem>>, vector<8x128xf32>,
    %c20_i32_63 = arith.constant 20 : i32
    %322 = arith.muli %arg0, %c20_i32_63 : i32
    %c12_i32 = arith.constant 12 : i32
    %323 = arith.addi %322, %c12_i32 : i32
    %324 = arith.index_cast %323 : i32 to index
    %325 = memref.load %arg2[%324] : memref<20xf32, #tpu.memory_space<smem>>
    %326 = arith.index_cast %323 : i32 to index
    %327 = memref.load %arg3[%326] : memref<20xf32, #tpu.memory_space<smem>>
    %328 = arith.index_cast %323 : i32 to index
    %329 = memref.load %arg4[%328] : memref<20xf32, #tpu.memory_space<smem>>
    %330 = vector.broadcast %325 : f32 to vector<1x128xf32>
    %331 = arith.mulf %9, %330 : vector<1x128xf32>
    %cst_64 = arith.constant -5.000000e-01 : f32
    %332 = vector.broadcast %cst_64 : f32 to vector<1x128xf32>
    %333 = arith.mulf %332, %331 : vector<1x128xf32>
    %334 = arith.mulf %333, %331 : vector<1x128xf32>
    %335 = math.exp %334 : vector<1x128xf32>
    %336 = vector.broadcast %327 : f32 to vector<1x128xf32>
    %337 = arith.mulf %9, %336 : vector<1x128xf32>
    %338 = math.cos %337 : vector<1x128xf32>
    %339 = vector.broadcast %329 : f32 to vector<1x128xf32>
    %340 = arith.mulf %339, %335 : vector<1x128xf32>
    %341 = arith.mulf %340, %338 : vector<1x128xf32>
    %342 = vector.shape_cast %341 : vector<1x128xf32> to vector<1x128xf32>
    %343 = vector.broadcast %342 : vector<1x128xf32> to vector<128x128xf32>
    %c65_i32_65 = arith.constant 65 : i32
    %344 = tpu.dynamic_rotate %343 by %c65_i32_65 dim 1 {stride = 1 : si32, stride_dimension = 0 : si32} : vector<128x128xf32>, i32 -> vector<128x128xf32>
    %345 = arith.mulf %344, %0 : vector<128x128xf32>
    %cst_66 = arith.constant dense<0.000000e+00> : vector<8x128xf32>
    %346 = tpu.matmul %1, %345, %cst_66 {dimension_numbers = #tpu.dot_dimension_numbers<[1], [0], [0], [1], [0, 0, 1, 1], [], []>} : vector<8x128xf32>, vector<128x128xf32>, vector<8x128xf32> -> vector<8x128xf32>
    %c0_67 = arith.constant 0 : index
    %c1536 = arith.constant 1536 : index
    %347 = vector.load %arg7[%c0_67, %c1536] : memref<8x2560xf32, #tpu.memory_space<vmem>>, vector<8x128xf32>
    tpu.vector_store %arg7[%c0_67, %c1536], %346 {strides = array<i32>} : memref<8x2560xf32, #tpu.memory_space<vmem>>, vector<8x128xf32>,
    %c20_i32_68 = arith.constant 20 : i32
    %348 = arith.muli %arg0, %c20_i32_68 : i32
    %c13_i32 = arith.constant 13 : i32
    %349 = arith.addi %348, %c13_i32 : i32
    %350 = arith.index_cast %349 : i32 to index
    %351 = memref.load %arg2[%350] : memref<20xf32, #tpu.memory_space<smem>>
    %352 = arith.index_cast %349 : i32 to index
    %353 = memref.load %arg3[%352] : memref<20xf32, #tpu.memory_space<smem>>
    %354 = arith.index_cast %349 : i32 to index
    %355 = memref.load %arg4[%354] : memref<20xf32, #tpu.memory_space<smem>>
    %356 = vector.broadcast %351 : f32 to vector<1x128xf32>
    %357 = arith.mulf %9, %356 : vector<1x128xf32>
    %cst_69 = arith.constant -5.000000e-01 : f32
    %358 = vector.broadcast %cst_69 : f32 to vector<1x128xf32>
    %359 = arith.mulf %358, %357 : vector<1x128xf32>
    %360 = arith.mulf %359, %357 : vector<1x128xf32>
    %361 = math.exp %360 : vector<1x128xf32>
    %362 = vector.broadcast %353 : f32 to vector<1x128xf32>
    %363 = arith.mulf %9, %362 : vector<1x128xf32>
    %364 = math.cos %363 : vector<1x128xf32>
    %365 = vector.broadcast %355 : f32 to vector<1x128xf32>
    %366 = arith.mulf %365, %361 : vector<1x128xf32>
    %367 = arith.mulf %366, %364 : vector<1x128xf32>
    %368 = vector.shape_cast %367 : vector<1x128xf32> to vector<1x128xf32>
    %369 = vector.broadcast %368 : vector<1x128xf32> to vector<128x128xf32>
    %c65_i32_70 = arith.constant 65 : i32
    %370 = tpu.dynamic_rotate %369 by %c65_i32_70 dim 1 {stride = 1 : si32, stride_dimension = 0 : si32} : vector<128x128xf32>, i32 -> vector<128x128xf32>
    %371 = arith.mulf %370, %0 : vector<128x128xf32>
    %cst_71 = arith.constant dense<0.000000e+00> : vector<8x128xf32>
    %372 = tpu.matmul %1, %371, %cst_71 {dimension_numbers = #tpu.dot_dimension_numbers<[1], [0], [0], [1], [0, 0, 1, 1], [], []>} : vector<8x128xf32>, vector<128x128xf32>, vector<8x128xf32> -> vector<8x128xf32>
    %c0_72 = arith.constant 0 : index
    %c1664 = arith.constant 1664 : index
    %373 = vector.load %arg7[%c0_72, %c1664] : memref<8x2560xf32, #tpu.memory_space<vmem>>, vector<8x128xf32>
    tpu.vector_store %arg7[%c0_72, %c1664], %372 {strides = array<i32>} : memref<8x2560xf32, #tpu.memory_space<vmem>>, vector<8x128xf32>,
    %c20_i32_73 = arith.constant 20 : i32
    %374 = arith.muli %arg0, %c20_i32_73 : i32
    %c14_i32 = arith.constant 14 : i32
    %375 = arith.addi %374, %c14_i32 : i32
    %376 = arith.index_cast %375 : i32 to index
    %377 = memref.load %arg2[%376] : memref<20xf32, #tpu.memory_space<smem>>
    %378 = arith.index_cast %375 : i32 to index
    %379 = memref.load %arg3[%378] : memref<20xf32, #tpu.memory_space<smem>>
    %380 = arith.index_cast %375 : i32 to index
    %381 = memref.load %arg4[%380] : memref<20xf32, #tpu.memory_space<smem>>
    %382 = vector.broadcast %377 : f32 to vector<1x128xf32>
    %383 = arith.mulf %9, %382 : vector<1x128xf32>
    %cst_74 = arith.constant -5.000000e-01 : f32
    %384 = vector.broadcast %cst_74 : f32 to vector<1x128xf32>
    %385 = arith.mulf %384, %383 : vector<1x128xf32>
    %386 = arith.mulf %385, %383 : vector<1x128xf32>
    %387 = math.exp %386 : vector<1x128xf32>
    %388 = vector.broadcast %379 : f32 to vector<1x128xf32>
    %389 = arith.mulf %9, %388 : vector<1x128xf32>
    %390 = math.cos %389 : vector<1x128xf32>
    %391 = vector.broadcast %381 : f32 to vector<1x128xf32>
    %392 = arith.mulf %391, %387 : vector<1x128xf32>
    %393 = arith.mulf %392, %390 : vector<1x128xf32>
    %394 = vector.shape_cast %393 : vector<1x128xf32> to vector<1x128xf32>
    %395 = vector.broadcast %394 : vector<1x128xf32> to vector<128x128xf32>
    %c65_i32_75 = arith.constant 65 : i32
    %396 = tpu.dynamic_rotate %395 by %c65_i32_75 dim 1 {stride = 1 : si32, stride_dimension = 0 : si32} : vector<128x128xf32>, i32 -> vector<128x128xf32>
    %397 = arith.mulf %396, %0 : vector<128x128xf32>
    %cst_76 = arith.constant dense<0.000000e+00> : vector<8x128xf32>
    %398 = tpu.matmul %1, %397, %cst_76 {dimension_numbers = #tpu.dot_dimension_numbers<[1], [0], [0], [1], [0, 0, 1, 1], [], []>} : vector<8x128xf32>, vector<128x128xf32>, vector<8x128xf32> -> vector<8x128xf32>
    %c0_77 = arith.constant 0 : index
    %c1792 = arith.constant 1792 : index
    %399 = vector.load %arg7[%c0_77, %c1792] : memref<8x2560xf32, #tpu.memory_space<vmem>>, vector<8x128xf32>
    tpu.vector_store %arg7[%c0_77, %c1792], %398 {strides = array<i32>} : memref<8x2560xf32, #tpu.memory_space<vmem>>, vector<8x128xf32>,
    %c20_i32_78 = arith.constant 20 : i32
    %400 = arith.muli %arg0, %c20_i32_78 : i32
    %c15_i32 = arith.constant 15 : i32
    %401 = arith.addi %400, %c15_i32 : i32
    %402 = arith.index_cast %401 : i32 to index
    %403 = memref.load %arg2[%402] : memref<20xf32, #tpu.memory_space<smem>>
    %404 = arith.index_cast %401 : i32 to index
    %405 = memref.load %arg3[%404] : memref<20xf32, #tpu.memory_space<smem>>
    %406 = arith.index_cast %401 : i32 to index
    %407 = memref.load %arg4[%406] : memref<20xf32, #tpu.memory_space<smem>>
    %408 = vector.broadcast %403 : f32 to vector<1x128xf32>
    %409 = arith.mulf %9, %408 : vector<1x128xf32>
    %cst_79 = arith.constant -5.000000e-01 : f32
    %410 = vector.broadcast %cst_79 : f32 to vector<1x128xf32>
    %411 = arith.mulf %410, %409 : vector<1x128xf32>
    %412 = arith.mulf %411, %409 : vector<1x128xf32>
    %413 = math.exp %412 : vector<1x128xf32>
    %414 = vector.broadcast %405 : f32 to vector<1x128xf32>
    %415 = arith.mulf %9, %414 : vector<1x128xf32>
    %416 = math.cos %415 : vector<1x128xf32>
    %417 = vector.broadcast %407 : f32 to vector<1x128xf32>
    %418 = arith.mulf %417, %413 : vector<1x128xf32>
    %419 = arith.mulf %418, %416 : vector<1x128xf32>
    %420 = vector.shape_cast %419 : vector<1x128xf32> to vector<1x128xf32>
    %421 = vector.broadcast %420 : vector<1x128xf32> to vector<128x128xf32>
    %c65_i32_80 = arith.constant 65 : i32
    %422 = tpu.dynamic_rotate %421 by %c65_i32_80 dim 1 {stride = 1 : si32, stride_dimension = 0 : si32} : vector<128x128xf32>, i32 -> vector<128x128xf32>
    %423 = arith.mulf %422, %0 : vector<128x128xf32>
    %cst_81 = arith.constant dense<0.000000e+00> : vector<8x128xf32>
    %424 = tpu.matmul %1, %423, %cst_81 {dimension_numbers = #tpu.dot_dimension_numbers<[1], [0], [0], [1], [0, 0, 1, 1], [], []>} : vector<8x128xf32>, vector<128x128xf32>, vector<8x128xf32> -> vector<8x128xf32>
    %c0_82 = arith.constant 0 : index
    %c1920 = arith.constant 1920 : index
    %425 = vector.load %arg7[%c0_82, %c1920] : memref<8x2560xf32, #tpu.memory_space<vmem>>, vector<8x128xf32>
    tpu.vector_store %arg7[%c0_82, %c1920], %424 {strides = array<i32>} : memref<8x2560xf32, #tpu.memory_space<vmem>>, vector<8x128xf32>,
    %c20_i32_83 = arith.constant 20 : i32
    %426 = arith.muli %arg0, %c20_i32_83 : i32
    %c16_i32 = arith.constant 16 : i32
    %427 = arith.addi %426, %c16_i32 : i32
    %428 = arith.index_cast %427 : i32 to index
    %429 = memref.load %arg2[%428] : memref<20xf32, #tpu.memory_space<smem>>
    %430 = arith.index_cast %427 : i32 to index
    %431 = memref.load %arg3[%430] : memref<20xf32, #tpu.memory_space<smem>>
    %432 = arith.index_cast %427 : i32 to index
    %433 = memref.load %arg4[%432] : memref<20xf32, #tpu.memory_space<smem>>
    %434 = vector.broadcast %429 : f32 to vector<1x128xf32>
    %435 = arith.mulf %9, %434 : vector<1x128xf32>
    %cst_84 = arith.constant -5.000000e-01 : f32
    %436 = vector.broadcast %cst_84 : f32 to vector<1x128xf32>
    %437 = arith.mulf %436, %435 : vector<1x128xf32>
    %438 = arith.mulf %437, %435 : vector<1x128xf32>
    %439 = math.exp %438 : vector<1x128xf32>
    %440 = vector.broadcast %431 : f32 to vector<1x128xf32>
    %441 = arith.mulf %9, %440 : vector<1x128xf32>
    %442 = math.cos %441 : vector<1x128xf32>
    %443 = vector.broadcast %433 : f32 to vector<1x128xf32>
    %444 = arith.mulf %443, %439 : vector<1x128xf32>
    %445 = arith.mulf %444, %442 : vector<1x128xf32>
    %446 = vector.shape_cast %445 : vector<1x128xf32> to vector<1x128xf32>
    %447 = vector.broadcast %446 : vector<1x128xf32> to vector<128x128xf32>
    %c65_i32_85 = arith.constant 65 : i32
    %448 = tpu.dynamic_rotate %447 by %c65_i32_85 dim 1 {stride = 1 : si32, stride_dimension = 0 : si32} : vector<128x128xf32>, i32 -> vector<128x128xf32>
    %449 = arith.mulf %448, %0 : vector<128x128xf32>
    %cst_86 = arith.constant dense<0.000000e+00> : vector<8x128xf32>
    %450 = tpu.matmul %1, %449, %cst_86 {dimension_numbers = #tpu.dot_dimension_numbers<[1], [0], [0], [1], [0, 0, 1, 1], [], []>} : vector<8x128xf32>, vector<128x128xf32>, vector<8x128xf32> -> vector<8x128xf32>
    %c0_87 = arith.constant 0 : index
    %c2048 = arith.constant 2048 : index
    %451 = vector.load %arg7[%c0_87, %c2048] : memref<8x2560xf32, #tpu.memory_space<vmem>>, vector<8x128xf32>
    tpu.vector_store %arg7[%c0_87, %c2048], %450 {strides = array<i32>} : memref<8x2560xf32, #tpu.memory_space<vmem>>, vector<8x128xf32>,
    %c20_i32_88 = arith.constant 20 : i32
    %452 = arith.muli %arg0, %c20_i32_88 : i32
    %c17_i32 = arith.constant 17 : i32
    %453 = arith.addi %452, %c17_i32 : i32
    %454 = arith.index_cast %453 : i32 to index
    %455 = memref.load %arg2[%454] : memref<20xf32, #tpu.memory_space<smem>>
    %456 = arith.index_cast %453 : i32 to index
    %457 = memref.load %arg3[%456] : memref<20xf32, #tpu.memory_space<smem>>
    %458 = arith.index_cast %453 : i32 to index
    %459 = memref.load %arg4[%458] : memref<20xf32, #tpu.memory_space<smem>>
    %460 = vector.broadcast %455 : f32 to vector<1x128xf32>
    %461 = arith.mulf %9, %460 : vector<1x128xf32>
    %cst_89 = arith.constant -5.000000e-01 : f32
    %462 = vector.broadcast %cst_89 : f32 to vector<1x128xf32>
    %463 = arith.mulf %462, %461 : vector<1x128xf32>
    %464 = arith.mulf %463, %461 : vector<1x128xf32>
    %465 = math.exp %464 : vector<1x128xf32>
    %466 = vector.broadcast %457 : f32 to vector<1x128xf32>
    %467 = arith.mulf %9, %466 : vector<1x128xf32>
    %468 = math.cos %467 : vector<1x128xf32>
    %469 = vector.broadcast %459 : f32 to vector<1x128xf32>
    %470 = arith.mulf %469, %465 : vector<1x128xf32>
    %471 = arith.mulf %470, %468 : vector<1x128xf32>
    %472 = vector.shape_cast %471 : vector<1x128xf32> to vector<1x128xf32>
    %473 = vector.broadcast %472 : vector<1x128xf32> to vector<128x128xf32>
    %c65_i32_90 = arith.constant 65 : i32
    %474 = tpu.dynamic_rotate %473 by %c65_i32_90 dim 1 {stride = 1 : si32, stride_dimension = 0 : si32} : vector<128x128xf32>, i32 -> vector<128x128xf32>
    %475 = arith.mulf %474, %0 : vector<128x128xf32>
    %cst_91 = arith.constant dense<0.000000e+00> : vector<8x128xf32>
    %476 = tpu.matmul %1, %475, %cst_91 {dimension_numbers = #tpu.dot_dimension_numbers<[1], [0], [0], [1], [0, 0, 1, 1], [], []>} : vector<8x128xf32>, vector<128x128xf32>, vector<8x128xf32> -> vector<8x128xf32>
    %c0_92 = arith.constant 0 : index
    %c2176 = arith.constant 2176 : index
    %477 = vector.load %arg7[%c0_92, %c2176] : memref<8x2560xf32, #tpu.memory_space<vmem>>, vector<8x128xf32>
    tpu.vector_store %arg7[%c0_92, %c2176], %476 {strides = array<i32>} : memref<8x2560xf32, #tpu.memory_space<vmem>>, vector<8x128xf32>,
    %c20_i32_93 = arith.constant 20 : i32
    %478 = arith.muli %arg0, %c20_i32_93 : i32
    %c18_i32 = arith.constant 18 : i32
    %479 = arith.addi %478, %c18_i32 : i32
    %480 = arith.index_cast %479 : i32 to index
    %481 = memref.load %arg2[%480] : memref<20xf32, #tpu.memory_space<smem>>
    %482 = arith.index_cast %479 : i32 to index
    %483 = memref.load %arg3[%482] : memref<20xf32, #tpu.memory_space<smem>>
    %484 = arith.index_cast %479 : i32 to index
    %485 = memref.load %arg4[%484] : memref<20xf32, #tpu.memory_space<smem>>
    %486 = vector.broadcast %481 : f32 to vector<1x128xf32>
    %487 = arith.mulf %9, %486 : vector<1x128xf32>
    %cst_94 = arith.constant -5.000000e-01 : f32
    %488 = vector.broadcast %cst_94 : f32 to vector<1x128xf32>
    %489 = arith.mulf %488, %487 : vector<1x128xf32>
    %490 = arith.mulf %489, %487 : vector<1x128xf32>
    %491 = math.exp %490 : vector<1x128xf32>
    %492 = vector.broadcast %483 : f32 to vector<1x128xf32>
    %493 = arith.mulf %9, %492 : vector<1x128xf32>
    %494 = math.cos %493 : vector<1x128xf32>
    %495 = vector.broadcast %485 : f32 to vector<1x128xf32>
    %496 = arith.mulf %495, %491 : vector<1x128xf32>
    %497 = arith.mulf %496, %494 : vector<1x128xf32>
    %498 = vector.shape_cast %497 : vector<1x128xf32> to vector<1x128xf32>
    %499 = vector.broadcast %498 : vector<1x128xf32> to vector<128x128xf32>
    %c65_i32_95 = arith.constant 65 : i32
    %500 = tpu.dynamic_rotate %499 by %c65_i32_95 dim 1 {stride = 1 : si32, stride_dimension = 0 : si32} : vector<128x128xf32>, i32 -> vector<128x128xf32>
    %501 = arith.mulf %500, %0 : vector<128x128xf32>
    %cst_96 = arith.constant dense<0.000000e+00> : vector<8x128xf32>
    %502 = tpu.matmul %1, %501, %cst_96 {dimension_numbers = #tpu.dot_dimension_numbers<[1], [0], [0], [1], [0, 0, 1, 1], [], []>} : vector<8x128xf32>, vector<128x128xf32>, vector<8x128xf32> -> vector<8x128xf32>
    %c0_97 = arith.constant 0 : index
    %c2304 = arith.constant 2304 : index
    %503 = vector.load %arg7[%c0_97, %c2304] : memref<8x2560xf32, #tpu.memory_space<vmem>>, vector<8x128xf32>
    tpu.vector_store %arg7[%c0_97, %c2304], %502 {strides = array<i32>} : memref<8x2560xf32, #tpu.memory_space<vmem>>, vector<8x128xf32>,
    %c20_i32_98 = arith.constant 20 : i32
    %504 = arith.muli %arg0, %c20_i32_98 : i32
    %c19_i32 = arith.constant 19 : i32
    %505 = arith.addi %504, %c19_i32 : i32
    %506 = arith.index_cast %505 : i32 to index
    %507 = memref.load %arg2[%506] : memref<20xf32, #tpu.memory_space<smem>>
    %508 = arith.index_cast %505 : i32 to index
    %509 = memref.load %arg3[%508] : memref<20xf32, #tpu.memory_space<smem>>
    %510 = arith.index_cast %505 : i32 to index
    %511 = memref.load %arg4[%510] : memref<20xf32, #tpu.memory_space<smem>>
    %512 = vector.broadcast %507 : f32 to vector<1x128xf32>
    %513 = arith.mulf %9, %512 : vector<1x128xf32>
    %cst_99 = arith.constant -5.000000e-01 : f32
    %514 = vector.broadcast %cst_99 : f32 to vector<1x128xf32>
    %515 = arith.mulf %514, %513 : vector<1x128xf32>
    %516 = arith.mulf %515, %513 : vector<1x128xf32>
    %517 = math.exp %516 : vector<1x128xf32>
    %518 = vector.broadcast %509 : f32 to vector<1x128xf32>
    %519 = arith.mulf %9, %518 : vector<1x128xf32>
    %520 = math.cos %519 : vector<1x128xf32>
    %521 = vector.broadcast %511 : f32 to vector<1x128xf32>
    %522 = arith.mulf %521, %517 : vector<1x128xf32>
    %523 = arith.mulf %522, %520 : vector<1x128xf32>
    %524 = vector.shape_cast %523 : vector<1x128xf32> to vector<1x128xf32>
    %525 = vector.broadcast %524 : vector<1x128xf32> to vector<128x128xf32>
    %c65_i32_100 = arith.constant 65 : i32
    %526 = tpu.dynamic_rotate %525 by %c65_i32_100 dim 1 {stride = 1 : si32, stride_dimension = 0 : si32} : vector<128x128xf32>, i32 -> vector<128x128xf32>
    %527 = arith.mulf %526, %0 : vector<128x128xf32>
    %cst_101 = arith.constant dense<0.000000e+00> : vector<8x128xf32>
    %528 = tpu.matmul %1, %527, %cst_101 {dimension_numbers = #tpu.dot_dimension_numbers<[1], [0], [0], [1], [0, 0, 1, 1], [], []>} : vector<8x128xf32>, vector<128x128xf32>, vector<8x128xf32> -> vector<8x128xf32>
    %c0_102 = arith.constant 0 : index
    %c2432 = arith.constant 2432 : index
    %529 = vector.load %arg7[%c0_102, %c2432] : memref<8x2560xf32, #tpu.memory_space<vmem>>, vector<8x128xf32>
    tpu.vector_store %arg7[%c0_102, %c2432], %528 {strides = array<i32>} : memref<8x2560xf32, #tpu.memory_space<vmem>>, vector<8x128xf32>,
    return
  }
  func.func @transform_0(%arg0: i32, %arg1: i32) -> i32 {
    %c0_i32 = arith.constant 0 : i32
    %c0_i32_0 = arith.constant 0 : i32
    return %c0_i32 : i32
  }
  func.func @transform_1(%arg0: i32, %arg1: i32) -> i32 {
    %c0_i32 = arith.constant 0 : i32
    %c0_i32_0 = arith.constant 0 : i32
    return %c0_i32 : i32
  }
  func.func @transform_2(%arg0: i32, %arg1: i32) -> i32 {
    %c0_i32 = arith.constant 0 : i32
    %c0_i32_0 = arith.constant 0 : i32
    return %c0_i32 : i32
  }
  func.func @transform_3(%arg0: i32, %arg1: i32) -> (i32, i32) {
    %c0_i32 = arith.constant 0 : i32
    %c0_i32_0 = arith.constant 0 : i32
    return %arg1, %c0_i32 : i32, i32
  }
  func.func @transform_4(%arg0: i32, %arg1: i32) -> (i32, i32) {
    %c0_i32 = arith.constant 0 : i32
    %c0_i32_0 = arith.constant 0 : i32
    return %c0_i32, %arg1 : i32, i32
  }
  func.func @transform_5(%arg0: i32, %arg1: i32) -> (i32, i32) {
    %c0_i32 = arith.constant 0 : i32
    %c0_i32_0 = arith.constant 0 : i32
    return %c0_i32, %arg0 : i32, i32
  }
}

</mosaic_0001>

<bundles_post_ra>
// kernel: morlet_wavelet_layer.1
= control target key start
LH: loop header
LB: loop body
LE: loop exit
PB: predicated region body
PF: predicated region fallthrough
CT: control target
= control target key end

     0   :  { %10 = vsyncpa [#allocation3], 0  ;;  %s11696_s0 = inlined_call_operand.vmem [shape: f32[20], index: 0, kind: input, shape index: {}]   ;;  %s11697_s1 = inlined_call_operand.vmem [shape: f32[20], index: 1, kind: input, shape index: {}]   ;;  %s11698_s2 = inlined_call_operand.vmem [shape: f32[20], index: 2, kind: input, shape index: {}]   ;;  %s11699_s3 = inlined_call_operand.vmem [shape: f32[128,128], index: 3, kind: input, shape index: {}]   ;;  %s11700_s4 = inlined_call_operand.vmem [shape: f32[8,128], index: 4, kind: input, shape index: {}]   ;;  %s11701_s5 = inlined_call_operand.vmem [shape: f32[8,2560], index: 5, kind: output, shape index: {}]  }
   0x1   :  { %11 = vsyncpa [#allocation5], 0  ;;  %s28_s20 = sshll.u32 %s11697_s1, 4  ;;  %s18_s23 = sshll.u32 %s11696_s0, 4  ;;  %s29_s20 = int_to_ptr.vmem [resolvable:$true] %s28_s20  ;;  %s19_s23 = int_to_ptr.vmem [resolvable:$true] %s18_s23 }
   0x2   :  { %s7418_s24 = scalar_lea.vmem %s29_s20, 16  ;;  %p7423_p1 = scmp.lt.s32.totalorder %s29_s20, %s29_s20 }
   0x3   :  { %p7419_p0 = scmp.ne.s32.totalorder %s29_s20, %s7418_s24  ;;  %p7424_p2 = scmp.lt.s32.totalorder %s7418_s24, %s7418_s24 }
   0x5   :  { %p7425_p3 = por %p7424_p2, %p7423_p1 }
   0x7   :  { %p7426_p4 = pnand %p7425_p3, %p7419_p0 }
   0x9   :  { %7429 = shalt.err (!%p7426_p4)
}
   0xa   :  { %s7458_s25 = smov [#allocation4]   ;;  %s7430_s26 = scalar_lea.vmem %s19_s23, 16 }
   0xb   :  { %31 = dma.vmem_to_smem %s29_s20, 16, %s7458_s25, [#allocation5]  }
   0xc   :  { %p7431_p5 = scmp.ne.s32.totalorder %s19_s23, %s7430_s26  ;;  %p7435_p6 = scmp.lt.s32.totalorder %s19_s23, %s19_s23 }
   0xd   :  { %p7436_p7 = scmp.lt.s32.totalorder %s7430_s26, %s7430_s26 }
   0xf   :  { %p7437_p8 = por %p7436_p7, %p7435_p6 }
  0x11   :  { %p7438_p9 = pnand %p7437_p8, %p7431_p5 }
  0x13   :  { %7441 = shalt.err (!%p7438_p9)
}
  0x14   :  { %s7459_s1 = smov [#allocation2]   ;;  %s38_s28 = sshll.u32 %s11698_s2, 4  ;;  %s39_s28 = int_to_ptr.vmem [resolvable:$true] %s38_s28 }
  0x15   :  { %21 = dma.vmem_to_smem %s19_s23, 16, %s7459_s1, [#allocation3]  }
  0x16   :  { %s7442_s29 = scalar_lea.vmem %s39_s28, 16  ;;  %p7447_p11 = scmp.lt.s32.totalorder %s39_s28, %s39_s28 }
  0x17   :  { %p7443_p10 = scmp.ne.s32.totalorder %s39_s28, %s7442_s29  ;;  %p7448_p12 = scmp.lt.s32.totalorder %s7442_s29, %s7442_s29 }
  0x19   :  { %p7449_p13 = por %p7448_p12, %p7447_p11 }
  0x1b   :  { %p7450_p0 = pnand %p7449_p13, %p7443_p10 }
  0x1d   :  { %7453 = shalt.err (!%p7450_p0)
}
  0x1e   :  { %s7460_s30 = smov [#allocation6]  }
  0x1f   :  { %41 = dma.vmem_to_smem %s39_s28, 16, %s7460_s30, [#allocation5]  }
  0x20   :  { %7454 = dma.done.wait [#allocation3], 16  }
  0x21   :  { %7455 = vsyncadd [#allocation3], 4294967280 }
  0x22   :  { %7456 = dma.done.wait [#allocation5], 32  }
  0x23   :  { %7457 = vsyncadd [#allocation5], 4294967264 }
  0x24   :  { %55 = sfence }
  0x25   :  { %v73_v0 = vlaneseq  ;;  %s81_s6 = sld [smem:[#allocation4]]  ;;  %s5470_s2 = sld [smem:[#allocation4 + $0x1]]  ;;  %v11718_v27 = vmov 683565275   ;;  %v11716_v29 = vmov 2475754826  }
  0x26   :  { %s80_s7 = sld [smem:[#allocation2]]  ;;  %s7534_s8 = sld [smem:[#allocation4 + $0x2]]  ;;  %v11703_v31 = vmov 2131351028   ;;  %v11705_v33 = vmov 2102212464  }
  0x27   :  { %v74_v1 = vand.u32 127, %v73_v0  ;;  %v11707_v35 = vmov 920167782   ;;  %v11713_v44 = vmov 1326507024   ;;  %s7592_s9 = sld [smem:[#allocation2 + $0x1]] }
  0x28   :  { %s7600_s10 = sld [smem:[#allocation2 + $0x2]]  ;;  %s7612_s11 = sld [smem:[#allocation4 + $0x3]] }
  0x29   :  { %v75_v2 = vsub.s32 127, %v74_v1  ;;  %s7681_s12 = sld [smem:[#allocation6]]  ;;  %s7705_s13 = sld [smem:[#allocation2 + $0x3]] }
  0x2a   :  { %s7774_s14 = sld [smem:[#allocation4 + $0x4]]  ;;  %s7467_s15 = smov 337  }
  0x2b   :  { %v76_v3 = vcvt.s32.f32 %v75_v2  ;;  %v89_v5 = vstv %s81_s6  ;;  %v358_v12 = vstv %s5470_s2  ;;  %s7468_s16 = smov 321   ;;  %s7469_s17 = smov 345  }
  0x2c   :  { %v83_v18 = vstv %s80_s7  ;;  %v627_v25 = vstv %s7534_s8  ;;  %s7470_s18 = smov 329   ;;  %s7471_s19 = smov 361  }
  0x2d   :  { %v77_v4 = vmul.f32 1.007874, %v76_v3  ;;  %s7472_s20 = smov 353   ;;  %s7826_s21 = sld [smem:[#allocation6 + $0x1]] }
  0x2e   :  { %s7836_s22 = sld [smem:[#allocation4 + $0x5]]  ;;  %s7841_s23 = sld [smem:[#allocation6 + $0x2]] }
  0x2f   :  { %v7525_v6 = vadd.f32 -64.0, %v77_v4  ;;  %s7474_s24 = smov 377   ;;  %s7475_s25 = smov 369  }
  0x30   :  { %s7857_s26 = sld [smem:[#allocation2 + $0x4]]  ;;  %s7476_s1 = smov 265  }
  0x31   :  { %v7528_v7 = vmul.f32 %v89_v5, %v7525_v6  ;;  %v7537_v14 = vmul.f32 %v358_v12, %v7525_v6  ;;  %v7541_v22 = vmul.f32 %v83_v18, %v7525_v6  ;;  %s7477_s0 = smov 257   ;;  %s7478_s27 = smov 281  }
  0x32   :  { %s7479_s28 = smov 273   ;;  %s7480_s29 = smov 297  }
  0x33   :  { %v91_v8 = vand.u32 2147483647, %v7528_v7  ;;  %v94_v9 = vand.u32 2139095040, %v7528_v7  ;;  %v363_v17 = vand.u32 2139095040, %v7537_v14  ;;  %v360_v37 = vand.u32 2147483647, %v7537_v14 }
  0x34   :  { %vm93_vm12 = vcmp.lt.s32.totalorder %v7528_v7, 0  ;;  %s7481_s30 = smov 289   ;;  %s7482_s6 = smov 313  }
  0x35   :  { %v95_v10 = vshrl.u32 %v94_v9, 23  ;;  %v98_v11 = vand.u32 8388607, %v91_v8  ;;  %v364_v20 = vshrl.u32 %v363_v17, 23  ;;  %v367_v61 = vand.u32 8388607, %v360_v37 }
  0x36   :  { %vm7629_vm13 = vcmp.le.f32.partialorder %v91_v8, 0.7853982  ;;  %s7483_s2 = smov 305   ;;  %s8033_s7 = sld [smem:[#allocation2 + $0x5]] }
  0x37   :  { %v5465_v13 = vadd.s32 4294967169, %v95_v10  ;;  %v99_v16 = vor.u32 8388608, %v98_v11  ;;  %v5472_v38 = vadd.s32 4294967169, %v364_v20  ;;  %v85_v10 = vmul.f32 -0.5, %v7541_v22  ;;  %s8044_s8 = sld [smem:[#allocation4 + $0x6]] }
  0x39   :  { %v101_v15 = vadd.s32 1, %v5465_v13  ;;  %v7543_v24 = vshll.u32 %v99_v16, 8  ;;  %v370_v51 = vadd.s32 1, %v5472_v38  ;;  %v368_v13 = vor.u32 8388608, %v367_v61 }
  0x3b   :  { %vm102_vm0 = vcmp.gt.s32.totalorder %v101_v15, 0  ;;  %vm371_vm5 = vcmp.gt.s32.totalorder %v370_v51, 0 }
  0x3c   :  { %v103_v19 = vsel %vm102_vm0, %v101_v15, 0  ;;  %v372_v62 = vsel %vm371_vm5, %v370_v51, 0  ;;  %v7575_v15 = vmul.f32 %v627_v25, %v7525_v6  ;;  %vm362_vm5 = vcmp.lt.s32.totalorder %v7537_v14, 0 }
  0x3d   :  { %v105_v21 = vand.u32 31, %v103_v19  ;;  %v104_v23 = vshrl.u32 %v103_v19, 5  ;;  %v373_v2 = vshrl.u32 %v372_v62, 5  ;;  %v374_v11 = vand.u32 31, %v372_v62 }
  0x3f   :  { %v106_v26 = vsub.s32 32, %v105_v21  ;;  %v108_v28 = vshll.u32 %v11718_v27, %v105_v21  ;;  %v111_v30 = vshll.u32 %v11716_v29, %v105_v21  ;;  %v114_v32 = vshll.u32 %v11703_v31, %v105_v21 }
  0x40   :  { %v117_v34 = vshll.u32 %v11705_v33, %v105_v21  ;;  %v120_v36 = vshll.u32 %v11707_v35, %v105_v21  ;;  %vm123_vm1 = vcmp.lt.s32.totalorder %v104_v23, 1  ;;  %vm124_vm2 = vcmp.lt.s32.totalorder %v104_v23, 2 }
  0x41   :  { %v107_v39 = vshrl.u32 %v11718_v27, %v106_v26  ;;  %v109_v40 = vshrl.u32 %v11716_v29, %v106_v26  ;;  %v112_v41 = vshrl.u32 %v11703_v31, %v106_v26  ;;  %v115_v42 = vshrl.u32 %v11705_v33, %v106_v26 }
  0x42   :  { %v118_v43 = vshrl.u32 %v11707_v35, %v106_v26  ;;  %v121_v45 = vshrl.u32 %v11713_v44, %v106_v26  ;;  %vm126_vm3 = vcmp.lt.s32.totalorder %v104_v23, 4  ;;  %vm125_vm4 = vcmp.lt.s32.totalorder %v104_v23, 3 }
  0x43   :  { %v110_v46 = vor.u32 %v109_v40, %v108_v28  ;;  %v113_v47 = vor.u32 %v112_v41, %v111_v30  ;;  %v116_v48 = vor.u32 %v115_v42, %v114_v32  ;;  %vm392_vm6 = vcmp.lt.s32.totalorder %v373_v2, 1 }
  0x44   :  { %v119_v49 = vor.u32 %v118_v43, %v117_v34  ;;  %v122_v50 = vor.u32 %v121_v45, %v120_v36  ;;  %v375_v16 = vsub.s32 32, %v374_v11  ;;  %v377_v17 = vshll.u32 %v11718_v27, %v374_v11 }
  0x45   :  { %v127_v52 = vsel %vm123_vm1, %v107_v39, %v110_v46  ;;  %v128_v53 = vsel %vm126_vm3, %v116_v48, 2102212464  ;;  %v131_v54 = vsel %vm123_vm1, %v110_v46, %v113_v47  ;;  %v135_v55 = vsel %vm123_vm1, %v113_v47, %v116_v48 }
  0x46   :  { %v129_v56 = vsel %vm125_vm4, %v113_v47, %v128_v53  ;;  %v132_v57 = vsel %vm126_vm3, %v119_v49, 920167782  ;;  %v136_v58 = vsel %vm126_vm3, %v122_v50, 1326507024  ;;  %v380_v18 = vshll.u32 %v11716_v29, %v374_v11 }
  0x47   :  { %v133_v59 = vsel %vm125_vm4, %v116_v48, %v132_v57  ;;  %v137_v60 = vsel %vm125_vm4, %v119_v49, %v136_v58  ;;  %v130_v63 = vsel %vm124_vm2, %v127_v52, %v129_v56  ;;  %v383_v19 = vshll.u32 %v11703_v31, %v374_v11 }
  0x48   :  { %v134_v0 = vsel %vm124_vm2, %v131_v54, %v133_v59  ;;  %v138_v1 = vsel %vm124_vm2, %v135_v55, %v137_v60  ;;  %v146_v12 = vmul.u32 %v7543_v24, %v130_v63  ;;  %v386_v21 = vshll.u32 %v11705_v33, %v374_v11 }
  0x49   :  { %v7564_v3 = vmul.u32.u64.low %v7543_v24, %v138_v1  ;;  %v7565_v4 = vmul.u32.u64.high %v7543_v24, %v138_v1, %v7564_v3  ;;  %v7568_v5 = vmul.u32.u64.low %v7543_v24, %v134_v0  ;;  %v7569_v9 = vmul.u32.u64.high %v7543_v24, %v134_v0, %v7568_v5 }
  0x4a   :  { %vm395_vm8 = vcmp.lt.s32.totalorder %v373_v2, 4  ;;  %v376_v23 = vshrl.u32 %v11718_v27, %v375_v16  ;;  %v378_v24 = vshrl.u32 %v11716_v29, %v375_v16  ;;  %v381_v25 = vshrl.u32 %v11703_v31, %v375_v16 }
  0x4b   :  { %vm148_vm7 = vc.u32 %v7565_v4, %v7568_v5  ;;  %v149_v20 = vadd.s32 1, %v7569_v9  ;;  %v384_v26 = vshrl.u32 %v11705_v33, %v375_v16  ;;  %v387_v30 = vshrl.u32 %v11707_v35, %v375_v16 }
  0x4c   :  { %v389_v32 = vshll.u32 %v11707_v35, %v374_v11  ;;  %v390_v34 = vshrl.u32 %v11713_v44, %v375_v16  ;;  %v379_v38 = vor.u32 %v378_v24, %v377_v17  ;;  %v382_v39 = vor.u32 %v381_v25, %v380_v18 }
  0x4d   :  { %v150_v28 = vsel %vm148_vm7, %v149_v20, %v7569_v9  ;;  %v385_v40 = vor.u32 %v384_v26, %v383_v19  ;;  %v388_v41 = vor.u32 %v387_v30, %v386_v21  ;;  %vm393_vm9 = vcmp.lt.s32.totalorder %v373_v2, 2 }
  0x4e   :  { %v151_v36 = vadd.s32 %v150_v28, %v146_v12  ;;  %v391_v42 = vor.u32 %v390_v34, %v389_v32  ;;  %vm394_vm10 = vcmp.lt.s32.totalorder %v373_v2, 3  ;;  %v400_v46 = vsel %vm392_vm6, %v379_v38, %v382_v39 }
  0x4f   :  { %v397_v45 = vsel %vm395_vm8, %v385_v40, 2102212464  ;;  %v408_v47 = vshll.u32 %v368_v13, 8  ;;  %v396_v48 = vsel %vm392_vm6, %v376_v23, %v379_v38  ;;  %v401_v49 = vsel %vm395_vm8, %v388_v41, 920167782 }
  0x50   :  { %v152_v43 = vadd.s32 536870912, %v151_v36  ;;  %v404_v50 = vsel %vm392_vm6, %v382_v39, %v385_v40  ;;  %v405_v51 = vsel %vm395_vm8, %v391_v42, 1326507024  ;;  %v398_v53 = vsel %vm394_vm10, %v382_v39, %v397_v45 }
  0x51   :  { %v402_v54 = vsel %vm394_vm10, %v385_v40, %v401_v49  ;;  %v406_v55 = vsel %vm394_vm10, %v388_v41, %v405_v51  ;;  %v399_v61 = vsel %vm393_vm9, %v396_v48, %v398_v53  ;;  %v632_v0 = vand.u32 2139095040, %v7575_v15 }
  0x52   :  { %v153_v52 = vshrl.u32 %v152_v43, 30  ;;  %v403_v56 = vsel %vm393_vm9, %v400_v46, %v402_v54  ;;  %v407_v57 = vsel %vm393_vm9, %v404_v50, %v406_v55  ;;  %v86_v1 = vmul.f32 %v85_v10, %v7541_v22 }
  0x53   :  { %v7604_v59 = vmul.u32.u64.low %v408_v47, %v407_v57  ;;  %v7605_v60 = vmul.u32.u64.high %v408_v47, %v407_v57, %v7604_v59  ;;  %v7608_v62 = vmul.u32.u64.low %v408_v47, %v403_v56  ;;  %v7609_v63 = vmul.u32.u64.high %v408_v47, %v403_v56, %v7608_v62 }
  0x54   :  { %v154_v58 = vshll.u32 %v153_v52, 30  ;;  %v629_v9 = vand.u32 2147483647, %v7575_v15  ;;  %v633_v11 = vshrl.u32 %v632_v0, 23  ;;  %v352_v13 = vstv %s7592_s9  ;;  %s8077_s9 = sld [smem:[#allocation6 + $0x3]] }
  0x55   :  { %v415_v16 = vmul.u32 %v408_v47, %v399_v61  ;;  %vm417_vm11 = vc.u32 %v7605_v60, %v7608_v62  ;;  %v418_v2 = vadd.s32 1, %v7609_v63  ;;  %v87_v18 = vmul.f32 1.442695, %v86_v1 }
  0x56   :  { %v155_v3 = vsub.s32 %v151_v36, %v154_v58  ;;  %v5479_v17 = vadd.s32 4294967169, %v633_v11  ;;  %v177_v20 = vsub.s32 4, %v153_v52  ;;  %v621_v21 = vstv %s7600_s10  ;;  %s8144_s10 = sld [smem:[#allocation4 + $0x7]] }
  0x57   :  { %v7621_v23 = vmul.f32 %v352_v13, %v7525_v6  ;;  %v419_v22 = vsel %vm417_vm11, %v418_v2, %v7609_v63  ;;  %v636_v10 = vand.u32 8388607, %v629_v9  ;;  %v7634_v30 = vmul.f32 %v621_v21, %v7525_v6 }
  0x58   :  { %v157_v12 = vsub.s32 0, %v155_v3  ;;  %v639_v24 = vadd.s32 1, %v5479_v17  ;;  %v420_v26 = vadd.s32 %v419_v22, %v415_v16  ;;  %v896_v32 = vstv %s7612_s11  ;;  %s8159_s11 = sld [smem:[#allocation6 + $0x4]] }
  0x59   :  { %v7639_v36 = vsel %vm93_vm12, %v177_v20, %v153_v52  ;;  %7230 = vpow2.f32 %v87_v18  ;;  %v7642_v40 = vmul.f32 -0.5, %v7621_v23  ;;  %v637_v8 = vor.u32 8388608, %v636_v10 }
  0x5a   :  { %v5466_v19 = vmin.u32 %v157_v12, %v155_v3  ;;  %vm640_vm14 = vcmp.gt.s32.totalorder %v639_v24, 0  ;;  %v421_v38 = vadd.s32 536870912, %v420_v26  ;;  %v147_v42 = vadd.s32 %v7568_v5, %v7565_v4 }
  0x5b   :  { %v641_v39 = vsel %vm640_vm14, %v639_v24, 0  ;;  %v7649_v45 = vmul.f32 %v896_v32, %v7525_v6  ;;  %v180_v47 = vsel %vm7629_vm13, 0, %v7639_v36  ;;  %v7655_v48 = vmul.f32 -0.5, %v7634_v30 }
  0x5c   :  { %v159_v25 = vclz %v5466_v19  ;;  %v643_v41 = vand.u32 31, %v641_v39  ;;  %v7646_v43 = vshrl.u32 %v421_v38, 30  ;;  %v416_v5 = vadd.s32 %v7608_v62, %v7605_v60 }
  0x5d   :  { %v7660_v54 = vshll.u32 %v637_v8, 8  ;;  %v898_v55 = vand.u32 2147483647, %v7649_v45  ;;  %v642_v11 = vshrl.u32 %v641_v39, 5  ;;  %v901_v2 = vand.u32 2139095040, %v7649_v45 }
  0x5e   :  { %v5467_v34 = vadd.s32 4294967294, %v159_v25  ;;  %v644_v49 = vsub.s32 32, %v643_v41  ;;  %v423_v4 = vshll.u32 %v7646_v43, 30  ;;  %v646_v53 = vshll.u32 %v11718_v27, %v643_v41 }
  0x5f   :  { %v649_v59 = vshll.u32 %v11716_v29, %v643_v41  ;;  %v652_v0 = vshll.u32 %v11703_v31, %v643_v41  ;;  %v655_v13 = vshll.u32 %v11705_v33, %v643_v41  ;;  %v658_v20 = vshll.u32 %v11707_v35, %v643_v41 }
  0x60   :  { %vm5468_vm15 = vcmp.lt.s32.totalorder %v5467_v34, 0  ;;  %v7663_v58 = vsub.s32 %v420_v26, %v423_v4  ;;  %v647_v61 = vshrl.u32 %v11716_v29, %v644_v49  ;;  %v650_v63 = vshrl.u32 %v11703_v31, %v644_v49 }
  0x61   :  { %v162_v46 = vsel %vm5468_vm15, 0, %v5467_v34  ;;  %v653_v60 = vshrl.u32 %v11705_v33, %v644_v49  ;;  %v645_v12 = vshrl.u32 %v11718_v27, %v644_v49  ;;  %v656_v16 = vshrl.u32 %v11707_v35, %v644_v49 }
  0x62   :  { %v163_v50 = vsub.s32 32, %v162_v46  ;;  %v164_v51 = vshll.u32 %v155_v3, %v162_v46  ;;  %v167_v52 = vsub.s32 4294967266, %v162_v46  ;;  %v426_v3 = vsub.s32 0, %v7663_v58 }
  0x63   :  { %v7677_v21 = vpop.eup %7230  ;;  %v648_v22 = vor.u32 %v647_v61, %v646_v53  ;;  %v651_v10 = vor.u32 %v650_v63, %v649_v59  ;;  %v654_v24 = vor.u32 %v653_v60, %v652_v0  ;;  %v657_v25 = vor.u32 %v656_v16, %v655_v13 }
  0x64   :  { %v165_v56 = vshrl.u32 %v147_v42, %v163_v50  ;;  %v168_v57 = vadd.s32 127, %v167_v52  ;;  %v5473_v19 = vmin.u32 %v426_v3, %v7663_v58  ;;  %v659_v34 = vshrl.u32 %v11713_v44, %v644_v49 }
  0x65   :  { %vm661_vm0 = vcmp.lt.s32.totalorder %v642_v11, 1  ;;  %vm662_vm1 = vcmp.lt.s32.totalorder %v642_v11, 2  ;;  %vm663_vm2 = vcmp.lt.s32.totalorder %v642_v11, 3  ;;  %vm664_vm3 = vcmp.lt.s32.totalorder %v642_v11, 4 }
  0x66   :  { %v166_v62 = vor.u32 %v165_v56, %v164_v51  ;;  %v169_v1 = vshll.u32 %v168_v57, 23  ;;  %v428_v32 = vclz %v5473_v19  ;;  %v665_v38 = vsel %vm661_vm0, %v645_v12, %v648_v22 }
  0x67   :  { %v660_v41 = vor.u32 %v659_v34, %v658_v20  ;;  %v666_v42 = vsel %vm664_vm3, %v654_v24, 2102212464  ;;  %v669_v50 = vsel %vm661_vm0, %v648_v22, %v651_v10  ;;  %v670_v51 = vsel %vm664_vm3, %v657_v25, 920167782 }
  0x68   :  { %v170_v17 = vor.u32 4788187, %v169_v1  ;;  %v173_v18 = vcvt.s32.f32 %v166_v62  ;;  %v5474_v8 = vadd.s32 4294967294, %v428_v32  ;;  %v667_v46 = vsel %vm663_vm2, %v651_v10, %v666_v42 }
  0x69   :  { %v902_v49 = vshrl.u32 %v901_v2, 23  ;;  %v671_v4 = vsel %vm663_vm2, %v654_v24, %v670_v51  ;;  %v673_v53 = vsel %vm661_vm0, %v651_v10, %v654_v24  ;;  %v668_v57 = vsel %vm662_vm1, %v665_v38, %v667_v46 }
  0x6a   :  { %v171_v26 = vand.u32 2147483647, %v170_v17  ;;  %vm5475_vm4 = vcmp.lt.s32.totalorder %v5474_v8, 0  ;;  %v672_v59 = vsel %vm662_vm1, %v669_v50, %v671_v4  ;;  %v674_v61 = vsel %vm664_vm3, %v660_v41, 1326507024 }
  0x6b   :  { %v431_v56 = vsel %vm5475_vm4, 0, %v5474_v8  ;;  %v675_v3 = vsel %vm663_vm2, %v657_v25, %v674_v61  ;;  %v7700_v12 = vmul.u32.u64.low %v7660_v54, %v672_v59  ;;  %v7701_v13 = vmul.u32.u64.high %v7660_v54, %v672_v59, %v7700_v12 }
  0x6c   :  { %v174_v39 = vmul.f32 %v173_v18, %v171_v26  ;;  %v432_v0 = vsub.s32 32, %v431_v56  ;;  %v433_v60 = vshll.u32 %v7663_v58, %v431_v56  ;;  %v436_v62 = vsub.s32 4294967266, %v431_v56 }
  0x6d   :  { %v676_v17 = vsel %vm662_vm1, %v673_v53, %v675_v3  ;;  %v5486_v19 = vadd.s32 4294967169, %v902_v49  ;;  %v194_v20 = vstv %s7681_s12  ;;  %v355_v24 = vmul.f32 %v7642_v40, %v7621_v23  ;;  %s8241_s12 = sld [smem:[#allocation6 + $0x5]] }
  0x6e   :  { %v175_v52 = vxor.u32 2147483648, %v174_v39  ;;  %v434_v16 = vshrl.u32 %v416_v5, %v432_v0  ;;  %v437_v2 = vadd.s32 127, %v436_v62  ;;  %v684_v5 = vmul.u32 %v7660_v54, %v668_v57 }
  0x6f   :  { %v7708_v58 = vmul.u32.u64.low %v7660_v54, %v676_v17  ;;  %v7709_v18 = vmul.u32.u64.high %v7660_v54, %v676_v17, %v7708_v58  ;;  %v687_v11 = vadd.s32 1, %v7701_v13  ;;  %v908_v25 = vadd.s32 1, %v5486_v19 }
  0x70   :  { %v176_v63 = vsel %vm93_vm12, %v175_v52, %v174_v39  ;;  %v435_v22 = vor.u32 %v434_v16, %v433_v60  ;;  %v438_v10 = vshll.u32 %v437_v2, 23  ;;  %v184_v26 = vand.u32 3, %v180_v47 }
  0x71   :  { %v179_v1 = vsel %vm7629_vm13, %v7528_v7, %v176_v63  ;;  %v624_v38 = vmul.f32 %v7655_v48, %v7634_v30  ;;  %vm183_vm6 = vweird.f32 %v7528_v7  ;;  %vm7726_vm7 = vcmp.le.f32.partialorder %v360_v37, 0.7853982 }
  0x72   :  { %7232 = vcosq.f32 %v179_v1  ;;  %v439_v32 = vor.u32 4788187, %v438_v10  ;;  %v442_v34 = vcvt.s32.f32 %v435_v22  ;;  %vm686_vm8 = vc.u32 %v7709_v18, %v7700_v12 }
  0x73   :  { %7234 = vsinq.f32 %v179_v1  ;;  %v7734_v28 = vand.u32 8388607, %v898_v55  ;;  %vm909_vm9 = vcmp.gt.s32.totalorder %v908_v25, 0  ;;  %v446_v30 = vsub.s32 4, %v7646_v43 }
  0x74   :  { %v440_v36 = vand.u32 2147483647, %v439_v32  ;;  %v688_v40 = vsel %vm686_vm8, %v687_v11, %v7701_v13  ;;  %v910_v47 = vsel %vm909_vm9, %v908_v25, 0  ;;  %v195_v48 = vmul.f32 %v7677_v21, %v194_v20 }
  0x75   :  { %v7739_v37 = vmul.f32 1.442695, %v355_v24  ;;  %v689_v54 = vadd.s32 %v688_v40, %v684_v5  ;;  %v912_v39 = vand.u32 31, %v910_v47  ;;  %vm185_vm10 = vcmp.lt.s32.totalorder %v184_v26, 2 }
  0x76   :  { %v443_v8 = vmul.f32 %v442_v34, %v440_v36  ;;  %v7741_v41 = vmul.f32 1.442695, %v624_v38  ;;  %v890_v42 = vstv %s7705_s13  ;;  %vm186_vm11 = vcmp.eq.s32.totalorder %v184_v26, 0  ;;  %s8249_s13 = sld [smem:[#allocation2 + $0x6]] }
  0x77   :  { %vm189_vm12 = vcmp.eq.s32.totalorder %v184_v26, 2  ;;  %v690_v46 = vadd.s32 536870912, %v689_v54  ;;  %v913_v50 = vsub.s32 32, %v912_v39  ;;  %v7747_v52 = vsel %vm362_vm5, %v446_v30, %v7646_v43 }
  0x78   :  { %v444_v49 = vxor.u32 2147483648, %v443_v8  ;;  %v906_v21 = vor.u32 8388608, %v7734_v28  ;;  %v915_v4 = vshll.u32 %v11718_v27, %v912_v39  ;;  %v918_v61 = vshll.u32 %v11716_v29, %v912_v39 }
  0x79   :  { %v7751_v57 = vshrl.u32 %v690_v46, 30  ;;  %v916_v59 = vshrl.u32 %v11716_v29, %v913_v50  ;;  %v919_v60 = vshrl.u32 %v11703_v31, %v913_v50  ;;  %v921_v43 = vshll.u32 %v11703_v31, %v912_v39 }
  0x7a   :  { %v445_v0 = vsel %vm362_vm5, %v444_v49, %v443_v8  ;;  %v922_v13 = vshrl.u32 %v11705_v33, %v913_v50  ;;  %v911_v2 = vshrl.u32 %v910_v47, 5  ;;  %v924_v17 = vshll.u32 %v11705_v33, %v912_v39 }
  0x7b   :  { %v448_v1 = vsel %vm7726_vm7, %v7537_v14, %v445_v0  ;;  %v692_v3 = vshll.u32 %v7751_v57, 30  ;;  %v927_v58 = vshll.u32 %v11707_v35, %v912_v39  ;;  %v917_v22 = vor.u32 %v916_v59, %v915_v4 }
  0x7c   :  { %v7233_v51 = vpop.eup %7232  ;;  %7236 = vcosq.f32 %v448_v1  ;;  %v920_v24 = vor.u32 %v919_v60, %v918_v61  ;;  %v925_v5 = vshrl.u32 %v11707_v35, %v913_v50  ;;  %v923_v32 = vor.u32 %v922_v13, %v921_v43 }
  0x7d   :  { %v7235_v53 = vpop.eup %7234  ;;  %v190_v56 = vxor.u32 2147483648, %v7233_v51  ;;  %v7769_v20 = vsub.s32 %v689_v54, %v692_v3  ;;  %7238 = vsinq.f32 %v448_v1  ;;  %v928_v26 = vshrl.u32 %v11713_v44, %v913_v50 }
  0x7e   :  { %v187_v63 = vxor.u32 2147483648, %v7235_v53  ;;  %v7781_v34 = vmul.f32 %v890_v42, %v7525_v6  ;;  %v914_v38 = vshrl.u32 %v11718_v27, %v913_v50  ;;  %v926_v7 = vor.u32 %v925_v5, %v924_v17 }
  0x7f   :  { %v191_v62 = vsel %vm189_vm12, %v190_v56, %v7235_v53  ;;  %v695_v25 = vsub.s32 0, %v7769_v20  ;;  %vm930_vm13 = vcmp.lt.s32.totalorder %v911_v2, 1  ;;  %v449_v28 = vsel %vm7726_vm7, 0, %v7747_v52 }
  0x80   :  { %v188_v16 = vsel %vm186_vm11, %v7233_v51, %v187_v63  ;;  %vm932_vm14 = vcmp.lt.s32.totalorder %v911_v2, 3  ;;  %v7792_v30 = vshll.u32 %v906_v21, 8  ;;  %v929_v40 = vor.u32 %v928_v26, %v927_v58 }
  0x81   :  { %v192_v19 = vsel %vm185_vm10, %v188_v16, %v191_v62  ;;  %v5480_v36 = vmin.u32 %v695_v25, %v7769_v20  ;;  %vm931_vm15 = vcmp.lt.s32.totalorder %v911_v2, 2  ;;  %vm933_vm0 = vcmp.lt.s32.totalorder %v911_v2, 4 }
  0x82   :  { %v193_v10 = vsel %vm183_vm6, nan, %v192_v19  ;;  %v938_v47 = vsel %vm930_vm13, %v917_v22, %v920_v24  ;;  %v935_v54 = vsel %vm933_vm0, %v923_v32, 2102212464  ;;  %v939_v39 = vsel %vm933_vm0, %v926_v7, 920167782 }
  0x83   :  { %v7776_v11 = vmul.f32 %v195_v48, %v193_v10  ;;  %v697_v48 = vclz %v5480_v36  ;;  %v942_v8 = vsel %vm930_vm13, %v920_v24, %v923_v32  ;;  %v934_v42 = vsel %vm930_vm13, %v914_v38, %v917_v22 }
  0x84   :  { %v936_v23 = vsel %vm932_vm14, %v920_v24, %v935_v54  ;;  %v940_v46 = vsel %vm932_vm14, %v923_v32, %v939_v39  ;;  %v943_v50 = vsel %vm933_vm0, %v929_v40, 1326507024  ;;  %v685_v51 = vadd.s32 %v7700_v12, %v7709_v18 }
  0x85   :  { %207 = vrot.lane.b32.xlu1 %v7776_v11, %s7467_s15  ;;  %199 = vrot.lane.b32.xlu0 %v7776_v11, %s7468_s16  ;;  %v5481_v49 = vadd.s32 4294967294, %v697_v48  ;;  %v941_v52 = vsel %vm931_vm15, %v938_v47, %v940_v46  ;;  %v944_v21 = vsel %vm932_vm14, %v926_v7, %v943_v50  ;;  %v1165_v59 = vstv %s7774_s14  ;;  %s8268_s14 = sld [smem:[#allocation2 + $0x7]] }
  0x86   :  { %v945_v4 = vsel %vm931_vm15, %v942_v8, %v944_v21  ;;  %v7809_v53 = vmul.u32.u64.low %v7792_v30, %v941_v52  ;;  %v7810_v56 = vmul.u32.u64.high %v7792_v30, %v941_v52, %v7809_v53  ;;  %v7237_v61 = vpop.eup %7236  ;;  %v937_v63 = vsel %vm931_vm15, %v934_v42, %v936_v23 }
  0x87   :  { %vm5482_vm1 = vcmp.lt.s32.totalorder %v5481_v49, 0  ;;  %v7816_v0 = vmul.u32.u64.low %v7792_v30, %v945_v4  ;;  %v7817_v12 = vmul.u32.u64.high %v7792_v30, %v945_v4, %v7816_v0  ;;  %v7239_v18 = vpop.eup %7238  ;;  %7240 = vpow2.f32 %v7739_v37 }
  0x88   :  { %v7820_v60 = vand.u32 3, %v449_v28  ;;  %v700_v43 = vsel %vm5482_vm1, 0, %v5481_v49  ;;  %7242 = vpow2.f32 %v7741_v41  ;;  %v953_v37 = vmul.u32 %v7792_v30, %v937_v63 }
  0x89   :  { %211 = vrot.lane.b32.xlu1 %v7776_v11, %s7469_s17  ;;  %203 = vrot.lane.b32.xlu0 %v7776_v11, %s7470_s18  ;;  %v701_v62 = vsub.s32 32, %v700_v43  ;;  %v702_v1 = vshll.u32 %v7769_v20, %v700_v43  ;;  %v705_v3 = vsub.s32 4294967266, %v700_v43  ;;  %v956_v13 = vadd.s32 1, %v7810_v56 }
  0x8a   :  { %v7473_v16 = vmov 0.0|0.0   ;;  %v7834_v2 = vmul.f32 %v1165_v59, %v7525_v6  ;;  %v892_v19 = vmul.f32 -0.5, %v7781_v34  ;;  %vm455_vm2 = vcmp.eq.s32.totalorder %v7820_v60, 0 }
  0x8b   :  { %6642 = vmatprep.subr.bf16.mxu0 %v7473_v16  ;;  %6666 = vmatprep.subr.bf16.mxu1 %v7473_v16  ;;  %v703_v17 = vshrl.u32 %v685_v51, %v701_v62  ;;  %v706_v58 = vadd.s32 127, %v705_v3  ;;  %v456_v41 = vxor.u32 2147483648, %v7239_v18  ;;  %v459_v20 = vxor.u32 2147483648, %v7237_v61 }
  0x8c   :  { %vm955_vm3 = vc.u32 %v7817_v12, %v7809_v53  ;;  %vm458_vm4 = vcmp.eq.s32.totalorder %v7820_v60, 2  ;;  %v1167_v25 = vand.u32 2147483647, %v7834_v2  ;;  %v1170_v32 = vand.u32 2139095040, %v7834_v2 }
  0x8d   :  { %219 = vrot.lane.b32.xlu1 %v7776_v11, %s7471_s19  ;;  %215 = vrot.lane.b32.xlu0 %v7776_v11, %s7472_s20  ;;  %v704_v22 = vor.u32 %v703_v17, %v702_v1  ;;  %v707_v10 = vshll.u32 %v706_v58, 23  ;;  %v957_v24 = vsel %vm955_vm3, %v956_v13, %v7810_v56  ;;  %vm454_vm5 = vcmp.lt.s32.totalorder %v7820_v60, 2 }
  0x8e   :  { %v958_v5 = vadd.s32 %v957_v24, %v953_v37  ;;  %v893_v7 = vmul.f32 %v892_v19, %v7781_v34  ;;  %v457_v28 = vsel %vm455_vm2, %v7237_v61, %v456_v41  ;;  %v460_v36 = vsel %vm458_vm4, %v459_v20, %v7239_v18 }
  0x8f   :  { %v708_v26 = vor.u32 4788187, %v707_v10  ;;  %v711_v38 = vcvt.s32.f32 %v704_v22  ;;  %v1171_v40 = vshrl.u32 %v1170_v32, 23  ;;  %vm452_vm6 = vweird.f32 %v7537_v14 }
  0x90   :  { %v959_v30 = vadd.s32 536870912, %v958_v5  ;;  %v463_v34 = vstv %s7826_s21  ;;  %v715_v48 = vsub.s32 4, %v7751_v57  ;;  %v1174_v42 = vand.u32 8388607, %v1167_v25  ;;  %s8367_s21 = sld [smem:[#allocation4 + $0x8]] }
  0x91   :  { %227 = vrot.lane.b32.xlu1 %v7776_v11, %s7474_s24  ;;  %223 = vrot.lane.b32.xlu0 %v7776_v11, %s7475_s25  ;;  %v709_v47 = vand.u32 2147483647, %v708_v26  ;;  %v7241_v54 = vpop.eup %7240  ;;  %v5493_v8 = vadd.s32 4294967169, %v1171_v40  ;;  %v1434_v23 = vstv %s7836_s22  ;;  %v461_v46 = vsel %vm454_vm5, %v457_v28, %v460_v36  ;;  %s10036_s22 = sld [smem:[#allocation2 + $0xf]] }
  0x92   :  { %v7866_v39 = vshrl.u32 %v959_v30, 30  ;;  %vm7875_vm7 = vcmp.le.f32.partialorder %v629_v9, 0.7853982  ;;  %v894_v49 = vmul.f32 1.442695, %v893_v7  ;;  %v7243_v52 = vpop.eup %7242  ;;  %vm631_vm8 = vcmp.lt.s32.totalorder %v7575_v15, 0 }
  0x93   :  { %v712_v51 = vmul.f32 %v711_v38, %v709_v47  ;;  %v732_v21 = vstv %s7841_s23  ;;  %v1177_v56 = vadd.s32 1, %v5493_v8  ;;  %v464_v9 = vmul.f32 %v7241_v54, %v463_v34  ;;  %s9631_s23 = sld [smem:[#allocation2 + $0xc]] }
  0x94   :  { %v961_v4 = vshll.u32 %v7866_v39, 30  ;;  %v7889_v61 = vsel %vm631_vm8, %v715_v48, %v7751_v57  ;;  %v7892_v63 = vmul.f32 %v1434_v23, %v7525_v6  ;;  %v462_v0 = vsel %vm452_vm6, nan, %v461_v46 }
  0x95   :  { %235 = vrot.lane.b32.xlu1 %v7776_v11, %s7476_s1  ;;  %231 = vrot.lane.b32.xlu0 %v7776_v11, %s7477_s0  ;;  %v713_v59 = vxor.u32 2147483648, %v712_v51  ;;  %v1175_v60 = vor.u32 8388608, %v1174_v42  ;;  %vm1178_vm9 = vcmp.gt.s32.totalorder %v1177_v56, 0  ;;  %v7900_v62 = vmul.f32 %v7243_v52, %v732_v21 }
  0x96   :  { %v7896_v18 = vsub.s32 %v958_v5, %v961_v4  ;;  %7244 = vpow2.f32 %v894_v49  ;;  %v1179_v1 = vsel %vm1178_vm9, %v1177_v56, 0  ;;  %v718_v14 = vsel %vm7875_vm7, 0, %v7889_v61 }
  0x97   :  { %v714_v43 = vsel %vm631_vm8, %v713_v59, %v712_v51  ;;  %v1159_v37 = vstv %s7857_s26  ;;  %v7914_v13 = vmul.f32 %v464_v9, %v462_v0  ;;  %v954_v17 = vadd.s32 %v7809_v53, %v7817_v12  ;;  %s8701_s26 = sld [smem:[#allocation6 + $0x7]] }
  0x98   :  { %v717_v57 = vsel %vm7875_vm7, %v7575_v15, %v714_v43  ;;  %v964_v3 = vsub.s32 0, %v7896_v18  ;;  %v1181_v58 = vand.u32 31, %v1179_v1  ;;  %v1439_v19 = vand.u32 2139095040, %v7892_v63 }
  0x99   :  { %243 = vrot.lane.b32.xlu1 %v7776_v11, %s7478_s27  ;;  %239 = vrot.lane.b32.xlu0 %v7776_v11, %s7479_s28  ;;  %7246 = vcosq.f32 %v717_v57  ;;  %v7920_v20 = vshrl.u32 %v1179_v1, 5  ;;  %v7922_v22 = vshll.u32 %v1175_v60, 8  ;;  %v1436_v28 = vand.u32 2147483647, %v7892_v63 }
  0x9a   :  { %v5487_v41 = vmin.u32 %v964_v3, %v7896_v18  ;;  %7248 = vsinq.f32 %v717_v57  ;;  %v1182_v10 = vsub.s32 32, %v1181_v58  ;;  %v1184_v24 = vshll.u32 %v11718_v27, %v1181_v58 }
  0x9b   :  { %v1187_v5 = vshll.u32 %v11716_v29, %v1181_v58  ;;  %v1190_v26 = vshll.u32 %v11703_v31, %v1181_v58  ;;  %v1193_v53 = vshll.u32 %v11705_v33, %v1181_v58  ;;  %v1196_v12 = vshll.u32 %v11707_v35, %v1181_v58 }
  0x9c   :  { %v966_v32 = vclz %v5487_v41  ;;  %v1185_v38 = vshrl.u32 %v11716_v29, %v1182_v10  ;;  %v1188_v7 = vshrl.u32 %v11703_v31, %v1182_v10  ;;  %v1440_v36 = vshrl.u32 %v1439_v19, 23 }
  0x9d   :  { %251 = vrot.lane.b32.xlu1 %v7776_v11, %s7480_s29  ;;  %247 = vrot.lane.b32.xlu0 %v7776_v11, %s7481_s30  ;;  %v1191_v40 = vshrl.u32 %v11705_v33, %v1182_v10  ;;  %v1194_v34 = vshrl.u32 %v11707_v35, %v1182_v10  ;;  %v1197_v47 = vshrl.u32 %v11713_v44, %v1182_v10  ;;  %vm1199_vm10 = vcmp.lt.s32.totalorder %v7920_v20, 1 }
  0x9e   :  { %v5488_v30 = vadd.s32 4294967294, %v966_v32  ;;  %v1183_v48 = vshrl.u32 %v11718_v27, %v1182_v10  ;;  %v1186_v54 = vor.u32 %v1185_v38, %v1184_v24  ;;  %v1189_v8 = vor.u32 %v1188_v7, %v1187_v5 }
  0x9f   :  { %v1195_v42 = vor.u32 %v1194_v34, %v1193_v53  ;;  %v1198_v23 = vor.u32 %v1197_v47, %v1196_v12  ;;  %vm1201_vm12 = vcmp.lt.s32.totalorder %v7920_v20, 3  ;;  %vm1202_vm13 = vcmp.lt.s32.totalorder %v7920_v20, 4 }
  0xa0   :  { %vm5489_vm11 = vcmp.lt.s32.totalorder %v5488_v30, 0  ;;  %v7941_v46 = vpop.eup %7244  ;;  %v5500_v49 = vadd.s32 4294967169, %v1440_v36  ;;  %vm900_vm14 = vcmp.lt.s32.totalorder %v7649_v45, 0  ;;  %vm1200_vm15 = vcmp.lt.s32.totalorder %v7920_v20, 2 }
  0xa1   :  { %259 = vrot.lane.b32.xlu1 %v7776_v11, %s7482_s6  ;;  %255 = vrot.lane.b32.xlu0 %v7776_v11, %s7483_s2  ;;  %v1192_v11 = vor.u32 %v1191_v40, %v1190_v26  ;;  %v969_v51 = vsel %vm5489_vm11, 0, %v5488_v30  ;;  %v1207_v9 = vsel %vm1199_vm10, %v1186_v54, %v1189_v8  ;;  %v1208_v59 = vsel %vm1202_vm13, %v1195_v42, 920167782 }
  0xa2   :  { %v970_v52 = vsub.s32 32, %v969_v51  ;;  %v971_v21 = vshll.u32 %v7896_v18, %v969_v51  ;;  %v974_v4 = vsub.s32 4294967266, %v969_v51  ;;  %v1212_v0 = vsel %vm1202_vm13, %v1198_v23, 1326507024 }
  0xa3   :  { %v1204_v56 = vsel %vm1202_vm13, %v1192_v11, 2102212464  ;;  %v7247_v60 = vpop.eup %7246  ;;  %v1203_v57 = vsel %vm1199_vm10, %v1183_v48, %v1186_v54  ;;  %v1211_v18 = vsel %vm1199_vm10, %v1189_v8, %v1192_v11  ;;  %v7966_v58 = vand.u32 3, %v718_v14 }
  0xa4   :  { %v972_v43 = vshrl.u32 %v954_v17, %v970_v52  ;;  %v975_v1 = vadd.s32 127, %v974_v4  ;;  %v7249_v3 = vpop.eup %7248  ;;  %v1205_v17 = vsel %vm1201_vm12, %v1189_v8, %v1204_v56  ;;  %v1209_v19 = vsel %vm1201_vm12, %v1192_v11, %v1208_v59 }
  0xa5   :  { %472 = vrot.lane.b32.xlu1 %v7914_v13, %s7470_s18  ;;  %468 = vrot.lane.b32.xlu0 %v7914_v13, %s7468_s16  ;;  %v1213_v41 = vsel %vm1201_vm12, %v1195_v42, %v1212_v0  ;;  %vm7976_vm0 = vcmp.le.f32.partialorder %v898_v55, 0.7853982  ;;  %v984_v61 = vsub.s32 4, %v7866_v39  ;;  %v1210_v14 = vsel %vm1200_vm15, %v1207_v9, %v1209_v19 }
  0xa6   :  { %v973_v50 = vor.u32 %v972_v43, %v971_v21  ;;  %v976_v24 = vshll.u32 %v975_v1, 23  ;;  %v1214_v5 = vsel %vm1200_vm15, %v1211_v18, %v1213_v41  ;;  %v7992_v55 = vand.u32 8388607, %v1436_v28 }
  0xa7   :  { %v7986_v32 = vmul.u32.u64.low %v7922_v22, %v1210_v14  ;;  %v7987_v26 = vmul.u32.u64.high %v7922_v22, %v1210_v14, %v7986_v32  ;;  %v1206_v38 = vsel %vm1200_vm15, %v1203_v57, %v1205_v17  ;;  %v1446_v7 = vadd.s32 1, %v5500_v49 }
  0xa8   :  { %v977_v53 = vor.u32 4788187, %v976_v24  ;;  %v980_v12 = vcvt.s32.f32 %v973_v50  ;;  %v725_v36 = vxor.u32 2147483648, %v7249_v3  ;;  %v728_v30 = vxor.u32 2147483648, %v7247_v60 }
  0xa9   :  { %480 = vrot.lane.b32.xlu1 %v7914_v13, %s7469_s17  ;;  %476 = vrot.lane.b32.xlu0 %v7914_v13, %s7467_s15  ;;  %v8001_v40 = vmul.u32.u64.low %v7922_v22, %v1214_v5  ;;  %v8002_v34 = vmul.u32.u64.high %v7922_v22, %v1214_v5, %v8001_v40  ;;  %vm724_vm1 = vcmp.eq.s32.totalorder %v7966_v58, 0  ;;  %vm727_vm2 = vcmp.eq.s32.totalorder %v7966_v58, 2 }
  0xaa   :  { %v978_v47 = vand.u32 2147483647, %v977_v53  ;;  %vm1447_vm3 = vcmp.gt.s32.totalorder %v1446_v7, 0  ;;  %v8009_v20 = vmul.f32 %v1159_v37, %v7525_v6  ;;  %v1222_v48 = vmul.u32 %v7922_v22, %v1206_v38 }
  0xab   :  { %v1225_v54 = vadd.s32 1, %v7987_v26  ;;  %v1448_v8 = vsel %vm1447_vm3, %v1446_v7, 0  ;;  %vm723_vm4 = vcmp.lt.s32.totalorder %v7966_v58, 2  ;;  %v8017_v42 = vsel %vm900_vm14, %v984_v61, %v7866_v39 }
  0xac   :  { %v981_v11 = vmul.f32 %v980_v12, %v978_v47  ;;  %v1450_v23 = vand.u32 31, %v1448_v8  ;;  %vm721_vm5 = vweird.f32 %v7575_v15  ;;  %v726_v37 = vsel %vm724_vm1, %v7247_v60, %v725_v36 }
  0xad   :  { %488 = vrot.lane.b32.xlu1 %v7914_v13, %s7471_s19  ;;  %484 = vrot.lane.b32.xlu0 %v7914_v13, %s7472_s20  ;;  %v729_v22 = vsel %vm727_vm2, %v728_v30, %v7249_v3  ;;  %vm1224_vm6 = vc.u32 %v8002_v34, %v7986_v32  ;;  %v1444_v39 = vor.u32 8388608, %v7992_v55  ;;  %v8040_v60 = vshrl.u32 %v1448_v8, 5 }
  0xae   :  { %v982_v51 = vxor.u32 2147483648, %v981_v11  ;;  %v1226_v49 = vsel %vm1224_vm6, %v1225_v54, %v7987_v26  ;;  %v1451_v52 = vsub.s32 32, %v1450_v23  ;;  %v1453_v21 = vshll.u32 %v11718_v27, %v1450_v23 }
  0xaf   :  { %v1227_v4 = vadd.s32 %v1226_v49, %v1222_v48  ;;  %v1456_v56 = vshll.u32 %v11716_v29, %v1450_v23  ;;  %v1459_v9 = vshll.u32 %v11703_v31, %v1450_v23  ;;  %v1462_v59 = vshll.u32 %v11705_v33, %v1450_v23 }
  0xb0   :  { %v983_v0 = vsel %vm900_vm14, %v982_v51, %v981_v11  ;;  %v1454_v43 = vshrl.u32 %v11716_v29, %v1451_v52  ;;  %v1457_v1 = vshrl.u32 %v11703_v31, %v1451_v52  ;;  %v1460_v3 = vshrl.u32 %v11705_v33, %v1451_v52 }
  0xb1   :  { %496 = vrot.lane.b32.xlu1 %v7914_v13, %s7474_s24  ;;  %492 = vrot.lane.b32.xlu0 %v7914_v13, %s7475_s25  ;;  %v986_v57 = vsel %vm7976_vm0, %v7649_v45, %v983_v0  ;;  %v1228_v18 = vadd.s32 536870912, %v1227_v4  ;;  %v1463_v17 = vshrl.u32 %v11707_v35, %v1451_v52  ;;  %v1465_v50 = vshll.u32 %v11707_v35, %v1450_v23 }
  0xb2   :  { %7250 = vcosq.f32 %v986_v57  ;;  %v1455_v19 = vor.u32 %v1454_v43, %v1453_v21  ;;  %v1458_v41 = vor.u32 %v1457_v1, %v1456_v56  ;;  %v1461_v61 = vor.u32 %v1460_v3, %v1459_v9 }
  0xb3   :  { %7252 = vsinq.f32 %v986_v57  ;;  %v8056_v24 = vshrl.u32 %v1228_v18, 30  ;;  %v1464_v14 = vor.u32 %v1463_v17, %v1462_v59  ;;  %v730_v5 = vsel %vm723_vm4, %v726_v37, %v729_v22 }
  0xb4   :  { %v1466_v26 = vshrl.u32 %v11713_v44, %v1451_v52  ;;  %vm1468_vm7 = vcmp.lt.s32.totalorder %v8040_v60, 1  ;;  %vm1470_vm8 = vcmp.lt.s32.totalorder %v8040_v60, 3  ;;  %v1452_v53 = vshrl.u32 %v11718_v27, %v1451_v52 }
  0xb5   :  { %504 = vrot.lane.b32.xlu1 %v7914_v13, %s7476_s1  ;;  %500 = vrot.lane.b32.xlu0 %v7914_v13, %s7477_s0  ;;  %v1230_v55 = vshll.u32 %v8056_v24, 30  ;;  %vm1469_vm9 = vcmp.lt.s32.totalorder %v8040_v60, 2  ;;  %vm1471_vm10 = vcmp.lt.s32.totalorder %v8040_v60, 4  ;;  %v1476_v12 = vsel %vm1468_vm7, %v1455_v19, %v1458_v41 }
  0xb6   :  { %v1467_v58 = vor.u32 %v1466_v26, %v1465_v50  ;;  %v1477_v38 = vsel %vm1471_vm10, %v1464_v14, 920167782  ;;  %v8075_v7 = vshll.u32 %v1444_v39, 8  ;;  %v1428_v30 = vstv %s8033_s7  ;;  %s8708_s7 = sld [smem:[#allocation2 + $0x9]] }
  0xb7   :  { %v8079_v36 = vsub.s32 %v1227_v4, %v1230_v55  ;;  %v1473_v40 = vsel %vm1471_vm10, %v1461_v61, 2102212464  ;;  %v1478_v47 = vsel %vm1470_vm8, %v1461_v61, %v1477_v38  ;;  %v731_v48 = vsel %vm721_vm5, nan, %v730_v5 }
  0xb8   :  { %v987_v54 = vsel %vm7976_vm0, 0, %v8017_v42  ;;  %v1479_v8 = vsel %vm1469_vm9, %v1476_v12, %v1478_v47  ;;  %v1703_v11 = vstv %s8044_s8  ;;  %v1472_v15 = vsel %vm1468_vm7, %v1452_v53, %v1455_v19  ;;  %s8751_s8 = sld [smem:[#allocation4 + $0xa]] }
  0xb9   :  { %512 = vrot.lane.b32.xlu1 %v7914_v13, %s7478_s27  ;;  %508 = vrot.lane.b32.xlu0 %v7914_v13, %s7479_s28  ;;  %v1233_v23 = vsub.s32 0, %v8079_v36  ;;  %v1480_v37 = vsel %vm1468_vm7, %v1458_v41, %v1461_v61  ;;  %v1481_v10 = vsel %vm1471_vm10, %v1467_v58, 1326507024  ;;  %v1474_v42 = vsel %vm1470_vm8, %v1458_v41, %v1473_v40 }
  0xba   :  { %v1482_v22 = vsel %vm1470_vm8, %v1464_v14, %v1481_v10  ;;  %v8110_v39 = vmul.u32.u64.low %v8075_v7, %v1479_v8  ;;  %v8111_v51 = vmul.u32.u64.high %v8075_v7, %v1479_v8, %v8110_v39  ;;  %v991_v49 = vand.u32 3, %v987_v54 }
  0xbb   :  { %v5494_v52 = vmin.u32 %v1233_v23, %v8079_v36  ;;  %v1429_v21 = vmul.f32 %v1428_v30, %v7525_v6  ;;  %v8117_v56 = vmul.f32 %v7900_v62, %v731_v48  ;;  %v1483_v9 = vsel %vm1469_vm9, %v1480_v37, %v1482_v22 }
  0xbc   :  { %v7251_v4 = vpop.eup %7250  ;;  %v8122_v59 = vmul.f32 %v1703_v11, %v7525_v6  ;;  %v1475_v1 = vsel %vm1469_vm9, %v1472_v15, %v1474_v42  ;;  %v8131_v62 = vmul.u32.u64.low %v8075_v7, %v1483_v9  ;;  %v8132_v57 = vmul.u32.u64.high %v8075_v7, %v1483_v9, %v8131_v62 }
  0xbd   :  { %520 = vrot.lane.b32.xlu1 %v7914_v13, %s7480_s29  ;;  %516 = vrot.lane.b32.xlu0 %v7914_v13, %s7481_s30  ;;  %v7253_v0 = vpop.eup %7252  ;;  %v1235_v43 = vclz %v5494_v52  ;;  %v1161_v18 = vmul.f32 -0.5, %v8009_v20  ;;  %v1494_v3 = vadd.s32 1, %v8111_v51  ;;  %vm7484_vm11 = vmmov 0  }
  0xbe   :  { %v11711_v17 = vmov 0.0   ;;  %vm990_vm12 = vweird.f32 %v7649_v45  ;;  %vm993_vm13 = vcmp.eq.s32.totalorder %v991_v49, 0  ;;  %v1430_v19 = vmul.f32 -0.5, %v1429_v21 }
  0xbf   :  { %5974 = vmatprep.mubr.msk.f32.mxu0 %vm7484_vm11, %v11711_v17  ;;  %6009 = vmatprep.mubr.msk.f32.mxu1 %vm7484_vm11, %v11711_v17  ;;  %v5495_v60 = vadd.s32 4294967294, %v1235_v43  ;;  %v994_v41 = vxor.u32 2147483648, %v7253_v0  ;;  %v997_v50 = vxor.u32 2147483648, %v7251_v4  ;;  %v1491_v61 = vmul.u32 %v8075_v7, %v1475_v1 }
  0xc0   :  { %v1708_v14 = vand.u32 2139095040, %v8122_v59  ;;  %vm996_vm14 = vcmp.eq.s32.totalorder %v991_v49, 2  ;;  %v1223_v5 = vadd.s32 %v7986_v32, %v8002_v34  ;;  %vm1493_vm0 = vc.u32 %v8132_v57, %v8110_v39 }
  0xc1   :  { %528 = vrot.lane.b32.xlu1 %v7914_v13, %s7482_s6  ;;  %524 = vrot.lane.b32.xlu0 %v7914_v13, %s7483_s2  ;;  %v1001_v13 = vstv %s8077_s9  ;;  %vm5496_vm15 = vcmp.lt.s32.totalorder %v5495_v60, 0  ;;  %v1162_v26 = vmul.f32 %v1161_v18, %v8009_v20  ;;  %v1495_v53 = vsel %vm1493_vm0, %v1494_v3, %v8111_v51  ;;  %s8512_s9 = sld [smem:[#allocation4 + $0x9]] }
  0xc2   :  { %v1238_v55 = vsel %vm5496_vm15, 0, %v5495_v60  ;;  %v1705_v58 = vand.u32 2147483647, %v8122_v59  ;;  %vm992_vm1 = vcmp.lt.s32.totalorder %v991_v49, 2  ;;  %v995_v30 = vsel %vm993_vm13, %v7251_v4, %v994_v41 }
  0xc3   :  { %v1239_v12 = vsub.s32 32, %v1238_v55  ;;  %v1240_v38 = vshll.u32 %v8079_v36, %v1238_v55  ;;  %v1243_v7 = vsub.s32 4294967266, %v1238_v55  ;;  %v998_v40 = vsel %vm996_vm14, %v997_v50, %v7253_v0 }
  0xc4   :  { %v1496_v32 = vadd.s32 %v1495_v53, %v1491_v61  ;;  %v1709_v34 = vshrl.u32 %v1708_v14, 23  ;;  %v1253_v48 = vsub.s32 4, %v8056_v24  ;;  %v1431_v36 = vmul.f32 %v1430_v19, %v1429_v21 }
  0xc5   :  { %741 = vrot.lane.b32.xlu1 %v8117_v56, %s7470_s18  ;;  %737 = vrot.lane.b32.xlu0 %v8117_v56, %s7468_s16  ;;  %v1241_v20 = vshrl.u32 %v1223_v5, %v1239_v12  ;;  %v1244_v47 = vadd.s32 127, %v1243_v7  ;;  %v1002_v54 = vmul.f32 %v7941_v46, %v1001_v13  ;;  %v1712_v23 = vand.u32 8388607, %v1705_v58 }
  0xc6   :  { %v1497_v8 = vadd.s32 536870912, %v1496_v32  ;;  %v5507_v11 = vadd.s32 4294967169, %v1709_v34  ;;  %v999_v15 = vsel %vm992_vm1, %v995_v30, %v998_v40  ;;  %v1163_v37 = vmul.f32 1.442695, %v1162_v26 }
  0xc7   :  { %v1242_v10 = vor.u32 %v1241_v20, %v1240_v38  ;;  %v1245_v42 = vshll.u32 %v1244_v47, 23  ;;  %vm1169_vm2 = vcmp.lt.s32.totalorder %v7834_v2, 0  ;;  %v1972_v52 = vstv %s8144_s10  ;;  %s8514_s10 = sld [smem:[#allocation6 + $0x6]] }
  0xc8   :  { %v8171_v22 = vshrl.u32 %v1497_v8, 30  ;;  %v1715_v51 = vadd.s32 1, %v5507_v11  ;;  %v8181_v49 = vsel %vm1169_vm2, %v1253_v48, %v8056_v24  ;;  %v1432_v4 = vmul.f32 1.442695, %v1431_v36 }
  0xc9   :  { %749 = vrot.lane.b32.xlu1 %v8117_v56, %s7469_s17  ;;  %745 = vrot.lane.b32.xlu0 %v8117_v56, %s7467_s15  ;;  %v1246_v46 = vor.u32 4788187, %v1245_v42  ;;  %v1249_v21 = vcvt.s32.f32 %v1242_v10  ;;  %v1000_v9 = vsel %vm990_vm12, nan, %v999_v15  ;;  %v1713_v43 = vor.u32 8388608, %v1712_v23 }
  0xca   :  { %v1499_v0 = vshll.u32 %v8171_v22, 30  ;;  %vm1716_vm3 = vcmp.gt.s32.totalorder %v1715_v51, 0  ;;  %7254 = vpow2.f32 %v1163_v37  ;;  %v8187_v18 = vmul.f32 %v1972_v52, %v7525_v6 }
  0xcb   :  { %v1247_v1 = vand.u32 2147483647, %v1246_v46  ;;  %v1717_v62 = vsel %vm1716_vm3, %v1715_v51, 0  ;;  %vm8191_vm4 = vcmp.le.f32.partialorder %v1167_v25, 0.7853982  ;;  %v1270_v24 = vstv %s8159_s11  ;;  %s9107_s11 = sld [smem:[#allocation6 + $0x9]] }
  0xcc   :  { %v8196_v13 = vsub.s32 %v1496_v32, %v1499_v0  ;;  %v1719_v45 = vand.u32 31, %v1717_v62  ;;  %v8202_v60 = vmul.f32 %v1002_v54, %v1000_v9  ;;  %v1256_v25 = vsel %vm8191_vm4, 0, %v8181_v49 }
  0xcd   :  { %757 = vrot.lane.b32.xlu1 %v8117_v56, %s7471_s19  ;;  %753 = vrot.lane.b32.xlu0 %v8117_v56, %s7472_s20  ;;  %v1250_v19 = vmul.f32 %v1249_v21, %v1247_v1  ;;  %7256 = vpow2.f32 %v1432_v4  ;;  %v1492_v41 = vadd.s32 %v8110_v39, %v8132_v57  ;;  %v8210_v14 = vshll.u32 %v1713_v43, 8 }
  0xce   :  { %v1502_v50 = vsub.s32 0, %v8196_v13  ;;  %v1720_v61 = vsub.s32 32, %v1719_v45  ;;  %v1718_v26 = vshrl.u32 %v1717_v62, 5  ;;  %v1722_v55 = vshll.u32 %v11718_v27, %v1719_v45 }
  0xcf   :  { %v1251_v5 = vxor.u32 2147483648, %v1250_v19  ;;  %v1977_v53 = vand.u32 2139095040, %v8187_v18  ;;  %v1725_v38 = vshll.u32 %v11716_v29, %v1719_v45  ;;  %v1728_v7 = vshll.u32 %v11703_v31, %v1719_v45 }
  0xd0   :  { %v5501_v12 = vmin.u32 %v1502_v50, %v8196_v13  ;;  %v1731_v30 = vshll.u32 %v11705_v33, %v1719_v45  ;;  %v1522_v57 = vsub.s32 4, %v8171_v22  ;;  %v1721_v40 = vshrl.u32 %v11718_v27, %v1720_v61 }
  0xd1   :  { %765 = vrot.lane.b32.xlu1 %v8117_v56, %s7474_s24  ;;  %761 = vrot.lane.b32.xlu0 %v8117_v56, %s7475_s25  ;;  %v1252_v39 = vsel %vm1169_vm2, %v1251_v5, %v1250_v19  ;;  %v1723_v32 = vshrl.u32 %v11716_v29, %v1720_v61  ;;  %v1726_v47 = vshrl.u32 %v11703_v31, %v1720_v61  ;;  %vm1737_vm5 = vcmp.lt.s32.totalorder %v1718_v26, 1 }
  0xd2   :  { %v8230_v34 = vsel %vm8191_vm4, %v7834_v2, %v1252_v39  ;;  %v1504_v20 = vclz %v5501_v12  ;;  %v1729_v48 = vshrl.u32 %v11705_v33, %v1720_v61  ;;  %v1732_v54 = vshrl.u32 %v11707_v35, %v1720_v61 }
  0xd3   :  { %v1724_v36 = vor.u32 %v1723_v32, %v1722_v55  ;;  %v1734_v8 = vshll.u32 %v11707_v35, %v1719_v45  ;;  %7258 = vcosq.f32 %v8230_v34  ;;  %v1727_v23 = vor.u32 %v1726_v47, %v1725_v38 }
  0xd4   :  { %v5502_v11 = vadd.s32 4294967294, %v1504_v20  ;;  %v1730_v15 = vor.u32 %v1729_v48, %v1728_v7  ;;  %v7255_v37 = vpop.eup %7254  ;;  %v1733_v10 = vor.u32 %v1732_v54, %v1731_v30  ;;  %v1735_v42 = vshrl.u32 %v11713_v44, %v1720_v61 }
  0xd5   :  { %1010 = vrot.lane.b32.xlu1 %v8202_v60, %s7470_s18  ;;  %1006 = vrot.lane.b32.xlu0 %v8202_v60, %s7468_s16  ;;  %vm1738_vm6 = vcmp.lt.s32.totalorder %v1718_v26, 2  ;;  %vm1739_vm7 = vcmp.lt.s32.totalorder %v1718_v26, 3  ;;  %vm1740_vm9 = vcmp.lt.s32.totalorder %v1718_v26, 4  ;;  %v1741_v51 = vsel %vm1737_vm5, %v1721_v40, %v1724_v36 }
  0xd6   :  { %vm5503_vm8 = vcmp.lt.s32.totalorder %v5502_v11, 0  ;;  %v1745_v52 = vsel %vm1737_vm5, %v1724_v36, %v1727_v23  ;;  %v1736_v4 = vor.u32 %v1735_v42, %v1734_v8  ;;  %v1742_v9 = vsel %vm1740_vm9, %v1730_v15, 2102212464 }
  0xd7   :  { %v7257_v46 = vpop.eup %7256  ;;  %v1507_v21 = vsel %vm5503_vm8, 0, %v5502_v11  ;;  %v1746_v0 = vsel %vm1740_vm9, %v1733_v10, 920167782  ;;  %v1743_v45 = vsel %vm1739_vm7, %v1727_v23, %v1742_v9  ;;  %v1749_v50 = vsel %vm1737_vm5, %v1727_v23, %v1730_v15 }
  0xd8   :  { %v1508_v43 = vsub.s32 32, %v1507_v21  ;;  %v1509_v1 = vshll.u32 %v8196_v13, %v1507_v21  ;;  %v1512_v62 = vsub.s32 4294967266, %v1507_v21  ;;  %v1747_v19 = vsel %vm1739_vm7, %v1730_v15, %v1746_v0 }
  0xd9   :  { %1018 = vrot.lane.b32.xlu1 %v8202_v60, %s7469_s17  ;;  %1014 = vrot.lane.b32.xlu0 %v8202_v60, %s7467_s15  ;;  %v1750_v61 = vsel %vm1740_vm9, %v1736_v4, 1326507024  ;;  %v1978_v5 = vshrl.u32 %v1977_v53, 23  ;;  %v1748_v12 = vsel %vm1738_vm6, %v1745_v52, %v1747_v19  ;;  %v1744_v7 = vsel %vm1738_vm6, %v1741_v51, %v1743_v45 }
  0xda   :  { %v1510_v13 = vshrl.u32 %v1492_v41, %v1508_v43  ;;  %v1513_v55 = vadd.s32 127, %v1512_v62  ;;  %v1751_v38 = vsel %vm1739_vm7, %v1733_v10, %v1750_v61  ;;  %vm8280_vm10 = vcmp.le.f32.partialorder %v1436_v28, 0.7853982 }
  0xdb   :  { %v1752_v30 = vsel %vm1738_vm6, %v1749_v50, %v1751_v38  ;;  %v8264_v39 = vmul.u32.u64.low %v8210_v14, %v1748_v12  ;;  %v8265_v40 = vmul.u32.u64.high %v8210_v14, %v1748_v12, %v8264_v39  ;;  %vm1438_vm12 = vcmp.lt.s32.totalorder %v7892_v63, 0 }
  0xdc   :  { %v1511_v32 = vor.u32 %v1510_v13, %v1509_v1  ;;  %v1514_v53 = vshll.u32 %v1513_v55, 23  ;;  %v8271_v41 = vmul.u32.u64.low %v8210_v14, %v1752_v30  ;;  %v8272_v20 = vmul.u32.u64.high %v8210_v14, %v1752_v30, %v8271_v41 }
  0xdd   :  { %1026 = vrot.lane.b32.xlu1 %v8202_v60, %s7471_s19  ;;  %1022 = vrot.lane.b32.xlu0 %v8202_v60, %s7472_s20  ;;  %v1539_v47 = vstv %s8241_s12  ;;  %v5514_v48 = vadd.s32 4294967169, %v1978_v5  ;;  %v8286_v36 = vpop.eup %7258  ;;  %v1523_v11 = vsel %vm1438_vm12, %v1522_v57, %v8171_v22  ;;  %v1760_v28 = vmul.u32 %v8210_v14, %v1744_v7  ;;  %s8472_s12 = sld [smem:[#allocation2 + $0x8]] }
  0xde   :  { %v1515_v54 = vor.u32 4788187, %v1514_v53  ;;  %v1518_v8 = vcvt.s32.f32 %v1511_v32  ;;  %7260 = vsinq.f32 %v8230_v34  ;;  %v8299_v23 = vand.u32 3, %v1256_v25 }
  0xdf   :  { %v1763_v15 = vadd.s32 1, %v8265_v40  ;;  %v1984_v10 = vadd.s32 1, %v5514_v48  ;;  %v1697_v51 = vstv %s8249_s13  ;;  %vm1762_vm13 = vc.u32 %v8272_v20, %v8264_v39  ;;  %s9113_s13 = sld [smem:[#allocation2 + $0xa]] }
  0xe0   :  { %v1516_v42 = vand.u32 2147483647, %v1515_v54  ;;  %v1974_v22 = vand.u32 2147483647, %v8187_v18  ;;  %v8312_v49 = vmul.f32 %v7255_v37, %v1270_v24  ;;  %v1525_v3 = vsel %vm8280_vm10, 0, %v1523_v11 }
  0xe1   :  { %1034 = vrot.lane.b32.xlu1 %v8202_v60, %s7474_s24  ;;  %1030 = vrot.lane.b32.xlu0 %v8202_v60, %s7475_s25  ;;  %v1764_v25 = vsel %vm1762_vm13, %v1763_v15, %v8265_v40  ;;  %vm1985_vm14 = vcmp.gt.s32.totalorder %v1984_v10, 0  ;;  %v8317_v57 = vmul.f32 %v7257_v46, %v1539_v47  ;;  %vm1265_vm15 = vcmp.eq.s32.totalorder %v8299_v23, 2 }
  0xe2   :  { %v1519_v14 = vmul.f32 %v1518_v8, %v1516_v42  ;;  %v1765_v34 = vadd.s32 %v1764_v25, %v1760_v28  ;;  %v1986_v52 = vsel %vm1985_vm14, %v1984_v10, 0  ;;  %v8321_v21 = vmul.f32 %v1697_v51, %v7525_v6 }
  0xe3   :  { %v1966_v4 = vstv %s8268_s14  ;;  %v1988_v9 = vand.u32 31, %v1986_v52  ;;  %v8324_v37 = vand.u32 3, %v1525_v3  ;;  %v1981_v43 = vand.u32 8388607, %v1974_v22  ;;  %s9127_s14 = sld [smem:[#allocation2 + $0xb]] }
  0xe4   :  { %v1520_v24 = vxor.u32 2147483648, %v1519_v14  ;;  %v1766_v0 = vadd.s32 536870912, %v1765_v34  ;;  %v1266_v46 = vxor.u32 2147483648, %v8286_v36  ;;  %v8333_v1 = vshrl.u32 %v1986_v52, 5 }
  0xe5   :  { %773 = vrot.lane.b32.xlu1 %v8117_v56, %s7476_s1  ;;  %769 = vrot.lane.b32.xlu0 %v8117_v56, %s7477_s0  ;;  %v1989_v62 = vsub.s32 32, %v1988_v9  ;;  %v1991_v45 = vshll.u32 %v11718_v27, %v1988_v9  ;;  %v1994_v61 = vshll.u32 %v11716_v29, %v1988_v9  ;;  %v1997_v5 = vshll.u32 %v11703_v31, %v1988_v9 }
  0xe6   :  { %v1521_v19 = vsel %vm1438_vm12, %v1520_v24, %v1519_v14  ;;  %v8338_v50 = vshrl.u32 %v1766_v0, 30  ;;  %v2000_v38 = vshll.u32 %v11705_v33, %v1988_v9  ;;  %v2003_v40 = vshll.u32 %v11707_v35, %v1988_v9 }
  0xe7   :  { %v1524_v13 = vsel %vm8280_vm10, %v7892_v63, %v1521_v19  ;;  %v1992_v55 = vshrl.u32 %v11716_v29, %v1989_v62  ;;  %v1995_v12 = vshrl.u32 %v11703_v31, %v1989_v62  ;;  %v1998_v30 = vshrl.u32 %v11705_v33, %v1989_v62 }
  0xe8   :  { %7262 = vcosq.f32 %v1524_v13  ;;  %v1768_v7 = vshll.u32 %v8338_v50, 30  ;;  %v7261_v32 = vpop.eup %7260  ;;  %v1982_v53 = vor.u32 8388608, %v1981_v43  ;;  %v2001_v26 = vshrl.u32 %v11707_v35, %v1989_v62 }
  0xe9   :  { %1042 = vrot.lane.b32.xlu1 %v8202_v60, %s7476_s1  ;;  %1038 = vrot.lane.b32.xlu0 %v8202_v60, %s7477_s0  ;;  %7264 = vsinq.f32 %v1524_v13  ;;  %v1993_v41 = vor.u32 %v1992_v55, %v1991_v45  ;;  %vm1261_vm0 = vcmp.lt.s32.totalorder %v8299_v23, 2  ;;  %v1996_v48 = vor.u32 %v1995_v12, %v1994_v61 }
  0xea   :  { %v8357_v47 = vsub.s32 %v1765_v34, %v1768_v7  ;;  %v1999_v54 = vor.u32 %v1998_v30, %v1997_v5  ;;  %v2004_v8 = vshrl.u32 %v11713_v44, %v1989_v62  ;;  %vm1262_vm1 = vcmp.eq.s32.totalorder %v8299_v23, 0 }
  0xeb   :  { %v1990_v11 = vshrl.u32 %v11718_v27, %v1989_v62  ;;  %v2002_v28 = vor.u32 %v2001_v26, %v2000_v38  ;;  %vm2006_vm2 = vcmp.lt.s32.totalorder %v8333_v1, 1  ;;  %v1263_v15 = vxor.u32 2147483648, %v7261_v32 }
  0xec   :  { %v8364_v10 = vmul.f32 -0.5, %v8321_v21  ;;  %v1771_v42 = vsub.s32 0, %v8357_v47  ;;  %v2005_v51 = vor.u32 %v2004_v8, %v2003_v40  ;;  %vm1259_vm3 = vweird.f32 %v7834_v2  ;;  %v8420_v8 = vld [vmem:[%s11699_s3] sm:$0xff] }
  0xed   :  { %781 = vrot.lane.b32.xlu1 %v8117_v56, %s7478_s27  ;;  %777 = vrot.lane.b32.xlu0 %v8117_v56, %s7479_s28  ;;  %v1267_v3 = vsel %vm1265_vm15, %v1266_v46, %v7261_v32  ;;  %vm2008_vm4 = vcmp.lt.s32.totalorder %v8333_v1, 3  ;;  %vm2009_vm5 = vcmp.lt.s32.totalorder %v8333_v1, 4  ;;  %v8378_v25 = vshll.u32 %v1982_v53, 8 }
  0xee   :  { %vm1530_vm6 = vcmp.lt.s32.totalorder %v8324_v37, 2  ;;  %v5508_v14 = vmin.u32 %v1771_v42, %v8357_v47  ;;  %vm2007_vm7 = vcmp.lt.s32.totalorder %v8333_v1, 2  ;;  %v2014_v34 = vsel %vm2006_vm2, %v1993_v41, %v1996_v48 }
  0xef   :  { %v2018_v52 = vsel %vm2006_vm2, %v1996_v48, %v1999_v54  ;;  %v2010_v9 = vsel %vm2006_vm2, %v1990_v11, %v1993_v41  ;;  %v2011_v24 = vsel %vm2009_vm5, %v1999_v54, 2102212464  ;;  %v2015_v0 = vsel %vm2009_vm5, %v2002_v28, 920167782  ;;  %v8429_v11 = vld [vmem:[%s11699_s3 + $0x8] sm:$0xff] }
  0xf0   :  { %v2019_v43 = vsel %vm2009_vm5, %v2005_v51, 1326507024  ;;  %v1773_v46 = vclz %v5508_v14  ;;  %v2012_v62 = vsel %vm2008_vm4, %v1996_v48, %v2011_v24  ;;  %v2016_v45 = vsel %vm2008_vm4, %v1999_v54, %v2015_v0 }
  0xf1   :  { %1050 = vrot.lane.b32.xlu1 %v8202_v60, %s7478_s27  ;;  %1046 = vrot.lane.b32.xlu0 %v8202_v60, %s7479_s28  ;;  %v2020_v19 = vsel %vm2008_vm4, %v2002_v28, %v2019_v43  ;;  %v1264_v61 = vsel %vm1262_vm1, %v8286_v36, %v1263_v15  ;;  %vm1534_vm8 = vcmp.eq.s32.totalorder %v8324_v37, 2  ;;  %v2017_v5 = vsel %vm2007_vm7, %v2014_v34, %v2016_v45 }
  0xf2   :  { %v2021_v13 = vsel %vm2007_vm7, %v2018_v52, %v2020_v19  ;;  %v7263_v55 = vpop.eup %7262  ;;  %vm1528_vm9 = vweird.f32 %v7892_v63  ;;  %v5509_v12 = vadd.s32 4294967294, %v1773_v46  ;;  %v2013_v38 = vsel %vm2007_vm7, %v2010_v9, %v2012_v62  ;;  %v8442_v9 = vld [vmem:[%s11699_s3 + $0x18] sm:$0xff] }
  0xf3   :  { %v8405_v7 = vmul.u32.u64.low %v8378_v25, %v2021_v13  ;;  %v8406_v30 = vmul.u32.u64.high %v8378_v25, %v2021_v13, %v8405_v7  ;;  %v7265_v36 = vpop.eup %7264  ;;  %vm1531_vm10 = vcmp.eq.s32.totalorder %v8324_v37, 0  ;;  %v1535_v53 = vxor.u32 2147483648, %v7263_v55 }
  0xf4   :  { %v8410_v41 = vmul.u32.u64.low %v8378_v25, %v2017_v5  ;;  %v8411_v26 = vmul.u32.u64.high %v8378_v25, %v2017_v5, %v8410_v41  ;;  %v1532_v48 = vxor.u32 2147483648, %v7265_v36  ;;  %v1761_v1 = vadd.s32 %v8264_v39, %v8272_v20 }
  0xf5   :  { %789 = vrot.lane.b32.xlu1 %v8117_v56, %s7480_s29  ;;  %785 = vrot.lane.b32.xlu0 %v8117_v56, %s7481_s30  ;;  %vm5510_vm12 = vcmp.lt.s32.totalorder %v5509_v12, 0  ;;  %v2241_v54 = vstv %s8367_s21  ;;  %v1268_v39 = vsel %vm1261_vm0, %v1264_v61, %v1267_v3  ;;  %v1536_v20 = vsel %vm1534_vm8, %v1535_v53, %v7265_v36  ;;  %s9445_s21 = sld [smem:[#allocation6 + $0xa]] }
  0xf6   :  { %v1776_v28 = vsel %vm5510_vm12, 0, %v5509_v12  ;;  %v2029_v15 = vmul.u32 %v8378_v25, %v2013_v38  ;;  %v1533_v42 = vsel %vm1531_vm10, %v7263_v55, %v1532_v48  ;;  %v1967_v3 = vmul.f32 %v1966_v4, %v7525_v6  ;;  %v8460_v4 = vld [vmem:[%s11699_s3 + $0x10] sm:$0xff] }
  0xf7   :  { %v208_v40 = vpop.permute.xlu1 %207  ;;  %v200_v32 = vpop.permute.xlu0 %199  ;;  %v1777_v51 = vsub.s32 32, %v1776_v28  ;;  %v1778_v14 = vshll.u32 %v8357_v47, %v1776_v28  ;;  %v1781_v34 = vsub.s32 4294967266, %v1776_v28  ;;  %vm2031_vm13 = vc.u32 %v8406_v30, %v8410_v41 }
  0xf8   :  { %v2032_v25 = vadd.s32 1, %v8411_v26  ;;  %v8451_v24 = vmul.f32 %v2241_v54, %v7525_v6  ;;  %v261_v47 = vmul.f32 %v200_v32, %v8420_v8  ;;  %v1269_v43 = vsel %vm1259_vm3, nan, %v1268_v39 }
  0xf9   :  { %1058 = vrot.lane.b32.xlu1 %v8202_v60, %s7480_s29  ;;  %1054 = vrot.lane.b32.xlu0 %v8202_v60, %s7481_s30  ;;  %v1779_v46 = vshrl.u32 %v1761_v1, %v1777_v51  ;;  %v1537_v62 = vsel %vm1530_vm6, %v1533_v42, %v1536_v20  ;;  %v1700_v45 = vmul.f32 %v8364_v10, %v8321_v21  ;;  %v1782_v2 = vadd.s32 127, %v1781_v34  ;;  %v8482_v21 = vld [vmem:[%s11699_s3 + $0x20] sm:$0xff] }
  0xfa   :  { %v2033_v19 = vsel %vm2031_vm13, %v2032_v25, %v8411_v26  ;;  %v8485_v10 = vmul.f32 %v8312_v49, %v1269_v43  ;;  %v1968_v7 = vmul.f32 -0.5, %v1967_v3  ;;  %v2246_v36 = vand.u32 2139095040, %v8451_v24 }
  0xfb   :  { %v212_v52 = vpop.permute.xlu1 %211  ;;  %v204_v23 = vpop.permute.xlu0 %203  ;;  %v1780_v13 = vor.u32 %v1779_v46, %v1778_v14  ;;  %v2034_v55 = vadd.s32 %v2033_v19, %v2029_v15  ;;  %v1783_v38 = vshll.u32 %v1782_v2, 23  ;;  %v263_v32 = vmul.f32 %v208_v40, %v8460_v4  ;;  %v8502_v15 = vld [vmem:[%s11699_s3 + $0x38] sm:$0xff]  ;;  %v8540_v2 = vld [vmem:[%s11699_s3 + $0x40] sm:$0xff] }
  0xfc   :  { %v262_v0 = vmul.f32 %v204_v23, %v8429_v11  ;;  %v264_v61 = vmul.f32 %v212_v52, %v8442_v9  ;;  %v1791_v53 = vsub.s32 4, %v8338_v50  ;;  %v11702_v48 = vand.u32 2147483647, %v8451_v24 }
  0xfd   :  { %797 = vrot.lane.b32.xlu1 %v8117_v56, %s7482_s6  ;;  %793 = vrot.lane.b32.xlu0 %v8117_v56, %s7483_s2  ;;  %v8477_v56 = vld [vmem:[%s11699_s3 + $0x28] sm:$0xff]  ;;  %v2035_v26 = vadd.s32 536870912, %v2034_v55  ;;  %v1538_v49 = vsel %vm1528_vm9, nan, %v1537_v62  ;;  %v1784_v1 = vor.u32 4788187, %v1783_v38  ;;  %v1787_v54 = vcvt.s32.f32 %v1780_v13 }
  0xfe   :  { %v6643_v5 = vpack.c.bf16 %v262_v0, %v261_v47  ;;  %v2247_v39 = vshrl.u32 %v2246_v36, 23  ;;  %v6646_v20 = vpack.c.bf16 %v264_v61, %v263_v32  ;;  %vm1707_vm14 = vcmp.lt.s32.totalorder %v8122_v59, 0 }
  0xff   :  { %v220_v12 = vpop.permute.xlu1 %219  ;;  %v216_v37 = vpop.permute.xlu0 %215  ;;  %v8510_v63 = vshrl.u32 %v2035_v26, 30  ;;  %v1785_v14 = vand.u32 2147483647, %v1784_v1  ;;  %v1969_v34 = vmul.f32 %v1968_v7, %v1967_v3  ;;  %v8518_v23 = vmul.f32 %v8317_v57, %v1538_v49 }
 0x100   :  { %6644 = vmatpush3.bf16.msra.mxu0 %v6643_v5  ;;  %v266_v40 = vmul.f32 %v220_v12, %v8477_v56  ;;  %v265_v28 = vmul.f32 %v216_v37, %v8482_v21  ;;  %v5521_v52 = vadd.s32 4294967169, %v2247_v39  ;;  %v1792_v25 = vsel %vm1707_vm14, %v1791_v53, %v8338_v50  ;;  %v8535_v50 = vld [vmem:[%s11699_s3 + $0x48] sm:$0xff] }
 0x101   :  { %1066 = vrot.lane.b32.xlu1 %v8202_v60, %s7482_s6  ;;  %1062 = vrot.lane.b32.xlu0 %v8202_v60, %s7483_s2  ;;  %v8507_v60 = vld [vmem:[%s11699_s3 + $0x30] sm:$0xff]  ;;  %v2037_v47 = vshll.u32 %v8510_v63, 30  ;;  %v2250_v0 = vand.u32 8388607, %v11702_v48  ;;  %v1788_v57 = vmul.f32 %v1787_v54, %v1785_v14  ;;  %v2235_v61 = vstv %s8472_s12 }
 0x102   :  { %6645 = vmatprep.subr.bf16.mxu0 %v7473_v16  ;;  %v2253_v3 = vadd.s32 1, %v5521_v52  ;;  %v6649_v62 = vpack.c.bf16 %v266_v40, %v265_v28  ;;  %v1701_v12 = vmul.f32 1.442695, %v1700_v45  ;;  %vm8548_vm15 = vcmp.le.f32.partialorder %v1705_v58, 0.7853982  ;;  %v8562_v58 = vld [vmem:[%s11699_s3 + $0x58] sm:$0xff] }
 0x103   :  { %v228_v42 = vpop.permute.xlu1 %227  ;;  %v224_v51 = vpop.permute.xlu0 %223  ;;  %v8543_v19 = vsub.s32 %v2034_v55, %v2037_v47  ;;  %v1789_v38 = vxor.u32 2147483648, %v1788_v57  ;;  %v1794_v7 = vsel %vm8548_vm15, 0, %v1792_v25  ;;  %v1970_v36 = vmul.f32 1.442695, %v1969_v34  ;;  %v8567_v45 = vld [vmem:[%s11699_s3 + $0x50] sm:$0xff] }
 0x104   :  { %6647 = vmatpush3.bf16.msra.mxu0 %v6646_v20  ;;  %v268_v43 = vmul.f32 %v228_v42, %v8502_v15  ;;  %v267_v46 = vmul.f32 %v224_v51, %v8507_v60  ;;  %vm2254_vm0 = vcmp.gt.s32.totalorder %v2253_v3, 0  ;;  %v8572_v26 = vmul.f32 %v2235_v61, %v7525_v6 }
 0x105   :  { %1279 = vrot.lane.b32.xlu1 %v8485_v10, %s7470_s18  ;;  %1275 = vrot.lane.b32.xlu0 %v8485_v10, %s7468_s16  ;;  %v2040_v55 = vsub.s32 0, %v8543_v19  ;;  %v1790_v53 = vsel %vm1707_vm14, %v1789_v38, %v1788_v57  ;;  %v2251_v49 = vor.u32 8388608, %v2250_v0  ;;  %v2255_v20 = vsel %vm2254_vm0, %v2253_v3, 0  ;;  %v8598_v57 = vld [vmem:[%s11699_s3 + $0x68] sm:$0xff]  ;;  %v8603_v3 = vld [vmem:[%s11699_s3 + $0x60] sm:$0xff] }
 0x106   :  { %6648 = vmatprep.subr.bf16.mxu0 %v7473_v16  ;;  %v6652_v32 = vpack.c.bf16 %v268_v43, %v267_v46  ;;  %7266 = vpow2.f32 %v1701_v12  ;;  %v1808_v42 = vstv %s8514_s10  ;;  %v2510_v51 = vstv %s8512_s9  ;;  %s8907_s10 = sld [smem:[#allocation4 + $0xb]]  ;;  %s8934_s9 = sld [smem:[#allocation6 + $0x8]] }
 0x107   :  { %v236_v5 = vpop.permute.xlu1 %235  ;;  %v232_v13 = vpop.permute.xlu0 %231  ;;  %v5515_v39 = vmin.u32 %v2040_v55, %v8543_v19  ;;  %v1793_v52 = vsel %vm8548_vm15, %v8122_v59, %v1790_v53  ;;  %v8590_v47 = vand.u32 3, %v1794_v7  ;;  %7268 = vpow2.f32 %v1970_v36 }
 0x108   :  { %6650 = vmatpush3.bf16.msra.mxu0 %v6649_v62  ;;  %v270_v1 = vmul.f32 %v236_v5, %v8535_v50  ;;  %v269_v54 = vmul.f32 %v232_v13, %v8540_v2  ;;  %v8593_v0 = vmul.f32 -0.5, %v8572_v26  ;;  %v2257_v43 = vand.u32 31, %v2255_v20 }
 0x109   :  { %1548 = vrot.lane.b32.xlu1 %v8518_v23, %s7470_s18  ;;  %1544 = vrot.lane.b32.xlu0 %v8518_v23, %s7468_s16  ;;  %v2042_v25 = vclz %v5515_v39  ;;  %v2030_v62 = vadd.s32 %v8410_v41, %v8406_v30  ;;  %v8608_v5 = vshll.u32 %v2251_v49, 8  ;;  %7270 = vcosq.f32 %v1793_v52 }
 0x10a   :  { %6651 = vmatprep.subr.bf16.mxu0 %v7473_v16  ;;  %v6655_v46 = vpack.c.bf16 %v270_v1, %v269_v54  ;;  %v8610_v37 = vshrl.u32 %v2255_v20, 5  ;;  %v2258_v38 = vsub.s32 32, %v2257_v43  ;;  %v8613_v7 = vmul.f32 %v2510_v51, %v7525_v6 }
 0x10b   :  { %v244_v40 = vpop.permute.xlu1 %243  ;;  %v240_v28 = vpop.permute.xlu0 %239  ;;  %v5516_v61 = vadd.s32 4294967294, %v2042_v25  ;;  %v2260_v55 = vshll.u32 %v11718_v27, %v2257_v43  ;;  %v2266_v20 = vshll.u32 %v11703_v31, %v2257_v43  ;;  %7272 = vsinq.f32 %v1793_v52 }
 0x10c   :  { %v272_v14 = vmul.f32 %v244_v40, %v8562_v58  ;;  %v271_v34 = vmul.f32 %v240_v28, %v8567_v45  ;;  %6653 = vmatpush3.bf16.msra.mxu0 %v6652_v32  ;;  %v2263_v32 = vshll.u32 %v11716_v29, %v2257_v43  ;;  %v2261_v49 = vshrl.u32 %v11716_v29, %v2258_v38  ;;  %v8630_v28 = vld [vmem:[%s11699_s3 + $0x78] sm:$0xff] }
 0x10d   :  { %1287 = vrot.lane.b32.xlu1 %v8485_v10, %s7469_s17  ;;  %1283 = vrot.lane.b32.xlu0 %v8485_v10, %s7467_s15  ;;  %vm5517_vm1 = vcmp.lt.s32.totalorder %v5516_v61, 0  ;;  %v2267_v25 = vshrl.u32 %v11705_v33, %v2258_v38  ;;  %vm2275_vm2 = vcmp.lt.s32.totalorder %v8610_v37, 1  ;;  %vm1976_vm3 = vcmp.lt.s32.totalorder %v8187_v18, 0 }
 0x10e   :  { %6654 = vmatprep.subr.bf16.mxu0 %v7473_v16  ;;  %v6658_v36 = vpack.c.bf16 %v272_v14, %v271_v34  ;;  %v2045_v53 = vsel %vm5517_vm1, 0, %v5516_v61  ;;  %v8635_v14 = vld [vmem:[%s11699_s3 + $0x70] sm:$0xff]  ;;  %v2264_v34 = vshrl.u32 %v11703_v31, %v2258_v38  ;;  %v2262_v31 = vor.u32 %v2261_v49, %v2260_v55 }
 0x10f   :  { %v252_v13 = vpop.permute.xlu1 %251  ;;  %v248_v12 = vpop.permute.xlu0 %247  ;;  %v2046_v1 = vsub.s32 32, %v2045_v53  ;;  %v2047_v54 = vshll.u32 %v8543_v19, %v2045_v53  ;;  %v2050_v39 = vsub.s32 4294967266, %v2045_v53  ;;  %v2269_v19 = vshll.u32 %v11705_v33, %v2257_v43 }
 0x110   :  { %6656 = vmatpush3.bf16.msra.mxu0 %v6655_v46  ;;  %v274_v30 = vmul.f32 %v252_v13, %v8598_v57  ;;  %v273_v41 = vmul.f32 %v248_v12, %v8603_v3  ;;  %v2270_v46 = vshrl.u32 %v11707_v35, %v2258_v38  ;;  %v2259_v12 = vshrl.u32 %v11718_v27, %v2258_v38  ;;  %v8642_v53 = vpop.eup %7266 }
 0x111   :  { %1556 = vrot.lane.b32.xlu1 %v8518_v23, %s7469_s17  ;;  %1552 = vrot.lane.b32.xlu0 %v8518_v23, %s7467_s15  ;;  %v2048_v61 = vshrl.u32 %v2030_v62, %v2046_v1  ;;  %v2051_v13 = vadd.s32 127, %v2050_v39  ;;  %v2272_v33 = vshll.u32 %v11707_v35, %v2257_v43  ;;  %vm8658_vm4 = vcmp.le.f32.partialorder %v1974_v22, 0.7853982 }
 0x112   :  { %6657 = vmatprep.subr.bf16.mxu0 %v7473_v16  ;;  %v6661_v48 = vpack.c.bf16 %v274_v30, %v273_v41  ;;  %v8654_v41 = vpop.eup %7268  ;;  %v2265_v55 = vor.u32 %v2264_v34, %v2263_v32  ;;  %v2268_v49 = vor.u32 %v2267_v25, %v2266_v20  ;;  %vm2278_vm5 = vcmp.lt.s32.totalorder %v8610_v37, 4 }
 0x113   :  { %v260_v40 = vpop.permute.xlu1 %259  ;;  %v256_v51 = vpop.permute.xlu0 %255  ;;  %v2052_v30 = vshll.u32 %v2051_v13, 23  ;;  %vm2276_vm6 = vcmp.lt.s32.totalorder %v8610_v37, 2  ;;  %vm2277_vm7 = vcmp.lt.s32.totalorder %v8610_v37, 3  ;;  %vm1800_vm8 = vcmp.eq.s32.totalorder %v8590_v47, 0 }
 0x114   :  { %6659 = vmatpush3.bf16.msra.mxu0 %v6658_v36  ;;  %v276_v52 = vmul.f32 %v260_v40, %v8630_v28  ;;  %v275_v62 = vmul.f32 %v256_v51, %v8635_v14  ;;  %v2049_v36 = vor.u32 %v2048_v61, %v2047_v54  ;;  %v2271_v40 = vor.u32 %v2270_v46, %v2269_v19  ;;  %v8666_v13 = vpop.eup %7270 }
 0x115   :  { %1295 = vrot.lane.b32.xlu1 %v8485_v10, %s7471_s19  ;;  %1291 = vrot.lane.b32.xlu0 %v8485_v10, %s7472_s20  ;;  %v2273_v51 = vshrl.u32 %v11713_v44, %v2258_v38  ;;  %v2053_v61 = vor.u32 4788187, %v2052_v30  ;;  %v2280_v38 = vsel %vm2278_vm5, %v2268_v49, 2102212464  ;;  %v2279_v46 = vsel %vm2275_vm2, %v2259_v12, %v2262_v31  ;;  %v8690_v30 = vld [vmem:[%s11700_s4] sm:$0xff] }
 0x116   :  { %6660 = vmatprep.subr.bf16.mxu0 %v7473_v16  ;;  %v2056_v22 = vcvt.s32.f32 %v2049_v36  ;;  %v6664_v20 = vpack.c.bf16 %v276_v52, %v275_v62  ;;  %v2284_v36 = vsel %vm2278_vm5, %v2271_v40, 920167782  ;;  %v2287_v52 = vsel %vm2275_vm2, %v2265_v55, %v2268_v49 }
 0x117   :  { %v473_v1 = vpop.permute.xlu1 %472  ;;  %v469_v39 = vpop.permute.xlu0 %468  ;;  %v2274_v32 = vor.u32 %v2273_v51, %v2272_v33  ;;  %v2054_v34 = vand.u32 2147483647, %v2053_v61  ;;  %v2283_v33 = vsel %vm2275_vm2, %v2262_v31, %v2265_v55  ;;  %v2281_v31 = vsel %vm2277_vm7, %v2265_v55, %v2280_v38 }
 0x118   :  { %v531_v35 = vmul.f32 %v473_v1, %v8429_v11  ;;  %v530_v54 = vmul.f32 %v469_v39, %v8420_v8  ;;  %6662 = vmatpush3.bf16.msra.mxu0 %v6661_v48  ;;  %v2060_v39 = vsub.s32 4, %v8510_v63  ;;  %v2285_v51 = vsel %vm2277_vm7, %v2268_v49, %v2284_v36 }
 0x119   :  { %1564 = vrot.lane.b32.xlu1 %v8518_v23, %s7471_s19  ;;  %1560 = vrot.lane.b32.xlu0 %v8518_v23, %s7472_s20  ;;  %v2288_v12 = vsel %vm2278_vm5, %v2274_v32, 1326507024  ;;  %v2057_v1 = vmul.f32 %v2056_v22, %v2054_v34  ;;  %vm1803_vm9 = vcmp.eq.s32.totalorder %v8590_v47, 2  ;;  %v2286_v22 = vsel %vm2276_vm6, %v2283_v33, %v2285_v51 }
 0x11a   :  { %6663 = vmatprep.subr.bf16.mxu0 %v7473_v16  ;;  %v6667_v48 = vpack.c.bf16 %v531_v35, %v530_v54  ;;  %v2289_v55 = vsel %vm2277_vm7, %v2271_v40, %v2288_v12  ;;  %v7273_v54 = vpop.eup %7272  ;;  %v8729_v33 = vmul.u32.u64.low %v8608_v5, %v2286_v22  ;;  %v8730_v36 = vmul.u32.u64.high %v8608_v5, %v2286_v22, %v8729_v33 }
 0x11b   :  { %v481_v25 = vpop.permute.xlu1 %480  ;;  %v477_v19 = vpop.permute.xlu0 %476  ;;  %v2290_v32 = vsel %vm2276_vm6, %v2287_v52, %v2289_v55  ;;  %v2058_v40 = vxor.u32 2147483648, %v2057_v1  ;;  %v2238_v52 = vmul.f32 %v8593_v0, %v8572_v26  ;;  %vm1797_vm10 = vweird.f32 %v8122_v59 }
 0x11c   :  { %v533_v62 = vmul.f32 %v481_v25, %v8442_v9  ;;  %v532_v35 = vmul.f32 %v477_v19, %v8460_v4  ;;  %6665 = vmatpush3.bf16.msra.mxu0 %v6664_v20  ;;  %6668 = vmatpush3.bf16.msra.mxu1 %v6667_v48  ;;  %v2282_v20 = vsel %vm2276_vm6, %v2279_v46, %v2281_v31  ;;  %v1801_v31 = vxor.u32 2147483648, %v7273_v54 }
 0x11d   :  { %1303 = vrot.lane.b32.xlu1 %v8485_v10, %s7474_s24  ;;  %1299 = vrot.lane.b32.xlu0 %v8485_v10, %s7475_s25  ;;  %v8721_v48 = vmul.u32.u64.low %v8608_v5, %v2290_v32  ;;  %v8722_v34 = vmul.u32.u64.high %v8608_v5, %v2290_v32, %v8721_v48  ;;  %v2059_v37 = vsel %vm1976_vm3, %v2058_v40, %v2057_v1  ;;  %v2061_v46 = vsel %vm1976_vm3, %v2060_v39, %v8510_v63 }
 0x11e   :  { %v6670_v61 = vpack.c.bf16 %v533_v62, %v532_v35  ;;  %6669 = vmatprep.subr.bf16.mxu1 %v7473_v16  ;;  %6690 = vmatprep.subr.bf16.mxu0 %v7473_v16  ;;  %v2515_v62 = vand.u32 2139095040, %v8613_v7  ;;  %v1804_v12 = vxor.u32 2147483648, %v8666_v13  ;;  %v2062_v1 = vsel %vm8658_vm4, %v8187_v18, %v2059_v37 }
 0x11f   :  { %v489_v49 = vpop.permute.xlu1 %488  ;;  %v485_v38 = vpop.permute.xlu0 %484  ;;  %5975 = vmatmul.mubr.f32.vlgmr.msra.gmra.mrb[0].mxu0 %v8690_v30  ;;  %7274 = vcosq.f32 %v2062_v1  ;;  %v2298_v0 = vmul.u32 %v8608_v5, %v2282_v20  ;;  %vm2300_vm12 = vc.u32 %v8722_v34, %v8729_v33  ;;  %v2077_v22 = vstv %s8701_s26  ;;  %s9192_s26 = sld [smem:[#allocation4 + $0xc]] }
 0x120   :  { %v535_v25 = vmul.f32 %v489_v49, %v8477_v56  ;;  %v534_v19 = vmul.f32 %v485_v38, %v8482_v21  ;;  %6671 = vmatpush3.bf16.msra.mxu1 %v6670_v61  ;;  %6044 = vmatprep.mubr.msk.f32.mxu0 %vm7484_vm11, %v11711_v17  ;;  %v2516_v39 = vshrl.u32 %v2515_v62, 23  ;;  %7276 = vsinq.f32 %v2062_v1 }
 0x121   :  { %1572 = vrot.lane.b32.xlu1 %v8518_v23, %s7474_s24  ;;  %1568 = vrot.lane.b32.xlu0 %v8518_v23, %s7475_s25  ;;  %v2301_v61 = vadd.s32 1, %v8730_v36  ;;  %v2504_v5 = vstv %s8708_s7  ;;  %v11709_v32 = vand.u32 2147483647, %v8613_v7  ;;  %vm1799_vm13 = vcmp.lt.s32.totalorder %v8590_v47, 2  ;;  %s9461_s7 = sld [smem:[#allocation6 + $0xb]] }
 0x122   :  { %v6673_v35 = vpack.c.bf16 %v535_v25, %v534_v19  ;;  %6672 = vmatprep.subr.bf16.mxu1 %v7473_v16  ;;  %v5528_v49 = vadd.s32 4294967169, %v2516_v39  ;;  %v2063_v40 = vsel %vm8658_vm4, 0, %v2061_v46  ;;  %v1802_v19 = vsel %vm1800_vm8, %v8666_v13, %v1801_v31 }
 0x123   :  { %v497_v63 = vpop.permute.xlu1 %496  ;;  %v493_v26 = vpop.permute.xlu0 %492  ;;  %v2302_v20 = vsel %vm2300_vm12, %v2301_v61, %v8730_v36  ;;  %v1805_v37 = vsel %vm1803_vm9, %v1804_v12, %v7273_v54  ;;  %v2239_v1 = vmul.f32 1.442695, %v2238_v52  ;;  %v8782_v36 = vmul.f32 %v2504_v5, %v7525_v6 }
 0x124   :  { %v537_v51 = vmul.f32 %v497_v63, %v8502_v15  ;;  %v536_v55 = vmul.f32 %v493_v26, %v8507_v60  ;;  %6674 = vmatpush3.bf16.msra.mxu1 %v6673_v35  ;;  %v2303_v62 = vadd.s32 %v2302_v20, %v2298_v0  ;;  %v2522_v35 = vadd.s32 1, %v5528_v49 }
 0x125   :  { %1311 = vrot.lane.b32.xlu1 %v8485_v10, %s7476_s1  ;;  %1307 = vrot.lane.b32.xlu0 %v8485_v10, %s7477_s0  ;;  %v8788_v13 = vand.u32 3, %v2063_v40  ;;  %v2519_v31 = vand.u32 8388607, %v11709_v32  ;;  %v1806_v52 = vsel %vm1799_vm13, %v1802_v19, %v1805_v37  ;;  %v2779_v26 = vstv %s8751_s8  ;;  %s9673_s8 = sld [smem:[#allocation4 + $0xe]] }
 0x126   :  { %v6676_v38 = vpack.c.bf16 %v537_v51, %v536_v55  ;;  %6675 = vmatprep.subr.bf16.mxu1 %v7473_v16  ;;  %v2304_v54 = vadd.s32 536870912, %v2303_v62  ;;  %vm2523_vm14 = vcmp.gt.s32.totalorder %v2522_v35, 0  ;;  %v1809_v51 = vmul.f32 %v8642_v53, %v1808_v42 }
 0x127   :  { %v505_v48 = vpop.permute.xlu1 %504  ;;  %v501_v25 = vpop.permute.xlu0 %500  ;;  %v2524_v63 = vsel %vm2523_vm14, %v2522_v35, 0  ;;  %v8800_v55 = vmul.f32 %v8654_v41, %v2077_v22  ;;  %7278 = vpow2.f32 %v2239_v1  ;;  %v8809_v47 = vmul.f32 -0.5, %v8782_v36 }
 0x128   :  { %v539_v43 = vmul.f32 %v505_v48, %v8535_v50  ;;  %v538_v46 = vmul.f32 %v501_v25, %v8540_v2  ;;  %6677 = vmatpush3.bf16.msra.mxu1 %v6676_v38  ;;  %v8802_v61 = vshrl.u32 %v2304_v54, 30  ;;  %v8804_v5 = vand.u32 31, %v2524_v63 }
 0x129   :  { %1580 = vrot.lane.b32.xlu1 %v8518_v23, %s7476_s1  ;;  %1576 = vrot.lane.b32.xlu0 %v8518_v23, %s7477_s0  ;;  %v7275_v40 = vpop.eup %7274  ;;  %v1807_v42 = vsel %vm1797_vm10, nan, %v1806_v52  ;;  %v2520_v41 = vor.u32 8388608, %v2519_v31  ;;  %v8819_v22 = vmul.f32 %v2779_v26, %v7525_v6  ;;  %vm2068_vm15 = vcmp.lt.s32.totalorder %v8788_v13, 2 }
 0x12a   :  { %v6679_v12 = vpack.c.bf16 %v539_v43, %v538_v46  ;;  %6678 = vmatprep.subr.bf16.mxu1 %v7473_v16  ;;  %v2306_v53 = vshll.u32 %v8802_v61, 30  ;;  %v7277_v20 = vpop.eup %7276  ;;  %vm2069_vm0 = vcmp.eq.s32.totalorder %v8788_v13, 0  ;;  %v2073_v25 = vxor.u32 2147483648, %v7275_v40 }
 0x12b   :  { %v513_v0 = vpop.permute.xlu1 %512  ;;  %v509_v39 = vpop.permute.xlu0 %508  ;;  %v2070_v35 = vxor.u32 2147483648, %v7277_v20  ;;  %vm2072_vm1 = vcmp.eq.s32.totalorder %v8788_v13, 2  ;;  %v2527_v43 = vsub.s32 32, %v8804_v5  ;;  %v8830_v54 = vmul.f32 %v1809_v51, %v1807_v42 }
 0x12c   :  { %v541_v49 = vmul.f32 %v513_v0, %v8562_v58  ;;  %v540_v38 = vmul.f32 %v509_v39, %v8567_v45  ;;  %6680 = vmatpush3.bf16.msra.mxu1 %v6679_v12  ;;  %v8825_v59 = vsub.s32 %v2303_v62, %v2306_v53  ;;  %v8834_v31 = vadd.s32 %v8729_v33, %v8722_v34 }
 0x12d   :  { %1319 = vrot.lane.b32.xlu1 %v8485_v10, %s7478_s27  ;;  %1315 = vrot.lane.b32.xlu0 %v8485_v10, %s7479_s28  ;;  %v8841_v12 = vshrl.u32 %v2524_v63, 5  ;;  %v2071_v34 = vsel %vm2069_vm0, %v7275_v40, %v2070_v35  ;;  %v2074_v33 = vsel %vm2072_vm1, %v2073_v25, %v7277_v20  ;;  %v2529_v26 = vshll.u32 %v11718_v27, %v8804_v5 }
 0x12e   :  { %v6682_v48 = vpack.c.bf16 %v541_v49, %v540_v38  ;;  %6681 = vmatprep.subr.bf16.mxu1 %v7473_v16  ;;  %v2309_v62 = vsub.s32 0, %v8825_v59  ;;  %v2530_v51 = vshrl.u32 %v11716_v29, %v2527_v43  ;;  %v2532_v49 = vshll.u32 %v11716_v29, %v8804_v5 }
 0x12f   :  { %v521_v19 = vpop.permute.xlu1 %520  ;;  %v517_v37 = vpop.permute.xlu0 %516  ;;  %v11736_v38 = vmov 2131351028   ;;  %v11737_v20 = vmov 2102212464   ;;  %vm2066_vm2 = vweird.f32 %v8187_v18  ;;  %v8870_v25 = vsel %vm2068_vm15, %v2071_v34, %v2074_v33 }
 0x130   :  { %v543_v46 = vmul.f32 %v521_v19, %v8598_v57  ;;  %v542_v1 = vmul.f32 %v517_v37, %v8603_v3  ;;  %6683 = vmatpush3.bf16.msra.mxu1 %v6682_v48  ;;  %v8843_v57 = vshll.u32 %v2520_v41, 8  ;;  %v2784_v3 = vand.u32 2139095040, %v8819_v22 }
 0x131   :  { %1588 = vrot.lane.b32.xlu1 %v8518_v23, %s7478_s27  ;;  %1584 = vrot.lane.b32.xlu0 %v8518_v23, %s7479_s28  ;;  %v5522_v63 = vmin.u32 %v2309_v62, %v8825_v59  ;;  %v2533_v42 = vshrl.u32 %v11736_v38, %v2527_v43  ;;  %v2535_v41 = vshll.u32 %v11736_v38, %v8804_v5  ;;  %v8875_v37 = vpop.eup %7278  ;;  %vm2544_vm4 = vcmp.lt.s32.totalorder %v8841_v12, 1 }
 0x132   :  { %v6685_v52 = vpack.c.bf16 %v543_v46, %v542_v1  ;;  %6684 = vmatprep.subr.bf16.mxu1 %v7473_v16  ;;  %v2536_v48 = vshrl.u32 %v11737_v20, %v2527_v43  ;;  %v8873_v19 = vshrl.u32 %v2784_v3, 23  ;;  %v2538_v46 = vshll.u32 %v11737_v20, %v8804_v5 }
 0x133   :  { %v529_v0 = vpop.permute.xlu1 %528  ;;  %v525_v39 = vpop.permute.xlu0 %524  ;;  %v11738_v1 = vmov 920167782   ;;  %v2542_v3 = vshrl.u32 %v11713_v44, %v2527_v43  ;;  %vm2545_vm5 = vcmp.lt.s32.totalorder %v8841_v12, 2  ;;  %vm2547_vm6 = vcmp.lt.s32.totalorder %v8841_v12, 4 }
 0x134   :  { %v545_v53 = vmul.f32 %v529_v0, %v8630_v28  ;;  %v544_v40 = vmul.f32 %v525_v39, %v8635_v14  ;;  %6686 = vmatpush3.bf16.msra.mxu1 %v6685_v52  ;;  %v2311_v28 = vclz %v5522_v63  ;;  %v2528_v14 = vshrl.u32 %v11718_v27, %v2527_v43 }
 0x135   :  { %1327 = vrot.lane.b32.xlu1 %v8485_v10, %s7480_s29  ;;  %1323 = vrot.lane.b32.xlu0 %v8485_v10, %s7481_s30  ;;  %v2539_v62 = vshrl.u32 %v11738_v1, %v2527_v43  ;;  %v2541_v13 = vshll.u32 %v11738_v1, %v8804_v5  ;;  %v2531_v0 = vor.u32 %v2530_v51, %v2529_v26  ;;  %vm2546_vm7 = vcmp.lt.s32.totalorder %v8841_v12, 3 }
 0x136   :  { %v6688_v35 = vpack.c.bf16 %v545_v53, %v544_v40  ;;  %6687 = vmatprep.subr.bf16.mxu1 %v7473_v16  ;;  %v5523_v33 = vadd.s32 4294967294, %v2311_v28  ;;  %v2534_v39 = vor.u32 %v2533_v42, %v2532_v49  ;;  %v2537_v40 = vor.u32 %v2536_v48, %v2535_v41 }
 0x137   :  { %v742_v52 = vpop.permute.xlu1 %741  ;;  %v738_v34 = vpop.permute.xlu0 %737  ;;  %v2540_v32 = vor.u32 %v2539_v62, %v2538_v46  ;;  %v2543_v26 = vor.u32 %v2542_v3, %v2541_v13  ;;  %v2548_v3 = vsel %vm2544_vm4, %v2528_v14, %v2531_v0  ;;  %v5535_v12 = vadd.s32 4294967169, %v8873_v19 }
 0x138   :  { %v800_v63 = vmul.f32 %v742_v52, %v8429_v11  ;;  %v799_v53 = vmul.f32 %v738_v34, %v8420_v8  ;;  %6689 = vmatpush3.bf16.msra.mxu1 %v6688_v35  ;;  %vm5524_vm3 = vcmp.lt.s32.totalorder %v5523_v33, 0  ;;  %v2549_v28 = vsel %vm2547_vm6, %v2537_v40, 2102212464 }
 0x139   :  { %1596 = vrot.lane.b32.xlu1 %v8518_v23, %s7480_s29  ;;  %1592 = vrot.lane.b32.xlu0 %v8518_v23, %s7481_s30  ;;  %v2314_v43 = vsel %vm5524_vm3, 0, %v5523_v33  ;;  %v2552_v62 = vsel %vm2544_vm4, %v2531_v0, %v2534_v39  ;;  %v2556_v34 = vsel %vm2544_vm4, %v2534_v39, %v2537_v40  ;;  %v2076_v0 = vsel %vm2066_vm2, nan, %v8870_v25 }
 0x13a   :  { %v6691_v5 = vpack.c.bf16 %v800_v63, %v799_v53  ;;  %6714 = vmatprep.subr.bf16.mxu1 %v7473_v16  ;;  %v2315_v42 = vsub.s32 32, %v2314_v43  ;;  %v2316_v41 = vshll.u32 %v8825_v59, %v2314_v43  ;;  %v2319_v48 = vsub.s32 4294967266, %v2314_v43 }
 0x13b   :  { %v750_v51 = vpop.permute.xlu1 %749  ;;  %v746_v49 = vpop.permute.xlu0 %745  ;;  %6010 = vmatmul.mubr.f32.vlgmr.msra.gmra.mrb[0].mxu1 %v8690_v30  ;;  %v2553_v30 = vsel %vm2547_vm6, %v2540_v32, 920167782  ;;  %v2550_v63 = vsel %vm2546_vm7, %v2534_v39, %v2549_v28  ;;  %vm2245_vm10 = vcmp.lt.s32.totalorder %v8451_v24, 0  ;;  %vm2514_vm2 = vcmp.lt.s32.totalorder %v8613_v7, 0 }
 0x13c   :  { %v802_v35 = vmul.f32 %v750_v51, %v8442_v9  ;;  %v801_v46 = vmul.f32 %v746_v49, %v8460_v4  ;;  %6692 = vmatpush3.bf16.msra.mxu0 %v6691_v5  ;;  %6079 = vmatprep.mubr.msk.f32.mxu1 %vm7484_vm11, %v11711_v17  ;;  %v2317_v59 = vshrl.u32 %v8834_v31, %v2315_v42  ;;  %v2320_v13 = vadd.s32 127, %v2319_v48 }
 0x13d   :  { %1335 = vrot.lane.b32.xlu1 %v8485_v10, %s7482_s6  ;;  %1331 = vrot.lane.b32.xlu0 %v8485_v10, %s7483_s2  ;;  %v2554_v52 = vsel %vm2546_vm7, %v2537_v40, %v2553_v30  ;;  %v2557_v10 = vsel %vm2547_vm6, %v2543_v26, 1326507024  ;;  %v2551_v25 = vsel %vm2545_vm5, %v2548_v3, %v2550_v63  ;;  %v2781_v63 = vand.u32 2147483647, %v8819_v22 }
 0x13e   :  { %v6694_v33 = vpack.c.bf16 %v802_v35, %v801_v46  ;;  %6693 = vmatprep.subr.bf16.mxu0 %v7473_v16  ;;  %v2318_v5 = vor.u32 %v2317_v59, %v2316_v41  ;;  %v2321_v43 = vshll.u32 %v2320_v13, 23  ;;  %v2555_v51 = vsel %vm2545_vm5, %v2552_v62, %v2554_v52 }
 0x13f   :  { %v758_v31 = vpop.permute.xlu1 %757  ;;  %v754_v53 = vpop.permute.xlu0 %753  ;;  %v2558_v40 = vsel %vm2546_vm7, %v2540_v32, %v2557_v10  ;;  %v8950_v48 = vmul.u32.u64.low %v8843_v57, %v2555_v51  ;;  %v8951_v28 = vmul.u32.u64.high %v8843_v57, %v2555_v51, %v8950_v48  ;;  %v11739_v46 = vand.u32 2147483647, %v8451_v24 }
 0x140   :  { %v804_v49 = vmul.f32 %v758_v31, %v8477_v56  ;;  %v803_v14 = vmul.f32 %v754_v53, %v8482_v21  ;;  %6695 = vmatpush3.bf16.msra.mxu0 %v6694_v33  ;;  %v2559_v39 = vsel %vm2545_vm5, %v2556_v34, %v2558_v40  ;;  %v2322_v32 = vor.u32 4788187, %v2321_v43 }
 0x141   :  { %1604 = vrot.lane.b32.xlu1 %v8518_v23, %s7482_s6  ;;  %1600 = vrot.lane.b32.xlu0 %v8518_v23, %s7483_s2  ;;  %v2325_v26 = vcvt.s32.f32 %v2318_v5  ;;  %v8943_v42 = vmul.u32.u64.low %v8843_v57, %v2559_v39  ;;  %v8944_v41 = vmul.u32.u64.high %v8843_v57, %v2559_v39, %v8943_v42  ;;  %vm8956_vm8 = vcmp.le.f32.partialorder %v11739_v46, 0.7853982 }
 0x142   :  { %v6697_v18 = vpack.c.bf16 %v804_v49, %v803_v14  ;;  %6696 = vmatprep.subr.bf16.mxu0 %v7473_v16  ;;  %v2323_v30 = vand.u32 2147483647, %v2322_v32  ;;  %v2507_v59 = vmul.f32 %v8809_v47, %v8782_v36  ;;  %v8966_v34 = vmul.f32 %v8800_v55, %v2076_v0 }
 0x143   :  { %v766_v35 = vpop.permute.xlu1 %765  ;;  %v762_v23 = vpop.permute.xlu0 %761  ;;  %v3048_v33 = vstv %s8907_s10  ;;  %v2567_v36 = vmul.u32 %v8843_v57, %v2551_v25  ;;  %vm2569_vm9 = vc.u32 %v8944_v41, %v8950_v48  ;;  %v2791_v47 = vadd.s32 1, %v5535_v12  ;;  %s9875_s10 = sld [smem:[#allocation4 + $0xf]] }
 0x144   :  { %v806_v13 = vmul.f32 %v766_v35, %v8502_v15  ;;  %v805_v52 = vmul.f32 %v762_v23, %v8507_v60  ;;  %6698 = vmatpush3.bf16.msra.mxu0 %v6697_v18  ;;  %v2326_v3 = vmul.f32 %v2325_v26, %v2323_v30  ;;  %v2570_v55 = vadd.s32 1, %v8951_v28 }
 0x145   :  { %1817 = vrot.lane.b32.xlu1 %v8830_v54, %s7470_s18  ;;  %1813 = vrot.lane.b32.xlu0 %v8830_v54, %s7468_s16  ;;  %v2329_v5 = vsub.s32 4, %v8802_v61  ;;  %vm2792_vm12 = vcmp.gt.s32.totalorder %v2791_v47, 0  ;;  %v8982_v57 = vmul.f32 %v3048_v33, %v7525_v6  ;;  %v2346_v40 = vstv %s8934_s9  ;;  %s9882_s9 = sld [smem:[#allocation6 + $0xd]] }
 0x146   :  { %v6700_v19 = vpack.c.bf16 %v806_v13, %v805_v52  ;;  %6699 = vmatprep.subr.bf16.mxu0 %v7473_v16  ;;  %v2327_v53 = vxor.u32 2147483648, %v2326_v3  ;;  %v2571_v49 = vsel %vm2569_vm9, %v2570_v55, %v8951_v28  ;;  %v2508_v0 = vmul.f32 1.442695, %v2507_v59 }
 0x147   :  { %v1011_v10 = vpop.permute.xlu1 %1010  ;;  %v1007_v31 = vpop.permute.xlu0 %1006  ;;  %v2793_v39 = vsel %vm2792_vm12, %v2791_v47, 0  ;;  %v2788_v26 = vand.u32 8388607, %v2781_v63  ;;  %v2330_v28 = vsel %vm2245_vm10, %v2329_v5, %v8802_v61  ;;  %v3053_v23 = vand.u32 2139095040, %v8982_v57 }
 0x148   :  { %v1069_v43 = vmul.f32 %v1011_v10, %v8429_v11  ;;  %v1068_v51 = vmul.f32 %v1007_v31, %v8420_v8  ;;  %6701 = vmatpush3.bf16.msra.mxu0 %v6700_v19  ;;  %v2328_v14 = vsel %vm2245_vm10, %v2327_v53, %v2326_v3  ;;  %v2572_v11 = vadd.s32 %v2571_v49, %v2567_v36 }
 0x149   :  { %2086 = vrot.lane.b32.xlu1 %v8966_v34, %s7470_s18  ;;  %2082 = vrot.lane.b32.xlu0 %v8966_v34, %s7468_s16  ;;  %v2331_v32 = vsel %vm8956_vm8, %v8451_v24, %v2328_v14  ;;  %v2795_v42 = vand.u32 31, %v2793_v39  ;;  %v2332_v13 = vsel %vm8956_vm8, 0, %v2330_v28  ;;  %v2789_v3 = vor.u32 8388608, %v2788_v26 }
 0x14a   :  { %v6715_v8 = vpack.c.bf16 %v1069_v43, %v1068_v51  ;;  %6702 = vmatprep.subr.bf16.mxu0 %v7473_v16  ;;  %7280 = vcosq.f32 %v2331_v32  ;;  %v2573_v35 = vadd.s32 536870912, %v2572_v11  ;;  %v9023_v47 = vshrl.u32 %v3053_v23, 23 }
 0x14b   :  { %v1019_v18 = vpop.permute.xlu1 %1018  ;;  %v1015_v25 = vpop.permute.xlu0 %1014  ;;  %7282 = vsinq.f32 %v2331_v32  ;;  %v2796_v12 = vsub.s32 32, %v2795_v42  ;;  %v2798_v36 = vshll.u32 %v11718_v27, %v2795_v42  ;;  %v2801_v62 = vshll.u32 %v11716_v29, %v2795_v42 }
 0x14c   :  { %v1071_v46 = vmul.f32 %v1019_v18, %v8442_v9  ;;  %v1070_v30 = vmul.f32 %v1015_v25, %v8460_v4  ;;  %6716 = vmatpush3.bf16.msra.mxu1 %v6715_v8  ;;  %v9013_v59 = vshrl.u32 %v2573_v35, 30  ;;  %v9019_v9 = vmul.f32 %v8875_v37, %v2346_v40 }
 0x14d   :  { %1825 = vrot.lane.b32.xlu1 %v8830_v54, %s7469_s17  ;;  %1821 = vrot.lane.b32.xlu0 %v8830_v54, %s7467_s15  ;;  %7284 = vpow2.f32 %v2508_v0  ;;  %v2804_v37 = vshll.u32 %v11736_v38, %v2795_v42  ;;  %v9033_v10 = vand.u32 3, %v2332_v13  ;;  %v2799_v53 = vshrl.u32 %v11716_v29, %v2796_v12 }
 0x14e   :  { %v6718_v61 = vpack.c.bf16 %v1071_v46, %v1070_v30  ;;  %6717 = vmatprep.subr.bf16.mxu1 %v7473_v16  ;;  %v2575_v33 = vshll.u32 %v9013_v59, 30  ;;  %v2805_v5 = vshrl.u32 %v11737_v20, %v2796_v12  ;;  %v2807_v43 = vshll.u32 %v11737_v20, %v2795_v42 }
 0x14f   :  { %v1027_v4 = vpop.permute.xlu1 %1026  ;;  %v1023_v52 = vpop.permute.xlu0 %1022  ;;  %v2808_v51 = vshrl.u32 %v11738_v1, %v2796_v12  ;;  %v9044_v0 = vshrl.u32 %v2793_v39, 5  ;;  %v2811_v8 = vshrl.u32 %v11713_v44, %v2796_v12  ;;  %v9052_v18 = vadd.s32 %v8950_v48, %v8944_v41 }
 0x150   :  { %v1073_v19 = vmul.f32 %v1027_v4, %v8477_v56  ;;  %v1072_v55 = vmul.f32 %v1023_v52, %v8482_v21  ;;  %6719 = vmatpush3.bf16.msra.mxu1 %v6718_v61  ;;  %v9035_v31 = vsub.s32 %v2572_v11, %v2575_v33  ;;  %v2802_v56 = vshrl.u32 %v11736_v38, %v2796_v12 }
 0x151   :  { %2094 = vrot.lane.b32.xlu1 %v8966_v34, %s7469_s17  ;;  %2090 = vrot.lane.b32.xlu0 %v8966_v34, %s7467_s15  ;;  %v2810_v11 = vshll.u32 %v11738_v1, %v2795_v42  ;;  %v9054_v25 = vshll.u32 %v2789_v3, 8  ;;  %v2800_v42 = vor.u32 %v2799_v53, %v2798_v36  ;;  %v2806_v23 = vor.u32 %v2805_v5, %v2804_v37 }
 0x152   :  { %v6721_v21 = vpack.c.bf16 %v1073_v19, %v1072_v55  ;;  %6720 = vmatprep.subr.bf16.mxu1 %v7473_v16  ;;  %v2578_v14 = vsub.s32 0, %v9035_v31  ;;  %v2803_v48 = vor.u32 %v2802_v56, %v2801_v62  ;;  %v2809_v46 = vor.u32 %v2808_v51, %v2807_v43 }
 0x153   :  { %v1035_v40 = vpop.permute.xlu1 %1034  ;;  %v1031_v49 = vpop.permute.xlu0 %1030  ;;  %v2812_v4 = vor.u32 %v2811_v8, %v2810_v11  ;;  %vm2813_vm13 = vcmp.lt.s32.totalorder %v9044_v0, 1  ;;  %vm2816_vm14 = vcmp.lt.s32.totalorder %v9044_v0, 4  ;;  %vm2341_vm15 = vcmp.eq.s32.totalorder %v9033_v10, 2 }
 0x154   :  { %v1075_v32 = vmul.f32 %v1035_v40, %v8502_v15  ;;  %v1074_v26 = vmul.f32 %v1031_v49, %v8507_v60  ;;  %6722 = vmatpush3.bf16.msra.mxu1 %v6721_v21  ;;  %v9056_v28 = vpop.eup %7280  ;;  %v5529_v39 = vmin.u32 %v2578_v14, %v9035_v31  ;;  %v2598_v15 = vsub.s32 4, %v9013_v59 }
 0x155   :  { %1833 = vrot.lane.b32.xlu1 %v8830_v54, %s7471_s19  ;;  %1829 = vrot.lane.b32.xlu0 %v8830_v54, %s7472_s20  ;;  %v2797_v60 = vshrl.u32 %v11718_v27, %v2796_v12  ;;  %v9065_v35 = vpop.eup %7282  ;;  %vm2815_vm0 = vcmp.lt.s32.totalorder %v9044_v0, 3  ;;  %v2818_v3 = vsel %vm2816_vm14, %v2806_v23, 2102212464  ;;  %v2342_v19 = vxor.u32 2147483648, %v9056_v28 }
 0x156   :  { %v6724_v41 = vpack.c.bf16 %v1075_v32, %v1074_v26  ;;  %6723 = vmatprep.subr.bf16.mxu1 %v7473_v16  ;;  %v2580_v13 = vclz %v5529_v39  ;;  %v2339_v36 = vxor.u32 2147483648, %v9065_v35  ;;  %vm2814_vm1 = vcmp.lt.s32.totalorder %v9044_v0, 2 }
 0x157   :  { %v774_v30 = vpop.permute.xlu1 %773  ;;  %v770_v61 = vpop.permute.xlu0 %769  ;;  %v2817_v37 = vsel %vm2813_vm13, %v2797_v60, %v2800_v42  ;;  %v2821_v53 = vsel %vm2813_vm13, %v2800_v42, %v2803_v48  ;;  %v2822_v56 = vsel %vm2816_vm14, %v2809_v46, 920167782  ;;  %v2819_v43 = vsel %vm2815_vm0, %v2803_v48, %v2818_v3 }
 0x158   :  { %v9070_v52 = vpop.eup %7284  ;;  %v808_v12 = vmul.f32 %v774_v30, %v8535_v50  ;;  %v807_v33 = vmul.f32 %v770_v61, %v8540_v2  ;;  %6725 = vmatpush3.bf16.msra.mxu1 %v6724_v41  ;;  %v5530_v55 = vadd.s32 4294967294, %v2580_v13  ;;  %v2823_v51 = vsel %vm2815_vm0, %v2806_v23, %v2822_v56 }
 0x159   :  { %2102 = vrot.lane.b32.xlu1 %v8966_v34, %s7471_s19  ;;  %2098 = vrot.lane.b32.xlu0 %v8966_v34, %s7472_s20  ;;  %v2826_v40 = vsel %vm2816_vm14, %v2812_v4, 1326507024  ;;  %v2825_v8 = vsel %vm2813_vm13, %v2803_v48, %v2806_v23  ;;  %v2820_v61 = vsel %vm2814_vm1, %v2817_v37, %v2819_v43  ;;  %vm2335_vm4 = vweird.f32 %v8451_v24 }
 0x15a   :  { %v6703_v62 = vpack.c.bf16 %v808_v12, %v807_v33  ;;  %6726 = vmatprep.subr.bf16.mxu1 %v7473_v16  ;;  %vm5531_vm3 = vcmp.lt.s32.totalorder %v5530_v55, 0  ;;  %v2827_v60 = vsel %vm2815_vm0, %v2809_v46, %v2826_v40  ;;  %vm2337_vm5 = vcmp.lt.s32.totalorder %v9033_v10, 2 }
 0x15b   :  { %v1043_v21 = vpop.permute.xlu1 %1042  ;;  %v1039_v5 = vpop.permute.xlu0 %1038  ;;  %v2583_v11 = vsel %vm5531_vm3, 0, %v5530_v55  ;;  %v2828_v13 = vsel %vm2814_vm1, %v2825_v8, %v2827_v60  ;;  %vm2338_vm6 = vcmp.eq.s32.totalorder %v9033_v10, 0  ;;  %v5542_v55 = vadd.s32 4294967169, %v9023_v47  ;;  %v9157_v47 = vld [vmem:[%s11699_s3 + $0x58] sm:$0xff]  ;;  %v9197_v60 = vld [vmem:[%s11699_s3 + $0x68] sm:$0xff] }
 0x15c   :  { %v1077_v49 = vmul.f32 %v1043_v21, %v8535_v50  ;;  %v1076_v14 = vmul.f32 %v1039_v5, %v8540_v2  ;;  %6704 = vmatpush3.bf16.msra.mxu0 %v6703_v62  ;;  %v2584_v32 = vsub.s32 32, %v2583_v11  ;;  %v2585_v26 = vshll.u32 %v9035_v31, %v2583_v11 }
 0x15d   :  { %1841 = vrot.lane.b32.xlu1 %v8830_v54, %s7474_s24  ;;  %1837 = vrot.lane.b32.xlu0 %v8830_v54, %s7475_s25  ;;  %v2588_v39 = vsub.s32 4294967266, %v2583_v11  ;;  %v2824_v50 = vsel %vm2814_vm1, %v2821_v53, %v2823_v51  ;;  %v9133_v12 = vmul.u32.u64.low %v9054_v25, %v2828_v13  ;;  %v9134_v33 = vmul.u32.u64.high %v9054_v25, %v2828_v13, %v9133_v12 }
 0x15e   :  { %v6727_v2 = vpack.c.bf16 %v1077_v49, %v1076_v14  ;;  %6705 = vmatprep.subr.bf16.mxu0 %v7473_v16  ;;  %v9118_v42 = vmul.u32.u64.low %v9054_v25, %v2824_v50  ;;  %v9119_v41 = vmul.u32.u64.high %v9054_v25, %v2824_v50, %v9118_v42  ;;  %v2586_v31 = vshrl.u32 %v9052_v18, %v2584_v32 }
 0x15f   :  { %v782_v48 = vpop.permute.xlu1 %781  ;;  %v778_v23 = vpop.permute.xlu0 %777  ;;  %v2589_v30 = vadd.s32 127, %v2588_v39  ;;  %v2836_v18 = vmul.u32 %v9054_v25, %v2820_v61  ;;  %v2343_v53 = vsel %vm2341_vm15, %v2342_v19, %v9065_v35  ;;  %v2599_v5 = vsel %vm2514_vm2, %v2598_v15, %v9013_v59  ;;  %v9163_v19 = vld [vmem:[%s11699_s3 + $0x50] sm:$0xff] }
 0x160   :  { %v810_v46 = vmul.f32 %v782_v48, %v8562_v58  ;;  %v809_v4 = vmul.f32 %v778_v23, %v8567_v45  ;;  %6728 = vmatpush3.bf16.msra.mxu1 %v6727_v2  ;;  %v2587_v58 = vor.u32 %v2586_v31, %v2585_v26  ;;  %v2839_v3 = vadd.s32 1, %v9119_v41  ;;  %v9203_v48 = vld [vmem:[%s11699_s3 + $0x60] sm:$0xff] }
 0x161   :  { %2110 = vrot.lane.b32.xlu1 %v8966_v34, %s7474_s24  ;;  %2106 = vrot.lane.b32.xlu0 %v8966_v34, %s7475_s25  ;;  %v2590_v0 = vshll.u32 %v2589_v30, 23  ;;  %v2340_v59 = vsel %vm2338_vm6, %v9056_v28, %v2339_v36  ;;  %vm2838_vm7 = vc.u32 %v9134_v33, %v9118_v42  ;;  %v11742_v15 = vand.u32 2147483647, %v8613_v7 }
 0x162   :  { %v6706_v45 = vpack.c.bf16 %v810_v46, %v809_v4  ;;  %6729 = vmatprep.subr.bf16.mxu1 %v7473_v16  ;;  %v2594_v21 = vcvt.s32.f32 %v2587_v58  ;;  %v2615_v40 = vstv %s9107_s11  ;;  %v2840_v28 = vsel %vm2838_vm7, %v2839_v3, %v9119_v41 }
 0x163   :  { %v1051_v62 = vpop.permute.xlu1 %1050  ;;  %v1047_v37 = vpop.permute.xlu0 %1046  ;;  %v2591_v56 = vor.u32 4788187, %v2590_v0  ;;  %vm9179_vm8 = vcmp.le.f32.partialorder %v11742_v15, 0.7853982  ;;  %v2773_v49 = vstv %s9113_s13  ;;  %v2841_v14 = vadd.s32 %v2840_v28, %v2836_v18 }
 0x164   :  { %v1079_v25 = vmul.f32 %v9157_v47, %v1051_v62  ;;  %v1078_v43 = vmul.f32 %v9163_v19, %v1047_v37  ;;  %6707 = vmatpush3.bf16.msra.mxu0 %v6706_v45  ;;  %v3060_v11 = vadd.s32 1, %v5542_v55  ;;  %v2344_v26 = vsel %vm2337_vm5, %v2340_v59, %v2343_v53 }
 0x165   :  { %1849 = vrot.lane.b32.xlu1 %v8830_v54, %s7476_s1  ;;  %1845 = vrot.lane.b32.xlu0 %v8830_v54, %s7477_s0  ;;  %v2592_v35 = vand.u32 2147483647, %v2591_v56  ;;  %v2601_v50 = vsel %vm9179_vm8, 0, %v2599_v5  ;;  %v3042_v2 = vstv %s9127_s14  ;;  %v2842_v23 = vadd.s32 536870912, %v2841_v14  ;;  %s9439_s14 = sld [smem:[#allocation4 + $0xd]] }
 0x166   :  { %v6730_v36 = vpack.c.bf16 %v1079_v25, %v1078_v43  ;;  %6708 = vmatprep.subr.bf16.mxu0 %v7473_v16  ;;  %vm3061_vm9 = vcmp.gt.s32.totalorder %v3060_v11, 0  ;;  %v9211_v30 = vmul.f32 %v2773_v49, %v7525_v6  ;;  %v3050_v61 = vand.u32 2147483647, %v8982_v57  ;;  %v9267_v49 = vld [vmem:[%s11699_s3 + $0x78] sm:$0xff] }
 0x167   :  { %v790_v8 = vpop.permute.xlu1 %789  ;;  %v786_v32 = vpop.permute.xlu0 %785  ;;  %v2595_v39 = vmul.f32 %v2594_v21, %v2592_v35  ;;  %v3062_v13 = vsel %vm3061_vm9, %v3060_v11, 0  ;;  %v9215_v4 = vshrl.u32 %v2842_v23, 30  ;;  %v9218_v12 = vmul.f32 %v3042_v2, %v7525_v6 }
 0x168   :  { %v812_v41 = vmul.f32 %v9197_v60, %v790_v8  ;;  %v811_v10 = vmul.f32 %v9203_v48, %v786_v32  ;;  %6731 = vmatpush3.bf16.msra.mxu1 %v6730_v36  ;;  %v9220_v58 = vand.u32 31, %v3062_v13  ;;  %v2345_v18 = vsel %vm2335_vm4, nan, %v2344_v26 }
 0x169   :  { %2118 = vrot.lane.b32.xlu1 %v8966_v34, %s7476_s1  ;;  %2114 = vrot.lane.b32.xlu0 %v8966_v34, %s7477_s0  ;;  %v2596_v31 = vxor.u32 2147483648, %v2595_v39  ;;  %v9226_v55 = vand.u32 3, %v2601_v50  ;;  %v9229_v62 = vmul.f32 %v9070_v52, %v2615_v40  ;;  %v2844_v24 = vshll.u32 %v9215_v4, 30 }
 0x16a   :  { %v6709_v46 = vpack.c.bf16 %v812_v41, %v811_v10  ;;  %6732 = vmatprep.subr.bf16.mxu1 %v7473_v16  ;;  %v9242_v52 = vmul.f32 -0.5, %v9211_v30  ;;  %v3057_v21 = vand.u32 8388607, %v3050_v61  ;;  %v3065_v5 = vsub.s32 32, %v9220_v58 }
 0x16b   :  { %v1059_v0 = vpop.permute.xlu1 %1058  ;;  %v1055_v45 = vpop.permute.xlu0 %1054  ;;  %v2597_v3 = vsel %vm2514_vm2, %v2596_v31, %v2595_v39  ;;  %v9248_v43 = vsub.s32 %v2841_v14, %v2844_v24  ;;  %v9251_v59 = vmul.f32 -0.5, %v9218_v12  ;;  %v9254_v35 = vmul.f32 %v9019_v9, %v2345_v18  ;;  %v9273_v9 = vld [vmem:[%s11699_s3 + $0x70] sm:$0xff] }
 0x16c   :  { %v1081_v37 = vmul.f32 %v9197_v60, %v1059_v0  ;;  %v1080_v53 = vmul.f32 %v9203_v48, %v1055_v45  ;;  %6710 = vmatpush3.bf16.msra.mxu0 %v6709_v46  ;;  %v2600_v56 = vsel %vm9179_vm8, %v8613_v7, %v2597_v3  ;;  %vm2610_vm10 = vcmp.eq.s32.totalorder %v9226_v55, 2 }
 0x16d   :  { %1857 = vrot.lane.b32.xlu1 %v8830_v54, %s7478_s27  ;;  %1853 = vrot.lane.b32.xlu0 %v8830_v54, %s7479_s28  ;;  %7286 = vcosq.f32 %v2600_v56  ;;  %v9259_v40 = vadd.s32 %v9118_v42, %v9134_v33  ;;  %v3067_v28 = vshll.u32 %v11718_v27, %v9220_v58  ;;  %v3317_v36 = vstv %s9192_s26  ;;  %s9664_s26 = sld [smem:[#allocation2 + $0xd]] }
 0x16e   :  { %v6733_v25 = vpack.c.bf16 %v1081_v37, %v1080_v53  ;;  %6711 = vmatprep.subr.bf16.mxu0 %v7473_v16  ;;  %7288 = vsinq.f32 %v2600_v56  ;;  %vm2607_vm12 = vcmp.eq.s32.totalorder %v9226_v55, 0  ;;  %v2847_v42 = vsub.s32 0, %v9248_v43 }
 0x16f   :  { %v798_v15 = vpop.permute.xlu1 %797  ;;  %v794_v51 = vpop.permute.xlu0 %793  ;;  %v3068_v33 = vshrl.u32 %v11716_v29, %v3065_v5  ;;  %v3058_v8 = vor.u32 8388608, %v3057_v21  ;;  %v3070_v32 = vshll.u32 %v11716_v29, %v9220_v58  ;;  %v3071_v26 = vshrl.u32 %v11736_v38, %v3065_v5 }
 0x170   :  { %v814_v14 = vmul.f32 %v9267_v49, %v798_v15  ;;  %v813_v11 = vmul.f32 %v9273_v9, %v794_v51  ;;  %6734 = vmatpush3.bf16.msra.mxu1 %v6733_v25  ;;  %v3073_v39 = vshll.u32 %v11736_v38, %v9220_v58  ;;  %vm2606_vm13 = vcmp.lt.s32.totalorder %v9226_v55, 2 }
 0x171   :  { %2126 = vrot.lane.b32.xlu1 %v8966_v34, %s7478_s27  ;;  %2122 = vrot.lane.b32.xlu0 %v8966_v34, %s7479_s28  ;;  %v5536_v2 = vmin.u32 %v2847_v42, %v9248_v43  ;;  %v3074_v41 = vshrl.u32 %v11737_v20, %v3065_v5  ;;  %v3076_v10 = vshll.u32 %v11737_v20, %v9220_v58  ;;  %v9294_v46 = vshrl.u32 %v3062_v13, 5 }
 0x172   :  { %v6712_v50 = vpack.c.bf16 %v814_v14, %v813_v11  ;;  %6735 = vmatprep.subr.bf16.mxu1 %v7473_v16  ;;  %v9297_v0 = vshrl.u32 %v11718_v27, %v3065_v5  ;;  %v3077_v45 = vshrl.u32 %v11738_v1, %v3065_v5  ;;  %v9301_v18 = vmul.f32 %v3317_v36, %v7525_v6 }
 0x173   :  { %v1067_v23 = vpop.permute.xlu1 %1066  ;;  %v1063_v31 = vpop.permute.xlu0 %1062  ;;  %v2849_v53 = vclz %v5536_v2  ;;  %v9305_v56 = vor.u32 %v3068_v33, %v3067_v28  ;;  %vm2604_vm14 = vweird.f32 %v8613_v7  ;;  %v3079_v24 = vshll.u32 %v11738_v1, %v9220_v58  ;;  %v9323_v33 = vld [vmem:[%s11700_s4] sm:$0xff] }
 0x174   :  { %v1083_v3 = vmul.f32 %v9267_v49, %v1067_v23  ;;  %v1082_v37 = vmul.f32 %v9273_v9, %v1063_v31  ;;  %6713 = vmatpush3.bf16.msra.mxu0 %v6712_v50  ;;  %v9312_v13 = vor.u32 %v3077_v45, %v3076_v10  ;;  %v3080_v21 = vshrl.u32 %v11713_v44, %v3065_v5 }
 0x175   :  { %1865 = vrot.lane.b32.xlu1 %v8830_v54, %s7480_s29  ;;  %1861 = vrot.lane.b32.xlu0 %v8830_v54, %s7481_s30  ;;  %v9317_v25 = vshll.u32 %v3058_v8, 8  ;;  %v5537_v51 = vadd.s32 4294967294, %v2849_v53  ;;  %v3072_v28 = vor.u32 %v3071_v26, %v3070_v32  ;;  %v3075_v36 = vor.u32 %v3074_v41, %v3073_v39  ;;  %v9332_v8 = vld [vmem:[%s11699_s3 + $0x8] sm:$0xff]  ;;  %v9338_v26 = vld [vmem:[%s11699_s3] sm:$0xff] }
 0x176   :  { %v6736_v15 = vpack.c.bf16 %v1083_v3, %v1082_v37  ;;  %6738 = vmatprep.subr.bf16.mxu0 %v7473_v16  ;;  %v3081_v58 = vor.u32 %v3080_v21, %v3079_v24  ;;  %vm3082_vm15 = vcmp.lt.s32.totalorder %v9294_v46, 1  ;;  %vm3083_vm0 = vcmp.lt.s32.totalorder %v9294_v46, 2 }
 0x177   :  { %v7287_v14 = vpop.eup %7286  ;;  %v1280_v11 = vpop.permute.xlu1 %1279  ;;  %6045 = vmatmul.mubr.f32.vlgmr.msra.gmra.mrb[2].mxu0 %v9323_v33  ;;  %vm3085_vm1 = vcmp.lt.s32.totalorder %v9294_v46, 4  ;;  %vm5538_vm2 = vcmp.lt.s32.totalorder %v5537_v51, 0  ;;  %vm3084_vm3 = vcmp.lt.s32.totalorder %v9294_v46, 3  ;;  %v3090_v3 = vsel %vm3082_vm15, %v9305_v56, %v3072_v28 }
 0x178   :  { %v1276_v42 = vpop.permute.xlu0 %1275  ;;  %v7289_v5 = vpop.eup %7288  ;;  %v1338_v32 = vmul.f32 %v9332_v8, %v1280_v11  ;;  %6737 = vmatpush3.bf16.msra.mxu1 %v6736_v15  ;;  %v2611_v50 = vxor.u32 2147483648, %v7287_v14  ;;  %6114 = vmatprep.mubr.msk.f32.mxu0 %vm7484_vm11, %v11711_v17  ;;  %v2852_v41 = vsel %vm5538_vm2, 0, %v5537_v51  ;;  %v3091_v10 = vsel %vm3085_vm1, %v9312_v13, 920167782 }
 0x179   :  { %v1337_v39 = vmul.f32 %v9338_v26, %v1276_v42  ;;  %2134 = vrot.lane.b32.xlu1 %v8966_v34, %s7480_s29  ;;  %2130 = vrot.lane.b32.xlu0 %v8966_v34, %s7481_s30  ;;  %v2608_v2 = vxor.u32 2147483648, %v7289_v5  ;;  %v2853_v45 = vsub.s32 32, %v2852_v41  ;;  %v2854_v21 = vshll.u32 %v9248_v43, %v2852_v41 }
 0x17a   :  { %6762 = vmatprep.subr.bf16.mxu1 %v7473_v16  ;;  %v2612_v31 = vsel %vm2610_vm10, %v2611_v50, %v7289_v5  ;;  %v2857_v15 = vsub.s32 4294967266, %v2852_v41  ;;  %v3087_v51 = vsel %vm3085_vm1, %v3075_v36, 2102212464  ;;  %v3092_v5 = vsel %vm3084_vm3, %v3075_v36, %v3091_v10 }
 0x17b   :  { %v6739_v23 = vpack.c.bf16 %v1338_v32, %v1337_v39  ;;  %v1549_v37 = vpop.permute.xlu1 %1548  ;;  %6080 = vmatmul.mubr.f32.vlgmr.msra.gmra.mrb[2].mxu1 %v9323_v33  ;;  %v2609_v24 = vsel %vm2607_vm12, %v7287_v14, %v2608_v2  ;;  %v3095_v14 = vsel %vm3085_vm1, %v3081_v58, 1326507024  ;;  %v2855_v32 = vshrl.u32 %v9259_v40, %v2853_v45 }
 0x17c   :  { %v1545_v53 = vpop.permute.xlu0 %1544  ;;  %v1607_v11 = vmul.f32 %v9332_v8, %v1549_v37  ;;  %6149 = vmatprep.mubr.msk.f32.mxu1 %vm7484_vm11, %v11711_v17  ;;  %v2613_v43 = vsel %vm2606_vm13, %v2609_v24, %v2612_v31  ;;  %v2858_v39 = vadd.s32 127, %v2857_v15  ;;  %v3322_v50 = vand.u32 2139095040, %v9301_v18 }
 0x17d   :  { %v1606_v42 = vmul.f32 %v9338_v26, %v1545_v53  ;;  %6740 = vmatpush3.bf16.msra.mxu0 %v6739_v23  ;;  %1873 = vrot.lane.b32.xlu1 %v8830_v54, %s7482_s6  ;;  %v3086_v58 = vsel %vm3082_vm15, %v9297_v0, %v9305_v56  ;;  %v3088_v41 = vsel %vm3084_vm3, %v3072_v28, %v3087_v51  ;;  %v9396_v0 = vld [vmem:[%s11699_s3 + $0x18] sm:$0xff]  ;;  %vm2783_vm5 = vcmp.lt.s32.totalorder %v8819_v22, 0 }
 0x17e   :  { %1869 = vrot.lane.b32.xlu0 %v8830_v54, %s7483_s2  ;;  %6741 = vmatprep.subr.bf16.mxu0 %v7473_v16  ;;  %v3094_v54 = vsel %vm3082_vm15, %v3072_v28, %v3075_v36  ;;  %v2856_v40 = vor.u32 %v2855_v32, %v2854_v21  ;;  %v2859_v23 = vshll.u32 %v2858_v39, 23  ;;  %v3093_v31 = vsel %vm3083_vm0, %v3090_v3, %v3092_v5  ;;  %v9402_v28 = vld [vmem:[%s11699_s3 + $0x10] sm:$0xff] }
 0x17f   :  { %v6763_v2 = vpack.c.bf16 %v1607_v11, %v1606_v42  ;;  %v1288_v55 = vpop.permute.xlu1 %1287  ;;  %v3096_v45 = vsel %vm3084_vm3, %v9312_v13, %v3095_v14  ;;  %v2614_v3 = vsel %vm2604_vm14, nan, %v2613_v43  ;;  %v3089_v7 = vsel %vm3083_vm0, %v3086_v58, %v3088_v41 }
 0x180   :  { %v1284_v10 = vpop.permute.xlu0 %1283  ;;  %v1340_v56 = vmul.f32 %v9396_v0, %v1288_v55  ;;  %v3097_v13 = vsel %vm3083_vm0, %v3094_v54, %v3096_v45  ;;  %v2860_v37 = vor.u32 4788187, %v2859_v23  ;;  %v2863_v53 = vcvt.s32.f32 %v2856_v40 }
 0x181   :  { %v1339_v36 = vmul.f32 %v9402_v28, %v1284_v10  ;;  %6764 = vmatpush3.bf16.msra.mxu1 %v6763_v2  ;;  %2142 = vrot.lane.b32.xlu1 %v8966_v34, %s7482_s6  ;;  %v9414_v24 = vmul.u32.u64.low %v9317_v25, %v3097_v13  ;;  %v9415_v21 = vmul.u32.u64.high %v9317_v25, %v3097_v13, %v9414_v24  ;;  %v9430_v39 = vmul.f32 %v9229_v62, %v2614_v3  ;;  %v9452_v10 = vld [vmem:[%s11699_s3 + $0x28] sm:$0xff] }
 0x182   :  { %2138 = vrot.lane.b32.xlu0 %v8966_v34, %s7483_s2  ;;  %6765 = vmatprep.subr.bf16.mxu1 %v7473_v16  ;;  %v9421_v51 = vmul.u32.u64.low %v9317_v25, %v3093_v31  ;;  %v9422_v11 = vmul.u32.u64.high %v9317_v25, %v3093_v31, %v9421_v51  ;;  %v2776_v34 = vmul.f32 %v9242_v52, %v9211_v30  ;;  %v2861_v14 = vand.u32 2147483647, %v2860_v37 }
 0x183   :  { %v6742_v15 = vpack.c.bf16 %v1340_v56, %v1339_v36  ;;  %v1557_v42 = vpop.permute.xlu1 %1556  ;;  %v3323_v46 = vshrl.u32 %v3322_v50, 23  ;;  %v3105_v58 = vmul.u32 %v9317_v25, %v3089_v7  ;;  %v3045_v62 = vmul.f32 %v9251_v59, %v9218_v12  ;;  %v9458_v12 = vld [vmem:[%s11699_s3 + $0x20] sm:$0xff] }
 0x184   :  { %v1553_v5 = vpop.permute.xlu0 %1552  ;;  %v1609_v43 = vmul.f32 %v9396_v0, %v1557_v42  ;;  %v2864_v2 = vmul.f32 %v2863_v53, %v2861_v14  ;;  %vm3107_vm4 = vc.u32 %v9415_v21, %v9421_v51  ;;  %v3108_v52 = vadd.s32 1, %v9422_v11 }
 0x185   :  { %v1608_v32 = vmul.f32 %v9402_v28, %v1553_v5  ;;  %6743 = vmatpush3.bf16.msra.mxu0 %v6742_v15  ;;  %2355 = vrot.lane.b32.xlu1 %v9254_v35, %s7470_s18  ;;  %v5549_v50 = vadd.s32 4294967169, %v3323_v46  ;;  %v2867_v55 = vsub.s32 4, %v9215_v4  ;;  %vm9473_vm6 = vcmp.le.f32.partialorder %v2781_v63, 0.7853982 }
 0x186   :  { %2351 = vrot.lane.b32.xlu0 %v9254_v35, %s7468_s16  ;;  %6744 = vmatprep.subr.bf16.mxu0 %v7473_v16  ;;  %v2865_v25 = vxor.u32 2147483648, %v2864_v2  ;;  %v3109_v23 = vsel %vm3107_vm4, %v3108_v52, %v9422_v11  ;;  %v2777_v3 = vmul.f32 1.442695, %v2776_v34  ;;  %v3046_v13 = vmul.f32 1.442695, %v3045_v62 }
 0x187   :  { %v6766_v30 = vpack.c.bf16 %v1609_v43, %v1608_v32  ;;  %v1296_v41 = vpop.permute.xlu1 %1295  ;;  %v3329_v31 = vadd.s32 1, %v5549_v50  ;;  %v3110_v56 = vadd.s32 %v3109_v23, %v3105_v58  ;;  %v2868_v63 = vsel %vm2783_vm5, %v2867_v55, %v9215_v4  ;;  %v9504_v50 = vld [vmem:[%s11699_s3 + $0x38] sm:$0xff] }
 0x188   :  { %v1292_v54 = vpop.permute.xlu0 %1291  ;;  %v1342_v40 = vmul.f32 %v9452_v10, %v1296_v41  ;;  %v2866_v24 = vsel %vm2783_vm5, %v2865_v25, %v2864_v2  ;;  %v11710_v34 = vand.u32 2147483647, %v9301_v18  ;;  %v3586_v4 = vstv %s9439_s14 }
 0x189   :  { %v1341_v59 = vmul.f32 %v9458_v12, %v1292_v54  ;;  %6767 = vmatpush3.bf16.msra.mxu1 %v6766_v30  ;;  %2624 = vrot.lane.b32.xlu1 %v9430_v39, %s7470_s18  ;;  %vm3330_vm7 = vcmp.gt.s32.totalorder %v3329_v31, 0  ;;  %v3111_v15 = vadd.s32 536870912, %v3110_v56  ;;  %7290 = vpow2.f32 %v2777_v3  ;;  %v9510_v54 = vld [vmem:[%s11699_s3 + $0x30] sm:$0xff] }
 0x18a   :  { %2620 = vrot.lane.b32.xlu0 %v9430_v39, %s7468_s16  ;;  %6768 = vmatprep.subr.bf16.mxu1 %v7473_v16  ;;  %v3331_v7 = vsel %vm3330_vm7, %v3329_v31, 0  ;;  %v2869_v32 = vsel %vm9473_vm6, %v8819_v22, %v2866_v24  ;;  %v2870_v46 = vsel %vm9473_vm6, 0, %v2868_v63  ;;  %v2884_v30 = vstv %s9445_s21  ;;  %s9853_s21 = sld [smem:[#allocation6 + $0xc]] }
 0x18b   :  { %v6745_v36 = vpack.c.bf16 %v1342_v40, %v1341_v59  ;;  %v1565_v37 = vpop.permute.xlu1 %1564  ;;  %v9489_v5 = vshrl.u32 %v3111_v15, 30  ;;  %v3333_v14 = vand.u32 31, %v3331_v7  ;;  %7292 = vpow2.f32 %v3046_v13 }
 0x18c   :  { %v1561_v53 = vpop.permute.xlu0 %1560  ;;  %v1611_v11 = vmul.f32 %v9452_v10, %v1565_v37  ;;  %v3153_v55 = vstv %s9461_s7  ;;  %v9515_v40 = vmul.f32 %v3586_v4, %v7525_v6  ;;  %7294 = vcosq.f32 %v2869_v32  ;;  %s9858_s7 = sld [smem:[#allocation2 + $0xe]] }
 0x18d   :  { %v1610_v42 = vmul.f32 %v9458_v12, %v1561_v53  ;;  %6746 = vmatpush3.bf16.msra.mxu0 %v6745_v36  ;;  %2363 = vrot.lane.b32.xlu1 %v9254_v35, %s7469_s17  ;;  %v3113_v62 = vshll.u32 %v9489_v5, 30  ;;  %v3334_v52 = vsub.s32 32, %v3333_v14  ;;  %v9521_v59 = vand.u32 3, %v2870_v46 }
 0x18e   :  { %2359 = vrot.lane.b32.xlu0 %v9254_v35, %s7467_s15  ;;  %6747 = vmatprep.subr.bf16.mxu0 %v7473_v16  ;;  %v3326_v31 = vand.u32 8388607, %v11710_v34  ;;  %v9528_v36 = vshrl.u32 %v3331_v7, 5  ;;  %v3336_v3 = vshll.u32 %v11718_v27, %v3333_v14  ;;  %v3339_v63 = vshll.u32 %v11716_v29, %v3333_v14 }
 0x18f   :  { %v6769_v43 = vpack.c.bf16 %v1611_v11, %v1610_v42  ;;  %v1304_v2 = vpop.permute.xlu1 %1303  ;;  %v9523_v23 = vsub.s32 %v3110_v56, %v3113_v62  ;;  %v3337_v13 = vshrl.u32 %v11716_v29, %v3334_v52  ;;  %v3340_v56 = vshrl.u32 %v11736_v38, %v3334_v52 }
 0x190   :  { %v1300_v58 = vpop.permute.xlu0 %1299  ;;  %v1344_v41 = vmul.f32 %v9504_v50, %v1304_v2  ;;  %v3342_v15 = vshll.u32 %v11736_v38, %v3333_v14  ;;  %v3343_v7 = vshrl.u32 %v11737_v20, %v3334_v52  ;;  %v3345_v4 = vshll.u32 %v11737_v20, %v3333_v14 }
 0x191   :  { %v1343_v25 = vmul.f32 %v9510_v54, %v1300_v58  ;;  %6770 = vmatpush3.bf16.msra.mxu1 %v6769_v43  ;;  %2632 = vrot.lane.b32.xlu1 %v9430_v39, %s7469_s17  ;;  %v3116_v24 = vsub.s32 0, %v9523_v23  ;;  %7296 = vsinq.f32 %v2869_v32  ;;  %v3327_v46 = vor.u32 8388608, %v3326_v31  ;;  %v9556_v31 = vld [vmem:[%s11699_s3 + $0x48] sm:$0xff] }
 0x192   :  { %2628 = vrot.lane.b32.xlu0 %v9430_v39, %s7467_s15  ;;  %6771 = vmatprep.subr.bf16.mxu1 %v7473_v16  ;;  %v3335_v2 = vshrl.u32 %v11718_v27, %v3334_v52  ;;  %v3338_v62 = vor.u32 %v3337_v13, %v3336_v3  ;;  %vm3354_vm8 = vcmp.lt.s32.totalorder %v9528_v36, 4  ;;  %v3348_v34 = vshll.u32 %v11738_v1, %v3333_v14  ;;  %v9562_v13 = vld [vmem:[%s11699_s3 + $0x40] sm:$0xff] }
 0x193   :  { %v6748_v45 = vpack.c.bf16 %v1344_v41, %v1343_v25  ;;  %v1573_v37 = vpop.permute.xlu1 %1572  ;;  %v5543_v43 = vmin.u32 %v3116_v24, %v9523_v23  ;;  %v3346_v41 = vshrl.u32 %v11738_v1, %v3334_v52  ;;  %v3349_v32 = vshrl.u32 %v11713_v44, %v3334_v52  ;;  %v9551_v24 = vpop.eup %7290 }
 0x194   :  { %v1569_v53 = vpop.permute.xlu0 %1568  ;;  %v1613_v11 = vmul.f32 %v9504_v50, %v1573_v37  ;;  %v3344_v14 = vor.u32 %v3343_v7, %v3342_v15  ;;  %vm3351_vm9 = vcmp.lt.s32.totalorder %v9528_v36, 1  ;;  %vm3352_vm10 = vcmp.lt.s32.totalorder %v9528_v36, 2 }
 0x195   :  { %v1612_v42 = vmul.f32 %v9510_v54, %v1569_v53  ;;  %6749 = vmatpush3.bf16.msra.mxu0 %v6748_v45  ;;  %2371 = vrot.lane.b32.xlu1 %v9254_v35, %s7471_s19  ;;  %v3118_v37 = vclz %v5543_v43  ;;  %v3341_v53 = vor.u32 %v3340_v56, %v3339_v63  ;;  %v3347_v56 = vor.u32 %v3346_v41, %v3345_v4  ;;  %v9565_v52 = vpop.eup %7292 }
 0x196   :  { %2367 = vrot.lane.b32.xlu0 %v9254_v35, %s7472_s20  ;;  %6750 = vmatprep.subr.bf16.mxu0 %v7473_v16  ;;  %v9574_v43 = vshll.u32 %v3327_v46, 8  ;;  %v3350_v15 = vor.u32 %v3349_v32, %v3348_v34  ;;  %v3356_v7 = vsel %vm3354_vm8, %v3344_v14, 2102212464  ;;  %v9580_v4 = vpop.eup %7294  ;;  %vm3353_vm13 = vcmp.lt.s32.totalorder %v9528_v36, 3 }
 0x197   :  { %v6772_v58 = vpack.c.bf16 %v1613_v11, %v1612_v42  ;;  %v1312_v25 = vpop.permute.xlu1 %1311  ;;  %v3106_v11 = vadd.s32 %v9421_v51, %v9415_v21  ;;  %v5544_v42 = vadd.s32 4294967294, %v3118_v37  ;;  %v3355_v21 = vsel %vm3351_vm9, %v3335_v2, %v3338_v62 }
 0x198   :  { %v1308_v45 = vpop.permute.xlu0 %1307  ;;  %v1346_v3 = vmul.f32 %v9556_v31, %v1312_v25  ;;  %v3360_v51 = vsel %vm3354_vm8, %v3347_v56, 920167782  ;;  %vm2876_vm14 = vcmp.eq.s32.totalorder %v9521_v59, 0  ;;  %v3359_v37 = vsel %vm3351_vm9, %v3338_v62, %v3341_v53 }
 0x199   :  { %v1345_v63 = vmul.f32 %v9562_v13, %v1308_v45  ;;  %6773 = vmatpush3.bf16.msra.mxu1 %v6772_v58  ;;  %2640 = vrot.lane.b32.xlu1 %v9430_v39, %s7471_s19  ;;  %vm5545_vm12 = vcmp.lt.s32.totalorder %v5544_v42, 0  ;;  %vm3052_vm15 = vcmp.lt.s32.totalorder %v8982_v57, 0  ;;  %v3361_v62 = vsel %vm3353_vm13, %v3344_v14, %v3360_v51 }
 0x19a   :  { %2636 = vrot.lane.b32.xlu0 %v9430_v39, %s7472_s20  ;;  %6774 = vmatprep.subr.bf16.mxu1 %v7473_v16  ;;  %v3121_v45 = vsel %vm5545_vm12, 0, %v5544_v42  ;;  %v3363_v42 = vsel %vm3351_vm9, %v3341_v53, %v3344_v14  ;;  %vm9622_vm0 = vcmp.le.f32.partialorder %v3050_v61, 0.7853982  ;;  %vm2873_vm1 = vweird.f32 %v8819_v22 }
 0x19b   :  { %v6751_v25 = vpack.c.bf16 %v1346_v3, %v1345_v63  ;;  %v1581_v58 = vpop.permute.xlu1 %1580  ;;  %v3122_v2 = vsub.s32 32, %v3121_v45  ;;  %v3123_v32 = vshll.u32 %v9523_v23, %v3121_v45  ;;  %v3126_v3 = vsub.s32 4294967266, %v3121_v45 }
 0x19c   :  { %v1577_v41 = vpop.permute.xlu0 %1576  ;;  %v1615_v34 = vmul.f32 %v9556_v31, %v1581_v58  ;;  %v3357_v63 = vsel %vm3353_vm13, %v3341_v53, %v3356_v7  ;;  %v3364_v58 = vsel %vm3354_vm8, %v3350_v15, 1326507024  ;;  %v3362_v7 = vsel %vm3352_vm10, %v3359_v37, %v3361_v62 }
 0x19d   :  { %v1614_v46 = vmul.f32 %v9562_v13, %v1577_v41  ;;  %6752 = vmatpush3.bf16.msra.mxu0 %v6751_v25  ;;  %2379 = vrot.lane.b32.xlu1 %v9254_v35, %s7474_s24  ;;  %v7297_v41 = vpop.eup %7296  ;;  %v3124_v23 = vshrl.u32 %v3106_v11, %v3122_v2  ;;  %v3127_v45 = vadd.s32 127, %v3126_v3  ;;  %v3136_v53 = vsub.s32 4, %v9489_v5 }
 0x19e   :  { %2375 = vrot.lane.b32.xlu0 %v9254_v35, %s7475_s25  ;;  %6753 = vmatprep.subr.bf16.mxu0 %v7473_v16  ;;  %v3358_v2 = vsel %vm3352_vm10, %v3355_v21, %v3357_v63  ;;  %v9636_v3 = vmul.u32.u64.low %v9574_v43, %v3362_v7  ;;  %v9637_v61 = vmul.u32.u64.high %v9574_v43, %v3362_v7, %v9636_v3  ;;  %v2877_v62 = vxor.u32 2147483648, %v7297_v41 }
 0x19f   :  { %v6775_v25 = vpack.c.bf16 %v1615_v34, %v1614_v46  ;;  %v1320_v17 = vpop.permute.xlu1 %1319  ;;  %v3365_v34 = vsel %vm3353_vm13, %v3347_v56, %v3364_v58  ;;  %vm2879_vm2 = vcmp.eq.s32.totalorder %v9521_v59, 2  ;;  %v3591_v36 = vand.u32 2139095040, %v9515_v40 }
 0x1a0   :  { %v1316_v44 = vpop.permute.xlu0 %1315  ;;  %v1348_v46 = vmul.f32 %v9157_v47, %v1320_v17  ;;  %v3366_v14 = vsel %vm3352_vm10, %v3363_v42, %v3365_v34  ;;  %v3125_v17 = vor.u32 %v3124_v23, %v3123_v32  ;;  %v2880_v42 = vxor.u32 2147483648, %v9580_v4 }
 0x1a1   :  { %v1347_v51 = vmul.f32 %v9163_v19, %v1316_v44  ;;  %6776 = vmatpush3.bf16.msra.mxu1 %v6775_v25  ;;  %2648 = vrot.lane.b32.xlu1 %v9430_v39, %s7474_s24  ;;  %v3128_v44 = vshll.u32 %v3127_v45, 23  ;;  %v9627_v11 = vmul.u32.u64.low %v9574_v43, %v3366_v14  ;;  %v9628_v15 = vmul.u32.u64.high %v9574_v43, %v3366_v14, %v9627_v11 }
 0x1a2   :  { %2644 = vrot.lane.b32.xlu0 %v9430_v39, %s7475_s25  ;;  %6777 = vmatprep.subr.bf16.mxu1 %v7473_v16  ;;  %v3132_v23 = vcvt.s32.f32 %v3125_v17  ;;  %vm2875_vm3 = vcmp.lt.s32.totalorder %v9521_v59, 2  ;;  %v3137_v63 = vsel %vm3052_vm15, %v3136_v53, %v9489_v5  ;;  %v3377_v7 = vadd.s32 1, %v9637_v61 }
 0x1a3   :  { %v6754_v37 = vpack.c.bf16 %v1348_v46, %v1347_v51  ;;  %v1589_v25 = vpop.permute.xlu1 %1588  ;;  %v3129_v58 = vor.u32 4788187, %v3128_v44  ;;  %vm3376_vm4 = vc.u32 %v9628_v15, %v9636_v3  ;;  %v3592_v46 = vshrl.u32 %v3591_v36, 23 }
 0x1a4   :  { %v1585_v32 = vpop.permute.xlu0 %1584  ;;  %v1617_v45 = vmul.f32 %v9157_v47, %v1589_v25  ;;  %v3374_v47 = vmul.u32 %v9574_v43, %v3358_v2  ;;  %v2878_v43 = vsel %vm2876_vm14, %v9580_v4, %v2877_v62  ;;  %v2881_v17 = vsel %vm2879_vm2, %v2880_v42, %v7297_v41 }
 0x1a5   :  { %v1616_v34 = vmul.f32 %v9163_v19, %v1585_v32  ;;  %6755 = vmatpush3.bf16.msra.mxu0 %v6754_v37  ;;  %2387 = vrot.lane.b32.xlu1 %v9254_v35, %s7476_s1  ;;  %v3130_v21 = vand.u32 2147483647, %v3129_v58  ;;  %v3588_v11 = vand.u32 2147483647, %v9515_v40  ;;  %v3378_v37 = vsel %vm3376_vm4, %v3377_v7, %v9637_v61 }
 0x1a6   :  { %2383 = vrot.lane.b32.xlu0 %v9254_v35, %s7477_s0  ;;  %6756 = vmatprep.subr.bf16.mxu0 %v7473_v16  ;;  %v5556_v4 = vadd.s32 4294967169, %v3592_v46  ;;  %v2885_v41 = vmul.f32 %v9551_v24, %v2884_v30  ;;  %v9685_v25 = vmul.f32 %v9565_v52, %v3153_v55  ;;  %v3379_v32 = vadd.s32 %v3378_v37, %v3374_v47 }
 0x1a7   :  { %v6778_v19 = vpack.c.bf16 %v1617_v45, %v1616_v34  ;;  %v1328_v51 = vpop.permute.xlu1 %1327  ;;  %v3133_v44 = vmul.f32 %v3132_v23, %v3130_v21  ;;  %v3139_v61 = vsel %vm9622_vm0, 0, %v3137_v63  ;;  %v3311_v42 = vstv %s9631_s23  ;;  %s10327_s23 = sld [smem:[#allocation6 + $0xe]] }
 0x1a8   :  { %v1324_v14 = vpop.permute.xlu0 %1323  ;;  %v1350_v5 = vmul.f32 %v9197_v60, %v1328_v51  ;;  %v3598_v58 = vadd.s32 1, %v5556_v4  ;;  %v2882_v34 = vsel %vm2875_vm3, %v2878_v43, %v2881_v17  ;;  %v3380_v24 = vadd.s32 536870912, %v3379_v32 }
 0x1a9   :  { %v1349_v53 = vmul.f32 %v9203_v48, %v1324_v14  ;;  %6779 = vmatpush3.bf16.msra.mxu1 %v6778_v19  ;;  %2656 = vrot.lane.b32.xlu1 %v9430_v39, %s7476_s1  ;;  %v3134_v2 = vxor.u32 2147483648, %v3133_v44  ;;  %v3595_v55 = vand.u32 8388607, %v3588_v11  ;;  %v9706_v59 = vand.u32 3, %v3139_v61 }
 0x1aa   :  { %2652 = vrot.lane.b32.xlu0 %v9430_v39, %s7477_s0  ;;  %6780 = vmatprep.subr.bf16.mxu1 %v7473_v16  ;;  %vm3599_vm5 = vcmp.gt.s32.totalorder %v3598_v58, 0  ;;  %v9708_v47 = vshrl.u32 %v3380_v24, 30  ;;  %v9712_v56 = vmul.f32 %v3311_v42, %v7525_v6  ;;  %v2883_v46 = vsel %vm2873_vm1, nan, %v2882_v34 }
 0x1ab   :  { %v6757_v62 = vpack.c.bf16 %v1350_v5, %v1349_v53  ;;  %v1597_v23 = vpop.permute.xlu1 %1596  ;;  %v3135_v30 = vsel %vm3052_vm15, %v3134_v2, %v3133_v44  ;;  %v3580_v14 = vstv %s9664_s26  ;;  %v3596_v43 = vor.u32 8388608, %v3595_v55  ;;  %s10339_s26 = sld [smem:[#allocation6 + $0xf]] }
 0x1ac   :  { %v1593_v45 = vpop.permute.xlu0 %1592  ;;  %v1619_v52 = vmul.f32 %v9197_v60, %v1597_v23  ;;  %v3138_v21 = vsel %vm9622_vm0, %v8982_v57, %v3135_v30  ;;  %v3600_v60 = vsel %vm3599_vm5, %v3598_v58, 0  ;;  %v3382_v51 = vshll.u32 %v9708_v47, 30 }
 0x1ad   :  { %v1618_v36 = vmul.f32 %v9203_v48, %v1593_v45  ;;  %6758 = vmatpush3.bf16.msra.mxu0 %v6757_v62  ;;  %2395 = vrot.lane.b32.xlu1 %v9254_v35, %s7478_s27  ;;  %7298 = vcosq.f32 %v3138_v21  ;;  %v3602_v19 = vand.u32 31, %v3600_v60  ;;  %v3855_v53 = vstv %s9673_s8  ;;  %s10760_s8 = sld [smem:[#allocation6 + $0x10]] }
 0x1ae   :  { %2391 = vrot.lane.b32.xlu0 %v9254_v35, %s7479_s28  ;;  %6759 = vmatprep.subr.bf16.mxu0 %v7473_v16  ;;  %7300 = vsinq.f32 %v3138_v21  ;;  %vm3144_vm6 = vcmp.lt.s32.totalorder %v9706_v59, 2  ;;  %vm3145_vm7 = vcmp.eq.s32.totalorder %v9706_v59, 0  ;;  %vm3148_vm8 = vcmp.eq.s32.totalorder %v9706_v59, 2 }
 0x1af   :  { %v6781_v48 = vpack.c.bf16 %v1619_v52, %v1618_v36  ;;  %v1336_v63 = vpop.permute.xlu1 %1335  ;;  %v3603_v5 = vsub.s32 32, %v3602_v19  ;;  %v9728_v22 = vsub.s32 %v3379_v32, %v3382_v51  ;;  %v9730_v37 = vshrl.u32 %v3600_v60, 5 }
 0x1b0   :  { %v1332_v7 = vpop.permute.xlu0 %1331  ;;  %v1352_v17 = vmul.f32 %v9267_v49, %v1336_v63  ;;  %v9733_v2 = vmul.f32 %v2885_v41, %v2883_v46  ;;  %v3605_v62 = vshll.u32 %v11718_v27, %v3602_v19  ;;  %vm3142_vm9 = vweird.f32 %v8982_v57 }
 0x1b1   :  { %v1351_v44 = vmul.f32 %v9273_v9, %v1332_v7  ;;  %6782 = vmatpush3.bf16.msra.mxu1 %v6781_v48  ;;  %2664 = vrot.lane.b32.xlu1 %v9430_v39, %s7478_s27  ;;  %v3606_v61 = vshrl.u32 %v11716_v29, %v3603_v5  ;;  %v9740_v23 = vadd.s32 %v9636_v3, %v9628_v15  ;;  %v3385_v32 = vsub.s32 0, %v9728_v22 }
 0x1b2   :  { %2660 = vrot.lane.b32.xlu0 %v9430_v39, %s7479_s28  ;;  %6783 = vmatprep.subr.bf16.mxu1 %v7473_v16  ;;  %v9743_v45 = vshll.u32 %v3596_v43, 8  ;;  %v9746_v34 = vmul.f32 %v3855_v53, %v7525_v6  ;;  %v3608_v24 = vshll.u32 %v11716_v29, %v3602_v19  ;;  %v3609_v55 = vshrl.u32 %v11736_v38, %v3603_v5 }
 0x1b3   :  { %v6760_v4 = vpack.c.bf16 %v1352_v17, %v1351_v44  ;;  %v1605_v42 = vpop.permute.xlu1 %1604  ;;  %v5550_v15 = vmin.u32 %v3385_v32, %v9728_v22  ;;  %v3611_v3 = vshll.u32 %v11736_v38, %v3602_v19  ;;  %v3612_v52 = vshrl.u32 %v11737_v20, %v3603_v5 }
 0x1b4   :  { %v1601_v58 = vpop.permute.xlu0 %1600  ;;  %v1621_v41 = vmul.f32 %v9267_v49, %v1605_v42  ;;  %vm3620_vm10 = vcmp.lt.s32.totalorder %v9730_v37, 1  ;;  %v3607_v36 = vor.u32 %v3606_v61, %v3605_v62  ;;  %v3614_v21 = vshll.u32 %v11737_v20, %v3602_v19 }
 0x1b5   :  { %v1620_v30 = vmul.f32 %v9273_v9, %v1601_v58  ;;  %6761 = vmatpush3.bf16.msra.mxu0 %v6760_v4  ;;  %2403 = vrot.lane.b32.xlu1 %v9254_v35, %s7480_s29  ;;  %v3604_v9 = vshrl.u32 %v11718_v27, %v3603_v5  ;;  %v3387_v7 = vclz %v5550_v15  ;;  %v3615_v46 = vshrl.u32 %v11738_v1, %v3603_v5 }
 0x1b6   :  { %2399 = vrot.lane.b32.xlu0 %v9254_v35, %s7481_s30  ;;  %6786 = vmatprep.subr.bf16.mxu0 %v7473_v16  ;;  %v3617_v51 = vshll.u32 %v11738_v1, %v3602_v19  ;;  %v11749_v43 = vmov 1326507024   ;;  %v11750_v61 = vmov 0.0   ;;  %v3610_v42 = vor.u32 %v3609_v55, %v3608_v24 }
 0x1b7   :  { %v6784_v49 = vpack.c.bf16 %v1621_v41, %v1620_v30  ;;  %v7299_v60 = vpop.eup %7298  ;;  %v1818_v48 = vpop.permute.xlu1 %1817  ;;  %v3618_v17 = vshrl.u32 %v11749_v43, %v3603_v5  ;;  %v5551_v58 = vadd.s32 4294967294, %v3387_v7  ;;  %v3613_v5 = vor.u32 %v3612_v52, %v3611_v3 }
 0x1b8   :  { %v1814_v63 = vpop.permute.xlu0 %1813  ;;  %6115 = vmatmul.mubr.f32.vlgmr.msra.gmra.mrb[4].mxu0 %v9323_v33  ;;  %v7301_v44 = vpop.eup %7300  ;;  %v1876_v53 = vmul.f32 %v9332_v8, %v1818_v48  ;;  %v3149_v62 = vxor.u32 2147483648, %v7299_v60  ;;  %vm3621_vm12 = vcmp.lt.s32.totalorder %v9730_v37, 2  ;;  %v3616_v30 = vor.u32 %v3615_v46, %v3614_v21 }
 0x1b9   :  { %v1875_v4 = vmul.f32 %v9338_v26, %v1814_v63  ;;  %6785 = vmatpush3.bf16.msra.mxu1 %v6784_v49  ;;  %6184 = vmatprep.mubr.msk.f32.mxu0 %vm7484_vm11, %v11750_v61  ;;  %v3146_v19 = vxor.u32 2147483648, %v7301_v44  ;;  %vm3623_vm13 = vcmp.lt.s32.totalorder %v9730_v37, 4  ;;  %vm5552_vm14 = vcmp.lt.s32.totalorder %v5551_v58, 0 }
 0x1ba   :  { %2672 = vrot.lane.b32.xlu1 %v9430_v39, %s7480_s29  ;;  %2668 = vrot.lane.b32.xlu0 %v9430_v39, %s7481_s30  ;;  %v3150_v41 = vsel %vm3148_vm8, %v3149_v62, %v7301_v44  ;;  %v3619_v3 = vor.u32 %v3618_v17, %v3617_v51  ;;  %v3625_v52 = vsel %vm3623_vm13, %v3613_v5, 2102212464  ;;  %vm3622_vm15 = vcmp.lt.s32.totalorder %v9730_v37, 3 }
 0x1bb   :  { %v6787_v32 = vpack.c.bf16 %v1876_v53, %v1875_v4  ;;  %6810 = vmatprep.subr.bf16.mxu1 %v7473_v16  ;;  %v2087_v24 = vpop.permute.xlu1 %2086  ;;  %v3147_v15 = vsel %vm3145_vm7, %v7299_v60, %v3146_v19  ;;  %v3624_v7 = vsel %vm3620_vm10, %v3604_v9, %v3607_v36  ;;  %v3628_v46 = vsel %vm3620_vm10, %v3607_v36, %v3610_v42 }
 0x1bc   :  { %v2083_v55 = vpop.permute.xlu0 %2082  ;;  %6150 = vmatmul.mubr.f32.vlgmr.msra.gmra.mrb[4].mxu1 %v9323_v33  ;;  %v2145_v49 = vmul.f32 %v9332_v8, %v2087_v24  ;;  %v3151_v21 = vsel %vm3144_vm6, %v3147_v15, %v3150_v41  ;;  %v3390_v33 = vsel %vm5552_vm14, 0, %v5551_v58  ;;  %v3626_v44 = vsel %vm3622_vm15, %v3610_v42, %v3625_v52 }
 0x1bd   :  { %v2144_v48 = vmul.f32 %v9338_v26, %v2083_v55  ;;  %6788 = vmatpush3.bf16.msra.mxu0 %v6787_v32  ;;  %6219 = vmatprep.mubr.msk.f32.mxu1 %vm7484_vm11, %v11750_v61  ;;  %v3391_v60 = vsub.s32 32, %v3390_v33  ;;  %v3392_v63 = vshll.u32 %v9728_v22, %v3390_v33  ;;  %v3395_v8 = vsub.s32 4294967266, %v3390_v33 }
 0x1be   :  { %2411 = vrot.lane.b32.xlu1 %v9254_v35, %s7482_s6  ;;  %2407 = vrot.lane.b32.xlu0 %v9254_v35, %s7483_s2  ;;  %v3152_v59 = vsel %vm3142_vm9, nan, %v3151_v21  ;;  %v3629_v53 = vsel %vm3623_vm13, %v3616_v30, 920167782  ;;  %v3632_v36 = vsel %vm3620_vm10, %v3610_v42, %v3613_v5  ;;  %v3633_v58 = vsel %vm3623_vm13, %v3619_v3, 1326507024 }
 0x1bf   :  { %v6811_v26 = vpack.c.bf16 %v2145_v49, %v2144_v48  ;;  %6789 = vmatprep.subr.bf16.mxu0 %v7473_v16  ;;  %v1826_v51 = vpop.permute.xlu1 %1825  ;;  %v3393_v17 = vshrl.u32 %v9740_v23, %v3391_v60  ;;  %v3396_v22 = vadd.s32 127, %v3395_v8  ;;  %v3630_v9 = vsel %vm3622_vm15, %v3613_v5, %v3629_v53 }
 0x1c0   :  { %v1822_v35 = vpop.permute.xlu0 %1821  ;;  %v1878_v57 = vmul.f32 %v9396_v0, %v1826_v51  ;;  %v3631_v19 = vsel %vm3621_vm12, %v3628_v46, %v3630_v9  ;;  %v3634_v42 = vsel %vm3622_vm15, %v3616_v30, %v3633_v58  ;;  %v3627_v52 = vsel %vm3621_vm12, %v3624_v7, %v3626_v44 }
 0x1c1   :  { %v1877_v4 = vmul.f32 %v9402_v28, %v1822_v35  ;;  %6812 = vmatpush3.bf16.msra.mxu1 %v6811_v26  ;;  %v3394_v23 = vor.u32 %v3393_v17, %v3392_v63  ;;  %v3397_v62 = vshll.u32 %v3396_v22, 23  ;;  %v3635_v3 = vsel %vm3621_vm12, %v3632_v36, %v3634_v42 }
 0x1c2   :  { %2680 = vrot.lane.b32.xlu1 %v9430_v39, %s7482_s6  ;;  %2676 = vrot.lane.b32.xlu0 %v9430_v39, %s7483_s2  ;;  %v9827_v5 = vmul.u32.u64.low %v9743_v45, %v3631_v19  ;;  %v9828_v41 = vmul.u32.u64.high %v9743_v45, %v3631_v19, %v9827_v5  ;;  %v9838_v48 = vmul.u32.u64.low %v9743_v45, %v3635_v3  ;;  %v9839_v21 = vmul.u32.u64.high %v9743_v45, %v3635_v3, %v9838_v48 }
 0x1c3   :  { %v6790_v32 = vpack.c.bf16 %v1878_v57, %v1877_v4  ;;  %6813 = vmatprep.subr.bf16.mxu1 %v7473_v16  ;;  %v2095_v39 = vpop.permute.xlu1 %2094  ;;  %v3398_v55 = vor.u32 4788187, %v3397_v62  ;;  %v3401_v15 = vcvt.s32.f32 %v3394_v23  ;;  %v9846_v33 = vmul.f32 %v9685_v25, %v3152_v59 }
 0x1c4   :  { %v2091_v24 = vpop.permute.xlu0 %2090  ;;  %v2147_v49 = vmul.f32 %v9396_v0, %v2095_v39  ;;  %v3313_v37 = vmul.f32 -0.5, %v9712_v56  ;;  %v3581_v0 = vmul.f32 %v3580_v14, %v7525_v6  ;;  %v3643_v63 = vmul.u32 %v9743_v45, %v3627_v52 }
 0x1c5   :  { %v2146_v30 = vmul.f32 %v9402_v28, %v2091_v24  ;;  %6791 = vmatpush3.bf16.msra.mxu0 %v6790_v32  ;;  %v3399_v60 = vand.u32 2147483647, %v3398_v55  ;;  %v3646_v8 = vadd.s32 1, %v9828_v41  ;;  %v3860_v26 = vand.u32 2139095040, %v9746_v34 }
 0x1c6   :  { %2893 = vrot.lane.b32.xlu1 %v9733_v2, %s7470_s18  ;;  %2889 = vrot.lane.b32.xlu0 %v9733_v2, %s7468_s16  ;;  %vm3645_vm0 = vc.u32 %v9839_v21, %v9827_v5  ;;  %v3314_v45 = vmul.f32 %v3313_v37, %v9712_v56  ;;  %v3582_v51 = vmul.f32 -0.5, %v3581_v0  ;;  %v3405_v4 = vsub.s32 4, %v9708_v47 }
 0x1c7   :  { %v6814_v28 = vpack.c.bf16 %v2147_v49, %v2146_v30  ;;  %6792 = vmatprep.subr.bf16.mxu0 %v7473_v16  ;;  %v1834_v7 = vpop.permute.xlu1 %1833  ;;  %v3402_v14 = vmul.f32 %v3401_v15, %v3399_v60  ;;  %v3647_v35 = vsel %vm3645_vm0, %v3646_v8, %v9828_v41  ;;  %v3861_v17 = vshrl.u32 %v3860_v26, 23 }
 0x1c8   :  { %v1830_v25 = vpop.permute.xlu0 %1829  ;;  %v1880_v59 = vmul.f32 %v9452_v10, %v1834_v7  ;;  %v3648_v44 = vadd.s32 %v3647_v35, %v3643_v63  ;;  %v3857_v9 = vand.u32 2147483647, %v9746_v34  ;;  %v3315_v58 = vmul.f32 1.442695, %v3314_v45 }
 0x1c9   :  { %v1879_v46 = vmul.f32 %v9458_v12, %v1830_v25  ;;  %6815 = vmatpush3.bf16.msra.mxu1 %v6814_v28  ;;  %v5563_v36 = vadd.s32 4294967169, %v3861_v17  ;;  %v3403_v62 = vxor.u32 2147483648, %v3402_v14  ;;  %vm3321_vm1 = vcmp.lt.s32.totalorder %v9301_v18, 0 }
 0x1ca   :  { %3162 = vrot.lane.b32.xlu1 %v9846_v33, %s7470_s18  ;;  %3158 = vrot.lane.b32.xlu0 %v9846_v33, %s7468_s16  ;;  %v3649_v19 = vadd.s32 536870912, %v3648_v44  ;;  %v11751_v42 = vand.u32 2147483647, %v9301_v18  ;;  %v3422_v39 = vstv %s9853_s21  ;;  %v3406_v52 = vsel %vm3321_vm1, %v3405_v4, %v9708_v47  ;;  %s11317_s21 = sld [smem:[#allocation6 + $0x12]] }
 0x1cb   :  { %v6793_v22 = vpack.c.bf16 %v1880_v59, %v1879_v46  ;;  %6816 = vmatprep.subr.bf16.mxu1 %v7473_v16  ;;  %v2103_v53 = vpop.permute.xlu1 %2102  ;;  %v3867_v32 = vadd.s32 1, %v5563_v36  ;;  %v3849_v3 = vstv %s9858_s7  ;;  %v3864_v49 = vand.u32 8388607, %v3857_v9 }
 0x1cc   :  { %v2099_v57 = vpop.permute.xlu0 %2098  ;;  %v2149_v23 = vmul.f32 %v9452_v10, %v2103_v53  ;;  %v3583_v10 = vmul.f32 %v3582_v51, %v3581_v0  ;;  %vm9887_vm2 = vcmp.le.f32.partialorder %v11751_v42, 0.7853982  ;;  %v3650_v24 = vshrl.u32 %v3649_v19, 30 }
 0x1cd   :  { %v2148_v56 = vmul.f32 %v9458_v12, %v2099_v57  ;;  %6794 = vmatpush3.bf16.msra.mxu0 %v6793_v22  ;;  %vm3868_vm3 = vcmp.gt.s32.totalorder %v3867_v32, 0  ;;  %v3404_v37 = vsel %vm3321_vm1, %v3403_v62, %v3402_v14  ;;  %7302 = vpow2.f32 %v3315_v58 }
 0x1ce   :  { %2901 = vrot.lane.b32.xlu1 %v9733_v2, %s7469_s17  ;;  %2897 = vrot.lane.b32.xlu0 %v9733_v2, %s7467_s15  ;;  %v3651_v60 = vshll.u32 %v3650_v24, 30  ;;  %v3584_v47 = vmul.f32 1.442695, %v3583_v10  ;;  %vm3590_vm4 = vcmp.lt.s32.totalorder %v9515_v40, 0  ;;  %v3869_v0 = vsel %vm3868_vm3, %v3867_v32, 0 }
 0x1cf   :  { %v6817_v12 = vpack.c.bf16 %v2149_v23, %v2148_v56  ;;  %6795 = vmatprep.subr.bf16.mxu0 %v7473_v16  ;;  %v1842_v55 = vpop.permute.xlu1 %1841  ;;  %v3408_v63 = vsel %vm9887_vm2, 0, %v3406_v52  ;;  %v9913_v26 = vmul.f32 %v3849_v3, %v7525_v6  ;;  %v3407_v59 = vsel %vm9887_vm2, %v9301_v18, %v3404_v37 }
 0x1d0   :  { %v1838_v15 = vpop.permute.xlu0 %1837  ;;  %v1882_v30 = vmul.f32 %v9504_v50, %v1842_v55  ;;  %v9910_v8 = vsub.s32 %v3648_v44, %v3651_v60  ;;  %v3674_v46 = vsub.s32 4, %v3650_v24  ;;  %v3865_v14 = vor.u32 8388608, %v3864_v49 }
 0x1d1   :  { %v1881_v48 = vmul.f32 %v9510_v54, %v1838_v15  ;;  %6818 = vmatpush3.bf16.msra.mxu1 %v6817_v12  ;;  %v3871_v45 = vand.u32 31, %v3869_v0  ;;  %v4124_v22 = vstv %s9875_s10  ;;  %v9926_v44 = vand.u32 3, %v3408_v63  ;;  %s10079_s10 = sld [smem:[#allocation4 + $0x10]] }
 0x1d2   :  { %3170 = vrot.lane.b32.xlu1 %v9846_v33, %s7469_s17  ;;  %3166 = vrot.lane.b32.xlu0 %v9846_v33, %s7467_s15  ;;  %v3654_v17 = vsub.s32 0, %v9910_v8  ;;  %7304 = vpow2.f32 %v3584_v47  ;;  %v3691_v53 = vstv %s9882_s9  ;;  %v3644_v56 = vadd.s32 %v9827_v5, %v9839_v21  ;;  %s10502_s9 = sld [smem:[#allocation2 + $0x10]] }
 0x1d3   :  { %v6796_v28 = vpack.c.bf16 %v1882_v30, %v1881_v48  ;;  %6819 = vmatprep.subr.bf16.mxu1 %v7473_v16  ;;  %v2111_v7 = vpop.permute.xlu1 %2110  ;;  %v3872_v57 = vsub.s32 32, %v3871_v45  ;;  %7306 = vcosq.f32 %v3407_v59  ;;  %v9938_v62 = vsel %vm3590_vm4, %v3674_v46, %v3650_v24 }
 0x1d4   :  { %v2107_v25 = vpop.permute.xlu0 %2106  ;;  %v2151_v51 = vmul.f32 %v9504_v50, %v2111_v7  ;;  %v5557_v50 = vmin.u32 %v3654_v17, %v9910_v8  ;;  %v9940_v19 = vshll.u32 %v3865_v14, 8  ;;  %v9943_v58 = vmul.f32 %v4124_v22, %v7525_v6 }
 0x1d5   :  { %v2150_v35 = vmul.f32 %v9510_v54, %v2107_v25  ;;  %6797 = vmatpush3.bf16.msra.mxu0 %v6796_v28  ;;  %v9932_v54 = vmul.f32 -0.5, %v9913_v26  ;;  %v3874_v42 = vshll.u32 %v11718_v27, %v3871_v45  ;;  %7308 = vsinq.f32 %v3407_v59 }
 0x1d6   :  { %2909 = vrot.lane.b32.xlu1 %v9733_v2, %s7471_s19  ;;  %2905 = vrot.lane.b32.xlu0 %v9733_v2, %s7472_s20  ;;  %v3656_v12 = vclz %v5557_v50  ;;  %v3875_v5 = vshrl.u32 %v11716_v29, %v3872_v57  ;;  %v3877_v21 = vshll.u32 %v11716_v29, %v3871_v45  ;;  %v3878_v41 = vshrl.u32 %v11736_v38, %v3872_v57 }
 0x1d7   :  { %v6820_v4 = vpack.c.bf16 %v2151_v51, %v2150_v35  ;;  %6798 = vmatprep.subr.bf16.mxu0 %v7473_v16  ;;  %v1850_v36 = vpop.permute.xlu1 %1849  ;;  %v9956_v15 = vshrl.u32 %v3869_v0, 5  ;;  %v3883_v52 = vshll.u32 %v11737_v20, %v3871_v45  ;;  %v9959_v3 = vpop.eup %7302  ;;  %v3880_v48 = vshll.u32 %v11736_v38, %v3871_v45 }
 0x1d8   :  { %v1846_v23 = vpop.permute.xlu0 %1845  ;;  %v1884_v10 = vmul.f32 %v9556_v31, %v1850_v36  ;;  %v5558_v55 = vadd.s32 4294967294, %v3656_v12  ;;  %v3881_v37 = vshrl.u32 %v11737_v20, %v3872_v57  ;;  %v3884_v60 = vshrl.u32 %v11738_v1, %v3872_v57 }
 0x1d9   :  { %v1883_v32 = vmul.f32 %v9562_v13, %v1846_v23  ;;  %6821 = vmatpush3.bf16.msra.mxu1 %v6820_v4  ;;  %v9965_v47 = vshll.u32 %v11738_v1, %v3871_v45  ;;  %v3873_v63 = vshrl.u32 %v11718_v27, %v3872_v57  ;;  %v3876_v25 = vor.u32 %v3875_v5, %v3874_v42  ;;  %v9992_v23 = vld [vmem:[%s11699_s3 + $0x50] sm:$0xff] }
 0x1da   :  { %3178 = vrot.lane.b32.xlu1 %v9846_v33, %s7471_s19  ;;  %3174 = vrot.lane.b32.xlu0 %v9846_v33, %s7472_s20  ;;  %vm5559_vm5 = vcmp.lt.s32.totalorder %v5558_v55, 0  ;;  %v3879_v59 = vor.u32 %v3878_v41, %v3877_v21  ;;  %v3887_v46 = vshrl.u32 %v11749_v43, %v3872_v57  ;;  %v3885_v45 = vor.u32 %v3884_v60, %v3883_v52  ;;  %v9986_v57 = vld [vmem:[%s11699_s3 + $0x58] sm:$0xff] }
 0x1db   :  { %v6799_v24 = vpack.c.bf16 %v1884_v10, %v1883_v32  ;;  %6822 = vmatprep.subr.bf16.mxu1 %v7473_v16  ;;  %v2119_v49 = vpop.permute.xlu1 %2118  ;;  %v3659_v7 = vsel %vm5559_vm5, 0, %v5558_v55  ;;  %v3882_v4 = vor.u32 %v3881_v37, %v3880_v48  ;;  %vm3889_vm6 = vcmp.lt.s32.totalorder %v9956_v15, 1 }
 0x1dc   :  { %v2115_v30 = vpop.permute.xlu0 %2114  ;;  %v2153_v28 = vmul.f32 %v9556_v31, %v2119_v49  ;;  %v3660_v31 = vsub.s32 32, %v3659_v7  ;;  %v9977_v51 = vpop.eup %7304  ;;  %v3664_v22 = vsub.s32 4294967266, %v3659_v7  ;;  %v3888_v50 = vor.u32 %v3887_v46, %v9965_v47 }
 0x1dd   :  { %v2152_v0 = vmul.f32 %v9562_v13, %v2115_v30  ;;  %6800 = vmatpush3.bf16.msra.mxu0 %v6799_v24  ;;  %v3661_v13 = vshll.u32 %v9910_v8, %v3659_v7  ;;  %v9981_v36 = vpop.eup %7306  ;;  %vm3417_vm7 = vcmp.eq.s32.totalorder %v9926_v44, 2  ;;  %vm3891_vm8 = vcmp.lt.s32.totalorder %v9956_v15, 3 }
 0x1de   :  { %2917 = vrot.lane.b32.xlu1 %v9733_v2, %s7474_s24  ;;  %2913 = vrot.lane.b32.xlu0 %v9733_v2, %s7475_s25  ;;  %v3662_v32 = vshrl.u32 %v3644_v56, %v3660_v31  ;;  %v3665_v12 = vadd.s32 127, %v3664_v22  ;;  %vm3890_vm9 = vcmp.lt.s32.totalorder %v9956_v15, 2  ;;  %vm3892_vm10 = vcmp.lt.s32.totalorder %v9956_v15, 4  ;;  %v10114_v56 = vld [vmem:[%s11699_s3 + $0x78] sm:$0xff] }
 0x1df   :  { %v6823_v14 = vpack.c.bf16 %v2153_v28, %v2152_v0  ;;  %6801 = vmatprep.subr.bf16.mxu0 %v7473_v16  ;;  %v1858_v35 = vpop.permute.xlu1 %1857  ;;  %v3897_v42 = vsel %vm3889_vm6, %v3876_v25, %v3879_v59  ;;  %vm10008_vm12 = vcmp.le.f32.partialorder %v3588_v11, 0.7853982  ;;  %v3894_v41 = vsel %vm3892_vm10, %v3882_v4, 2102212464  ;;  %v7309_v55 = vpop.eup %7308 }
 0x1e0   :  { %v1854_v17 = vpop.permute.xlu0 %1853  ;;  %v1886_v8 = vmul.f32 %v9986_v57, %v1858_v35  ;;  %v3663_v21 = vor.u32 %v3662_v32, %v3661_v13  ;;  %v3898_v24 = vsel %vm3892_vm10, %v3885_v45, 920167782  ;;  %v3418_v30 = vxor.u32 2147483648, %v9981_v36  ;;  %v10059_v32 = vld [vmem:[%s11699_s3 + $0x60] sm:$0xff] }
 0x1e1   :  { %v1885_v10 = vmul.f32 %v9992_v23, %v1854_v17  ;;  %6824 = vmatpush3.bf16.msra.mxu1 %v6823_v14  ;;  %v3666_v48 = vshll.u32 %v3665_v12, 23  ;;  %v3893_v37 = vsel %vm3889_vm6, %v3873_v63, %v3876_v25  ;;  %v3899_v11 = vsel %vm3891_vm8, %v3882_v4, %v3898_v24 }
 0x1e2   :  { %3186 = vrot.lane.b32.xlu1 %v9846_v33, %s7474_s24  ;;  %3182 = vrot.lane.b32.xlu0 %v9846_v33, %s7475_s25  ;;  %vm3413_vm13 = vcmp.lt.s32.totalorder %v9926_v44, 2  ;;  %v3895_v28 = vsel %vm3891_vm8, %v3879_v59, %v3894_v41  ;;  %v3901_v0 = vsel %vm3889_vm6, %v3879_v59, %v3882_v4  ;;  %v3670_v7 = vcvt.s32.f32 %v3663_v21 }
 0x1e3   :  { %v6802_v5 = vpack.c.bf16 %v1886_v8, %v1885_v10  ;;  %6825 = vmatprep.subr.bf16.mxu1 %v7473_v16  ;;  %v2127_v52 = vpop.permute.xlu1 %2126  ;;  %v3667_v63 = vor.u32 4788187, %v3666_v48  ;;  %v3900_v25 = vsel %vm3890_vm9, %v3897_v42, %v3899_v11  ;;  %v3902_v46 = vsel %vm3892_vm10, %v3888_v50, 1326507024  ;;  %v10053_v10 = vld [vmem:[%s11699_s3 + $0x68] sm:$0xff] }
 0x1e4   :  { %v2123_v49 = vpop.permute.xlu0 %2122  ;;  %v2155_v60 = vmul.f32 %v9986_v57, %v2127_v52  ;;  %v3903_v59 = vsel %vm3891_vm8, %v3885_v45, %v3902_v46  ;;  %v10042_v31 = vmul.u32.u64.low %v9940_v19, %v3900_v25  ;;  %v10043_v13 = vmul.u32.u64.high %v9940_v19, %v3900_v25, %v10042_v31 }
 0x1e5   :  { %v2154_v47 = vmul.f32 %v9992_v23, %v2123_v49  ;;  %6803 = vmatpush3.bf16.msra.mxu0 %v6802_v5  ;;  %v3415_v22 = vxor.u32 2147483648, %v7309_v55  ;;  %v3668_v4 = vand.u32 2147483647, %v3667_v63  ;;  %v3896_v50 = vsel %vm3890_vm9, %v3893_v37, %v3895_v28 }
 0x1e6   :  { %2925 = vrot.lane.b32.xlu1 %v9733_v2, %s7476_s1  ;;  %2921 = vrot.lane.b32.xlu0 %v9733_v2, %s7477_s0  ;;  %v3904_v8 = vsel %vm3890_vm9, %v3901_v0, %v3903_v59  ;;  %vm3411_vm14 = vweird.f32 %v9301_v18  ;;  %vm3414_vm15 = vcmp.eq.s32.totalorder %v9926_v44, 0  ;;  %v3852_v21 = vmul.f32 %v9932_v54, %v9913_v26 }
 0x1e7   :  { %v6826_v14 = vpack.c.bf16 %v2155_v60, %v2154_v47  ;;  %6804 = vmatprep.subr.bf16.mxu0 %v7473_v16  ;;  %v1866_v35 = vpop.permute.xlu1 %1865  ;;  %v10064_v15 = vmul.u32.u64.low %v9940_v19, %v3904_v8  ;;  %v10065_v42 = vmul.u32.u64.high %v9940_v19, %v3904_v8, %v10064_v15  ;;  %v3671_v5 = vmul.f32 %v3670_v7, %v3668_v4  ;;  %v10120_v4 = vld [vmem:[%s11699_s3 + $0x70] sm:$0xff] }
 0x1e8   :  { %v1862_v17 = vpop.permute.xlu0 %1861  ;;  %v1888_v45 = vmul.f32 %v10053_v10, %v1866_v35  ;;  %v4129_v41 = vand.u32 2139095040, %v9943_v58  ;;  %v3912_v52 = vmul.u32 %v9940_v19, %v3896_v50  ;;  %v3915_v49 = vadd.s32 1, %v10043_v13 }
 0x1e9   :  { %v1887_v12 = vmul.f32 %v10059_v32, %v1862_v17  ;;  %6827 = vmatpush3.bf16.msra.mxu1 %v6826_v14  ;;  %v4126_v48 = vand.u32 2147483647, %v9943_v58  ;;  %v3419_v60 = vsel %vm3417_vm7, %v3418_v30, %v7309_v55  ;;  %v3672_v26 = vxor.u32 2147483648, %v3671_v5 }
 0x1ea   :  { %3194 = vrot.lane.b32.xlu1 %v9846_v33, %s7476_s1  ;;  %3190 = vrot.lane.b32.xlu0 %v9846_v33, %s7477_s0  ;;  %v3677_v54 = vsel %vm10008_vm12, 0, %v9938_v62  ;;  %v4130_v47 = vshrl.u32 %v4129_v41, 23  ;;  %v3416_v0 = vsel %vm3414_vm15, %v9981_v36, %v3415_v22  ;;  %vm3914_vm0 = vc.u32 %v10065_v42, %v10042_v31 }
 0x1eb   :  { %v6805_v24 = vpack.c.bf16 %v1888_v45, %v1887_v12  ;;  %6828 = vmatprep.subr.bf16.mxu1 %v7473_v16  ;;  %v2135_v37 = vpop.permute.xlu1 %2134  ;;  %v3673_v62 = vsel %vm3590_vm4, %v3672_v26, %v3671_v5  ;;  %v3916_v55 = vsel %vm3914_vm0, %v3915_v49, %v10043_v13  ;;  %v4118_v30 = vstv %s10036_s22  ;;  %s10325_s22 = sld [smem:[#allocation4 + $0x11]] }
 0x1ec   :  { %v2131_v11 = vpop.permute.xlu0 %2130  ;;  %v2157_v19 = vmul.f32 %v10053_v10, %v2135_v37  ;;  %v5570_v63 = vadd.s32 4294967169, %v4130_v47  ;;  %v3676_v36 = vsel %vm10008_vm12, %v9515_v40, %v3673_v62  ;;  %v10105_v25 = vand.u32 3, %v3677_v54  ;;  %v10175_v62 = vld [vmem:[%s11700_s4] sm:$0xff] }
 0x1ed   :  { %v2156_v28 = vmul.f32 %v10059_v32, %v2131_v11  ;;  %6806 = vmatpush3.bf16.msra.mxu0 %v6805_v24  ;;  %v3917_v46 = vadd.s32 %v3916_v55, %v3912_v52  ;;  %v3420_v35 = vsel %vm3413_vm13, %v3416_v0, %v3419_v60  ;;  %7310 = vcosq.f32 %v3676_v36 }
 0x1ee   :  { %2933 = vrot.lane.b32.xlu1 %v9733_v2, %s7478_s27  ;;  %2929 = vrot.lane.b32.xlu0 %v9733_v2, %s7479_s28  ;;  %v4133_v13 = vand.u32 8388607, %v4126_v48  ;;  %v4136_v17 = vadd.s32 1, %v5570_v63  ;;  %7312 = vsinq.f32 %v3676_v36  ;;  %v3423_v8 = vmul.f32 %v9959_v3, %v3422_v39  ;;  %v10187_v63 = vld [vmem:[%s11699_s3 + $0x8] sm:$0xff]  ;;  %v10193_v36 = vld [vmem:[%s11699_s3] sm:$0xff] }
 0x1ef   :  { %v6829_v7 = vpack.c.bf16 %v2157_v19, %v2156_v28  ;;  %6807 = vmatprep.subr.bf16.mxu0 %v7473_v16  ;;  %v1874_v14 = vpop.permute.xlu1 %1873  ;;  %v3918_v50 = vadd.s32 536870912, %v3917_v46  ;;  %v10133_v45 = vmul.f32 %v9977_v51, %v3691_v53  ;;  %v10135_v12 = vmul.f32 1.442695, %v3852_v21 }
 0x1f0   :  { %v1870_v59 = vpop.permute.xlu0 %1869  ;;  %v1890_v22 = vmul.f32 %v10114_v56, %v1874_v14  ;;  %vm4137_vm1 = vcmp.gt.s32.totalorder %v4136_v17, 0  ;;  %v4393_v24 = vstv %s10079_s10  ;;  %v3421_v37 = vsel %vm3411_vm14, nan, %v3420_v35  ;;  %s11238_s10 = sld [smem:[#allocation2 + $0x13]] }
 0x1f1   :  { %v1889_v44 = vmul.f32 %v10120_v4, %v1870_v59  ;;  %6830 = vmatpush3.bf16.msra.mxu1 %v6829_v7  ;;  %v10138_v5 = vshrl.u32 %v3918_v50, 30  ;;  %v4138_v41 = vsel %vm4137_vm1, %v4136_v17, 0  ;;  %vm3682_vm2 = vcmp.lt.s32.totalorder %v10105_v25, 2 }
 0x1f2   :  { %3202 = vrot.lane.b32.xlu1 %v9846_v33, %s7478_s27  ;;  %3198 = vrot.lane.b32.xlu0 %v9846_v33, %s7479_s28  ;;  %v10145_v39 = vmul.f32 %v4118_v30, %v7525_v6  ;;  %v10147_v53 = vand.u32 31, %v4138_v41  ;;  %vm3680_vm3 = vweird.f32 %v9515_v40  ;;  %v4134_v11 = vor.u32 8388608, %v4133_v13 }
 0x1f3   :  { %v6808_v15 = vpack.c.bf16 %v1890_v22, %v1889_v44  ;;  %6831 = vmatprep.subr.bf16.mxu1 %v7473_v16  ;;  %v2143_v52 = vpop.permute.xlu1 %2142  ;;  %v3920_v21 = vshll.u32 %v10138_v5, 30  ;;  %vm3683_vm4 = vcmp.eq.s32.totalorder %v10105_v25, 0  ;;  %vm3686_vm5 = vcmp.eq.s32.totalorder %v10105_v25, 2 }
 0x1f4   :  { %v2139_v49 = vpop.permute.xlu0 %2138  ;;  %v2159_v3 = vmul.f32 %v10114_v56, %v2143_v52  ;;  %v4141_v18 = vsub.s32 32, %v10147_v53  ;;  %v10161_v60 = vmul.f32 %v4393_v24, %v7525_v6  ;;  %v10164_v54 = vmul.f32 %v3423_v8, %v3421_v37 }
 0x1f5   :  { %v2158_v51 = vmul.f32 %v10120_v4, %v2139_v49  ;;  %6809 = vmatpush3.bf16.msra.mxu0 %v6808_v15  ;;  %v10168_v47 = vadd.s32 %v10042_v31, %v10065_v42  ;;  %v10170_v19 = vsub.s32 %v3917_v46, %v3920_v21  ;;  %v4143_v55 = vshll.u32 %v11718_v27, %v10147_v53 }
 0x1f6   :  { %2941 = vrot.lane.b32.xlu1 %v9733_v2, %s7480_s29  ;;  %2937 = vrot.lane.b32.xlu0 %v9733_v2, %s7481_s30  ;;  %v4144_v30 = vshrl.u32 %v11716_v29, %v4141_v18  ;;  %v4146_v31 = vshll.u32 %v11716_v29, %v10147_v53  ;;  %v4147_v42 = vshrl.u32 %v11736_v38, %v4141_v18  ;;  %v10199_v59 = vshll.u32 %v4134_v11, 8 }
 0x1f7   :  { %v6832_v26 = vpack.c.bf16 %v2159_v3, %v2158_v51  ;;  %6834 = vmatprep.subr.bf16.mxu0 %v7473_v16  ;;  %v2356_v28 = vpop.permute.xlu1 %2355  ;;  %v3923_v14 = vsub.s32 0, %v10170_v19  ;;  %v7311_v35 = vpop.eup %7310  ;;  %v10205_v13 = vshrl.u32 %v4138_v41, 5  ;;  %v4149_v17 = vshll.u32 %v11736_v38, %v10147_v53 }
 0x1f8   :  { %v2352_v0 = vpop.permute.xlu0 %2351  ;;  %6185 = vmatmul.mubr.f32.vlgmr.msra.gmra.mrb[6].mxu0 %v10175_v62  ;;  %v2414_v7 = vmul.f32 %v10187_v63, %v2356_v28  ;;  %v4152_v22 = vshll.u32 %v11737_v20, %v10147_v53  ;;  %v4398_v44 = vand.u32 2139095040, %v10161_v60  ;;  %v7313_v50 = vpop.eup %7312  ;;  %v3687_v15 = vxor.u32 2147483648, %v7311_v35 }
 0x1f9   :  { %v2413_v46 = vmul.f32 %v10193_v36, %v2352_v0  ;;  %6833 = vmatpush3.bf16.msra.mxu1 %v6832_v26  ;;  %6254 = vmatprep.mubr.msk.f32.mxu0 %vm7484_vm11, %v11750_v61  ;;  %v5564_v24 = vmin.u32 %v3923_v14, %v10170_v19  ;;  %v4142_v52 = vshrl.u32 %v11718_v27, %v4141_v18  ;;  %v3684_v37 = vxor.u32 2147483648, %v7313_v50 }
 0x1fa   :  { %3210 = vrot.lane.b32.xlu1 %v9846_v33, %s7480_s29  ;;  %3206 = vrot.lane.b32.xlu0 %v9846_v33, %s7481_s30  ;;  %v4145_v3 = vor.u32 %v4144_v30, %v4143_v55  ;;  %v4148_v51 = vor.u32 %v4147_v42, %v4146_v31  ;;  %v4150_v21 = vshrl.u32 %v11737_v20, %v4141_v18  ;;  %vm4158_vm6 = vcmp.lt.s32.totalorder %v10205_v13, 1 }
 0x1fb   :  { %v6835_v8 = vpack.c.bf16 %v2414_v7, %v2413_v46  ;;  %6858 = vmatprep.subr.bf16.mxu1 %v7473_v16  ;;  %v2625_v49 = vpop.permute.xlu1 %2624  ;;  %v3688_v28 = vsel %vm3686_vm5, %v3687_v15, %v7313_v50  ;;  %v3925_v0 = vclz %v5564_v24  ;;  %v3685_v55 = vsel %vm3683_vm4, %v7311_v35, %v3684_v37 }
 0x1fc   :  { %v2621_v41 = vpop.permute.xlu0 %2620  ;;  %6220 = vmatmul.mubr.f32.vlgmr.msra.gmra.mrb[6].mxu1 %v10175_v62  ;;  %v2683_v11 = vmul.f32 %v10187_v63, %v2625_v49  ;;  %v4153_v30 = vshrl.u32 %v11738_v1, %v4141_v18  ;;  %v4155_v31 = vshll.u32 %v11738_v1, %v10147_v53  ;;  %v3689_v7 = vsel %vm3682_vm2, %v3685_v55, %v3688_v28  ;;  %v10243_v53 = vld [vmem:[%s11699_s3 + $0x18] sm:$0xff] }
 0x1fd   :  { %v2682_v26 = vmul.f32 %v10193_v36, %v2621_v41  ;;  %6836 = vmatpush3.bf16.msra.mxu0 %v6835_v8  ;;  %6289 = vmatprep.mubr.msk.f32.mxu1 %vm7484_vm11, %v11750_v61  ;;  %v5565_v46 = vadd.s32 4294967294, %v3925_v0  ;;  %v4156_v14 = vshrl.u32 %v11749_v43, %v4141_v18  ;;  %v3690_v35 = vsel %vm3680_vm3, nan, %v3689_v7  ;;  %v10249_v18 = vld [vmem:[%s11699_s3 + $0x10] sm:$0xff] }
 0x1fe   :  { %2949 = vrot.lane.b32.xlu1 %v9733_v2, %s7482_s6  ;;  %2945 = vrot.lane.b32.xlu0 %v9733_v2, %s7483_s2  ;;  %v4151_v8 = vor.u32 %v4150_v21, %v4149_v17  ;;  %v4154_v15 = vor.u32 %v4153_v30, %v4152_v22  ;;  %vm4159_vm7 = vcmp.lt.s32.totalorder %v10205_v13, 2  ;;  %vm4161_vm9 = vcmp.lt.s32.totalorder %v10205_v13, 4 }
 0x1ff   :  { %v6859_v42 = vpack.c.bf16 %v2683_v11, %v2682_v26  ;;  %6837 = vmatprep.subr.bf16.mxu0 %v7473_v16  ;;  %v2364_v2 = vpop.permute.xlu1 %2363  ;;  %vm5566_vm8 = vcmp.lt.s32.totalorder %v5565_v46, 0  ;;  %v4157_v17 = vor.u32 %v4156_v14, %v4155_v31  ;;  %vm4160_vm10 = vcmp.lt.s32.totalorder %v10205_v13, 3 }
 0x200   :  { %v2360_v50 = vpop.permute.xlu0 %2359  ;;  %v2416_v25 = vmul.f32 %v10243_v53, %v2364_v2  ;;  %v3928_v40 = vsel %vm5566_vm8, 0, %v5565_v46  ;;  %v4163_v22 = vsel %vm4161_vm9, %v4151_v8, 2102212464  ;;  %v10263_v28 = vmul.f32 %v10133_v45, %v3690_v35 }
 0x201   :  { %v2415_v24 = vmul.f32 %v10249_v18, %v2360_v50  ;;  %6860 = vmatpush3.bf16.msra.mxu1 %v6859_v42  ;;  %v3929_v41 = vsub.s32 32, %v3928_v40  ;;  %v3930_v37 = vshll.u32 %v10170_v19, %v3928_v40  ;;  %v3933_v21 = vsub.s32 4294967266, %v3928_v40 }
 0x202   :  { %3218 = vrot.lane.b32.xlu1 %v9846_v33, %s7482_s6  ;;  %3214 = vrot.lane.b32.xlu0 %v9846_v33, %s7483_s2  ;;  %v4162_v33 = vsel %vm4158_vm6, %v4142_v52, %v4145_v3  ;;  %v4166_v0 = vsel %vm4158_vm6, %v4145_v3, %v4148_v51  ;;  %v4167_v55 = vsel %vm4161_vm9, %v4154_v15, 920167782  ;;  %v4164_v45 = vsel %vm4160_vm10, %v4148_v51, %v4163_v22 }
 0x203   :  { %v6838_v49 = vpack.c.bf16 %v2416_v25, %v2415_v24  ;;  %6861 = vmatprep.subr.bf16.mxu1 %v7473_v16  ;;  %v2633_v11 = vpop.permute.xlu1 %2632  ;;  %v3931_v19 = vshrl.u32 %v10168_v47, %v3929_v41  ;;  %v3934_v42 = vadd.s32 127, %v3933_v21  ;;  %v4168_v52 = vsel %vm4160_vm10, %v4151_v8, %v4167_v55  ;;  %v10300_v24 = vld [vmem:[%s11699_s3 + $0x28] sm:$0xff] }
 0x204   :  { %v2629_v26 = vpop.permute.xlu0 %2628  ;;  %v2685_v30 = vmul.f32 %v10243_v53, %v2633_v11  ;;  %v4170_v3 = vsel %vm4158_vm6, %v4148_v51, %v4151_v8  ;;  %v4171_v7 = vsel %vm4161_vm9, %v4157_v17, 1326507024  ;;  %v4169_v2 = vsel %vm4159_vm7, %v4166_v0, %v4168_v52  ;;  %v10306_v17 = vld [vmem:[%s11699_s3 + $0x20] sm:$0xff] }
 0x205   :  { %v2684_v31 = vmul.f32 %v10249_v18, %v2629_v26  ;;  %6839 = vmatpush3.bf16.msra.mxu0 %v6838_v49  ;;  %v3932_v46 = vor.u32 %v3931_v19, %v3930_v37  ;;  %v3935_v14 = vshll.u32 %v3934_v42, 23  ;;  %7314 = vpow2.f32 %v10135_v12 }
 0x206   :  { %3431 = vrot.lane.b32.xlu1 %v10164_v54, %s7470_s18  ;;  %3427 = vrot.lane.b32.xlu0 %v10164_v54, %s7468_s16  ;;  %v4172_v25 = vsel %vm4160_vm10, %v4154_v15, %v4171_v7  ;;  %v10293_v51 = vmul.u32.u64.low %v10199_v59, %v4169_v2  ;;  %v10294_v8 = vmul.u32.u64.high %v10199_v59, %v4169_v2, %v10293_v51  ;;  %v4120_v49 = vmul.f32 -0.5, %v10145_v39 }
 0x207   :  { %v6862_v47 = vpack.c.bf16 %v2685_v30, %v2684_v31  ;;  %6840 = vmatprep.subr.bf16.mxu0 %v7473_v16  ;;  %v2372_v50 = vpop.permute.xlu1 %2371  ;;  %v3936_v15 = vor.u32 4788187, %v3935_v14  ;;  %v3939_v22 = vcvt.s32.f32 %v3932_v46  ;;  %v4165_v41 = vsel %vm4159_vm7, %v4162_v33, %v4164_v45 }
 0x208   :  { %v2368_v35 = vpop.permute.xlu0 %2367  ;;  %v2418_v40 = vmul.f32 %v10300_v24, %v2372_v50  ;;  %v4173_v37 = vsel %vm4159_vm7, %v4170_v3, %v4172_v25  ;;  %v4399_v21 = vshrl.u32 %v4398_v44, 23  ;;  %v3943_v13 = vsub.s32 4, %v10138_v5 }
 0x209   :  { %v2417_v12 = vmul.f32 %v10306_v17, %v2368_v35  ;;  %6863 = vmatpush3.bf16.msra.mxu1 %v6862_v47  ;;  %v3937_v26 = vand.u32 2147483647, %v3936_v15  ;;  %v10322_v0 = vmul.u32.u64.low %v10199_v59, %v4173_v37  ;;  %v10323_v55 = vmul.u32.u64.high %v10199_v59, %v4173_v37, %v10322_v0  ;;  %v10350_v35 = vld [vmem:[%s11699_s3 + $0x38] sm:$0xff] }
 0x20a   :  { %3700 = vrot.lane.b32.xlu1 %v10263_v28, %s7470_s18  ;;  %3696 = vrot.lane.b32.xlu0 %v10263_v28, %s7468_s16  ;;  %v4184_v33 = vadd.s32 1, %v10294_v8  ;;  %v5577_v19 = vadd.s32 4294967169, %v4399_v21  ;;  %v4181_v52 = vmul.u32 %v10199_v59, %v4165_v41  ;;  %vm3859_vm12 = vcmp.lt.s32.totalorder %v9746_v34, 0 }
 0x20b   :  { %v6841_v11 = vpack.c.bf16 %v2418_v40, %v2417_v12  ;;  %6864 = vmatprep.subr.bf16.mxu1 %v7473_v16  ;;  %v2641_v30 = vpop.permute.xlu1 %2640  ;;  %v3940_v45 = vmul.f32 %v3939_v22, %v3937_v26  ;;  %v11715_v3 = vand.u32 2147483647, %v10161_v60  ;;  %v4121_v14 = vmul.f32 %v4120_v49, %v10145_v39  ;;  %v10356_v40 = vld [vmem:[%s11699_s3 + $0x30] sm:$0xff]  ;;  %v10415_v22 = vld [vmem:[%s11699_s3 + $0x40] sm:$0xff] }
 0x20c   :  { %v2637_v31 = vpop.permute.xlu0 %2636  ;;  %v2687_v44 = vmul.f32 %v10300_v24, %v2641_v30  ;;  %v4405_v7 = vadd.s32 1, %v5577_v19  ;;  %vm4183_vm13 = vc.u32 %v10323_v55, %v10293_v51  ;;  %vm10368_vm15 = vcmp.le.f32.partialorder %v3857_v9, 0.7853982 }
 0x20d   :  { %v2686_v42 = vmul.f32 %v10306_v17, %v2637_v31  ;;  %6842 = vmatpush3.bf16.msra.mxu0 %v6841_v11  ;;  %v3941_v46 = vxor.u32 2147483648, %v3940_v45  ;;  %v4185_v50 = vsel %vm4183_vm13, %v4184_v33, %v10294_v8  ;;  %v3944_v8 = vsel %vm3859_vm12, %v3943_v13, %v10138_v5 }
 0x20e   :  { %3439 = vrot.lane.b32.xlu1 %v10164_v54, %s7469_s17  ;;  %3435 = vrot.lane.b32.xlu0 %v10164_v54, %s7467_s15  ;;  %vm4406_vm14 = vcmp.gt.s32.totalorder %v4405_v7, 0  ;;  %v4186_v12 = vadd.s32 %v4185_v50, %v4181_v52  ;;  %v4402_v5 = vand.u32 8388607, %v11715_v3  ;;  %v4122_v21 = vmul.f32 1.442695, %v4121_v14 }
 0x20f   :  { %v6865_v47 = vpack.c.bf16 %v2687_v44, %v2686_v42  ;;  %6843 = vmatprep.subr.bf16.mxu0 %v7473_v16  ;;  %v2380_v59 = vpop.permute.xlu1 %2379  ;;  %v7315_v15 = vpop.eup %7314  ;;  %v3942_v49 = vsel %vm3859_vm12, %v3941_v46, %v3940_v45  ;;  %v4407_v41 = vsel %vm4406_vm14, %v4405_v7, 0  ;;  %v3946_v9 = vsel %vm10368_vm15, 0, %v3944_v8  ;;  %v10409_v8 = vld [vmem:[%s11699_s3 + $0x48] sm:$0xff] }
 0x210   :  { %v2376_v2 = vpop.permute.xlu0 %2375  ;;  %v2420_v25 = vmul.f32 %v10350_v35, %v2380_v59  ;;  %v4187_v11 = vadd.s32 536870912, %v4186_v12  ;;  %v3960_v30 = vstv %s10327_s23  ;;  %v4409_v31 = vand.u32 31, %v4407_v41  ;;  %s10553_s23 = sld [smem:[#allocation4 + $0x12]] }
 0x211   :  { %v2419_v39 = vmul.f32 %v10356_v40, %v2376_v2  ;;  %6866 = vmatpush3.bf16.msra.mxu1 %v6865_v47  ;;  %v4662_v13 = vstv %s10325_s22  ;;  %v3945_v44 = vsel %vm10368_vm15, %v9746_v34, %v3942_v49  ;;  %v4403_v52 = vor.u32 8388608, %v4402_v5  ;;  %s10532_s22 = sld [smem:[#allocation2 + $0x11]] }
 0x212   :  { %3708 = vrot.lane.b32.xlu1 %v10263_v28, %s7469_s17  ;;  %3704 = vrot.lane.b32.xlu0 %v10263_v28, %s7467_s15  ;;  %v10386_v42 = vshrl.u32 %v4187_v11, 30  ;;  %v4410_v7 = vsub.s32 32, %v4409_v31  ;;  %v10394_v46 = vmul.f32 %v7315_v15, %v3960_v30  ;;  %7316 = vpow2.f32 %v4122_v21 }
 0x213   :  { %v6844_v37 = vpack.c.bf16 %v2420_v25, %v2419_v39  ;;  %6867 = vmatprep.subr.bf16.mxu1 %v7473_v16  ;;  %v2649_v26 = vpop.permute.xlu1 %2648  ;;  %7318 = vcosq.f32 %v3945_v44  ;;  %v10397_v50 = vand.u32 3, %v3946_v9  ;;  %v10401_v25 = vadd.s32 %v10293_v51, %v10323_v55 }
 0x214   :  { %v2645_v0 = vpop.permute.xlu0 %2644  ;;  %v2689_v33 = vmul.f32 %v10350_v35, %v2649_v26  ;;  %v4189_v14 = vshll.u32 %v10386_v42, 30  ;;  %v10404_v39 = vmul.f32 %v4662_v13, %v7525_v6  ;;  %v4412_v55 = vshll.u32 %v11718_v27, %v4409_v31 }
 0x215   :  { %v2688_v19 = vmul.f32 %v10356_v40, %v2645_v0  ;;  %6845 = vmatpush3.bf16.msra.mxu0 %v6844_v37  ;;  %v4413_v5 = vshrl.u32 %v11716_v29, %v4410_v7  ;;  %v4415_v37 = vshll.u32 %v11716_v29, %v4409_v31  ;;  %v4421_v21 = vshll.u32 %v11737_v20, %v4409_v31 }
 0x216   :  { %3447 = vrot.lane.b32.xlu1 %v10164_v54, %s7471_s19  ;;  %3443 = vrot.lane.b32.xlu0 %v10164_v54, %s7472_s20  ;;  %v10418_v51 = vsub.s32 %v4186_v12, %v4189_v14  ;;  %v10428_v11 = vshll.u32 %v4403_v52, 8  ;;  %v4416_v0 = vshrl.u32 %v11736_v38, %v4410_v7  ;;  %v4422_v9 = vshrl.u32 %v11738_v1, %v4410_v7 }
 0x217   :  { %v6868_v47 = vpack.c.bf16 %v2689_v33, %v2688_v19  ;;  %6846 = vmatprep.subr.bf16.mxu0 %v7473_v16  ;;  %v2388_v59 = vpop.permute.xlu1 %2387  ;;  %7320 = vsinq.f32 %v3945_v44  ;;  %v10434_v33 = vshrl.u32 %v4407_v41, 5  ;;  %v4418_v19 = vshll.u32 %v11736_v38, %v4409_v31 }
 0x218   :  { %v2384_v2 = vpop.permute.xlu0 %2383  ;;  %v2422_v15 = vmul.f32 %v10409_v8, %v2388_v59  ;;  %v4192_v12 = vsub.s32 0, %v10418_v51  ;;  %v4423_v41 = vor.u32 %v4422_v9, %v4421_v21  ;;  %v4424_v44 = vshll.u32 %v11738_v1, %v4409_v31 }
 0x219   :  { %v2421_v49 = vmul.f32 %v10415_v22, %v2384_v2  ;;  %6869 = vmatpush3.bf16.msra.mxu1 %v6868_v47  ;;  %v4419_v47 = vshrl.u32 %v11737_v20, %v4410_v7  ;;  %v4411_v2 = vshrl.u32 %v11718_v27, %v4410_v7  ;;  %v4212_v27 = vsub.s32 4, %v10386_v42 }
 0x21a   :  { %3716 = vrot.lane.b32.xlu1 %v10263_v28, %s7471_s19  ;;  %3712 = vrot.lane.b32.xlu0 %v10263_v28, %s7472_s20  ;;  %v5571_v59 = vmin.u32 %v4192_v12, %v10418_v51  ;;  %v4414_v12 = vor.u32 %v4413_v5, %v4412_v55  ;;  %vm4427_vm0 = vcmp.lt.s32.totalorder %v10434_v33, 1  ;;  %vm4430_vm1 = vcmp.lt.s32.totalorder %v10434_v33, 4 }
 0x21b   :  { %v6847_v26 = vpack.c.bf16 %v2422_v15, %v2421_v49  ;;  %6870 = vmatprep.subr.bf16.mxu1 %v7473_v16  ;;  %v2657_v30 = vpop.permute.xlu1 %2656  ;;  %v4425_v15 = vshrl.u32 %v11749_v43, %v4410_v7  ;;  %v4667_v49 = vand.u32 2139095040, %v10404_v39  ;;  %v4420_v45 = vor.u32 %v4419_v47, %v4418_v19 }
 0x21c   :  { %v2653_v13 = vpop.permute.xlu0 %2652  ;;  %v2691_v52 = vmul.f32 %v10409_v8, %v2657_v30  ;;  %v10453_v31 = vpop.eup %7316  ;;  %vm4429_vm2 = vcmp.lt.s32.totalorder %v10434_v33, 3  ;;  %vm3955_vm3 = vcmp.eq.s32.totalorder %v10397_v50, 2  ;;  %vm4428_vm4 = vcmp.lt.s32.totalorder %v10434_v33, 2 }
 0x21d   :  { %v2690_v14 = vmul.f32 %v10415_v22, %v2653_v13  ;;  %6848 = vmatpush3.bf16.msra.mxu0 %v6847_v26  ;;  %v4194_v26 = vclz %v5571_v59  ;;  %v4417_v13 = vor.u32 %v4416_v0, %v4415_v37  ;;  %v10458_v55 = vpop.eup %7318  ;;  %v4426_v5 = vor.u32 %v4425_v15, %v4424_v44 }
 0x21e   :  { %3455 = vrot.lane.b32.xlu1 %v10164_v54, %s7474_s24  ;;  %3451 = vrot.lane.b32.xlu0 %v10164_v54, %s7475_s25  ;;  %v4431_v0 = vsel %vm4427_vm0, %v4411_v2, %v4414_v12  ;;  %vm4128_vm6 = vcmp.lt.s32.totalorder %v9943_v58, 0  ;;  %vm10497_vm7 = vcmp.le.f32.partialorder %v4126_v48, 0.7853982  ;;  %vm3949_vm8 = vweird.f32 %v9746_v34 }
 0x21f   :  { %v6871_v30 = vpack.c.bf16 %v2691_v52, %v2690_v14  ;;  %6849 = vmatprep.subr.bf16.mxu0 %v7473_v16  ;;  %v2396_v3 = vpop.permute.xlu1 %2395  ;;  %v5572_v9 = vadd.s32 4294967294, %v4194_v26  ;;  %v4435_v19 = vsel %vm4427_vm0, %v4414_v12, %v4417_v13  ;;  %v4439_v15 = vsel %vm4427_vm0, %v4417_v13, %v4420_v45 }
 0x220   :  { %v2392_v29 = vpop.permute.xlu0 %2391  ;;  %v2424_v7 = vmul.f32 %v9986_v57, %v2396_v3  ;;  %v4436_v3 = vsel %vm4430_vm1, %v4423_v41, 920167782  ;;  %vm3951_vm9 = vcmp.lt.s32.totalorder %v10397_v50, 2  ;;  %vm3952_vm10 = vcmp.eq.s32.totalorder %v10397_v50, 0 }
 0x221   :  { %v2423_v21 = vmul.f32 %v9992_v23, %v2392_v29  ;;  %6872 = vmatpush3.bf16.msra.mxu1 %v6871_v30  ;;  %v4432_v29 = vsel %vm4430_vm1, %v4420_v45, 2102212464  ;;  %vm5573_vm5 = vcmp.lt.s32.totalorder %v5572_v9, 0  ;;  %v4437_v44 = vsel %vm4429_vm2, %v4420_v45, %v4436_v3 }
 0x222   :  { %3724 = vrot.lane.b32.xlu1 %v10263_v28, %s7474_s24  ;;  %3720 = vrot.lane.b32.xlu0 %v10263_v28, %s7475_s25  ;;  %v4197_v14 = vsel %vm5573_vm5, 0, %v5572_v9  ;;  %v4433_v59 = vsel %vm4429_vm2, %v4417_v13, %v4432_v29  ;;  %v4438_v45 = vsel %vm4428_vm4, %v4435_v19, %v4437_v44  ;;  %v11760_v50 = vstv %s10339_s26  ;;  %s10752_s26 = sld [smem:[#allocation4 + $0x13]] }
 0x223   :  { %v6850_v37 = vpack.c.bf16 %v2424_v7, %v2423_v21  ;;  %6873 = vmatprep.subr.bf16.mxu1 %v7473_v16  ;;  %v2665_v47 = vpop.permute.xlu1 %2664  ;;  %v4198_v26 = vsub.s32 32, %v4197_v14  ;;  %v4199_v12 = vshll.u32 %v10418_v51, %v4197_v14  ;;  %v7321_v7 = vpop.eup %7320  ;;  %v3956_v21 = vxor.u32 2147483648, %v10458_v55 }
 0x224   :  { %v2661_v52 = vpop.permute.xlu0 %2660  ;;  %v2693_v30 = vmul.f32 %v9986_v57, %v2665_v47  ;;  %v4202_v9 = vsub.s32 4294967266, %v4197_v14  ;;  %v4440_v57 = vsel %vm4430_vm1, %v4426_v5, 1326507024  ;;  %v4434_v29 = vsel %vm4428_vm4, %v4431_v0, %v4433_v59 }
 0x225   :  { %v2692_v2 = vmul.f32 %v9992_v23, %v2661_v52  ;;  %6851 = vmatpush3.bf16.msra.mxu0 %v6850_v37  ;;  %v4200_v13 = vshrl.u32 %v10401_v25, %v4198_v26  ;;  %v4441_v3 = vsel %vm4429_vm2, %v4423_v41, %v4440_v57  ;;  %v3953_v0 = vxor.u32 2147483648, %v7321_v7 }
 0x226   :  { %3463 = vrot.lane.b32.xlu1 %v10164_v54, %s7476_s1  ;;  %3459 = vrot.lane.b32.xlu0 %v10164_v54, %s7477_s0  ;;  %v4203_v19 = vadd.s32 127, %v4202_v9  ;;  %v4442_v47 = vsel %vm4428_vm4, %v4439_v15, %v4441_v3  ;;  %v10511_v48 = vmul.u32.u64.low %v10428_v11, %v4438_v45  ;;  %v10512_v52 = vmul.u32.u64.high %v10428_v11, %v4438_v45, %v10511_v48 }
 0x227   :  { %v6874_v23 = vpack.c.bf16 %v2693_v30, %v2692_v2  ;;  %6852 = vmatprep.subr.bf16.mxu0 %v7473_v16  ;;  %v2404_v5 = vpop.permute.xlu1 %2403  ;;  %v4201_v41 = vor.u32 %v4200_v13, %v4199_v12  ;;  %v10523_v59 = vmul.u32.u64.low %v10428_v11, %v4442_v47  ;;  %v10524_v44 = vmul.u32.u64.high %v10428_v11, %v4442_v47, %v10523_v59 }
 0x228   :  { %v2400_v37 = vpop.permute.xlu0 %2399  ;;  %v2426_v25 = vmul.f32 %v10053_v10, %v2404_v5  ;;  %v4204_v33 = vshll.u32 %v4203_v19, 23  ;;  %v4668_v15 = vshrl.u32 %v4667_v49, 23  ;;  %v4450_v2 = vmul.u32 %v10428_v11, %v4434_v29 }
 0x229   :  { %v2425_v14 = vmul.f32 %v10059_v32, %v2400_v37  ;;  %6875 = vmatpush3.bf16.msra.mxu1 %v6874_v23  ;;  %v4208_v45 = vcvt.s32.f32 %v4201_v41  ;;  %v4453_v57 = vadd.s32 1, %v10512_v52  ;;  %v3957_v3 = vsel %vm3955_vm3, %v3956_v21, %v7321_v7 }
 0x22a   :  { %3732 = vrot.lane.b32.xlu1 %v10263_v28, %s7476_s1  ;;  %3728 = vrot.lane.b32.xlu0 %v10263_v28, %s7477_s0  ;;  %v4205_v9 = vor.u32 4788187, %v4204_v33  ;;  %v5584_v23 = vadd.s32 4294967169, %v4668_v15  ;;  %v4213_v11 = vsel %vm4128_vm6, %v4212_v27, %v10386_v42  ;;  %vm4452_vm12 = vc.u32 %v10524_v44, %v10511_v48 }
 0x22b   :  { %v6853_v30 = vpack.c.bf16 %v2426_v25, %v2425_v14  ;;  %6876 = vmatprep.subr.bf16.mxu1 %v7473_v16  ;;  %v4387_v27 = vstv %s10502_s9  ;;  %v4454_v42 = vsel %vm4452_vm12, %v4453_v57, %v10512_v52  ;;  %v4664_v29 = vand.u32 2147483647, %v10404_v39  ;;  %s11352_s9 = sld [smem:[#allocation6 + $0x13]] }
 0x22c   :  { %v2673_v26 = vpop.permute.xlu1 %2672  ;;  %v2669_v12 = vpop.permute.xlu0 %2668  ;;  %v4674_v7 = vadd.s32 1, %v5584_v23  ;;  %v4455_v47 = vadd.s32 %v4454_v42, %v4450_v2  ;;  %v10570_v33 = vmul.f32 %v4387_v27, %v7525_v6  ;;  %v11762_v51 = vmov 2475754826  }
 0x22d   :  { %v2695_v49 = vmul.f32 %v10053_v10, %v2673_v26  ;;  %v2694_v13 = vmul.f32 %v10059_v32, %v2669_v12  ;;  %6854 = vmatpush3.bf16.msra.mxu0 %v6853_v30  ;;  %v3954_v10 = vsel %vm3952_vm10, %v10458_v55, %v3953_v0  ;;  %v4206_v32 = vand.u32 2147483647, %v4205_v9 }
 0x22e   :  { %3471 = vrot.lane.b32.xlu1 %v10164_v54, %s7478_s27  ;;  %3467 = vrot.lane.b32.xlu0 %v10164_v54, %s7479_s28  ;;  %v4215_v55 = vsel %vm10497_vm7, 0, %v4213_v11  ;;  %vm4675_vm13 = vcmp.gt.s32.totalorder %v4674_v7, 0  ;;  %v3958_v52 = vsel %vm3951_vm9, %v3954_v10, %v3957_v3  ;;  %v4456_v59 = vadd.s32 536870912, %v4455_v47 }
 0x22f   :  { %v6877_v21 = vpack.c.bf16 %v2695_v49, %v2694_v13  ;;  %6855 = vmatprep.subr.bf16.mxu0 %v7473_v16  ;;  %v4209_v19 = vmul.f32 %v4208_v45, %v4206_v32  ;;  %v4676_v0 = vsel %vm4675_vm13, %v4674_v7, 0  ;;  %v10575_v2 = vand.u32 3, %v4215_v55 }
 0x230   :  { %v2412_v5 = vpop.permute.xlu1 %2411  ;;  %v2408_v37 = vpop.permute.xlu0 %2407  ;;  %v10572_v15 = vand.u32 31, %v4676_v0  ;;  %v10580_v26 = vmul.f32 %v10453_v31, %v11760_v50  ;;  %v4656_v12 = vstv %s10532_s22  ;;  %v3959_v57 = vsel %vm3949_vm8, nan, %v3958_v52  ;;  %s10923_s22 = sld [smem:[#allocation6 + $0x11]] }
 0x231   :  { %v2428_v25 = vmul.f32 %v10114_v56, %v2412_v5  ;;  %v2427_v14 = vmul.f32 %v10120_v4, %v2408_v37  ;;  %6878 = vmatpush3.bf16.msra.mxu1 %v6877_v21  ;;  %v4210_v41 = vxor.u32 2147483648, %v4209_v19  ;;  %v10587_v49 = vshrl.u32 %v4456_v59, 30 }
 0x232   :  { %3740 = vrot.lane.b32.xlu1 %v10263_v28, %s7478_s27  ;;  %3736 = vrot.lane.b32.xlu0 %v10263_v28, %s7479_s28  ;;  %v4679_v13 = vsub.s32 32, %v10572_v15  ;;  %v4671_v34 = vand.u32 8388607, %v4664_v29  ;;  %v4931_v32 = vstv %s10553_s23  ;;  %v4684_v27 = vshll.u32 %v11762_v51, %v10572_v15 }
 0x233   :  { %v6856_v30 = vpack.c.bf16 %v2428_v25, %v2427_v14  ;;  %6879 = vmatprep.subr.bf16.mxu1 %v7473_v16  ;;  %v4211_v23 = vsel %vm4128_vm6, %v4210_v41, %v4209_v19  ;;  %v4458_v10 = vshll.u32 %v10587_v49, 30  ;;  %vm4224_vm14 = vcmp.eq.s32.totalorder %v10575_v2, 2 }
 0x234   :  { %v2681_v9 = vpop.permute.xlu1 %2680  ;;  %v2677_v45 = vpop.permute.xlu0 %2676  ;;  %v4214_v31 = vsel %vm10497_vm7, %v9943_v58, %v4211_v23  ;;  %v4682_v21 = vshrl.u32 %v11762_v51, %v4679_v13  ;;  %v4685_v19 = vshrl.u32 %v11736_v38, %v4679_v13  ;;  %v4687_v55 = vshll.u32 %v11736_v38, %v10572_v15 }
 0x235   :  { %v2697_v3 = vmul.f32 %v10114_v56, %v2681_v9  ;;  %v2696_v11 = vmul.f32 %v10120_v4, %v2677_v45  ;;  %6857 = vmatpush3.bf16.msra.mxu0 %v6856_v30  ;;  %7322 = vcosq.f32 %v4214_v31  ;;  %v11761_v56 = vmov 683565275  }
 0x236   :  { %3479 = vrot.lane.b32.xlu1 %v10164_v54, %s7480_s29  ;;  %3475 = vrot.lane.b32.xlu0 %v10164_v54, %s7481_s30  ;;  %v4681_v4 = vshll.u32 %v11761_v56, %v10572_v15  ;;  %7324 = vsinq.f32 %v4214_v31  ;;  %v10611_v37 = vsub.s32 %v4455_v47, %v4458_v10  ;;  %v4688_v25 = vshrl.u32 %v11737_v20, %v4679_v13 }
 0x237   :  { %v6880_v7 = vpack.c.bf16 %v2697_v3, %v2696_v11  ;;  %6882 = vmatprep.subr.bf16.mxu0 %v7473_v16  ;;  %v10620_v41 = vmul.f32 %v10394_v46, %v3959_v57  ;;  %vm4221_vm15 = vcmp.eq.s32.totalorder %v10575_v2, 0  ;;  %v4672_v47 = vor.u32 8388608, %v4671_v34 }
 0x238   :  { %v2894_v42 = vpop.permute.xlu1 %2893  ;;  %v2890_v5 = vpop.permute.xlu0 %2889  ;;  %6255 = vmatmul.mubr.f32.vlgmr.msra.gmra.mrb[8].mxu0 %v10175_v62  ;;  %vm4220_vm0 = vcmp.lt.s32.totalorder %v10575_v2, 2  ;;  %v10632_v59 = vadd.s32 %v10511_v48, %v10524_v44  ;;  %v4461_v46 = vsub.s32 0, %v10611_v37  ;;  %v10635_v30 = vshrl.u32 %v4676_v0, 5 }
 0x239   :  { %v2952_v14 = vmul.f32 %v10187_v63, %v2894_v42  ;;  %v2951_v52 = vmul.f32 %v10193_v36, %v2890_v5  ;;  %6881 = vmatpush3.bf16.msra.mxu1 %v6880_v7  ;;  %6324 = vmatprep.mubr.msk.f32.mxu0 %vm7484_vm11, %v11750_v61  ;;  %v10638_v50 = vmul.f32 %v4931_v32, %v7525_v6  ;;  %vm4218_vm1 = vweird.f32 %v9943_v58 }
 0x23a   :  { %3748 = vrot.lane.b32.xlu1 %v10263_v28, %s7480_s29  ;;  %3744 = vrot.lane.b32.xlu0 %v10263_v28, %s7481_s30  ;;  %v4680_v45 = vshrl.u32 %v11761_v56, %v4679_v13  ;;  %v4690_v57 = vshll.u32 %v11737_v20, %v10572_v15  ;;  %v4691_v48 = vshrl.u32 %v11738_v1, %v4679_v13  ;;  %v10652_v7 = vshll.u32 %v4672_v47, 8 }
 0x23b   :  { %v6883_v9 = vpack.c.bf16 %v2952_v14, %v2951_v52  ;;  %6906 = vmatprep.subr.bf16.mxu1 %v7473_v16  ;;  %v5578_v0 = vmin.u32 %v4461_v46, %v10611_v37  ;;  %v4683_v3 = vor.u32 %v4682_v21, %v4681_v4  ;;  %v4686_v11 = vor.u32 %v4685_v19, %v4684_v27 }
 0x23c   :  { %v3163_v44 = vpop.permute.xlu1 %3162  ;;  %v3159_v23 = vpop.permute.xlu0 %3158  ;;  %6290 = vmatmul.mubr.f32.vlgmr.msra.gmra.mrb[8].mxu1 %v10175_v62  ;;  %v4689_v31 = vor.u32 %v4688_v25, %v4687_v55  ;;  %v4692_v32 = vor.u32 %v4691_v48, %v4690_v57  ;;  %v4693_v4 = vshll.u32 %v11738_v1, %v10572_v15  ;;  %vm4696_vm2 = vcmp.lt.s32.totalorder %v10635_v30, 1 }
 0x23d   :  { %v3221_v34 = vmul.f32 %v10187_v63, %v3163_v44  ;;  %v3220_v10 = vmul.f32 %v10193_v36, %v3159_v23  ;;  %6884 = vmatpush3.bf16.msra.mxu0 %v6883_v9  ;;  %6359 = vmatprep.mubr.msk.f32.mxu1 %vm7484_vm11, %v11750_v61  ;;  %v4463_v62 = vclz %v5578_v0  ;;  %v4694_v63 = vshrl.u32 %v11749_v43, %v4679_v13 }
 0x23e   :  { %3487 = vrot.lane.b32.xlu1 %v10164_v54, %s7482_s6  ;;  %3483 = vrot.lane.b32.xlu0 %v10164_v54, %s7483_s2  ;;  %vm4697_vm3 = vcmp.lt.s32.totalorder %v10635_v30, 2  ;;  %vm4698_vm4 = vcmp.lt.s32.totalorder %v10635_v30, 3  ;;  %vm4699_vm5 = vcmp.lt.s32.totalorder %v10635_v30, 4  ;;  %v4700_v15 = vsel %vm4696_vm2, %v4680_v45, %v4683_v3 }
 0x23f   :  { %v6907_v36 = vpack.c.bf16 %v3221_v34, %v3220_v10  ;;  %6885 = vmatprep.subr.bf16.mxu0 %v7473_v16  ;;  %v7323_v21 = vpop.eup %7322  ;;  %v5579_v42 = vadd.s32 4294967294, %v4463_v62  ;;  %v4701_v13 = vsel %vm4699_vm5, %v4689_v31, 2102212464  ;;  %v4705_v5 = vsel %vm4699_vm5, %v4692_v32, 920167782 }
 0x240   :  { %v2902_v27 = vpop.permute.xlu1 %2901  ;;  %v2898_v54 = vpop.permute.xlu0 %2897  ;;  %v4225_v14 = vxor.u32 2147483648, %v7323_v21  ;;  %v4704_v52 = vsel %vm4696_vm2, %v4683_v3, %v4686_v11  ;;  %v4695_v46 = vor.u32 %v4694_v63, %v4693_v4  ;;  %v4702_v9 = vsel %vm4698_vm4, %v4686_v11, %v4701_v13 }
 0x241   :  { %v7325_v19 = vpop.eup %7324  ;;  %v2954_v55 = vmul.f32 %v10243_v53, %v2902_v27  ;;  %v2953_v25 = vmul.f32 %v10249_v18, %v2898_v54  ;;  %6908 = vmatpush3.bf16.msra.mxu1 %v6907_v36  ;;  %vm5580_vm6 = vcmp.lt.s32.totalorder %v5579_v42, 0  ;;  %v4706_v44 = vsel %vm4698_vm4, %v4689_v31, %v4705_v5 }
 0x242   :  { %3756 = vrot.lane.b32.xlu1 %v10263_v28, %s7482_s6  ;;  %3752 = vrot.lane.b32.xlu0 %v10263_v28, %s7483_s2  ;;  %v4222_v47 = vxor.u32 2147483648, %v7325_v19  ;;  %v4226_v57 = vsel %vm4224_vm14, %v4225_v14, %v7325_v19  ;;  %v4466_v48 = vsel %vm5580_vm6, 0, %v5579_v42  ;;  %v4708_v36 = vsel %vm4696_vm2, %v4686_v11, %v4689_v31 }
 0x243   :  { %v6886_v45 = vpack.c.bf16 %v2954_v55, %v2953_v25  ;;  %6909 = vmatprep.subr.bf16.mxu1 %v7473_v16  ;;  %v4467_v3 = vsub.s32 32, %v4466_v48  ;;  %v4468_v34 = vshll.u32 %v10611_v37, %v4466_v48  ;;  %v4471_v10 = vsub.s32 4294967266, %v4466_v48 }
 0x244   :  { %v3171_v23 = vpop.permute.xlu1 %3170  ;;  %v3167_v0 = vpop.permute.xlu0 %3166  ;;  %v4223_v28 = vsel %vm4221_vm15, %v7323_v21, %v4222_v47  ;;  %v4707_v11 = vsel %vm4697_vm3, %v4704_v52, %v4706_v44  ;;  %v4703_v13 = vsel %vm4697_vm3, %v4700_v15, %v4702_v9  ;;  %v4657_v47 = vmul.f32 %v4656_v12, %v7525_v6 }
 0x245   :  { %v3223_v62 = vmul.f32 %v10243_v53, %v3171_v23  ;;  %v3222_v4 = vmul.f32 %v10249_v18, %v3167_v0  ;;  %6887 = vmatpush3.bf16.msra.mxu0 %v6886_v45  ;;  %v4227_v63 = vsel %vm4220_vm0, %v4223_v28, %v4226_v57  ;;  %v4469_v53 = vshrl.u32 %v10632_v59, %v4467_v3 }
 0x246   :  { %3969 = vrot.lane.b32.xlu1 %v10620_v41, %s7470_s18  ;;  %3965 = vrot.lane.b32.xlu0 %v10620_v41, %s7468_s16  ;;  %v4228_v37 = vsel %vm4218_vm1, nan, %v4227_v63  ;;  %v4472_v21 = vadd.s32 127, %v4471_v10  ;;  %v4709_v18 = vsel %vm4699_vm5, %v4695_v46, 1326507024  ;;  %v4936_v57 = vand.u32 2139095040, %v10638_v50 }
 0x247   :  { %v6910_v2 = vpack.c.bf16 %v3223_v62, %v3222_v4  ;;  %v10706_v27 = vmul.f32 %v10580_v26, %v4228_v37  ;;  %6888 = vmatprep.subr.bf16.mxu0 %v7473_v16  ;;  %v4710_v31 = vsel %vm4698_vm4, %v4692_v32, %v4709_v18  ;;  %v4470_v59 = vor.u32 %v4469_v53, %v4468_v34 }
 0x248   :  { %v2910_v58 = vpop.permute.xlu1 %2909  ;;  %v2906_v54 = vpop.permute.xlu0 %2905  ;;  %v4473_v42 = vshll.u32 %v4472_v21, 23  ;;  %v4711_v26 = vsel %vm4697_vm3, %v4708_v36, %v4710_v31  ;;  %v10728_v30 = vmul.u32.u64.low %v10652_v7, %v4707_v11  ;;  %v10729_v14 = vmul.u32.u64.high %v10652_v7, %v4707_v11, %v10728_v30 }
 0x249   :  { %v2956_v5 = vmul.f32 %v10300_v24, %v2910_v58  ;;  %v2955_v19 = vmul.f32 %v10306_v17, %v2906_v54  ;;  %6911 = vmatpush3.bf16.msra.mxu1 %v6910_v2  ;;  %v10720_v55 = vmul.u32.u64.low %v10652_v7, %v4711_v26  ;;  %v10721_v25 = vmul.u32.u64.high %v10652_v7, %v4711_v26, %v10720_v55 }
 0x24a   :  { %4238 = vrot.lane.b32.xlu1 %v10706_v27, %s7470_s18  ;;  %4234 = vrot.lane.b32.xlu0 %v10706_v27, %s7468_s16  ;;  %v4474_v32 = vor.u32 4788187, %v4473_v42  ;;  %v4477_v15 = vcvt.s32.f32 %v4470_v59  ;;  %v4719_v23 = vmul.u32 %v10652_v7, %v4703_v13  ;;  %v4389_v12 = vmul.f32 -0.5, %v10570_v33 }
 0x24b   :  { %v6889_v52 = vpack.c.bf16 %v2956_v5, %v2955_v19  ;;  %6912 = vmatprep.subr.bf16.mxu1 %v7473_v16  ;;  %vm4721_vm7 = vc.u32 %v10721_v25, %v10728_v30  ;;  %v4722_v28 = vadd.s32 1, %v10729_v14  ;;  %v4937_v3 = vshrl.u32 %v4936_v57, 23 }
 0x24c   :  { %v3179_v46 = vpop.permute.xlu1 %3178  ;;  %v3175_v9 = vpop.permute.xlu0 %3174  ;;  %v4475_v45 = vand.u32 2147483647, %v4474_v32  ;;  %v4481_v10 = vsub.s32 4, %v10587_v49  ;;  %v4933_v4 = vand.u32 2147483647, %v10638_v50  ;;  %v4390_v21 = vmul.f32 %v4389_v12, %v10570_v33 }
 0x24d   :  { %v3225_v48 = vmul.f32 %v10300_v24, %v3179_v46  ;;  %v3224_v44 = vmul.f32 %v10306_v17, %v3175_v9  ;;  %6890 = vmatpush3.bf16.msra.mxu0 %v6889_v52  ;;  %v4658_v17 = vmul.f32 -0.5, %v4657_v47  ;;  %v4723_v62 = vsel %vm4721_vm7, %v4722_v28, %v10729_v14 }
 0x24e   :  { %3977 = vrot.lane.b32.xlu1 %v10620_v41, %s7469_s17  ;;  %3973 = vrot.lane.b32.xlu0 %v10620_v41, %s7467_s15  ;;  %v4478_v0 = vmul.f32 %v4477_v15, %v4475_v45  ;;  %v4724_v37 = vadd.s32 %v4723_v62, %v4719_v23  ;;  %v5591_v53 = vadd.s32 4294967169, %v4937_v3  ;;  %vm4397_vm8 = vcmp.lt.s32.totalorder %v10161_v60, 0 }
 0x24f   :  { %v6913_v24 = vpack.c.bf16 %v3225_v48, %v3224_v44  ;;  %6891 = vmatprep.subr.bf16.mxu0 %v7473_v16  ;;  %v4659_v11 = vmul.f32 %v4658_v17, %v4657_v47  ;;  %v4940_v42 = vand.u32 8388607, %v4933_v4  ;;  %v4482_v33 = vsel %vm4397_vm8, %v4481_v10, %v10587_v49 }
 0x250   :  { %v2918_v7 = vpop.permute.xlu1 %2917  ;;  %v2914_v34 = vpop.permute.xlu0 %2913  ;;  %v4479_v18 = vxor.u32 2147483648, %v4478_v0  ;;  %v4725_v31 = vadd.s32 536870912, %v4724_v37  ;;  %v4943_v58 = vadd.s32 1, %v5591_v53  ;;  %v4391_v19 = vmul.f32 1.442695, %v4390_v21 }
 0x251   :  { %v2958_v63 = vmul.f32 %v10350_v35, %v2918_v7  ;;  %v2957_v36 = vmul.f32 %v10356_v40, %v2914_v34  ;;  %6914 = vmatpush3.bf16.msra.mxu1 %v6913_v24  ;;  %v11763_v55 = vand.u32 2147483647, %v10161_v60  ;;  %v4660_v32 = vmul.f32 1.442695, %v4659_v11 }
 0x252   :  { %4246 = vrot.lane.b32.xlu1 %v10706_v27, %s7469_s17  ;;  %4242 = vrot.lane.b32.xlu0 %v10706_v27, %s7467_s15  ;;  %v10772_v5 = vshrl.u32 %v4725_v31, 30  ;;  %vm4944_vm10 = vcmp.gt.s32.totalorder %v4943_v58, 0  ;;  %v4941_v9 = vor.u32 8388608, %v4940_v42  ;;  %v5200_v57 = vstv %s10752_s26 }
 0x253   :  { %v6892_v2 = vpack.c.bf16 %v2958_v63, %v2957_v36  ;;  %6915 = vmatprep.subr.bf16.mxu1 %v7473_v16  ;;  %vm10780_vm9 = vcmp.le.f32.partialorder %v11763_v55, 0.7853982  ;;  %v4945_v14 = vsel %vm4944_vm10, %v4943_v58, 0  ;;  %7326 = vpow2.f32 %v4391_v19  ;;  %v10844_v19 = vld [vmem:[%s11699_s3 + $0x50] sm:$0xff] }
 0x254   :  { %v3187_v54 = vpop.permute.xlu1 %3186  ;;  %v3183_v59 = vpop.permute.xlu0 %3182  ;;  %v4727_v15 = vshll.u32 %v10772_v5, 30  ;;  %v4484_v46 = vsel %vm10780_vm9, 0, %v4482_v33  ;;  %v4947_v45 = vand.u32 31, %v4945_v14  ;;  %7328 = vpow2.f32 %v4660_v32 }
 0x255   :  { %v3227_v13 = vmul.f32 %v10350_v35, %v3187_v54  ;;  %v3226_v26 = vmul.f32 %v10356_v40, %v3183_v59  ;;  %6893 = vmatpush3.bf16.msra.mxu0 %v6892_v2  ;;  %v4480_v40 = vsel %vm4397_vm8, %v4479_v18, %v4478_v0  ;;  %v4498_v0 = vstv %s10760_s8  ;;  %s11211_s8 = sld [smem:[#allocation2 + $0x12]] }
 0x256   :  { %3985 = vrot.lane.b32.xlu1 %v10620_v41, %s7471_s19  ;;  %3981 = vrot.lane.b32.xlu0 %v10620_v41, %s7472_s20  ;;  %v4483_v23 = vsel %vm10780_vm9, %v10161_v60, %v4480_v40  ;;  %v10796_v12 = vsub.s32 %v4724_v37, %v4727_v15  ;;  %v4948_v28 = vsub.s32 32, %v4947_v45  ;;  %v10804_v17 = vand.u32 3, %v4484_v46 }
 0x257   :  { %v6916_v49 = vpack.c.bf16 %v3227_v13, %v3226_v26  ;;  %6894 = vmatprep.subr.bf16.mxu0 %v7473_v16  ;;  %7330 = vcosq.f32 %v4483_v23  ;;  %v10809_v10 = vadd.s32 %v10728_v30, %v10721_v25  ;;  %v10811_v62 = vshll.u32 %v4941_v9, 8  ;;  %v10838_v26 = vld [vmem:[%s11699_s3 + $0x58] sm:$0xff] }
 0x258   :  { %v2926_v52 = vpop.permute.xlu1 %2925  ;;  %v2922_v47 = vpop.permute.xlu0 %2921  ;;  %v4730_v3 = vsub.s32 0, %v10796_v12  ;;  %v10814_v63 = vmul.f32 %v5200_v57, %v7525_v6  ;;  %v4950_v21 = vshll.u32 %v11761_v56, %v4947_v45  ;;  %7332 = vsinq.f32 %v4483_v23 }
 0x259   :  { %v2960_v48 = vmul.f32 %v10409_v8, %v2926_v52  ;;  %v2959_v44 = vmul.f32 %v10415_v22, %v2922_v47  ;;  %6917 = vmatpush3.bf16.msra.mxu1 %v6916_v49  ;;  %v4951_v25 = vshrl.u32 %v11762_v51, %v4948_v28  ;;  %v4953_v30 = vshll.u32 %v11762_v51, %v4947_v45 }
 0x25a   :  { %4254 = vrot.lane.b32.xlu1 %v10706_v27, %s7471_s19  ;;  %4250 = vrot.lane.b32.xlu0 %v10706_v27, %s7472_s20  ;;  %v5585_v53 = vmin.u32 %v4730_v3, %v10796_v12  ;;  %v4954_v2 = vshrl.u32 %v11736_v38, %v4948_v28  ;;  %v4957_v11 = vshrl.u32 %v11737_v20, %v4948_v28  ;;  %v4750_v54 = vsub.s32 4, %v10772_v5 }
 0x25b   :  { %v6895_v24 = vpack.c.bf16 %v2960_v48, %v2959_v44  ;;  %6918 = vmatprep.subr.bf16.mxu1 %v7473_v16  ;;  %v10831_v59 = vshrl.u32 %v4945_v14, 5  ;;  %v4959_v42 = vshll.u32 %v11737_v20, %v4947_v45  ;;  %v4960_v13 = vshrl.u32 %v11738_v1, %v4948_v28 }
 0x25c   :  { %v3195_v7 = vpop.permute.xlu1 %3194  ;;  %v3191_v34 = vpop.permute.xlu0 %3190  ;;  %v4962_v40 = vshll.u32 %v11738_v1, %v4947_v45  ;;  %v4949_v49 = vshrl.u32 %v11761_v56, %v4948_v28  ;;  %v4952_v32 = vor.u32 %v4951_v25, %v4950_v21  ;;  %v4963_v15 = vshrl.u32 %v11749_v43, %v4948_v28 }
 0x25d   :  { %v3229_v36 = vmul.f32 %v10409_v8, %v3195_v7  ;;  %v3228_v37 = vmul.f32 %v10415_v22, %v3191_v34  ;;  %6896 = vmatpush3.bf16.msra.mxu0 %v6895_v24  ;;  %v4956_v8 = vshll.u32 %v11736_v38, %v4947_v45  ;;  %v4732_v22 = vclz %v5585_v53  ;;  %v10856_v9 = vpop.eup %7326 }
 0x25e   :  { %3993 = vrot.lane.b32.xlu1 %v10620_v41, %s7474_s24  ;;  %3989 = vrot.lane.b32.xlu0 %v10620_v41, %s7475_s25  ;;  %v5205_v14 = vand.u32 2139095040, %v10814_v63  ;;  %v4955_v47 = vor.u32 %v4954_v2, %v4953_v30  ;;  %v4961_v44 = vor.u32 %v4960_v13, %v4959_v42  ;;  %vm4965_vm13 = vcmp.lt.s32.totalorder %v10831_v59, 1  ;;  %v10860_v23 = vpop.eup %7328  ;;  %v10897_v42 = vld [vmem:[%s11699_s3 + $0x60] sm:$0xff] }
 0x25f   :  { %v6919_v18 = vpack.c.bf16 %v3229_v36, %v3228_v37  ;;  %6897 = vmatprep.subr.bf16.mxu0 %v7473_v16  ;;  %v5586_v35 = vadd.s32 4294967294, %v4732_v22  ;;  %v4958_v46 = vor.u32 %v4957_v11, %v4956_v8  ;;  %vm4966_vm14 = vcmp.lt.s32.totalorder %v10831_v59, 2 }
 0x260   :  { %v2934_v31 = vpop.permute.xlu1 %2933  ;;  %v2930_v58 = vpop.permute.xlu0 %2929  ;;  %v4964_v7 = vor.u32 %v4963_v15, %v4962_v40  ;;  %vm4967_vm15 = vcmp.lt.s32.totalorder %v10831_v59, 3  ;;  %vm4968_vm0 = vcmp.lt.s32.totalorder %v10831_v59, 4  ;;  %v4969_v25 = vsel %vm4965_vm13, %v4949_v49, %v4952_v32 }
 0x261   :  { %v2962_v33 = vmul.f32 %v10838_v26, %v2934_v31  ;;  %v2961_v55 = vmul.f32 %v10844_v19, %v2930_v58  ;;  %6920 = vmatpush3.bf16.msra.mxu1 %v6919_v18  ;;  %vm5587_vm12 = vcmp.lt.s32.totalorder %v5586_v35, 0  ;;  %v10864_v34 = vpop.eup %7330  ;;  %v4970_v30 = vsel %vm4968_vm0, %v4958_v46, 2102212464  ;;  %v10891_v31 = vld [vmem:[%s11699_s3 + $0x68] sm:$0xff] }
 0x262   :  { %4262 = vrot.lane.b32.xlu1 %v10706_v27, %s7474_s24  ;;  %4258 = vrot.lane.b32.xlu0 %v10706_v27, %s7475_s25  ;;  %v4735_v48 = vsel %vm5587_vm12, 0, %v5586_v35  ;;  %v10879_v8 = vpop.eup %7332  ;;  %vm4666_vm1 = vcmp.lt.s32.totalorder %v10404_v39, 0  ;;  %v4971_v2 = vsel %vm4967_vm15, %v4955_v47, %v4970_v30  ;;  %v4973_v11 = vsel %vm4965_vm13, %v4952_v32, %v4955_v47 }
 0x263   :  { %v6898_v52 = vpack.c.bf16 %v2962_v33, %v2961_v55  ;;  %6921 = vmatprep.subr.bf16.mxu1 %v7473_v16  ;;  %v4736_v3 = vsub.s32 32, %v4735_v48  ;;  %v4737_v36 = vshll.u32 %v10796_v12, %v4735_v48  ;;  %v4740_v37 = vsub.s32 4294967266, %v4735_v48 }
 0x264   :  { %v3203_v45 = vpop.permute.xlu1 %3202  ;;  %v3199_v57 = vpop.permute.xlu0 %3198  ;;  %v4977_v55 = vsel %vm4965_vm13, %v4955_v47, %v4958_v46  ;;  %vm10908_vm2 = vcmp.le.f32.partialorder %v4664_v29, 0.7853982  ;;  %v4972_v49 = vsel %vm4966_vm14, %v4969_v25, %v4971_v2  ;;  %v4978_v15 = vsel %vm4968_vm0, %v4964_v7, 1326507024 }
 0x265   :  { %v3231_v28 = vmul.f32 %v10838_v26, %v3203_v45  ;;  %v3230_v24 = vmul.f32 %v10844_v19, %v3199_v57  ;;  %6899 = vmatpush3.bf16.msra.mxu0 %v6898_v52  ;;  %v4738_v21 = vshrl.u32 %v10809_v10, %v4736_v3  ;;  %v4741_v22 = vadd.s32 127, %v4740_v37 }
 0x266   :  { %4001 = vrot.lane.b32.xlu1 %v10620_v41, %s7476_s1  ;;  %3997 = vrot.lane.b32.xlu0 %v10620_v41, %s7477_s0  ;;  %v4974_v10 = vsel %vm4968_vm0, %v4961_v44, 920167782  ;;  %v4979_v45 = vsel %vm4967_vm15, %v4961_v44, %v4978_v15  ;;  %vm4487_vm3 = vweird.f32 %v10161_v60  ;;  %vm4489_vm4 = vcmp.lt.s32.totalorder %v10804_v17, 2 }
 0x267   :  { %v6922_v53 = vpack.c.bf16 %v3231_v28, %v3230_v24  ;;  %6900 = vmatprep.subr.bf16.mxu0 %v7473_v16  ;;  %v4739_v33 = vor.u32 %v4738_v21, %v4737_v36  ;;  %v4742_v40 = vshll.u32 %v4741_v22, 23  ;;  %v4975_v32 = vsel %vm4967_vm15, %v4958_v46, %v4974_v10 }
 0x268   :  { %v2942_v18 = vpop.permute.xlu1 %2941  ;;  %v2938_v12 = vpop.permute.xlu0 %2937  ;;  %v4976_v29 = vsel %vm4966_vm14, %v4973_v11, %v4975_v32  ;;  %v4980_v46 = vsel %vm4966_vm14, %v4977_v55, %v4979_v45  ;;  %vm4490_vm5 = vcmp.eq.s32.totalorder %v10804_v17, 0  ;;  %v4491_v25 = vxor.u32 2147483648, %v10879_v8 }
 0x269   :  { %v2964_v58 = vmul.f32 %v10891_v31, %v2942_v18  ;;  %v2963_v13 = vmul.f32 %v10897_v42, %v2938_v12  ;;  %6923 = vmatpush3.bf16.msra.mxu1 %v6922_v53  ;;  %v4746_v47 = vcvt.s32.f32 %v4739_v33  ;;  %v4743_v28 = vor.u32 4788187, %v4742_v40 }
 0x26a   :  { %4270 = vrot.lane.b32.xlu1 %v10706_v27, %s7476_s1  ;;  %4266 = vrot.lane.b32.xlu0 %v10706_v27, %s7477_s0  ;;  %v10928_v24 = vmul.u32.u64.low %v10811_v62, %v4976_v29  ;;  %v10929_v3 = vmul.u32.u64.high %v10811_v62, %v4976_v29, %v10928_v24  ;;  %v10935_v44 = vmul.u32.u64.low %v10811_v62, %v4980_v46  ;;  %v10936_v37 = vmul.u32.u64.high %v10811_v62, %v4980_v46, %v10935_v44 }
 0x26b   :  { %v6901_v52 = vpack.c.bf16 %v2964_v58, %v2963_v13  ;;  %6924 = vmatprep.subr.bf16.mxu1 %v7473_v16  ;;  %v4744_v59 = vand.u32 2147483647, %v4743_v28  ;;  %v5206_v53 = vshrl.u32 %v5205_v14, 23  ;;  %v4494_v30 = vxor.u32 2147483648, %v10864_v34  ;;  %v10956_v14 = vld [vmem:[%s11699_s3 + $0x78] sm:$0xff]  ;;  %v10962_v13 = vld [vmem:[%s11699_s3 + $0x70] sm:$0xff] }
 0x26c   :  { %v3211_v57 = vpop.permute.xlu1 %3210  ;;  %v3207_v48 = vpop.permute.xlu0 %3206  ;;  %v4988_v18 = vmul.u32 %v10811_v62, %v4972_v49  ;;  %vm4493_vm6 = vcmp.eq.s32.totalorder %v10804_v17, 2  ;;  %v4991_v11 = vadd.s32 1, %v10929_v3  ;;  %v4751_v33 = vsel %vm4666_vm1, %v4750_v54, %v10772_v5  ;;  %v11011_v17 = vld [vmem:[%s11700_s4] sm:$0xff] }
 0x26d   :  { %v3233_v7 = vmul.f32 %v10891_v31, %v3211_v57  ;;  %v3232_v36 = vmul.f32 %v10897_v42, %v3207_v48  ;;  %6902 = vmatpush3.bf16.msra.mxu0 %v6901_v52  ;;  %v4747_v2 = vmul.f32 %v4746_v47, %v4744_v59  ;;  %v5598_v10 = vadd.s32 4294967169, %v5206_v53 }
 0x26e   :  { %4009 = vrot.lane.b32.xlu1 %v10620_v41, %s7478_s27  ;;  %4005 = vrot.lane.b32.xlu0 %v10620_v41, %s7479_s28  ;;  %vm4990_vm7 = vc.u32 %v10936_v37, %v10928_v24  ;;  %v5202_v49 = vand.u32 2147483647, %v10814_v63  ;;  %v4492_v5 = vsel %vm4490_vm5, %v10864_v34, %v4491_v25  ;;  %v4495_v54 = vsel %vm4493_vm6, %v4494_v30, %v10879_v8 }
 0x26f   :  { %v6925_v21 = vpack.c.bf16 %v3233_v7, %v3232_v36  ;;  %6903 = vmatprep.subr.bf16.mxu0 %v7473_v16  ;;  %v4748_v55 = vxor.u32 2147483648, %v4747_v2  ;;  %v4992_v40 = vsel %vm4990_vm7, %v4991_v11, %v10929_v3  ;;  %v5212_v32 = vadd.s32 1, %v5598_v10 }
 0x270   :  { %v2950_v12 = vpop.permute.xlu1 %2949  ;;  %v2946_v22 = vpop.permute.xlu0 %2945  ;;  %v4993_v52 = vadd.s32 %v4992_v40, %v4988_v18  ;;  %v4753_v57 = vsel %vm10908_vm2, 0, %v4751_v33  ;;  %v4767_v48 = vstv %s10923_s22  ;;  %v4496_v3 = vsel %vm4489_vm4, %v4492_v5, %v4495_v54  ;;  %v11022_v18 = vld [vmem:[%s11699_s3 + $0x8] sm:$0xff] }
 0x271   :  { %v2966_v58 = vmul.f32 %v10956_v14, %v2950_v12  ;;  %v2965_v62 = vmul.f32 %v10962_v13, %v2946_v22  ;;  %6926 = vmatpush3.bf16.msra.mxu1 %v6925_v21  ;;  %v4749_v45 = vsel %vm4666_vm1, %v4748_v55, %v4747_v2  ;;  %vm5213_vm8 = vcmp.gt.s32.totalorder %v5212_v32, 0  ;;  %v11028_v22 = vld [vmem:[%s11699_s3] sm:$0xff] }
 0x272   :  { %4278 = vrot.lane.b32.xlu1 %v10706_v27, %s7478_s27  ;;  %4274 = vrot.lane.b32.xlu0 %v10706_v27, %s7479_s28  ;;  %v4752_v34 = vsel %vm10908_vm2, %v10404_v39, %v4749_v45  ;;  %v4994_v8 = vadd.s32 536870912, %v4993_v52  ;;  %v5209_v7 = vand.u32 8388607, %v5202_v49  ;;  %v5214_v36 = vsel %vm5213_vm8, %v5212_v32, 0 }
 0x273   :  { %v6904_v15 = vpack.c.bf16 %v2966_v58, %v2965_v62  ;;  %6927 = vmatprep.subr.bf16.mxu1 %v7473_v16  ;;  %7334 = vcosq.f32 %v4752_v34  ;;  %v11004_v35 = vand.u32 3, %v4753_v57  ;;  %v4499_v25 = vmul.f32 %v10856_v9, %v4498_v0 }
 0x274   :  { %v3219_v47 = vpop.permute.xlu1 %3218  ;;  %v3215_v29 = vpop.permute.xlu0 %3214  ;;  %7336 = vsinq.f32 %v4752_v34  ;;  %v11006_v59 = vshrl.u32 %v4994_v8, 30  ;;  %v11017_v30 = vand.u32 31, %v5214_v36  ;;  %v4497_v0 = vsel %vm4487_vm3, nan, %v4496_v3 }
 0x275   :  { %v3235_v28 = vmul.f32 %v10956_v14, %v3219_v47  ;;  %v3234_v46 = vmul.f32 %v10962_v13, %v3215_v29  ;;  %6905 = vmatpush3.bf16.msra.mxu0 %v6904_v15  ;;  %v11041_v11 = vmul.f32 %v10860_v23, %v4767_v48  ;;  %v5210_v10 = vor.u32 8388608, %v5209_v7 }
 0x276   :  { %4017 = vrot.lane.b32.xlu1 %v10620_v41, %s7480_s29  ;;  %4013 = vrot.lane.b32.xlu0 %v10620_v41, %s7481_s30  ;;  %v4996_v9 = vshll.u32 %v11006_v59, 30  ;;  %v5217_v58 = vsub.s32 32, %v11017_v30  ;;  %vm4756_vm9 = vweird.f32 %v10404_v39  ;;  %vm4758_vm10 = vcmp.lt.s32.totalorder %v11004_v35, 2 }
 0x277   :  { %v6928_v44 = vpack.c.bf16 %v3235_v28, %v3234_v46  ;;  %6930 = vmatprep.subr.bf16.mxu0 %v7473_v16  ;;  %vm4759_vm12 = vcmp.eq.s32.totalorder %v11004_v35, 0  ;;  %v11051_v23 = vmul.f32 %v4499_v25, %v4497_v0  ;;  %vm4762_vm13 = vcmp.eq.s32.totalorder %v11004_v35, 2 }
 0x278   :  { %v3432_v53 = vpop.permute.xlu1 %3431  ;;  %v3428_v21 = vpop.permute.xlu0 %3427  ;;  %6325 = vmatmul.mubr.f32.vlgmr.msra.gmra.mrb[10].mxu0 %v11011_v17  ;;  %v11048_v60 = vsub.s32 %v4993_v52, %v4996_v9  ;;  %v5219_v40 = vshll.u32 %v11761_v56, %v11017_v30  ;;  %v5220_v32 = vshrl.u32 %v11762_v51, %v5217_v58  ;;  %v11063_v54 = vadd.s32 %v10928_v24, %v10936_v37 }
 0x279   :  { %v3490_v12 = vmul.f32 %v11022_v18, %v3432_v53  ;;  %v3489_v2 = vmul.f32 %v11028_v22, %v3428_v21  ;;  %6929 = vmatpush3.bf16.msra.mxu1 %v6928_v44  ;;  %6394 = vmatprep.mubr.msk.f32.mxu0 %vm7484_vm11, %v11750_v61  ;;  %v11070_v47 = vshrl.u32 %v5214_v36, 5  ;;  %v5222_v29 = vshll.u32 %v11762_v51, %v11017_v30  ;;  %v11089_v44 = vld [vmem:[%s11699_s3 + $0x18] sm:$0xff]  ;;  %v11095_v53 = vld [vmem:[%s11699_s3 + $0x10] sm:$0xff] }
 0x27a   :  { %4286 = vrot.lane.b32.xlu1 %v10706_v27, %s7480_s29  ;;  %4282 = vrot.lane.b32.xlu0 %v10706_v27, %s7481_s30  ;;  %v4999_v52 = vsub.s32 0, %v11048_v60  ;;  %v5223_v45 = vshrl.u32 %v11736_v38, %v5217_v58  ;;  %v11075_v57 = vshll.u32 %v5210_v10, 8  ;;  %v5225_v37 = vshll.u32 %v11736_v38, %v11017_v30 }
 0x27b   :  { %v6931_v62 = vpack.c.bf16 %v3490_v12, %v3489_v2  ;;  %6954 = vmatprep.subr.bf16.mxu1 %v7473_v16  ;;  %v5218_v51 = vshrl.u32 %v11761_v56, %v5217_v58  ;;  %v5221_v8 = vor.u32 %v5220_v32, %v5219_v40  ;;  %v5226_v3 = vshrl.u32 %v11737_v20, %v5217_v58 }
 0x27c   :  { %v3701_v33 = vpop.permute.xlu1 %3700  ;;  %v3697_v55 = vpop.permute.xlu0 %3696  ;;  %6360 = vmatmul.mubr.f32.vlgmr.msra.gmra.mrb[10].mxu1 %v11011_v17  ;;  %v5592_v24 = vmin.u32 %v4999_v52, %v11048_v60  ;;  %v5229_v7 = vshrl.u32 %v11738_v1, %v5217_v58  ;;  %v5224_v12 = vor.u32 %v5223_v45, %v5222_v29  ;;  %v5231_v2 = vshll.u32 %v11738_v1, %v11017_v30 }
 0x27d   :  { %v3759_v15 = vmul.f32 %v11022_v18, %v3701_v33  ;;  %v3758_v5 = vmul.f32 %v11028_v22, %v3697_v55  ;;  %6932 = vmatpush3.bf16.msra.mxu0 %v6931_v62  ;;  %6429 = vmatprep.mubr.msk.f32.mxu1 %vm7484_vm11, %v11750_v61  ;;  %v7335_v28 = vpop.eup %7334  ;;  %v5232_v0 = vshrl.u32 %v11749_v43, %v5217_v58  ;;  %vm5234_vm14 = vcmp.lt.s32.totalorder %v11070_v47, 1 }
 0x27e   :  { %4025 = vrot.lane.b32.xlu1 %v10620_v41, %s7482_s6  ;;  %4021 = vrot.lane.b32.xlu0 %v10620_v41, %s7483_s2  ;;  %v5228_v41 = vshll.u32 %v11737_v20, %v11017_v30  ;;  %v7337_v36 = vpop.eup %7336  ;;  %v4763_v21 = vxor.u32 2147483648, %v7335_v28  ;;  %v5001_v20 = vclz %v5592_v24  ;;  %v5227_v40 = vor.u32 %v5226_v3, %v5225_v37 }
 0x27f   :  { %v6955_v48 = vpack.c.bf16 %v3759_v15, %v3758_v5  ;;  %6933 = vmatprep.subr.bf16.mxu0 %v7473_v16  ;;  %v4760_v25 = vxor.u32 2147483648, %v7337_v36  ;;  %vm5237_vm15 = vcmp.lt.s32.totalorder %v11070_v47, 4  ;;  %v5233_v5 = vor.u32 %v5232_v0, %v5231_v2 }
 0x280   :  { %v3440_v46 = vpop.permute.xlu1 %3439  ;;  %v3436_v34 = vpop.permute.xlu0 %3435  ;;  %v4764_v10 = vsel %vm4762_vm13, %v4763_v21, %v7337_v36  ;;  %v5593_v62 = vadd.s32 4294967294, %v5001_v20  ;;  %v5230_v32 = vor.u32 %v5229_v7, %v5228_v41  ;;  %vm5235_vm1 = vcmp.lt.s32.totalorder %v11070_v47, 2 }
 0x281   :  { %v3492_v38 = vmul.f32 %v11089_v44, %v3440_v46  ;;  %v3491_v56 = vmul.f32 %v11095_v53, %v3436_v34  ;;  %6956 = vmatpush3.bf16.msra.mxu1 %v6955_v48  ;;  %vm5236_vm2 = vcmp.lt.s32.totalorder %v11070_v47, 3  ;;  %v5239_v35 = vsel %vm5237_vm15, %v5227_v40, 2102212464  ;;  %v11143_v46 = vld [vmem:[%s11699_s3 + $0x20] sm:$0xff] }
 0x282   :  { %4294 = vrot.lane.b32.xlu1 %v10706_v27, %s7482_s6  ;;  %4290 = vrot.lane.b32.xlu0 %v10706_v27, %s7483_s2  ;;  %v4761_v27 = vsel %vm4759_vm12, %v7335_v28, %v4760_v25  ;;  %vm5594_vm0 = vcmp.lt.s32.totalorder %v5593_v62, 0  ;;  %v5242_v37 = vsel %vm5234_vm14, %v5221_v8, %v5224_v12  ;;  %v5243_v41 = vsel %vm5237_vm15, %v5230_v32, 920167782 }
 0x283   :  { %v6934_v9 = vpack.c.bf16 %v3492_v38, %v3491_v56  ;;  %6957 = vmatprep.subr.bf16.mxu1 %v7473_v16  ;;  %v4765_v30 = vsel %vm4758_vm10, %v4761_v27, %v4764_v10  ;;  %v5004_v15 = vsel %vm5594_vm0, 0, %v5593_v62  ;;  %v5238_v3 = vsel %vm5234_vm14, %v5218_v51, %v5221_v8 }
 0x284   :  { %v3709_v33 = vpop.permute.xlu1 %3708  ;;  %v3705_v55 = vpop.permute.xlu0 %3704  ;;  %v4766_v58 = vsel %vm4756_vm9, nan, %v4765_v30  ;;  %v5005_v24 = vsub.s32 32, %v5004_v15  ;;  %v5009_v39 = vsub.s32 4294967266, %v5004_v15  ;;  %v5246_v7 = vsel %vm5234_vm14, %v5224_v12, %v5227_v40 }
 0x285   :  { %v3761_v1 = vmul.f32 %v11089_v44, %v3709_v33  ;;  %v3760_v43 = vmul.f32 %v11095_v53, %v3705_v55  ;;  %6935 = vmatpush3.bf16.msra.mxu0 %v6934_v9  ;;  %v11124_v29 = vmul.f32 %v11041_v11, %v4766_v58  ;;  %v11137_v11 = vld [vmem:[%s11699_s3 + $0x28] sm:$0xff]  ;;  %v5240_v38 = vsel %vm5236_vm2, %v5224_v12, %v5239_v35  ;;  %v11192_v58 = vld [vmem:[%s11699_s3 + $0x38] sm:$0xff] }
 0x286   :  { %4507 = vrot.lane.b32.xlu1 %v11051_v23, %s7470_s18  ;;  %4503 = vrot.lane.b32.xlu0 %v11051_v23, %s7468_s16  ;;  %v5010_v36 = vadd.s32 127, %v5009_v39  ;;  %v5244_v56 = vsel %vm5236_vm2, %v5227_v40, %v5243_v41  ;;  %v5247_v21 = vsel %vm5237_vm15, %v5233_v5, 1326507024  ;;  %v5006_v8 = vshll.u32 %v11048_v60, %v5004_v15  ;;  %v11198_v5 = vld [vmem:[%s11699_s3 + $0x30] sm:$0xff] }
 0x287   :  { %v6958_v52 = vpack.c.bf16 %v3761_v1, %v3760_v43  ;;  %6936 = vmatprep.subr.bf16.mxu0 %v7473_v16  ;;  %v5245_v20 = vsel %vm5235_vm1, %v5242_v37, %v5244_v56  ;;  %v5248_v25 = vsel %vm5236_vm2, %v5230_v32, %v5247_v21  ;;  %v5007_v12 = vshrl.u32 %v11063_v54, %v5005_v24 }
 0x288   :  { %v3448_v45 = vpop.permute.xlu1 %3447  ;;  %v3444_v48 = vpop.permute.xlu0 %3443  ;;  %v5249_v9 = vsel %vm5235_vm1, %v5246_v7, %v5248_v25  ;;  %v11170_v10 = vmul.u32.u64.low %v11075_v57, %v5245_v20  ;;  %v11171_v62 = vmul.u32.u64.high %v11075_v57, %v5245_v20, %v11170_v10  ;;  %v5011_v55 = vshll.u32 %v5010_v36, 23  ;;  %v11229_v20 = vld [vmem:[%s11699_s3 + $0x40] sm:$0xff] }
 0x289   :  { %v3494_v28 = vmul.f32 %v11137_v11, %v3448_v45  ;;  %v3493_v34 = vmul.f32 %v11143_v46, %v3444_v48  ;;  %6959 = vmatpush3.bf16.msra.mxu1 %v6958_v52  ;;  %v5241_v27 = vsel %vm5235_vm1, %v5238_v3, %v5240_v38  ;;  %v5008_v35 = vor.u32 %v5007_v12, %v5006_v8 }
 0x28a   :  { %4776 = vrot.lane.b32.xlu1 %v11124_v29, %s7470_s18  ;;  %4772 = vrot.lane.b32.xlu0 %v11124_v29, %s7468_s16  ;;  %v11183_v54 = vmul.u32.u64.low %v11075_v57, %v5249_v9  ;;  %v11184_v40 = vmul.u32.u64.high %v11075_v57, %v5249_v9, %v11183_v54  ;;  %v5257_v30 = vmul.u32 %v11075_v57, %v5241_v27  ;;  %v5260_v47 = vadd.s32 1, %v11171_v62 }
 0x28b   :  { %v6937_v51 = vpack.c.bf16 %v3494_v28, %v3493_v34  ;;  %6960 = vmatprep.subr.bf16.mxu1 %v7473_v16  ;;  %v5012_v45 = vor.u32 4788187, %v5011_v55  ;;  %v5015_v3 = vcvt.s32.f32 %v5008_v35  ;;  %v4925_v27 = vstv %s11211_s8 }
 0x28c   :  { %v3717_v2 = vpop.permute.xlu1 %3716  ;;  %v3713_v0 = vpop.permute.xlu0 %3712  ;;  %vm5259_vm3 = vc.u32 %v11184_v40, %v11170_v10  ;;  %vm4935_vm4 = vcmp.lt.s32.totalorder %v10638_v50, 0  ;;  %vm11258_vm5 = vcmp.le.f32.partialorder %v4933_v4, 0.7853982  ;;  %vm5204_vm7 = vcmp.lt.s32.totalorder %v10814_v63, 0 }
 0x28d   :  { %v3763_v60 = vmul.f32 %v11137_v11, %v3717_v2  ;;  %v3762_v33 = vmul.f32 %v11143_v46, %v3713_v0  ;;  %6938 = vmatpush3.bf16.msra.mxu0 %v6937_v51  ;;  %v5261_v48 = vsel %vm5259_vm3, %v5260_v47, %v11171_v62  ;;  %v5013_v34 = vand.u32 2147483647, %v5012_v45  ;;  %v11223_v51 = vld [vmem:[%s11699_s3 + $0x48] sm:$0xff] }
 0x28e   :  { %4515 = vrot.lane.b32.xlu1 %v11051_v23, %s7469_s17  ;;  %4511 = vrot.lane.b32.xlu0 %v11051_v23, %s7467_s15  ;;  %v5262_v37 = vadd.s32 %v5261_v48, %v5257_v30  ;;  %v4926_v47 = vmul.f32 %v4925_v27, %v7525_v6  ;;  %vm11322_vm8 = vcmp.le.f32.partialorder %v5202_v49, 0.7853982  ;;  %vm5025_vm13 = vweird.f32 %v10638_v50 }
 0x28f   :  { %v6961_v32 = vpack.c.bf16 %v3763_v60, %v3762_v33  ;;  %6939 = vmatprep.subr.bf16.mxu0 %v7473_v16  ;;  %v5016_v2 = vmul.f32 %v5015_v3, %v5013_v34  ;;  %vm5294_vm0 = vweird.f32 %v10814_v63 }
 0x290   :  { %v3456_v1 = vpop.permute.xlu1 %3455  ;;  %v3452_v43 = vpop.permute.xlu0 %3451  ;;  %v5263_v7 = vadd.s32 536870912, %v5262_v37 }
 0x291   :  { %v3496_v15 = vmul.f32 %v11192_v58, %v3456_v1  ;;  %v3495_v52 = vmul.f32 %v11198_v5, %v3452_v43  ;;  %6962 = vmatpush3.bf16.msra.mxu1 %v6961_v32  ;;  %v5017_v54 = vxor.u32 2147483648, %v5016_v2 }
 0x292   :  { %4784 = vrot.lane.b32.xlu1 %v11124_v29, %s7469_s17  ;;  %4780 = vrot.lane.b32.xlu0 %v11124_v29, %s7467_s15  ;;  %v11218_v21 = vshrl.u32 %v5263_v7, 30  ;;  %v4927_v7 = vmul.f32 -0.5, %v4926_v47 }
 0x293   :  { %v6940_v57 = vpack.c.bf16 %v3496_v15, %v3495_v52  ;;  %6963 = vmatprep.subr.bf16.mxu1 %v7473_v16 }
 0x294   :  { %v3725_v24 = vpop.permute.xlu1 %3724  ;;  %v3721_v39 = vpop.permute.xlu0 %3720  ;;  %v5265_v0 = vshll.u32 %v11218_v21, 30 }
 0x295   :  { %v3765_v41 = vmul.f32 %v11192_v58, %v3725_v24  ;;  %v3764_v28 = vmul.f32 %v11198_v5, %v3721_v39  ;;  %6941 = vmatpush3.bf16.msra.mxu0 %v6940_v57  ;;  %v5018_v57 = vsel %vm4935_vm4, %v5017_v54, %v5016_v2  ;;  %v5194_v39 = vstv %s11238_s10 }
 0x296   :  { %4523 = vrot.lane.b32.xlu1 %v11051_v23, %s7471_s19  ;;  %4519 = vrot.lane.b32.xlu0 %v11051_v23, %s7472_s20  ;;  %v11240_v60 = vsub.s32 %v5262_v37, %v5265_v0  ;;  %v5021_v4 = vsel %vm11258_vm5, %v10638_v50, %v5018_v57 }
 0x297   :  { %v6964_v36 = vpack.c.bf16 %v3765_v41, %v3764_v28  ;;  %6942 = vmatprep.subr.bf16.mxu0 %v7473_v16  ;;  %7338 = vcosq.f32 %v5021_v4 }
 0x298   :  { %v3464_v38 = vpop.permute.xlu1 %3463  ;;  %v3460_v56 = vpop.permute.xlu0 %3459  ;;  %v5268_v32 = vsub.s32 0, %v11240_v60  ;;  %7340 = vsinq.f32 %v5021_v4 }
 0x299   :  { %v3498_v8 = vmul.f32 %v11223_v51, %v3464_v38  ;;  %v3497_v25 = vmul.f32 %v11229_v20, %v3460_v56  ;;  %6965 = vmatpush3.bf16.msra.mxu1 %v6964_v36  ;;  %v5195_v36 = vmul.f32 %v5194_v39, %v7525_v6  ;;  %v5258_v38 = vadd.s32 %v11170_v10, %v11184_v40 }
 0x29a   :  { %4792 = vrot.lane.b32.xlu1 %v11124_v29, %s7471_s19  ;;  %4788 = vrot.lane.b32.xlu0 %v11124_v29, %s7472_s20  ;;  %v5599_v15 = vmin.u32 %v5268_v32, %v11240_v60  ;;  %v4928_v10 = vmul.f32 %v4927_v7, %v4926_v47 }
 0x29b   :  { %v6943_v12 = vpack.c.bf16 %v3498_v8, %v3497_v25  ;;  %6966 = vmatprep.subr.bf16.mxu1 %v7473_v16 }
 0x29c   :  { %v3733_v9 = vpop.permute.xlu1 %3732  ;;  %v3729_v62 = vpop.permute.xlu0 %3728  ;;  %v5270_v48 = vclz %v5599_v15  ;;  %v4929_v47 = vmul.f32 1.442695, %v4928_v10 }
 0x29d   :  { %v3767_v33 = vmul.f32 %v11223_v51, %v3733_v9  ;;  %v3766_v55 = vmul.f32 %v11229_v20, %v3729_v62  ;;  %6944 = vmatpush3.bf16.msra.mxu0 %v6943_v12 }
 0x29e   :  { %4531 = vrot.lane.b32.xlu1 %v11051_v23, %s7474_s24  ;;  %4527 = vrot.lane.b32.xlu0 %v11051_v23, %s7475_s25  ;;  %v5600_v28 = vadd.s32 4294967294, %v5270_v48  ;;  %v612_v48 = vpop.f32.mrb[0].mxu1  ;;  %7342 = vpow2.f32 %v4929_v47 }
 0x29f   :  { %v6967_v1 = vpack.c.bf16 %v3767_v33, %v3766_v55  ;;  %6945 = vmatprep.subr.bf16.mxu0 %v7473_v16  ;;  %v5196_v55 = vmul.f32 -0.5, %v5195_v36  ;;  %616 = vst [vmem:[%s11701_s5 + $0x8] sm:$0xff] %v612_v48 }
 0x2a0   :  { %v3472_v43 = vpop.permute.xlu1 %3471  ;;  %v3468_v30 = vpop.permute.xlu0 %3467  ;;  %vm5601_vm6 = vcmp.lt.s32.totalorder %v5600_v28, 0 }
 0x2a1   :  { %v3500_v52 = vmul.f32 %v10838_v26, %v3472_v43  ;;  %v3499_v35 = vmul.f32 %v10844_v19, %v3468_v30  ;;  %6968 = vmatpush3.bf16.msra.mxu1 %v6967_v1  ;;  %v5197_v57 = vmul.f32 %v5196_v55, %v5195_v36  ;;  %v7339_v45 = vpop.eup %7338 }
 0x2a2   :  { %4800 = vrot.lane.b32.xlu1 %v11124_v29, %s7474_s24  ;;  %4796 = vrot.lane.b32.xlu0 %v11124_v29, %s7475_s25 }
 0x2a3   :  { %v6946_v24 = vpack.c.bf16 %v3500_v52, %v3499_v35  ;;  %6969 = vmatprep.subr.bf16.mxu1 %v7473_v16 }
 0x2a4   :  { %v3741_v37 = vpop.permute.xlu1 %3740  ;;  %v3737_v41 = vpop.permute.xlu0 %3736 }
 0x2a5   :  { %v3769_v34 = vmul.f32 %v10838_v26, %v3741_v37  ;;  %v3768_v3 = vmul.f32 %v10844_v19, %v3737_v41  ;;  %6947 = vmatpush3.bf16.msra.mxu0 %v6946_v24  ;;  %v5019_v26 = vsub.s32 4, %v11006_v59  ;;  %v5273_v19 = vsel %vm5601_vm6, 0, %v5600_v28 }
 0x2a6   :  { %4539 = vrot.lane.b32.xlu1 %v11051_v23, %s7476_s1  ;;  %4535 = vrot.lane.b32.xlu0 %v11051_v23, %s7477_s0  ;;  %v5274_v2 = vsub.s32 32, %v5273_v19  ;;  %v5275_v0 = vshll.u32 %v11240_v60, %v5273_v19  ;;  %v5278_v12 = vsub.s32 4294967266, %v5273_v19  ;;  %v5032_v19 = vxor.u32 2147483648, %v7339_v45 }
 0x2a7   :  { %v6970_v56 = vpack.c.bf16 %v3769_v34, %v3768_v3  ;;  %6948 = vmatprep.subr.bf16.mxu0 %v7473_v16  ;;  %v5020_v60 = vsel %vm4935_vm4, %v5019_v26, %v11006_v59  ;;  %v6011_v34 = vpop.f32.mrb[1].mxu1  ;;  %v7341_v3 = vpop.eup %7340 }
 0x2a8   :  { %v3480_v8 = vpop.permute.xlu1 %3479  ;;  %v3476_v25 = vpop.permute.xlu0 %3475  ;;  %v5276_v40 = vshrl.u32 %v5258_v38, %v5274_v2  ;;  %v5279_v62 = vadd.s32 127, %v5278_v12  ;;  %v5022_v59 = vsel %vm11258_vm5, 0, %v5020_v60  ;;  %v5198_v38 = vmul.f32 1.442695, %v5197_v57 }
 0x2a9   :  { %v3502_v6 = vmul.f32 %v10891_v31, %v3480_v8  ;;  %v3501_v9 = vmul.f32 %v10897_v42, %v3476_v25  ;;  %6971 = vmatpush3.bf16.msra.mxu1 %v6970_v56  ;;  %v5026_v4 = vand.u32 3, %v5022_v59  ;;  %v5288_v2 = vsub.s32 4, %v11218_v21 }
 0x2aa   :  { %4808 = vrot.lane.b32.xlu1 %v11124_v29, %s7476_s1  ;;  %4804 = vrot.lane.b32.xlu0 %v11124_v29, %s7477_s0  ;;  %v5277_v32 = vor.u32 %v5276_v40, %v5275_v0  ;;  %v5280_v1 = vshll.u32 %v5279_v62, 23  ;;  %7344 = vpow2.f32 %v5198_v38 }
 0x2ab   :  { %v6949_v33 = vpack.c.bf16 %v3502_v6, %v3501_v9  ;;  %6972 = vmatprep.subr.bf16.mxu1 %v7473_v16  ;;  %v5029_v6 = vxor.u32 2147483648, %v7341_v3  ;;  %vm5031_vm9 = vcmp.eq.s32.totalorder %v5026_v4, 2  ;;  %vm5028_vm10 = vcmp.eq.s32.totalorder %v5026_v4, 0 }
 0x2ac   :  { %v3749_v27 = vpop.permute.xlu1 %3748  ;;  %v3745_v54 = vpop.permute.xlu0 %3744  ;;  %v5281_v15 = vor.u32 4788187, %v5280_v1  ;;  %v5284_v52 = vcvt.s32.f32 %v5277_v32  ;;  %vm5027_vm12 = vcmp.lt.s32.totalorder %v5026_v4, 2  ;;  %v5289_v60 = vsel %vm5204_vm7, %v5288_v2, %v11218_v21 }
 0x2ad   :  { %v3771_v43 = vmul.f32 %v10891_v31, %v3749_v27  ;;  %v3770_v30 = vmul.f32 %v10897_v42, %v3745_v54  ;;  %6950 = vmatpush3.bf16.msra.mxu0 %v6949_v33  ;;  %v343_v31 = vpop.f32.mrb[0].mxu0  ;;  %v5033_v33 = vsel %vm5031_vm9, %v5032_v19, %v7341_v3  ;;  %v5030_v54 = vsel %vm5028_vm10, %v7339_v45, %v5029_v6  ;;  %v7343_v21 = vpop.eup %7342 }
 0x2ae   :  { %4547 = vrot.lane.b32.xlu1 %v11051_v23, %s7478_s27  ;;  %4543 = vrot.lane.b32.xlu0 %v11051_v23, %s7479_s28  ;;  %v5282_v39 = vand.u32 2147483647, %v5281_v15  ;;  %347 = vst [vmem:[%s11701_s5] sm:$0xff] %v343_v31  ;;  %v5976_v28 = vpop.f32.mrb[1].mxu0  ;;  %v5036_v1 = vstv %s11317_s21  ;;  %v5034_v59 = vsel %vm5027_vm12, %v5030_v54, %v5033_v33 }
 0x2af   :  { %v6973_v35 = vpack.c.bf16 %v3771_v43, %v3770_v30  ;;  %6951 = vmatprep.subr.bf16.mxu0 %v7473_v16  ;;  %v5291_v43 = vsel %vm11322_vm8, 0, %v5289_v60  ;;  %v5035_v31 = vsel %vm5025_vm13, nan, %v5034_v59 }
 0x2b0   :  { %v3488_v42 = vpop.permute.xlu1 %3487  ;;  %v3484_v24 = vpop.permute.xlu0 %3483  ;;  %v5285_v7 = vmul.f32 %v5284_v52, %v5282_v39  ;;  %v5295_v57 = vand.u32 3, %v5291_v43 }
 0x2b1   :  { %v3504_v37 = vmul.f32 %v10956_v14, %v3488_v42  ;;  %v3503_v41 = vmul.f32 %v10962_v13, %v3484_v24  ;;  %6974 = vmatpush3.bf16.msra.mxu1 %v6973_v35  ;;  %v5037_v35 = vmul.f32 %v7343_v21, %v5036_v1  ;;  %v1150_v1 = vpop.f32.mrb[2].mxu1 }
 0x2b2   :  { %4816 = vrot.lane.b32.xlu1 %v11124_v29, %s7478_s27  ;;  %4812 = vrot.lane.b32.xlu0 %v11124_v29, %s7479_s28  ;;  %v5286_v25 = vxor.u32 2147483648, %v5285_v7  ;;  %vm5300_vm14 = vcmp.eq.s32.totalorder %v5295_v57, 2  ;;  %vm5297_vm15 = vcmp.eq.s32.totalorder %v5295_v57, 0  ;;  %vm5296_vm1 = vcmp.lt.s32.totalorder %v5295_v57, 2  ;;  %1154 = vst [vmem:[%s11701_s5 + $0x18] sm:$0xff] %v1150_v1 }
 0x2b3   :  { %v6952_v36 = vpack.c.bf16 %v3504_v37, %v3503_v41  ;;  %6975 = vmatprep.subr.bf16.mxu1 %v7473_v16  ;;  %v5305_v41 = vstv %s11352_s9 }
 0x2b4   :  { %v3757_v56 = vpop.permute.xlu1 %3756  ;;  %v3753_v26 = vpop.permute.xlu0 %3752  ;;  %v5287_v49 = vsel %vm5204_vm7, %v5286_v25, %v5285_v7 }
 0x2b5   :  { %v3773_v0 = vmul.f32 %v10956_v14, %v3757_v56  ;;  %v3772_v12 = vmul.f32 %v10962_v13, %v3753_v26  ;;  %6953 = vmatpush3.bf16.msra.mxu0 %v6952_v36  ;;  %v5290_v10 = vsel %vm11322_vm8, %v10814_v63, %v5287_v49  ;;  %v7345_v24 = vpop.eup %7344 }
 0x2b6   :  { %4555 = vrot.lane.b32.xlu1 %v11051_v23, %s7480_s29  ;;  %4551 = vrot.lane.b32.xlu0 %v11051_v23, %s7481_s30  ;;  %7346 = vcosq.f32 %v5290_v10  ;;  %v5306_v26 = vmul.f32 %v7345_v24, %v5305_v41 }
 0x2b7   :  { %v6976_v9 = vpack.c.bf16 %v3773_v0, %v3772_v12  ;;  %6978 = vmatprep.subr.bf16.mxu0 %v7473_v16  ;;  %7348 = vsinq.f32 %v5290_v10 }
 0x2b8   :  { %v3970_v40 = vpop.permute.xlu1 %3969  ;;  %v3966_v62 = vpop.permute.xlu0 %3965  ;;  %6395 = vmatmul.mubr.f32.vlgmr.msra.gmra.mrb[12].mxu0 %v11011_v17 }
 0x2b9   :  { %v4028_v55 = vmul.f32 %v11022_v18, %v3970_v40  ;;  %v4027_v27 = vmul.f32 %v11028_v22, %v3966_v62  ;;  %6977 = vmatpush3.bf16.msra.mxu1 %v6976_v9  ;;  %6464 = vmatprep.mubr.msk.f32.mxu0 %vm7484_vm11, %v11750_v61 }
 0x2ba   :  { %4824 = vrot.lane.b32.xlu1 %v11124_v29, %s7480_s29  ;;  %4820 = vrot.lane.b32.xlu0 %v11124_v29, %s7481_s30 }
 0x2bb   :  { %v6979_v32 = vpack.c.bf16 %v4028_v55, %v4027_v27  ;;  %7002 = vmatprep.subr.bf16.mxu1 %v7473_v16 }
 0x2bc   :  { %v4239_v30 = vpop.permute.xlu1 %4238  ;;  %v4235_v47 = vpop.permute.xlu0 %4234  ;;  %6430 = vmatmul.mubr.f32.vlgmr.msra.gmra.mrb[12].mxu1 %v11011_v17 }
 0x2bd   :  { %v4297_v15 = vmul.f32 %v11022_v18, %v4239_v30  ;;  %v4296_v52 = vmul.f32 %v11028_v22, %v4235_v47  ;;  %6980 = vmatpush3.bf16.msra.mxu0 %v6979_v32  ;;  %6499 = vmatprep.mubr.msk.f32.mxu1 %vm7484_vm11, %v11750_v61  ;;  %v881_v32 = vpop.f32.mrb[2].mxu0  ;;  %v6081_v30 = vpop.f32.mrb[3].mxu1 }
 0x2be   :  { %4563 = vrot.lane.b32.xlu1 %v11051_v23, %s7482_s6  ;;  %4559 = vrot.lane.b32.xlu0 %v11051_v23, %s7483_s2  ;;  %v11376_v23 = vmul.f32 %v5037_v35, %v5035_v31  ;;  %885 = vst [vmem:[%s11701_s5 + $0x10] sm:$0xff] %v881_v32  ;;  %v6046_v43 = vpop.f32.mrb[3].mxu0 }
 0x2bf   :  { %v7003_v50 = vpack.c.bf16 %v4297_v15, %v4296_v52  ;;  %6981 = vmatprep.subr.bf16.mxu0 %v7473_v16  ;;  %v1419_v1 = vpop.f32.mrb[4].mxu0  ;;  %v1688_v43 = vpop.f32.mrb[4].mxu1 }
 0x2c0   :  { %v3978_v48 = vpop.permute.xlu1 %3977  ;;  %v3974_v42 = vpop.permute.xlu0 %3973  ;;  %1423 = vst [vmem:[%s11701_s5 + $0x20] sm:$0xff] %v1419_v1  ;;  %1692 = vst [vmem:[%s11701_s5 + $0x28] sm:$0xff] %v1688_v43 }
 0x2c1   :  { %v4030_v39 = vmul.f32 %v11089_v44, %v3978_v48  ;;  %v4029_v45 = vmul.f32 %v11095_v53, %v3974_v42  ;;  %7004 = vmatpush3.bf16.msra.mxu1 %v7003_v50  ;;  %v7347_v37 = vpop.eup %7346  ;;  %v6116_v30 = vpop.f32.mrb[5].mxu0 }
 0x2c2   :  { %4832 = vrot.lane.b32.xlu1 %v11124_v29, %s7482_s6  ;;  %4828 = vrot.lane.b32.xlu0 %v11124_v29, %s7483_s2  ;;  %v7349_v4 = vpop.eup %7348  ;;  %v5301_v34 = vxor.u32 2147483648, %v7347_v37 }
 0x2c3   :  { %v6982_v28 = vpack.c.bf16 %v4030_v39, %v4029_v45  ;;  %7005 = vmatprep.subr.bf16.mxu1 %v7473_v16  ;;  %v5298_v36 = vxor.u32 2147483648, %v7349_v4 }
 0x2c4   :  { %v4247_v3 = vpop.permute.xlu1 %4246  ;;  %v4243_v7 = vpop.permute.xlu0 %4242  ;;  %v5302_v56 = vsel %vm5300_vm14, %v5301_v34, %v7349_v4 }
 0x2c5   :  { %v4299_v38 = vmul.f32 %v11089_v44, %v4247_v3  ;;  %v4298_v29 = vmul.f32 %v11095_v53, %v4243_v7  ;;  %6983 = vmatpush3.bf16.msra.mxu0 %v6982_v28  ;;  %v5299_v19 = vsel %vm5297_vm15, %v7347_v37, %v5298_v36  ;;  %v11443_v3 = vld [vmem:[%s11699_s3 + $0x58] sm:$0xff]  ;;  %v11449_v36 = vld [vmem:[%s11699_s3 + $0x50] sm:$0xff] }
 0x2c6   :  { %5045 = vrot.lane.b32.xlu1 %v11376_v23, %s7470_s18  ;;  %5041 = vrot.lane.b32.xlu0 %v11376_v23, %s7468_s16  ;;  %v5303_v25 = vsel %vm5296_vm1, %v5299_v19, %v5302_v56 }
 0x2c7   :  { %v7006_v8 = vpack.c.bf16 %v4299_v38, %v4298_v29  ;;  %6984 = vmatprep.subr.bf16.mxu0 %v7473_v16  ;;  %v5304_v12 = vsel %vm5294_vm0, nan, %v5303_v25 }
 0x2c8   :  { %v3986_v2 = vpop.permute.xlu1 %3985  ;;  %v3982_v0 = vpop.permute.xlu0 %3981  ;;  %v11392_v9 = vmul.f32 %v5306_v26, %v5304_v12  ;;  %v11467_v12 = vld [vmem:[%s11699_s3 + $0x68] sm:$0xff] }
 0x2c9   :  { %v4032_v6 = vmul.f32 %v11137_v11, %v3986_v2  ;;  %v4031_v49 = vmul.f32 %v11143_v46, %v3982_v0  ;;  %7007 = vmatpush3.bf16.msra.mxu1 %v7006_v8 }
 0x2ca   :  { %7008 = vmatprep.subr.bf16.mxu1 %v7473_v16  ;;  %5314 = vrot.lane.b32.xlu1 %v11392_v9, %s7470_s18 }
 0x2cb   :  { %v6985_v10 = vpack.c.bf16 %v4032_v6, %v4031_v49  ;;  %5310 = vrot.lane.b32.xlu0 %v11392_v9, %s7468_s16  ;;  %v11473_v49 = vld [vmem:[%s11699_s3 + $0x60] sm:$0xff] }
 0x2cc   :  { %v4255_v40 = vpop.permute.xlu1 %4254  ;;  %v4251_v62 = vpop.permute.xlu0 %4250 }
 0x2cd   :  { %v4301_v63 = vmul.f32 %v11137_v11, %v4255_v40  ;;  %v4300_v33 = vmul.f32 %v11143_v46, %v4251_v62  ;;  %6986 = vmatpush3.bf16.msra.mxu0 %v6985_v10 }
 0x2ce   :  { %6987 = vmatprep.subr.bf16.mxu0 %v7473_v16  ;;  %5053 = vrot.lane.b32.xlu1 %v11376_v23, %s7469_s17 }
 0x2cf   :  { %v7009_v60 = vpack.c.bf16 %v4301_v63, %v4300_v33  ;;  %5049 = vrot.lane.b32.xlu0 %v11376_v23, %s7467_s15 }
 0x2d0   :  { %v3994_v55 = vpop.permute.xlu1 %3993  ;;  %v3990_v27 = vpop.permute.xlu0 %3989 }
 0x2d1   :  { %v4034_v54 = vmul.f32 %v11192_v58, %v3994_v55  ;;  %v4033_v21 = vmul.f32 %v11198_v5, %v3990_v27  ;;  %7010 = vmatpush3.bf16.msra.mxu1 %v7009_v60 }
 0x2d2   :  { %7011 = vmatprep.subr.bf16.mxu1 %v7473_v16  ;;  %5322 = vrot.lane.b32.xlu1 %v11392_v9, %s7469_s17 }
 0x2d3   :  { %v6988_v47 = vpack.c.bf16 %v4034_v54, %v4033_v21  ;;  %5318 = vrot.lane.b32.xlu0 %v11392_v9, %s7467_s15 }
 0x2d4   :  { %v4263_v59 = vpop.permute.xlu1 %4262  ;;  %v4259_v15 = vpop.permute.xlu0 %4258 }
 0x2d5   :  { %v4303_v52 = vmul.f32 %v11192_v58, %v4263_v59  ;;  %v4302_v35 = vmul.f32 %v11198_v5, %v4259_v15  ;;  %6989 = vmatpush3.bf16.msra.mxu0 %v6988_v47  ;;  %v6151_v47 = vpop.f32.mrb[5].mxu1  ;;  %v11504_v15 = vld [vmem:[%s11699_s3 + $0x78] sm:$0xff] }
 0x2d6   :  { %6990 = vmatprep.subr.bf16.mxu0 %v7473_v16  ;;  %5061 = vrot.lane.b32.xlu1 %v11376_v23, %s7471_s19 }
 0x2d7   :  { %v7012_v57 = vpack.c.bf16 %v4303_v52, %v4302_v35  ;;  %5057 = vrot.lane.b32.xlu0 %v11376_v23, %s7472_s20  ;;  %v11510_v35 = vld [vmem:[%s11699_s3 + $0x70] sm:$0xff] }
 0x2d8   :  { %v4002_v50 = vpop.permute.xlu1 %4001  ;;  %v3998_v31 = vpop.permute.xlu0 %3997 }
 0x2d9   :  { %v4036_v48 = vmul.f32 %v11223_v51, %v4002_v50  ;;  %v4035_v42 = vmul.f32 %v11229_v20, %v3998_v31  ;;  %7013 = vmatpush3.bf16.msra.mxu1 %v7012_v57 }
 0x2da   :  { %7014 = vmatprep.subr.bf16.mxu1 %v7473_v16  ;;  %5330 = vrot.lane.b32.xlu1 %v11392_v9, %s7471_s19 }
 0x2db   :  { %v6991_v24 = vpack.c.bf16 %v4036_v48, %v4035_v42  ;;  %5326 = vrot.lane.b32.xlu0 %v11392_v9, %s7472_s20 }
 0x2dc   :  { %v4271_v39 = vpop.permute.xlu1 %4270  ;;  %v4267_v45 = vpop.permute.xlu0 %4266 }
 0x2dd   :  { %v4305_v37 = vmul.f32 %v11223_v51, %v4271_v39  ;;  %v4304_v41 = vmul.f32 %v11229_v20, %v4267_v45  ;;  %6992 = vmatpush3.bf16.msra.mxu0 %v6991_v24 }
 0x2de   :  { %6993 = vmatprep.subr.bf16.mxu0 %v7473_v16  ;;  %5069 = vrot.lane.b32.xlu1 %v11376_v23, %s7474_s24 }
 0x2df   :  { %v7015_v4 = vpack.c.bf16 %v4305_v37, %v4304_v41  ;;  %5065 = vrot.lane.b32.xlu0 %v11376_v23, %s7475_s25 }
 0x2e0   :  { %v4010_v28 = vpop.permute.xlu1 %4009  ;;  %v4006_v34 = vpop.permute.xlu0 %4005 }
 0x2e1   :  { %v4038_v7 = vmul.f32 %v11443_v3, %v4010_v28  ;;  %v4037_v38 = vmul.f32 %v11449_v36, %v4006_v34  ;;  %7016 = vmatpush3.bf16.msra.mxu1 %v7015_v4  ;;  %v1957_v28 = vpop.f32.mrb[6].mxu0  ;;  %v2226_v34 = vpop.f32.mrb[6].mxu1 }
 0x2e2   :  { %7017 = vmatprep.subr.bf16.mxu1 %v7473_v16  ;;  %5338 = vrot.lane.b32.xlu1 %v11392_v9, %s7474_s24  ;;  %1961 = vst [vmem:[%s11701_s5 + $0x30] sm:$0xff] %v1957_v28  ;;  %2230 = vst [vmem:[%s11701_s5 + $0x38] sm:$0xff] %v2226_v34 }
 0x2e3   :  { %v6994_v29 = vpack.c.bf16 %v4038_v7, %v4037_v38  ;;  %5334 = vrot.lane.b32.xlu0 %v11392_v9, %s7475_s25 }
 0x2e4   :  { %v4279_v56 = vpop.permute.xlu1 %4278  ;;  %v4275_v26 = vpop.permute.xlu0 %4274 }
 0x2e5   :  { %v4307_v19 = vmul.f32 %v11443_v3, %v4279_v56  ;;  %v4306_v8 = vmul.f32 %v11449_v36, %v4275_v26  ;;  %6995 = vmatpush3.bf16.msra.mxu0 %v6994_v29 }
 0x2e6   :  { %6996 = vmatprep.subr.bf16.mxu0 %v7473_v16  ;;  %5077 = vrot.lane.b32.xlu1 %v11376_v23, %s7476_s1 }
 0x2e7   :  { %v7018_v25 = vpack.c.bf16 %v4307_v19, %v4306_v8  ;;  %5073 = vrot.lane.b32.xlu0 %v11376_v23, %s7477_s0 }
 0x2e8   :  { %v4018_v2 = vpop.permute.xlu1 %4017  ;;  %v4014_v0 = vpop.permute.xlu0 %4013 }
 0x2e9   :  { %v4040_v6 = vmul.f32 %v11467_v12, %v4018_v2  ;;  %v4039_v10 = vmul.f32 %v11473_v49, %v4014_v0  ;;  %7019 = vmatpush3.bf16.msra.mxu1 %v7018_v25 }
 0x2ea   :  { %7020 = vmatprep.subr.bf16.mxu1 %v7473_v16  ;;  %5346 = vrot.lane.b32.xlu1 %v11392_v9, %s7476_s1 }
 0x2eb   :  { %v6997_v40 = vpack.c.bf16 %v4040_v6, %v4039_v10  ;;  %5342 = vrot.lane.b32.xlu0 %v11392_v9, %s7477_s0 }
 0x2ec   :  { %v4287_v62 = vpop.permute.xlu1 %4286  ;;  %v4283_v63 = vpop.permute.xlu0 %4282 }
 0x2ed   :  { %v4309_v33 = vmul.f32 %v11467_v12, %v4287_v62  ;;  %v4308_v60 = vmul.f32 %v11473_v49, %v4283_v63  ;;  %6998 = vmatpush3.bf16.msra.mxu0 %v6997_v40 }
 0x2ee   :  { %6999 = vmatprep.subr.bf16.mxu0 %v7473_v16  ;;  %5085 = vrot.lane.b32.xlu1 %v11376_v23, %s7478_s27 }
 0x2ef   :  { %v7021_v55 = vpack.c.bf16 %v4309_v33, %v4308_v60  ;;  %5081 = vrot.lane.b32.xlu0 %v11376_v23, %s7479_s28 }
 0x2f0   :  { %v4026_v27 = vpop.permute.xlu1 %4025  ;;  %v4022_v54 = vpop.permute.xlu0 %4021 }
 0x2f1   :  { %v4042_v21 = vmul.f32 %v10956_v14, %v4026_v27  ;;  %v4041_v32 = vmul.f32 %v10962_v13, %v4022_v54  ;;  %7022 = vmatpush3.bf16.msra.mxu1 %v7021_v55 }
 0x2f2   :  { %7023 = vmatprep.subr.bf16.mxu1 %v7473_v16  ;;  %5354 = vrot.lane.b32.xlu1 %v11392_v9, %s7478_s27 }
 0x2f3   :  { %v7000_v59 = vpack.c.bf16 %v4042_v21, %v4041_v32  ;;  %5350 = vrot.lane.b32.xlu0 %v11392_v9, %s7479_s28 }
 0x2f4   :  { %v4295_v14 = vpop.permute.xlu1 %4294  ;;  %v4291_v13 = vpop.permute.xlu0 %4290 }
 0x2f5   :  { %v4311_v52 = vmul.f32 %v11504_v15, %v4295_v14  ;;  %v4310_v57 = vmul.f32 %v11510_v35, %v4291_v13  ;;  %7001 = vmatpush3.bf16.msra.mxu0 %v7000_v59 }
 0x2f6   :  { %7026 = vmatprep.subr.bf16.mxu0 %v7473_v16  ;;  %5093 = vrot.lane.b32.xlu1 %v11376_v23, %s7480_s29 }
 0x2f7   :  { %v7024_v50 = vpack.c.bf16 %v4311_v52, %v4310_v57  ;;  %5089 = vrot.lane.b32.xlu0 %v11376_v23, %s7481_s30 }
 0x2f8   :  { %v4508_v31 = vpop.permute.xlu1 %4507  ;;  %v4504_v48 = vpop.permute.xlu0 %4503  ;;  %6465 = vmatmul.mubr.f32.vlgmr.msra.gmra.mrb[14].mxu0 %v11011_v17 }
 0x2f9   :  { %v4566_v42 = vmul.f32 %v11022_v18, %v4508_v31  ;;  %v4565_v24 = vmul.f32 %v11028_v22, %v4504_v48  ;;  %7025 = vmatpush3.bf16.msra.mxu1 %v7024_v50  ;;  %6534 = vmatprep.mubr.msk.f32.mxu0 %vm7484_vm11, %v11750_v61 }
 0x2fa   :  { %7050 = vmatprep.subr.bf16.mxu1 %v7473_v16  ;;  %5362 = vrot.lane.b32.xlu1 %v11392_v9, %s7480_s29 }
 0x2fb   :  { %v7027_v39 = vpack.c.bf16 %v4566_v42, %v4565_v24  ;;  %5358 = vrot.lane.b32.xlu0 %v11392_v9, %s7481_s30 }
 0x2fc   :  { %v4777_v45 = vpop.permute.xlu1 %4776  ;;  %v4773_v37 = vpop.permute.xlu0 %4772  ;;  %6500 = vmatmul.mubr.f32.vlgmr.msra.gmra.mrb[14].mxu1 %v11011_v17 }
 0x2fd   :  { %v4835_v41 = vmul.f32 %v11022_v18, %v4777_v45  ;;  %v4834_v4 = vmul.f32 %v11028_v22, %v4773_v37  ;;  %7028 = vmatpush3.bf16.msra.mxu0 %v7027_v39  ;;  %6569 = vmatprep.mubr.msk.f32.mxu1 %vm7484_vm11, %v11750_v61  ;;  %v6186_v17 = vpop.f32.mrb[7].mxu0  ;;  %v6221_v18 = vpop.f32.mrb[7].mxu1 }
 0x2fe   :  { %7029 = vmatprep.subr.bf16.mxu0 %v7473_v16  ;;  %5101 = vrot.lane.b32.xlu1 %v11376_v23, %s7482_s6 }
 0x2ff   :  { %v7051_v7 = vpack.c.bf16 %v4835_v41, %v4834_v4  ;;  %5097 = vrot.lane.b32.xlu0 %v11376_v23, %s7483_s2 }
 0x300   :  { %v4516_v22 = vpop.permute.xlu1 %4515  ;;  %v4512_v38 = vpop.permute.xlu0 %4511 }
 0x301   :  { %v4568_v29 = vmul.f32 %v11089_v44, %v4516_v22  ;;  %v4567_v56 = vmul.f32 %v11095_v53, %v4512_v38  ;;  %7052 = vmatpush3.bf16.msra.mxu1 %v7051_v7 }
 0x302   :  { %7053 = vmatprep.subr.bf16.mxu1 %v7473_v16  ;;  %5370 = vrot.lane.b32.xlu1 %v11392_v9, %s7482_s6 }
 0x303   :  { %v7030_v26 = vpack.c.bf16 %v4568_v29, %v4567_v56  ;;  %5366 = vrot.lane.b32.xlu0 %v11392_v9, %s7483_s2 }
 0x304   :  { %v4785_v19 = vpop.permute.xlu1 %4784  ;;  %v4781_v8 = vpop.permute.xlu0 %4780 }
 0x305   :  { %v4837_v23 = vmul.f32 %v11089_v44, %v4785_v19  ;;  %v4836_v25 = vmul.f32 %v11095_v53, %v4781_v8  ;;  %7031 = vmatpush3.bf16.msra.mxu0 %v7030_v26 }
 0x306   :  { %7032 = vmatprep.subr.bf16.mxu0 %v7473_v16 }
 0x307   :  { %v7054_v2 = vpack.c.bf16 %v4837_v23, %v4836_v25 }
 0x308   :  { %v4524_v0 = vpop.permute.xlu1 %4523  ;;  %v4520_v6 = vpop.permute.xlu0 %4519 }
 0x309   :  { %v4570_v10 = vmul.f32 %v11137_v11, %v4524_v0  ;;  %v4569_v40 = vmul.f32 %v11143_v46, %v4520_v6  ;;  %7055 = vmatpush3.bf16.msra.mxu1 %v7054_v2 }
 0x30a   :  { %7056 = vmatprep.subr.bf16.mxu1 %v7473_v16 }
 0x30b   :  { %v7033_v9 = vpack.c.bf16 %v4570_v10, %v4569_v40  ;;  %v2495_v62 = vpop.f32.mrb[8].mxu0 }
 0x30c   :  { %v4793_v63 = vpop.permute.xlu1 %4792  ;;  %v4789_v33 = vpop.permute.xlu0 %4788  ;;  %2499 = vst [vmem:[%s11701_s5 + $0x40] sm:$0xff] %v2495_v62 }
 0x30d   :  { %v4839_v44 = vmul.f32 %v11137_v11, %v4793_v63  ;;  %v4838_v53 = vmul.f32 %v11143_v46, %v4789_v33  ;;  %7034 = vmatpush3.bf16.msra.mxu0 %v7033_v9  ;;  %v6256_v60 = vpop.f32.mrb[9].mxu0 }
 0x30e   :  { %7035 = vmatprep.subr.bf16.mxu0 %v7473_v16  ;;  %v11599_v60 = vld [vmem:[%s11700_s4] sm:$0xff] }
 0x30f   :  { %v7057_v55 = vpack.c.bf16 %v4839_v44, %v4838_v53  ;;  %v2764_v27 = vpop.f32.mrb[8].mxu1 }
 0x310   :  { %v4532_v54 = vpop.permute.xlu1 %4531  ;;  %v4528_v21 = vpop.permute.xlu0 %4527  ;;  %2768 = vst [vmem:[%s11701_s5 + $0x48] sm:$0xff] %v2764_v27 }
 0x311   :  { %v4572_v32 = vmul.f32 %v11192_v58, %v4532_v54  ;;  %v4571_v1 = vmul.f32 %v11198_v5, %v4528_v21  ;;  %7058 = vmatpush3.bf16.msra.mxu1 %v7057_v55  ;;  %v6291_v11 = vpop.f32.mrb[9].mxu1  ;;  %v7408_v55 = vld [vmem:[%s11699_s3 + $0x8] sm:$0xff]  ;;  %v7409_v54 = vld [vmem:[%s11699_s3] sm:$0xff] }
 0x312   :  { %7059 = vmatprep.subr.bf16.mxu1 %v7473_v16 }
 0x313   :  { %v7036_v46 = vpack.c.bf16 %v4572_v32, %v4571_v1 }
 0x314   :  { %v4801_v43 = vpop.permute.xlu1 %4800  ;;  %v4797_v30 = vpop.permute.xlu0 %4796 }
 0x315   :  { %v4841_v47 = vmul.f32 %v11192_v58, %v4801_v43  ;;  %v4840_v59 = vmul.f32 %v11198_v5, %v4797_v30  ;;  %7037 = vmatpush3.bf16.msra.mxu0 %v7036_v46 }
 0x316   :  { %7038 = vmatprep.subr.bf16.mxu0 %v7473_v16 }
 0x317   :  { %v7060_v14 = vpack.c.bf16 %v4841_v47, %v4840_v59 }
 0x318   :  { %v4540_v13 = vpop.permute.xlu1 %4539  ;;  %v4536_v52 = vpop.permute.xlu0 %4535 }
 0x319   :  { %v4574_v57 = vmul.f32 %v11223_v51, %v4540_v13  ;;  %v4573_v50 = vmul.f32 %v11229_v20, %v4536_v52  ;;  %7061 = vmatpush3.bf16.msra.mxu1 %v7060_v14  ;;  %v7410_v14 = vld [vmem:[%s11699_s3 + $0x18] sm:$0xff]  ;;  %v7411_v52 = vld [vmem:[%s11699_s3 + $0x10] sm:$0xff] }
 0x31a   :  { %7062 = vmatprep.subr.bf16.mxu1 %v7473_v16 }
 0x31b   :  { %v7039_v31 = vpack.c.bf16 %v4574_v57, %v4573_v50 }
 0x31c   :  { %v4809_v48 = vpop.permute.xlu1 %4808  ;;  %v4805_v42 = vpop.permute.xlu0 %4804 }
 0x31d   :  { %v4843_v58 = vmul.f32 %v11223_v51, %v4809_v48  ;;  %v4842_v5 = vmul.f32 %v11229_v20, %v4805_v42  ;;  %7040 = vmatpush3.bf16.msra.mxu0 %v7039_v31 }
 0x31e   :  { %7041 = vmatprep.subr.bf16.mxu0 %v7473_v16 }
 0x31f   :  { %v7063_v24 = vpack.c.bf16 %v4843_v58, %v4842_v5 }
 0x320   :  { %v4548_v39 = vpop.permute.xlu1 %4547  ;;  %v4544_v45 = vpop.permute.xlu0 %4543 }
 0x321   :  { %v4576_v37 = vmul.f32 %v11443_v3, %v4548_v39  ;;  %v4575_v41 = vmul.f32 %v11449_v36, %v4544_v45  ;;  %7064 = vmatpush3.bf16.msra.mxu1 %v7063_v24  ;;  %v7412_v39 = vld [vmem:[%s11699_s3 + $0x28] sm:$0xff] }
 0x322   :  { %7065 = vmatprep.subr.bf16.mxu1 %v7473_v16 }
 0x323   :  { %v7042_v4 = vpack.c.bf16 %v4576_v37, %v4575_v41  ;;  %v7413_v37 = vld [vmem:[%s11699_s3 + $0x20] sm:$0xff] }
 0x324   :  { %v4817_v28 = vpop.permute.xlu1 %4816  ;;  %v4813_v34 = vpop.permute.xlu0 %4812 }
 0x325   :  { %v4845_v51 = vmul.f32 %v11443_v3, %v4817_v28  ;;  %v4844_v20 = vmul.f32 %v11449_v36, %v4813_v34  ;;  %7043 = vmatpush3.bf16.msra.mxu0 %v7042_v4 }
 0x326   :  { %7044 = vmatprep.subr.bf16.mxu0 %v7473_v16 }
 0x327   :  { %v7066_v17 = vpack.c.bf16 %v4845_v51, %v4844_v20 }
 0x328   :  { %v4556_v18 = vpop.permute.xlu1 %4555  ;;  %v4552_v7 = vpop.permute.xlu0 %4551 }
 0x329   :  { %v4578_v22 = vmul.f32 %v11467_v12, %v4556_v18  ;;  %v4577_v38 = vmul.f32 %v11473_v49, %v4552_v7  ;;  %7067 = vmatpush3.bf16.msra.mxu1 %v7066_v17 }
 0x32a   :  { %7068 = vmatprep.subr.bf16.mxu1 %v7473_v16 }
 0x32b   :  { %v7045_v29 = vpack.c.bf16 %v4578_v22, %v4577_v38 }
 0x32c   :  { %v4825_v56 = vpop.permute.xlu1 %4824  ;;  %v4821_v26 = vpop.permute.xlu0 %4820 }
 0x32d   :  { %v4847_v19 = vmul.f32 %v11467_v12, %v4825_v56  ;;  %v4846_v8 = vmul.f32 %v11473_v49, %v4821_v26  ;;  %7046 = vmatpush3.bf16.msra.mxu0 %v7045_v29  ;;  %v7414_v26 = vld [vmem:[%s11699_s3 + $0x38] sm:$0xff] }
 0x32e   :  { %7047 = vmatprep.subr.bf16.mxu0 %v7473_v16 }
 0x32f   :  { %v7069_v23 = vpack.c.bf16 %v4847_v19, %v4846_v8  ;;  %v7415_v8 = vld [vmem:[%s11699_s3 + $0x30] sm:$0xff] }
 0x330   :  { %v4564_v25 = vpop.permute.xlu1 %4563  ;;  %v4560_v2 = vpop.permute.xlu0 %4559 }
 0x331   :  { %v4580_v0 = vmul.f32 %v11504_v15, %v4564_v25  ;;  %v4579_v6 = vmul.f32 %v11510_v35, %v4560_v2  ;;  %7070 = vmatpush3.bf16.msra.mxu1 %v7069_v23 }
 0x332   :  { %7071 = vmatprep.subr.bf16.mxu1 %v7473_v16 }
 0x333   :  { %v7048_v10 = vpack.c.bf16 %v4580_v0, %v4579_v6 }
 0x334   :  { %v4833_v40 = vpop.permute.xlu1 %4832  ;;  %v4829_v9 = vpop.permute.xlu0 %4828 }
 0x335   :  { %v4849_v62 = vmul.f32 %v11504_v15, %v4833_v40  ;;  %v4848_v63 = vmul.f32 %v11510_v35, %v4829_v9  ;;  %7049 = vmatpush3.bf16.msra.mxu0 %v7048_v10 }
 0x336   :  { %7074 = vmatprep.subr.bf16.mxu0 %v7473_v16 }
 0x337   :  { %v7072_v33 = vpack.c.bf16 %v4849_v62, %v4848_v63  ;;  %v7416_v63 = vld [vmem:[%s11699_s3 + $0x48] sm:$0xff] }
 0x338   :  { %v5046_v44 = vpop.permute.xlu1 %5045  ;;  %v5042_v53 = vpop.permute.xlu0 %5041  ;;  %6535 = vmatmul.mubr.f32.vlgmr.msra.gmra.mrb[16].mxu0 %v11599_v60 }
 0x339   :  { %v5104_v27 = vmul.f32 %v7408_v55, %v5046_v44  ;;  %v5103_v21 = vmul.f32 %v7409_v54, %v5042_v53  ;;  %7073 = vmatpush3.bf16.msra.mxu1 %v7072_v33  ;;  %6604 = vmatprep.mubr.msk.f32.mxu0 %vm7484_vm11, %v11750_v61  ;;  %v7417_v44 = vld [vmem:[%s11699_s3 + $0x40] sm:$0xff] }
 0x33a   :  { %7098 = vmatprep.subr.bf16.mxu1 %v7473_v16 }
 0x33b   :  { %v7075_v32 = vpack.c.bf16 %v5104_v27, %v5103_v21 }
 0x33c   :  { %6570 = vmatmul.mubr.f32.vlgmr.msra.gmra.mrb[16].mxu1 %v11599_v60  ;;  %v5315_v1 = vpop.permute.xlu1 %5314 }
 0x33d   :  { %v5311_v11 = vpop.permute.xlu0 %5310  ;;  %7076 = vmatpush3.bf16.msra.mxu0 %v7075_v32  ;;  %6639 = vmatprep.mubr.msk.f32.mxu1 %vm7484_vm11, %v11750_v61  ;;  %v5373_v46 = vmul.f32 %v7408_v55, %v5315_v1 }
 0x33e   :  { %v5372_v43 = vmul.f32 %v7409_v54, %v5311_v11  ;;  %7077 = vmatprep.subr.bf16.mxu0 %v7473_v16 }
 0x340   :  { %v7099_v30 = vpack.c.bf16 %v5373_v46, %v5372_v43  ;;  %v5054_v47 = vpop.permute.xlu1 %5053 }
 0x341   :  { %v5050_v59 = vpop.permute.xlu0 %5049  ;;  %v5106_v13 = vmul.f32 %v7410_v14, %v5054_v47 }
 0x342   :  { %v5105_v57 = vmul.f32 %v7411_v52, %v5050_v59  ;;  %7100 = vmatpush3.bf16.msra.mxu1 %v7099_v30 }
 0x343   :  { %7101 = vmatprep.subr.bf16.mxu1 %v7473_v16 }
 0x344   :  { %v7078_v61 = vpack.c.bf16 %v5106_v13, %v5105_v57  ;;  %v5323_v50 = vpop.permute.xlu1 %5322 }
 0x345   :  { %v5319_v31 = vpop.permute.xlu0 %5318  ;;  %v5375_v48 = vmul.f32 %v7410_v14, %v5323_v50 }
 0x346   :  { %v5374_v42 = vmul.f32 %v7411_v52, %v5319_v31  ;;  %7079 = vmatpush3.bf16.msra.mxu0 %v7078_v61 }
 0x347   :  { %7080 = vmatprep.subr.bf16.mxu0 %v7473_v16 }
 0x348   :  { %v7102_v58 = vpack.c.bf16 %v5375_v48, %v5374_v42  ;;  %v5062_v5 = vpop.permute.xlu1 %5061 }
 0x349   :  { %v5058_v24 = vpop.permute.xlu0 %5057  ;;  %v5108_v45 = vmul.f32 %v7412_v39, %v5062_v5 }
 0x34a   :  { %v5107_v41 = vmul.f32 %v7413_v37, %v5058_v24  ;;  %7103 = vmatpush3.bf16.msra.mxu1 %v7102_v58 }
 0x34b   :  { %7104 = vmatprep.subr.bf16.mxu1 %v7473_v16  ;;  %v3033_v4 = vpop.f32.mrb[10].mxu0 }
 0x34c   :  { %v7081_v28 = vpack.c.bf16 %v5108_v45, %v5107_v41  ;;  %3037 = vst [vmem:[%s11701_s5 + $0x50] sm:$0xff] %v3033_v4  ;;  %v6326_v34 = vpop.f32.mrb[11].mxu0  ;;  %v5331_v51 = vpop.permute.xlu1 %5330 }
 0x34d   :  { %v5327_v20 = vpop.permute.xlu0 %5326  ;;  %v5377_v17 = vmul.f32 %v7412_v39, %v5331_v51 }
 0x34e   :  { %v5376_v18 = vmul.f32 %v7413_v37, %v5327_v20  ;;  %7082 = vmatpush3.bf16.msra.mxu0 %v7081_v28 }
 0x34f   :  { %7083 = vmatprep.subr.bf16.mxu0 %v7473_v16  ;;  %v3302_v7 = vpop.f32.mrb[10].mxu1 }
 0x350   :  { %v7105_v22 = vpack.c.bf16 %v5377_v17, %v5376_v18  ;;  %3306 = vst [vmem:[%s11701_s5 + $0x58] sm:$0xff] %v3302_v7  ;;  %v6361_v38 = vpop.f32.mrb[11].mxu1  ;;  %v5070_v29 = vpop.permute.xlu1 %5069 }
 0x351   :  { %v5066_v56 = vpop.permute.xlu0 %5065  ;;  %v5110_v19 = vmul.f32 %v7414_v26, %v5070_v29 }
 0x352   :  { %v5109_v23 = vmul.f32 %v7415_v8, %v5066_v56  ;;  %7106 = vmatpush3.bf16.msra.mxu1 %v7105_v22 }
 0x353   :  { %7107 = vmatprep.subr.bf16.mxu1 %v7473_v16 }
 0x354   :  { %v7084_v25 = vpack.c.bf16 %v5110_v19, %v5109_v23  ;;  %v5339_v2 = vpop.permute.xlu1 %5338 }
 0x355   :  { %v5335_v0 = vpop.permute.xlu0 %5334  ;;  %v5379_v6 = vmul.f32 %v7414_v26, %v5339_v2 }
 0x356   :  { %v5378_v10 = vmul.f32 %v7415_v8, %v5335_v0  ;;  %7085 = vmatpush3.bf16.msra.mxu0 %v7084_v25 }
 0x357   :  { %7086 = vmatprep.subr.bf16.mxu0 %v7473_v16 }
 0x358   :  { %v7108_v40 = vpack.c.bf16 %v5379_v6, %v5378_v10  ;;  %v5078_v9 = vpop.permute.xlu1 %5077 }
 0x359   :  { %v5074_v62 = vpop.permute.xlu0 %5073  ;;  %v5112_v33 = vmul.f32 %v7416_v63, %v5078_v9 }
 0x35a   :  { %v5111_v53 = vmul.f32 %v7417_v44, %v5074_v62  ;;  %7109 = vmatpush3.bf16.msra.mxu1 %v7108_v40 }
 0x35b   :  { %7110 = vmatprep.subr.bf16.mxu1 %v7473_v16 }
 0x35c   :  { %v7087_v55 = vpack.c.bf16 %v5112_v33, %v5111_v53  ;;  %v5347_v27 = vpop.permute.xlu1 %5346 }
 0x35d   :  { %v5343_v54 = vpop.permute.xlu0 %5342  ;;  %v5381_v21 = vmul.f32 %v7416_v63, %v5347_v27 }
 0x35e   :  { %v5380_v32 = vmul.f32 %v7417_v44, %v5343_v54  ;;  %7088 = vmatpush3.bf16.msra.mxu0 %v7087_v55 }
 0x35f   :  { %7089 = vmatprep.subr.bf16.mxu0 %v7473_v16 }
 0x360   :  { %v7111_v1 = vpack.c.bf16 %v5381_v21, %v5380_v32  ;;  %v5086_v11 = vpop.permute.xlu1 %5085 }
 0x361   :  { %v5082_v46 = vpop.permute.xlu0 %5081  ;;  %v5114_v43 = vmul.f32 %v11443_v3, %v5086_v11 }
 0x362   :  { %v5113_v30 = vmul.f32 %v11449_v36, %v5082_v46  ;;  %7112 = vmatpush3.bf16.msra.mxu1 %v7111_v1 }
 0x363   :  { %7113 = vmatprep.subr.bf16.mxu1 %v7473_v16 }
 0x364   :  { %v7090_v47 = vpack.c.bf16 %v5114_v43, %v5113_v30  ;;  %v5355_v59 = vpop.permute.xlu1 %5354 }
 0x365   :  { %v5351_v14 = vpop.permute.xlu0 %5350  ;;  %v5383_v13 = vmul.f32 %v11443_v3, %v5355_v59 }
 0x366   :  { %v5382_v52 = vmul.f32 %v11449_v36, %v5351_v14  ;;  %7091 = vmatpush3.bf16.msra.mxu0 %v7090_v47 }
 0x367   :  { %7092 = vmatprep.subr.bf16.mxu0 %v7473_v16 }
 0x368   :  { %v7114_v57 = vpack.c.bf16 %v5383_v13, %v5382_v52  ;;  %v5094_v61 = vpop.permute.xlu1 %5093 }
 0x369   :  { %v5090_v50 = vpop.permute.xlu0 %5089  ;;  %v5116_v31 = vmul.f32 %v11467_v12, %v5094_v61 }
 0x36a   :  { %v5115_v48 = vmul.f32 %v11473_v49, %v5090_v50  ;;  %7115 = vmatpush3.bf16.msra.mxu1 %v7114_v57 }
 0x36b   :  { %7116 = vmatprep.subr.bf16.mxu1 %v7473_v16 }
 0x36c   :  { %v7093_v42 = vpack.c.bf16 %v5116_v31, %v5115_v48  ;;  %v5363_v58 = vpop.permute.xlu1 %5362 }
 0x36d   :  { %v5359_v5 = vpop.permute.xlu0 %5358  ;;  %v5385_v3 = vmul.f32 %v11467_v12, %v5363_v58 }
 0x36e   :  { %v5384_v36 = vmul.f32 %v11473_v49, %v5359_v5  ;;  %7094 = vmatpush3.bf16.msra.mxu0 %v7093_v42 }
 0x36f   :  { %7095 = vmatprep.subr.bf16.mxu0 %v7473_v16 }
 0x370   :  { %v7117_v24 = vpack.c.bf16 %v5385_v3, %v5384_v36  ;;  %v5102_v39 = vpop.permute.xlu1 %5101 }
 0x371   :  { %v5098_v45 = vpop.permute.xlu0 %5097  ;;  %v5118_v37 = vmul.f32 %v11504_v15, %v5102_v39 }
 0x372   :  { %v5117_v41 = vmul.f32 %v11510_v35, %v5098_v45  ;;  %7118 = vmatpush3.bf16.msra.mxu1 %v7117_v24 }
 0x373   :  { %7119 = vmatprep.subr.bf16.mxu1 %v7473_v16 }
 0x374   :  { %v7096_v4 = vpack.c.bf16 %v5118_v37, %v5117_v41  ;;  %v5371_v28 = vpop.permute.xlu1 %5370 }
 0x375   :  { %v5367_v34 = vpop.permute.xlu0 %5366  ;;  %v5387_v12 = vmul.f32 %v11504_v15, %v5371_v28 }
 0x376   :  { %v5386_v49 = vmul.f32 %v11510_v35, %v5367_v34  ;;  %7097 = vmatpush3.bf16.msra.mxu0 %v7096_v4 }
 0x378   :  { %v7120_v51 = vpack.c.bf16 %v5387_v12, %v5386_v49 }
 0x379   :  { %6605 = vmatmul.mubr.f32.vlgmr.msra.gmra.mrb[18].mxu0 %v11599_v60 }
 0x37a   :  { %7121 = vmatpush3.bf16.msra.mxu1 %v7120_v51 }
 0x37d   :  { %6640 = vmatmul.mubr.f32.vlgmr.msra.gmra.mrb[18].mxu1 %v11599_v60 }
 0x38b   :  { %v3571_v20 = vpop.f32.mrb[12].mxu0 }
 0x38c   :  { %3575 = vst [vmem:[%s11701_s5 + $0x60] sm:$0xff] %v3571_v20  ;;  %v6396_v16 = vpop.f32.mrb[13].mxu0 }
 0x38f   :  { %v3840_v17 = vpop.f32.mrb[12].mxu1 }
 0x390   :  { %3844 = vst [vmem:[%s11701_s5 + $0x68] sm:$0xff] %v3840_v17  ;;  %v6431_v15 = vpop.f32.mrb[13].mxu1 }
 0x3cb   :  { %v4109_v35 = vpop.f32.mrb[14].mxu0 }
 0x3cc   :  { %4113 = vst [vmem:[%s11701_s5 + $0x70] sm:$0xff] %v4109_v35  ;;  %v6466_v18 = vpop.f32.mrb[15].mxu0 }
 0x3cf   :  { %v4378_v7 = vpop.f32.mrb[14].mxu1 }
 0x3d0   :  { %4382 = vst [vmem:[%s11701_s5 + $0x78] sm:$0xff] %v4378_v7  ;;  %v6501_v60 = vpop.f32.mrb[15].mxu1 }
 0x40b   :  { %v4647_v22 = vpop.f32.mrb[16].mxu0 }
 0x40c   :  { %4651 = vst [vmem:[%s11701_s5 + $0x80] sm:$0xff] %v4647_v22  ;;  %v6536_v38 = vpop.f32.mrb[17].mxu0 }
 0x40f   :  { %v4916_v29 = vpop.f32.mrb[16].mxu1 }
 0x410   :  { %4920 = vst [vmem:[%s11701_s5 + $0x88] sm:$0xff] %v4916_v29  ;;  %v6571_v56 = vpop.f32.mrb[17].mxu1 }
 0x44c   :  { %v5185_v26 = vpop.f32.mrb[18].mxu0 }
 0x44d   :  { %5189 = vst [vmem:[%s11701_s5 + $0x90] sm:$0xff] %v5185_v26  ;;  %v6606_v19 = vpop.f32.mrb[19].mxu0 }
 0x450   :  { %v5454_v8 = vpop.f32.mrb[18].mxu1 }
 0x451   :  { %5458 = vst [vmem:[%s11701_s5 + $0x98] sm:$0xff] %v5454_v8  ;;  %v6641_v23 = vpop.f32.mrb[19].mxu1 }
 0x452   :  { %5463 = vsyncpa [#allocation3], 1 }
 0x453   :  { %5464 = vsyncpa [#allocation5], 1 }

</bundles_post_ra>
